<compile_context>
chip_gen: v6e
topology: v6e:2x2x1
jax: 0.10.0
libtpu: 0.0.40
codegen_flags: <defaults>
</compile_context>

<pallas_src>
import math
from functools import partial

import jax
import jax.numpy as jnp
from jax.experimental import pallas as pl
from jax.experimental.pallas import tpu as pltpu

BN_EPS = 1e-5
CPAD = 128          # lane-padded channel width carried through the whole net
TM_MAX = 256        # max rows (M = N*Hout*Wout) per grid step


def _round_up(x, m):
    return (x + m - 1) // m * m


# --------------------------------------------------------------------------- #
# Pallas kernels
# --------------------------------------------------------------------------- #
def _fused_conv_kernel(*refs, apply_relu: bool, has_residual: bool):
    """out = act( (patches @ W_folded) + shift [+ residual] )   (BN folded)."""
    if has_residual:
        p_ref, w_ref, shift_ref, res_ref, o_ref = refs
    else:
        p_ref, w_ref, shift_ref, o_ref = refs
        res_ref = None
    y = jnp.dot(p_ref[...], w_ref[...], preferred_element_type=jnp.float32)
    y = y + shift_ref[...]                       # folded BatchNorm shift (eval)
    if has_residual:
        y = y + res_ref[...]
    if apply_relu:
        y = jnp.maximum(y, 0.0)
    o_ref[...] = y


def _head_kernel(x_ref, w_ref, b_ref, o_ref, *, inv_hw: float):
    """Adaptive avg-pool to (1,1) + Linear.  x: (N, H*W, CPAD)."""
    pooled = jnp.sum(x_ref[...], axis=1) * inv_hw           # (N, CPAD), f32
    o_ref[...] = jnp.dot(pooled.astype(w_ref.dtype), w_ref[...],
                         preferred_element_type=jnp.float32) + b_ref[...]


# --------------------------------------------------------------------------- #
# Pallas wrappers
# --------------------------------------------------------------------------- #
def fused_matmul_bn(patches, w_folded, shift, residual, apply_relu):
    """patches: (M, K) bf16, w_folded: (K, CPAD) bf16, shift: (1, CPAD) f32."""
    M, K = patches.shape
    Cout = w_folded.shape[1]                                  # == CPAD (128)

    tm = min(TM_MAX, _round_up(M, 8))
    Mpad = _round_up(M, tm)
    if Mpad != M:
        patches = jnp.pad(patches, ((0, Mpad - M), (0, 0)))
        if residual is not None:
            residual = jnp.pad(residual, ((0, Mpad - M), (0, 0)))
    grid = (Mpad // tm,)

    in_specs = [
        pl.BlockSpec((tm, K), lambda i: (i, 0)),              # patches tile
        pl.BlockSpec((K, Cout), lambda i: (0, 0)),            # weights (resident)
        pl.BlockSpec((1, Cout), lambda i: (0, 0)),            # BN shift
    ]
    args = [patches, w_folded, shift]
    has_res = residual is not None
    if has_res:
        in_specs.append(pl.BlockSpec((tm, Cout), lambda i: (i, 0)))
        args.append(residual)

    flops = 2 * Mpad * K * Cout
    bytes_accessed = (patches.size * patches.dtype.itemsize
                      + w_folded.size * w_folded.dtype.itemsize
                      + shift.size * 4
                      + (residual.size * residual.dtype.itemsize if has_res else 0)
                      + Mpad * Cout * 4)

    kernel = partial(_fused_conv_kernel, apply_relu=apply_relu,
                     has_residual=has_res)
    out = pl.pallas_call(
        kernel,
        out_shape=jax.ShapeDtypeStruct((Mpad, Cout), jnp.float32),
        grid=grid,
        in_specs=in_specs,
        out_specs=pl.BlockSpec((tm, Cout), lambda i: (i, 0)),
        compiler_params=pltpu.CompilerParams(
            dimension_semantics=("parallel",),
            vmem_limit_bytes=32 * 1024 * 1024),
        cost_estimate=pl.CostEstimate(flops=flops, transcendentals=0,
                                      bytes_accessed=bytes_accessed),
    )(*args)
    return out[:M] if Mpad != M else out


def head(x, lin_w, lin_b, num_classes):
    N, H, W, C = x.shape
    x3 = x.reshape(N, H * W, C)
    out = pl.pallas_call(
        partial(_head_kernel, inv_hw=1.0 / float(H * W)),
        out_shape=jax.ShapeDtypeStruct((N, CPAD), jnp.float32),
        grid=(1,),
        in_specs=[pl.BlockSpec((N, H * W, C), lambda i: (0, 0, 0)),
                  pl.BlockSpec((CPAD, CPAD), lambda i: (0, 0)),
                  pl.BlockSpec((1, CPAD), lambda i: (0, 0))],
        out_specs=pl.BlockSpec((N, CPAD), lambda i: (0, 0)),
        compiler_params=pltpu.CompilerParams(
            vmem_limit_bytes=32 * 1024 * 1024),
    )(x3, lin_w, lin_b)
    return out[:, :num_classes]


# --------------------------------------------------------------------------- #
# Plain-JAX glue: im2col, parameter construction, network wiring
# --------------------------------------------------------------------------- #
def pad_channels(x, cpad):
    N, H, W, C = x.shape
    if C == cpad:
        return x
    return jnp.pad(x, ((0, 0), (0, 0), (0, 0), (0, cpad - C)))


def im2col(x, ksize, stride, padding):
    """x: (N,H,W,C) -> patches (N*Hout*Wout, ksize*ksize*C); tap order (ky,kx,c)."""
    N, H, W, C = x.shape
    if padding > 0:
        x = jnp.pad(x, ((0, 0), (padding, padding), (padding, padding), (0, 0)))
    Hout = (H + 2 * padding - ksize) // stride + 1
    Wout = (W + 2 * padding - ksize) // stride + 1
    cols = []
    for ky in range(ksize):
        for kx in range(ksize):
            cols.append(x[:, ky:ky + stride * Hout:stride,
                          kx:kx + stride * Wout:stride, :])
    patches = jnp.concatenate(cols, axis=-1)
    return patches.reshape(N * Hout * Wout, ksize * ksize * C), Hout, Wout


def conv_bn_act(x, w_folded, shift, ksize, stride, padding, relu, residual=None):
    N = x.shape[0]
    patches, Hout, Wout = im2col(x, ksize, stride, padding)
    patches = patches.astype(jnp.bfloat16)            # halve matmul/DMA bytes
    res_flat = None
    if residual is not None:
        res_flat = residual.reshape(N * Hout * Wout, CPAD)
    out = fused_matmul_bn(patches, w_folded, shift, res_flat, relu)
    return out.reshape(N, Hout, Wout, CPAD)


def make_conv_weight(key, kh, kw, cin, cout):
    """Kaiming-normal conv weight embedded into lane-padded (kh*kw*CPAD, CPAD)."""
    fan_in = cin * kh * kw
    std = math.sqrt(2.0 / fan_in)
    w = jax.random.normal(key, (kh * kw, cin, cout), jnp.float32) * std
    w_pad = jnp.zeros((kh * kw, CPAD, CPAD), jnp.float32)
    w_pad = w_pad.at[:, :cin, :cout].set(w)
    return w_pad.reshape(kh * kw * CPAD, CPAD)


def fold_bn_into(w_pad, cout):
    """Fold eval-mode BN (gamma=1, beta=0, mean=0, var=1) into weight; zero shift."""
    scale = jnp.zeros((CPAD,), jnp.float32).at[:cout].set(
        1.0 / math.sqrt(1.0 + BN_EPS))
    shift = jnp.zeros((1, CPAD), jnp.float32)          # beta - mean*scale == 0
    w_folded = (w_pad * scale[None, :]).astype(jnp.bfloat16)
    return w_folded, shift


def make_block(key, cin, cout, stride):
    k1, k2, k3 = jax.random.split(key, 3)
    w1, b1 = fold_bn_into(make_conv_weight(k1, 3, 3, cin, cout), cout)
    w2, b2 = fold_bn_into(make_conv_weight(k2, 3, 3, cout, cout), cout)
    params = {'w1': w1, 'b1': b1, 'w2': w2, 'b2': b2}
    cfg = {'stride': stride, 'has_sc': (stride != 1 or cin != cout)}
    if cfg['has_sc']:
        wsc, bsc = fold_bn_into(make_conv_weight(k3, 1, 1, cin, cout), cout)
        params['wsc'], params['bsc'] = wsc, bsc
    return params, cfg


def make_resnet(key, num_blocks, num_classes):
    keys = jax.random.split(key, 8)
    params = {}
    params['stem_w'], params['stem_b'] = fold_bn_into(
        make_conv_weight(keys[0], 3, 3, 3, 16), 16)

    in_ch = 16
    layer_params, layer_cfgs = [], []
    for li, (out_ch, first_stride) in enumerate(zip((16, 32, 64), (1, 2, 2))):
        strides = [first_stride] + [1] * (num_blocks[li] - 1)
        bp, bc = [], []
        for bi, s in enumerate(strides):
            bkey = jax.random.fold_in(keys[1 + li], bi)
            p, c = make_block(bkey, in_ch, out_ch, s)
            bp.append(p)
            bc.append(c)
            in_ch = out_ch
        layer_params.append(bp)
        layer_cfgs.append(bc)
    params['layers'] = layer_params

    # Linear 64 -> num_classes: kaiming-normal weight (per _weights_init),
    # PyTorch-default uniform bias; embedded into lane-padded (CPAD, CPAD).
    fan_in = 64
    lw = jax.random.normal(keys[5], (64, num_classes), jnp.float32) \
        * math.sqrt(2.0 / fan_in)
    bound = 1.0 / math.sqrt(fan_in)
    lb = jax.random.uniform(keys[6], (num_classes,), jnp.float32,
                            minval=-bound, maxval=bound)
    lw_pad = jnp.zeros((CPAD, CPAD), jnp.float32).at[:64, :num_classes].set(lw)
    lb_pad = jnp.zeros((1, CPAD), jnp.float32).at[0, :num_classes].set(lb)
    params['lin_w'] = lw_pad.astype(jnp.bfloat16)
    params['lin_b'] = lb_pad
    return params, layer_cfgs


def basic_block(x, p, cfg):
    stride = cfg['stride']                              # static Python int
    h = conv_bn_act(x, p['w1'], p['b1'], 3, stride, 1, relu=True)
    if cfg['has_sc']:
        sc = conv_bn_act(x, p['wsc'], p['bsc'], 1, stride, 0, relu=False)
    else:
        sc = x
    return conv_bn_act(h, p['w2'], p['b2'], 3, 1, 1, relu=True, residual=sc)


def resnet_forward(x_nchw, params, layer_cfgs, num_classes):
    x = jnp.transpose(x_nchw, (0, 2, 3, 1))             # NCHW -> NHWC
    x = pad_channels(x, CPAD)                           # lane-pad 3 -> 128
    x = conv_bn_act(x, params['stem_w'], params['stem_b'], 3, 1, 1, relu=True)
    for lp, lc in zip(params['layers'], layer_cfgs):
        for p, c in zip(lp, lc):
            x = basic_block(x, p, c)
    return head(x, params['lin_w'], params['lin_b'], num_classes)


# --------------------------------------------------------------------------- #
if __name__ == "__main__":
    key = jax.random.PRNGKey(0)
    kx, kp = jax.random.split(key)

    num_blocks = [1, 1, 1]
    num_classes = 10
    x = jax.random.normal(kx, (2, 3, 16, 16), jnp.float32)   # NCHW like PyTorch

    params, layer_cfgs = make_resnet(kp, num_blocks, num_classes)
    fwd = jax.jit(partial(resnet_forward,
                          layer_cfgs=layer_cfgs, num_classes=num_classes))
    out = fwd(x, params)
    jax.block_until_ready(out)
    assert out.shape == (2, num_classes) and out.dtype == jnp.float32
    print("KERNEL_OK")
</pallas_src>

<mosaic_0001>
module attributes {stable_mosaic.version = 11 : i64} {
  func.func @_fused_conv_kernel(%arg0: i32, %arg1: memref<256x1152xbf16, #tpu.memory_space<vmem>>, %arg2: memref<1152x128xbf16, #tpu.memory_space<vmem>>, %arg3: memref<1x128xf32, #tpu.memory_space<vmem>>, %arg4: memref<256x128xf32, #tpu.memory_space<vmem>>) attributes {dimension_semantics = [#tpu.dimension_semantics<parallel>], iteration_bounds = array<i64: 2>, scalar_prefetch = 0 : i64, scratch_operands = 0 : i64, tpu.core_type = #tpu.core_type<tc>, window_params = [{transform_indices = @transform_0, window_bounds = array<i64: 256, 1152>}, {pipeline_mode = #tpu.pipeline_mode<synchronous>, transform_indices = @transform_1, window_bounds = array<i64: 1152, 128>}, {pipeline_mode = #tpu.pipeline_mode<synchronous>, transform_indices = @transform_2, window_bounds = array<i64: 1, 128>}, {transform_indices = @transform_3, window_bounds = array<i64: 256, 128>}]} {
    %c0 = arith.constant 0 : index
    %c0_0 = arith.constant 0 : index
    %0 = vector.load %arg1[%c0, %c0_0] : memref<256x1152xbf16, #tpu.memory_space<vmem>>, vector<256x1152xbf16>
    %c0_1 = arith.constant 0 : index
    %c0_2 = arith.constant 0 : index
    %1 = vector.load %arg2[%c0_1, %c0_2] : memref<1152x128xbf16, #tpu.memory_space<vmem>>, vector<1152x128xbf16>
    %cst = arith.constant dense<0.000000e+00> : vector<256x128xf32>
    %2 = tpu.matmul %0, %1, %cst {dimension_numbers = #tpu.dot_dimension_numbers<[1], [0], [0], [1], [0, 0, 1, 1], [], []>} : vector<256x1152xbf16>, vector<1152x128xbf16>, vector<256x128xf32> -> vector<256x128xf32>
    %c0_3 = arith.constant 0 : index
    %c0_4 = arith.constant 0 : index
    %3 = vector.load %arg3[%c0_3, %c0_4] : memref<1x128xf32, #tpu.memory_space<vmem>>, vector<1x128xf32>
    %4 = vector.broadcast %3 : vector<1x128xf32> to vector<256x128xf32>
    %5 = arith.addf %2, %4 : vector<256x128xf32>
    %cst_5 = arith.constant 0.000000e+00 : f32
    %6 = vector.broadcast %cst_5 : f32 to vector<256x128xf32>
    %7 = arith.maximumf %5, %6 : vector<256x128xf32>
    %c0_6 = arith.constant 0 : index
    %c0_7 = arith.constant 0 : index
    %8 = vector.load %arg4[%c0_6, %c0_7] : memref<256x128xf32, #tpu.memory_space<vmem>>, vector<256x128xf32>
    tpu.vector_store %arg4[%c0_6, %c0_7], %7 {strides = array<i32>} : memref<256x128xf32, #tpu.memory_space<vmem>>, vector<256x128xf32>,
    return
  }
  func.func @transform_0(%arg0: i32) -> (i32, i32) {
    %c0_i32 = arith.constant 0 : i32
    %c0_i32_0 = arith.constant 0 : i32
    return %arg0, %c0_i32 : i32, i32
  }
  func.func @transform_1(%arg0: i32) -> (i32, i32) {
    %c0_i32 = arith.constant 0 : i32
    %c0_i32_0 = arith.constant 0 : i32
    %c0_i32_1 = arith.constant 0 : i32
    return %c0_i32, %c0_i32_0 : i32, i32
  }
  func.func @transform_2(%arg0: i32) -> (i32, i32) {
    %c0_i32 = arith.constant 0 : i32
    %c0_i32_0 = arith.constant 0 : i32
    %c0_i32_1 = arith.constant 0 : i32
    return %c0_i32, %c0_i32_0 : i32, i32
  }
  func.func @transform_3(%arg0: i32) -> (i32, i32) {
    %c0_i32 = arith.constant 0 : i32
    %c0_i32_0 = arith.constant 0 : i32
    return %arg0, %c0_i32 : i32, i32
  }
}

module attributes {stable_mosaic.version = 11 : i64} {
  func.func @_fused_conv_kernel(%arg0: i32, %arg1: memref<256x1152xbf16, #tpu.memory_space<vmem>>, %arg2: memref<1152x128xbf16, #tpu.memory_space<vmem>>, %arg3: memref<1x128xf32, #tpu.memory_space<vmem>>, %arg4: memref<256x128xf32, #tpu.memory_space<vmem>>, %arg5: memref<256x128xf32, #tpu.memory_space<vmem>>) attributes {dimension_semantics = [#tpu.dimension_semantics<parallel>], iteration_bounds = array<i64: 2>, scalar_prefetch = 0 : i64, scratch_operands = 0 : i64, tpu.core_type = #tpu.core_type<tc>, window_params = [{transform_indices = @transform_0, window_bounds = array<i64: 256, 1152>}, {pipeline_mode = #tpu.pipeline_mode<synchronous>, transform_indices = @transform_1, window_bounds = array<i64: 1152, 128>}, {pipeline_mode = #tpu.pipeline_mode<synchronous>, transform_indices = @transform_2, window_bounds = array<i64: 1, 128>}, {transform_indices = @transform_3, window_bounds = array<i64: 256, 128>}, {transform_indices = @transform_4, window_bounds = array<i64: 256, 128>}]} {
    %c0 = arith.constant 0 : index
    %c0_0 = arith.constant 0 : index
    %0 = vector.load %arg1[%c0, %c0_0] : memref<256x1152xbf16, #tpu.memory_space<vmem>>, vector<256x1152xbf16>
    %c0_1 = arith.constant 0 : index
    %c0_2 = arith.constant 0 : index
    %1 = vector.load %arg2[%c0_1, %c0_2] : memref<1152x128xbf16, #tpu.memory_space<vmem>>, vector<1152x128xbf16>
    %cst = arith.constant dense<0.000000e+00> : vector<256x128xf32>
    %2 = tpu.matmul %0, %1, %cst {dimension_numbers = #tpu.dot_dimension_numbers<[1], [0], [0], [1], [0, 0, 1, 1], [], []>} : vector<256x1152xbf16>, vector<1152x128xbf16>, vector<256x128xf32> -> vector<256x128xf32>
    %c0_3 = arith.constant 0 : index
    %c0_4 = arith.constant 0 : index
    %3 = vector.load %arg3[%c0_3, %c0_4] : memref<1x128xf32, #tpu.memory_space<vmem>>, vector<1x128xf32>
    %4 = vector.broadcast %3 : vector<1x128xf32> to vector<256x128xf32>
    %5 = arith.addf %2, %4 : vector<256x128xf32>
    %c0_5 = arith.constant 0 : index
    %c0_6 = arith.constant 0 : index
    %6 = vector.load %arg4[%c0_5, %c0_6] : memref<256x128xf32, #tpu.memory_space<vmem>>, vector<256x128xf32>
    %7 = arith.addf %5, %6 : vector<256x128xf32>
    %cst_7 = arith.constant 0.000000e+00 : f32
    %8 = vector.broadcast %cst_7 : f32 to vector<256x128xf32>
    %9 = arith.maximumf %7, %8 : vector<256x128xf32>
    %c0_8 = arith.constant 0 : index
    %c0_9 = arith.constant 0 : index
    %10 = vector.load %arg5[%c0_8, %c0_9] : memref<256x128xf32, #tpu.memory_space<vmem>>, vector<256x128xf32>
    tpu.vector_store %arg5[%c0_8, %c0_9], %9 {strides = array<i32>} : memref<256x128xf32, #tpu.memory_space<vmem>>, vector<256x128xf32>,
    return
  }
  func.func @transform_0(%arg0: i32) -> (i32, i32) {
    %c0_i32 = arith.constant 0 : i32
    %c0_i32_0 = arith.constant 0 : i32
    return %arg0, %c0_i32 : i32, i32
  }
  func.func @transform_1(%arg0: i32) -> (i32, i32) {
    %c0_i32 = arith.constant 0 : i32
    %c0_i32_0 = arith.constant 0 : i32
    %c0_i32_1 = arith.constant 0 : i32
    return %c0_i32, %c0_i32_0 : i32, i32
  }
  func.func @transform_2(%arg0: i32) -> (i32, i32) {
    %c0_i32 = arith.constant 0 : i32
    %c0_i32_0 = arith.constant 0 : i32
    %c0_i32_1 = arith.constant 0 : i32
    return %c0_i32, %c0_i32_0 : i32, i32
  }
  func.func @transform_3(%arg0: i32) -> (i32, i32) {
    %c0_i32 = arith.constant 0 : i32
    %c0_i32_0 = arith.constant 0 : i32
    return %arg0, %c0_i32 : i32, i32
  }
  func.func @transform_4(%arg0: i32) -> (i32, i32) {
    %c0_i32 = arith.constant 0 : i32
    %c0_i32_0 = arith.constant 0 : i32
    return %arg0, %c0_i32 : i32, i32
  }
}

module attributes {stable_mosaic.version = 11 : i64} {
  func.func @_fused_conv_kernel(%arg0: i32, %arg1: memref<128x128xbf16, #tpu.memory_space<vmem>>, %arg2: memref<128x128xbf16, #tpu.memory_space<vmem>>, %arg3: memref<1x128xf32, #tpu.memory_space<vmem>>, %arg4: memref<128x128xf32, #tpu.memory_space<vmem>>) attributes {dimension_semantics = [#tpu.dimension_semantics<parallel>], iteration_bounds = array<i64: 1>, scalar_prefetch = 0 : i64, scratch_operands = 0 : i64, tpu.core_type = #tpu.core_type<tc>, window_params = [{transform_indices = @transform_0, window_bounds = array<i64: 128, 128>}, {pipeline_mode = #tpu.pipeline_mode<synchronous>, transform_indices = @transform_1, window_bounds = array<i64: 128, 128>}, {pipeline_mode = #tpu.pipeline_mode<synchronous>, transform_indices = @transform_2, window_bounds = array<i64: 1, 128>}, {transform_indices = @transform_3, window_bounds = array<i64: 128, 128>}]} {
    %c0 = arith.constant 0 : index
    %c0_0 = arith.constant 0 : index
    %0 = vector.load %arg1[%c0, %c0_0] : memref<128x128xbf16, #tpu.memory_space<vmem>>, vector<128x128xbf16>
    %c0_1 = arith.constant 0 : index
    %c0_2 = arith.constant 0 : index
    %1 = vector.load %arg2[%c0_1, %c0_2] : memref<128x128xbf16, #tpu.memory_space<vmem>>, vector<128x128xbf16>
    %cst = arith.constant dense<0.000000e+00> : vector<128x128xf32>
    %2 = tpu.matmul %0, %1, %cst {dimension_numbers = #tpu.dot_dimension_numbers<[1], [0], [0], [1], [0, 0, 1, 1], [], []>} : vector<128x128xbf16>, vector<128x128xbf16>, vector<128x128xf32> -> vector<128x128xf32>
    %c0_3 = arith.constant 0 : index
    %c0_4 = arith.constant 0 : index
    %3 = vector.load %arg3[%c0_3, %c0_4] : memref<1x128xf32, #tpu.memory_space<vmem>>, vector<1x128xf32>
    %4 = vector.broadcast %3 : vector<1x128xf32> to vector<128x128xf32>
    %5 = arith.addf %2, %4 : vector<128x128xf32>
    %c0_5 = arith.constant 0 : index
    %c0_6 = arith.constant 0 : index
    %6 = vector.load %arg4[%c0_5, %c0_6] : memref<128x128xf32, #tpu.memory_space<vmem>>, vector<128x128xf32>
    tpu.vector_store %arg4[%c0_5, %c0_6], %5 {strides = array<i32>} : memref<128x128xf32, #tpu.memory_space<vmem>>, vector<128x128xf32>,
    return
  }
  func.func @transform_0(%arg0: i32) -> (i32, i32) {
    %c0_i32 = arith.constant 0 : i32
    %c0_i32_0 = arith.constant 0 : i32
    return %arg0, %c0_i32 : i32, i32
  }
  func.func @transform_1(%arg0: i32) -> (i32, i32) {
    %c0_i32 = arith.constant 0 : i32
    %c0_i32_0 = arith.constant 0 : i32
    %c0_i32_1 = arith.constant 0 : i32
    return %c0_i32, %c0_i32_0 : i32, i32
  }
  func.func @transform_2(%arg0: i32) -> (i32, i32) {
    %c0_i32 = arith.constant 0 : i32
    %c0_i32_0 = arith.constant 0 : i32
    %c0_i32_1 = arith.constant 0 : i32
    return %c0_i32, %c0_i32_0 : i32, i32
  }
  func.func @transform_3(%arg0: i32) -> (i32, i32) {
    %c0_i32 = arith.constant 0 : i32
    %c0_i32_0 = arith.constant 0 : i32
    return %arg0, %c0_i32 : i32, i32
  }
}

module attributes {stable_mosaic.version = 11 : i64} {
  func.func @_fused_conv_kernel(%arg0: i32, %arg1: memref<128x1152xbf16, #tpu.memory_space<vmem>>, %arg2: memref<1152x128xbf16, #tpu.memory_space<vmem>>, %arg3: memref<1x128xf32, #tpu.memory_space<vmem>>, %arg4: memref<128x128xf32, #tpu.memory_space<vmem>>) attributes {dimension_semantics = [#tpu.dimension_semantics<parallel>], iteration_bounds = array<i64: 1>, scalar_prefetch = 0 : i64, scratch_operands = 0 : i64, tpu.core_type = #tpu.core_type<tc>, window_params = [{transform_indices = @transform_0, window_bounds = array<i64: 128, 1152>}, {pipeline_mode = #tpu.pipeline_mode<synchronous>, transform_indices = @transform_1, window_bounds = array<i64: 1152, 128>}, {pipeline_mode = #tpu.pipeline_mode<synchronous>, transform_indices = @transform_2, window_bounds = array<i64: 1, 128>}, {transform_indices = @transform_3, window_bounds = array<i64: 128, 128>}]} {
    %c0 = arith.constant 0 : index
    %c0_0 = arith.constant 0 : index
    %0 = vector.load %arg1[%c0, %c0_0] : memref<128x1152xbf16, #tpu.memory_space<vmem>>, vector<128x1152xbf16>
    %c0_1 = arith.constant 0 : index
    %c0_2 = arith.constant 0 : index
    %1 = vector.load %arg2[%c0_1, %c0_2] : memref<1152x128xbf16, #tpu.memory_space<vmem>>, vector<1152x128xbf16>
    %cst = arith.constant dense<0.000000e+00> : vector<128x128xf32>
    %2 = tpu.matmul %0, %1, %cst {dimension_numbers = #tpu.dot_dimension_numbers<[1], [0], [0], [1], [0, 0, 1, 1], [], []>} : vector<128x1152xbf16>, vector<1152x128xbf16>, vector<128x128xf32> -> vector<128x128xf32>
    %c0_3 = arith.constant 0 : index
    %c0_4 = arith.constant 0 : index
    %3 = vector.load %arg3[%c0_3, %c0_4] : memref<1x128xf32, #tpu.memory_space<vmem>>, vector<1x128xf32>
    %4 = vector.broadcast %3 : vector<1x128xf32> to vector<128x128xf32>
    %5 = arith.addf %2, %4 : vector<128x128xf32>
    %cst_5 = arith.constant 0.000000e+00 : f32
    %6 = vector.broadcast %cst_5 : f32 to vector<128x128xf32>
    %7 = arith.maximumf %5, %6 : vector<128x128xf32>
    %c0_6 = arith.constant 0 : index
    %c0_7 = arith.constant 0 : index
    %8 = vector.load %arg4[%c0_6, %c0_7] : memref<128x128xf32, #tpu.memory_space<vmem>>, vector<128x128xf32>
    tpu.vector_store %arg4[%c0_6, %c0_7], %7 {strides = array<i32>} : memref<128x128xf32, #tpu.memory_space<vmem>>, vector<128x128xf32>,
    return
  }
  func.func @transform_0(%arg0: i32) -> (i32, i32) {
    %c0_i32 = arith.constant 0 : i32
    %c0_i32_0 = arith.constant 0 : i32
    return %arg0, %c0_i32 : i32, i32
  }
  func.func @transform_1(%arg0: i32) -> (i32, i32) {
    %c0_i32 = arith.constant 0 : i32
    %c0_i32_0 = arith.constant 0 : i32
    %c0_i32_1 = arith.constant 0 : i32
    return %c0_i32, %c0_i32_0 : i32, i32
  }
  func.func @transform_2(%arg0: i32) -> (i32, i32) {
    %c0_i32 = arith.constant 0 : i32
    %c0_i32_0 = arith.constant 0 : i32
    %c0_i32_1 = arith.constant 0 : i32
    return %c0_i32, %c0_i32_0 : i32, i32
  }
  func.func @transform_3(%arg0: i32) -> (i32, i32) {
    %c0_i32 = arith.constant 0 : i32
    %c0_i32_0 = arith.constant 0 : i32
    return %arg0, %c0_i32 : i32, i32
  }
}

module attributes {stable_mosaic.version = 11 : i64} {
  func.func @_fused_conv_kernel(%arg0: i32, %arg1: memref<128x1152xbf16, #tpu.memory_space<vmem>>, %arg2: memref<1152x128xbf16, #tpu.memory_space<vmem>>, %arg3: memref<1x128xf32, #tpu.memory_space<vmem>>, %arg4: memref<128x128xf32, #tpu.memory_space<vmem>>, %arg5: memref<128x128xf32, #tpu.memory_space<vmem>>) attributes {dimension_semantics = [#tpu.dimension_semantics<parallel>], iteration_bounds = array<i64: 1>, scalar_prefetch = 0 : i64, scratch_operands = 0 : i64, tpu.core_type = #tpu.core_type<tc>, window_params = [{transform_indices = @transform_0, window_bounds = array<i64: 128, 1152>}, {pipeline_mode = #tpu.pipeline_mode<synchronous>, transform_indices = @transform_1, window_bounds = array<i64: 1152, 128>}, {pipeline_mode = #tpu.pipeline_mode<synchronous>, transform_indices = @transform_2, window_bounds = array<i64: 1, 128>}, {transform_indices = @transform_3, window_bounds = array<i64: 128, 128>}, {transform_indices = @transform_4, window_bounds = array<i64: 128, 128>}]} {
    %c0 = arith.constant 0 : index
    %c0_0 = arith.constant 0 : index
    %0 = vector.load %arg1[%c0, %c0_0] : memref<128x1152xbf16, #tpu.memory_space<vmem>>, vector<128x1152xbf16>
    %c0_1 = arith.constant 0 : index
    %c0_2 = arith.constant 0 : index
    %1 = vector.load %arg2[%c0_1, %c0_2] : memref<1152x128xbf16, #tpu.memory_space<vmem>>, vector<1152x128xbf16>
    %cst = arith.constant dense<0.000000e+00> : vector<128x128xf32>
    %2 = tpu.matmul %0, %1, %cst {dimension_numbers = #tpu.dot_dimension_numbers<[1], [0], [0], [1], [0, 0, 1, 1], [], []>} : vector<128x1152xbf16>, vector<1152x128xbf16>, vector<128x128xf32> -> vector<128x128xf32>
    %c0_3 = arith.constant 0 : index
    %c0_4 = arith.constant 0 : index
    %3 = vector.load %arg3[%c0_3, %c0_4] : memref<1x128xf32, #tpu.memory_space<vmem>>, vector<1x128xf32>
    %4 = vector.broadcast %3 : vector<1x128xf32> to vector<128x128xf32>
    %5 = arith.addf %2, %4 : vector<128x128xf32>
    %c0_5 = arith.constant 0 : index
    %c0_6 = arith.constant 0 : index
    %6 = vector.load %arg4[%c0_5, %c0_6] : memref<128x128xf32, #tpu.memory_space<vmem>>, vector<128x128xf32>
    %7 = arith.addf %5, %6 : vector<128x128xf32>
    %cst_7 = arith.constant 0.000000e+00 : f32
    %8 = vector.broadcast %cst_7 : f32 to vector<128x128xf32>
    %9 = arith.maximumf %7, %8 : vector<128x128xf32>
    %c0_8 = arith.constant 0 : index
    %c0_9 = arith.constant 0 : index
    %10 = vector.load %arg5[%c0_8, %c0_9] : memref<128x128xf32, #tpu.memory_space<vmem>>, vector<128x128xf32>
    tpu.vector_store %arg5[%c0_8, %c0_9], %9 {strides = array<i32>} : memref<128x128xf32, #tpu.memory_space<vmem>>, vector<128x128xf32>,
    return
  }
  func.func @transform_0(%arg0: i32) -> (i32, i32) {
    %c0_i32 = arith.constant 0 : i32
    %c0_i32_0 = arith.constant 0 : i32
    return %arg0, %c0_i32 : i32, i32
  }
  func.func @transform_1(%arg0: i32) -> (i32, i32) {
    %c0_i32 = arith.constant 0 : i32
    %c0_i32_0 = arith.constant 0 : i32
    %c0_i32_1 = arith.constant 0 : i32
    return %c0_i32, %c0_i32_0 : i32, i32
  }
  func.func @transform_2(%arg0: i32) -> (i32, i32) {
    %c0_i32 = arith.constant 0 : i32
    %c0_i32_0 = arith.constant 0 : i32
    %c0_i32_1 = arith.constant 0 : i32
    return %c0_i32, %c0_i32_0 : i32, i32
  }
  func.func @transform_3(%arg0: i32) -> (i32, i32) {
    %c0_i32 = arith.constant 0 : i32
    %c0_i32_0 = arith.constant 0 : i32
    return %arg0, %c0_i32 : i32, i32
  }
  func.func @transform_4(%arg0: i32) -> (i32, i32) {
    %c0_i32 = arith.constant 0 : i32
    %c0_i32_0 = arith.constant 0 : i32
    return %arg0, %c0_i32 : i32, i32
  }
}

module attributes {stable_mosaic.version = 11 : i64} {
  func.func @_fused_conv_kernel(%arg0: i32, %arg1: memref<32x128xbf16, #tpu.memory_space<vmem>>, %arg2: memref<128x128xbf16, #tpu.memory_space<vmem>>, %arg3: memref<1x128xf32, #tpu.memory_space<vmem>>, %arg4: memref<32x128xf32, #tpu.memory_space<vmem>>) attributes {dimension_semantics = [#tpu.dimension_semantics<parallel>], iteration_bounds = array<i64: 1>, scalar_prefetch = 0 : i64, scratch_operands = 0 : i64, tpu.core_type = #tpu.core_type<tc>, window_params = [{transform_indices = @transform_0, window_bounds = array<i64: 32, 128>}, {pipeline_mode = #tpu.pipeline_mode<synchronous>, transform_indices = @transform_1, window_bounds = array<i64: 128, 128>}, {pipeline_mode = #tpu.pipeline_mode<synchronous>, transform_indices = @transform_2, window_bounds = array<i64: 1, 128>}, {transform_indices = @transform_3, window_bounds = array<i64: 32, 128>}]} {
    %c0 = arith.constant 0 : index
    %c0_0 = arith.constant 0 : index
    %0 = vector.load %arg1[%c0, %c0_0] : memref<32x128xbf16, #tpu.memory_space<vmem>>, vector<32x128xbf16>
    %c0_1 = arith.constant 0 : index
    %c0_2 = arith.constant 0 : index
    %1 = vector.load %arg2[%c0_1, %c0_2] : memref<128x128xbf16, #tpu.memory_space<vmem>>, vector<128x128xbf16>
    %cst = arith.constant dense<0.000000e+00> : vector<32x128xf32>
    %2 = tpu.matmul %0, %1, %cst {dimension_numbers = #tpu.dot_dimension_numbers<[1], [0], [0], [1], [0, 0, 1, 1], [], []>} : vector<32x128xbf16>, vector<128x128xbf16>, vector<32x128xf32> -> vector<32x128xf32>
    %c0_3 = arith.constant 0 : index
    %c0_4 = arith.constant 0 : index
    %3 = vector.load %arg3[%c0_3, %c0_4] : memref<1x128xf32, #tpu.memory_space<vmem>>, vector<1x128xf32>
    %4 = vector.broadcast %3 : vector<1x128xf32> to vector<32x128xf32>
    %5 = arith.addf %2, %4 : vector<32x128xf32>
    %c0_5 = arith.constant 0 : index
    %c0_6 = arith.constant 0 : index
    %6 = vector.load %arg4[%c0_5, %c0_6] : memref<32x128xf32, #tpu.memory_space<vmem>>, vector<32x128xf32>
    tpu.vector_store %arg4[%c0_5, %c0_6], %5 {strides = array<i32>} : memref<32x128xf32, #tpu.memory_space<vmem>>, vector<32x128xf32>,
    return
  }
  func.func @transform_0(%arg0: i32) -> (i32, i32) {
    %c0_i32 = arith.constant 0 : i32
    %c0_i32_0 = arith.constant 0 : i32
    return %arg0, %c0_i32 : i32, i32
  }
  func.func @transform_1(%arg0: i32) -> (i32, i32) {
    %c0_i32 = arith.constant 0 : i32
    %c0_i32_0 = arith.constant 0 : i32
    %c0_i32_1 = arith.constant 0 : i32
    return %c0_i32, %c0_i32_0 : i32, i32
  }
  func.func @transform_2(%arg0: i32) -> (i32, i32) {
    %c0_i32 = arith.constant 0 : i32
    %c0_i32_0 = arith.constant 0 : i32
    %c0_i32_1 = arith.constant 0 : i32
    return %c0_i32, %c0_i32_0 : i32, i32
  }
  func.func @transform_3(%arg0: i32) -> (i32, i32) {
    %c0_i32 = arith.constant 0 : i32
    %c0_i32_0 = arith.constant 0 : i32
    return %arg0, %c0_i32 : i32, i32
  }
}

module attributes {stable_mosaic.version = 11 : i64} {
  func.func @_fused_conv_kernel(%arg0: i32, %arg1: memref<32x1152xbf16, #tpu.memory_space<vmem>>, %arg2: memref<1152x128xbf16, #tpu.memory_space<vmem>>, %arg3: memref<1x128xf32, #tpu.memory_space<vmem>>, %arg4: memref<32x128xf32, #tpu.memory_space<vmem>>) attributes {dimension_semantics = [#tpu.dimension_semantics<parallel>], iteration_bounds = array<i64: 1>, scalar_prefetch = 0 : i64, scratch_operands = 0 : i64, tpu.core_type = #tpu.core_type<tc>, window_params = [{transform_indices = @transform_0, window_bounds = array<i64: 32, 1152>}, {pipeline_mode = #tpu.pipeline_mode<synchronous>, transform_indices = @transform_1, window_bounds = array<i64: 1152, 128>}, {pipeline_mode = #tpu.pipeline_mode<synchronous>, transform_indices = @transform_2, window_bounds = array<i64: 1, 128>}, {transform_indices = @transform_3, window_bounds = array<i64: 32, 128>}]} {
    %c0 = arith.constant 0 : index
    %c0_0 = arith.constant 0 : index
    %0 = vector.load %arg1[%c0, %c0_0] : memref<32x1152xbf16, #tpu.memory_space<vmem>>, vector<32x1152xbf16>
    %c0_1 = arith.constant 0 : index
    %c0_2 = arith.constant 0 : index
    %1 = vector.load %arg2[%c0_1, %c0_2] : memref<1152x128xbf16, #tpu.memory_space<vmem>>, vector<1152x128xbf16>
    %cst = arith.constant dense<0.000000e+00> : vector<32x128xf32>
    %2 = tpu.matmul %0, %1, %cst {dimension_numbers = #tpu.dot_dimension_numbers<[1], [0], [0], [1], [0, 0, 1, 1], [], []>} : vector<32x1152xbf16>, vector<1152x128xbf16>, vector<32x128xf32> -> vector<32x128xf32>
    %c0_3 = arith.constant 0 : index
    %c0_4 = arith.constant 0 : index
    %3 = vector.load %arg3[%c0_3, %c0_4] : memref<1x128xf32, #tpu.memory_space<vmem>>, vector<1x128xf32>
    %4 = vector.broadcast %3 : vector<1x128xf32> to vector<32x128xf32>
    %5 = arith.addf %2, %4 : vector<32x128xf32>
    %cst_5 = arith.constant 0.000000e+00 : f32
    %6 = vector.broadcast %cst_5 : f32 to vector<32x128xf32>
    %7 = arith.maximumf %5, %6 : vector<32x128xf32>
    %c0_6 = arith.constant 0 : index
    %c0_7 = arith.constant 0 : index
    %8 = vector.load %arg4[%c0_6, %c0_7] : memref<32x128xf32, #tpu.memory_space<vmem>>, vector<32x128xf32>
    tpu.vector_store %arg4[%c0_6, %c0_7], %7 {strides = array<i32>} : memref<32x128xf32, #tpu.memory_space<vmem>>, vector<32x128xf32>,
    return
  }
  func.func @transform_0(%arg0: i32) -> (i32, i32) {
    %c0_i32 = arith.constant 0 : i32
    %c0_i32_0 = arith.constant 0 : i32
    return %arg0, %c0_i32 : i32, i32
  }
  func.func @transform_1(%arg0: i32) -> (i32, i32) {
    %c0_i32 = arith.constant 0 : i32
    %c0_i32_0 = arith.constant 0 : i32
    %c0_i32_1 = arith.constant 0 : i32
    return %c0_i32, %c0_i32_0 : i32, i32
  }
  func.func @transform_2(%arg0: i32) -> (i32, i32) {
    %c0_i32 = arith.constant 0 : i32
    %c0_i32_0 = arith.constant 0 : i32
    %c0_i32_1 = arith.constant 0 : i32
    return %c0_i32, %c0_i32_0 : i32, i32
  }
  func.func @transform_3(%arg0: i32) -> (i32, i32) {
    %c0_i32 = arith.constant 0 : i32
    %c0_i32_0 = arith.constant 0 : i32
    return %arg0, %c0_i32 : i32, i32
  }
}

module attributes {stable_mosaic.version = 11 : i64} {
  func.func @_head_kernel(%arg0: i32, %arg1: memref<2x16x128xf32, #tpu.memory_space<vmem>>, %arg2: memref<128x128xbf16, #tpu.memory_space<vmem>>, %arg3: memref<1x128xf32, #tpu.memory_space<vmem>>, %arg4: memref<2x128xf32, #tpu.memory_space<vmem>>) attributes {dimension_semantics = [#tpu.dimension_semantics<arbitrary>], iteration_bounds = array<i64: 1>, scalar_prefetch = 0 : i64, scratch_operands = 0 : i64, tpu.core_type = #tpu.core_type<tc>, window_params = [{pipeline_mode = #tpu.pipeline_mode<synchronous>, transform_indices = @transform_0, window_bounds = array<i64: 2, 16, 128>}, {pipeline_mode = #tpu.pipeline_mode<synchronous>, transform_indices = @transform_1, window_bounds = array<i64: 128, 128>}, {pipeline_mode = #tpu.pipeline_mode<synchronous>, transform_indices = @transform_2, window_bounds = array<i64: 1, 128>}, {pipeline_mode = #tpu.pipeline_mode<synchronous>, transform_indices = @transform_3, window_bounds = array<i64: 2, 128>}]} {
    %c0 = arith.constant 0 : index
    %c0_0 = arith.constant 0 : index
    %c0_1 = arith.constant 0 : index
    %0 = vector.load %arg1[%c0, %c0_0, %c0_1] : memref<2x16x128xf32, #tpu.memory_space<vmem>>, vector<2x16x128xf32>
    %cst = arith.constant dense<0.000000e+00> : vector<2x128xf32>
    %1 = vector.multi_reduction <add>, %0, %cst [1] : vector<2x16x128xf32> to vector<2x128xf32>
    %cst_2 = arith.constant 6.250000e-02 : f32
    %2 = vector.broadcast %cst_2 : f32 to vector<2x128xf32>
    %3 = arith.mulf %1, %2 : vector<2x128xf32>
    %4 = arith.truncf %3 : vector<2x128xf32> to vector<2x128xbf16>
    %c0_3 = arith.constant 0 : index
    %c0_4 = arith.constant 0 : index
    %5 = vector.load %arg2[%c0_3, %c0_4] : memref<128x128xbf16, #tpu.memory_space<vmem>>, vector<128x128xbf16>
    %cst_5 = arith.constant dense<0.000000e+00> : vector<2x128xf32>
    %6 = tpu.matmul %4, %5, %cst_5 {dimension_numbers = #tpu.dot_dimension_numbers<[1], [0], [0], [1], [0, 0, 1, 1], [], []>} : vector<2x128xbf16>, vector<128x128xbf16>, vector<2x128xf32> -> vector<2x128xf32>
    %c0_6 = arith.constant 0 : index
    %c0_7 = arith.constant 0 : index
    %7 = vector.load %arg3[%c0_6, %c0_7] : memref<1x128xf32, #tpu.memory_space<vmem>>, vector<1x128xf32>
    %8 = vector.broadcast %7 : vector<1x128xf32> to vector<2x128xf32>
    %9 = arith.addf %6, %8 : vector<2x128xf32>
    %c0_8 = arith.constant 0 : index
    %c0_9 = arith.constant 0 : index
    %10 = vector.load %arg4[%c0_8, %c0_9] : memref<2x128xf32, #tpu.memory_space<vmem>>, vector<2x128xf32>
    tpu.vector_store %arg4[%c0_8, %c0_9], %9 {strides = array<i32>} : memref<2x128xf32, #tpu.memory_space<vmem>>, vector<2x128xf32>,
    return
  }
  func.func @transform_0(%arg0: i32) -> (i32, i32, i32) {
    %c0_i32 = arith.constant 0 : i32
    %c0_i32_0 = arith.constant 0 : i32
    %c0_i32_1 = arith.constant 0 : i32
    %c0_i32_2 = arith.constant 0 : i32
    return %c0_i32, %c0_i32_0, %c0_i32_1 : i32, i32, i32
  }
  func.func @transform_1(%arg0: i32) -> (i32, i32) {
    %c0_i32 = arith.constant 0 : i32
    %c0_i32_0 = arith.constant 0 : i32
    %c0_i32_1 = arith.constant 0 : i32
    return %c0_i32, %c0_i32_0 : i32, i32
  }
  func.func @transform_2(%arg0: i32) -> (i32, i32) {
    %c0_i32 = arith.constant 0 : i32
    %c0_i32_0 = arith.constant 0 : i32
    %c0_i32_1 = arith.constant 0 : i32
    return %c0_i32, %c0_i32_0 : i32, i32
  }
  func.func @transform_3(%arg0: i32) -> (i32, i32) {
    %c0_i32 = arith.constant 0 : i32
    %c0_i32_0 = arith.constant 0 : i32
    %c0_i32_1 = arith.constant 0 : i32
    return %c0_i32, %c0_i32_0 : i32, i32
  }
}

module attributes {stable_mosaic.version = 11 : i64} {
  func.func @_fused_conv_kernel(%arg0: i32, %arg1: memref<32x1152xbf16, #tpu.memory_space<vmem>>, %arg2: memref<1152x128xbf16, #tpu.memory_space<vmem>>, %arg3: memref<1x128xf32, #tpu.memory_space<vmem>>, %arg4: memref<32x128xf32, #tpu.memory_space<vmem>>, %arg5: memref<32x128xf32, #tpu.memory_space<vmem>>) attributes {dimension_semantics = [#tpu.dimension_semantics<parallel>], iteration_bounds = array<i64: 1>, scalar_prefetch = 0 : i64, scratch_operands = 0 : i64, tpu.core_type = #tpu.core_type<tc>, window_params = [{transform_indices = @transform_0, window_bounds = array<i64: 32, 1152>}, {pipeline_mode = #tpu.pipeline_mode<synchronous>, transform_indices = @transform_1, window_bounds = array<i64: 1152, 128>}, {pipeline_mode = #tpu.pipeline_mode<synchronous>, transform_indices = @transform_2, window_bounds = array<i64: 1, 128>}, {transform_indices = @transform_3, window_bounds = array<i64: 32, 128>}, {transform_indices = @transform_4, window_bounds = array<i64: 32, 128>}]} {
    %c0 = arith.constant 0 : index
    %c0_0 = arith.constant 0 : index
    %0 = vector.load %arg1[%c0, %c0_0] : memref<32x1152xbf16, #tpu.memory_space<vmem>>, vector<32x1152xbf16>
    %c0_1 = arith.constant 0 : index
    %c0_2 = arith.constant 0 : index
    %1 = vector.load %arg2[%c0_1, %c0_2] : memref<1152x128xbf16, #tpu.memory_space<vmem>>, vector<1152x128xbf16>
    %cst = arith.constant dense<0.000000e+00> : vector<32x128xf32>
    %2 = tpu.matmul %0, %1, %cst {dimension_numbers = #tpu.dot_dimension_numbers<[1], [0], [0], [1], [0, 0, 1, 1], [], []>} : vector<32x1152xbf16>, vector<1152x128xbf16>, vector<32x128xf32> -> vector<32x128xf32>
    %c0_3 = arith.constant 0 : index
    %c0_4 = arith.constant 0 : index
    %3 = vector.load %arg3[%c0_3, %c0_4] : memref<1x128xf32, #tpu.memory_space<vmem>>, vector<1x128xf32>
    %4 = vector.broadcast %3 : vector<1x128xf32> to vector<32x128xf32>
    %5 = arith.addf %2, %4 : vector<32x128xf32>
    %c0_5 = arith.constant 0 : index
    %c0_6 = arith.constant 0 : index
    %6 = vector.load %arg4[%c0_5, %c0_6] : memref<32x128xf32, #tpu.memory_space<vmem>>, vector<32x128xf32>
    %7 = arith.addf %5, %6 : vector<32x128xf32>
    %cst_7 = arith.constant 0.000000e+00 : f32
    %8 = vector.broadcast %cst_7 : f32 to vector<32x128xf32>
    %9 = arith.maximumf %7, %8 : vector<32x128xf32>
    %c0_8 = arith.constant 0 : index
    %c0_9 = arith.constant 0 : index
    %10 = vector.load %arg5[%c0_8, %c0_9] : memref<32x128xf32, #tpu.memory_space<vmem>>, vector<32x128xf32>
    tpu.vector_store %arg5[%c0_8, %c0_9], %9 {strides = array<i32>} : memref<32x128xf32, #tpu.memory_space<vmem>>, vector<32x128xf32>,
    return
  }
  func.func @transform_0(%arg0: i32) -> (i32, i32) {
    %c0_i32 = arith.constant 0 : i32
    %c0_i32_0 = arith.constant 0 : i32
    return %arg0, %c0_i32 : i32, i32
  }
  func.func @transform_1(%arg0: i32) -> (i32, i32) {
    %c0_i32 = arith.constant 0 : i32
    %c0_i32_0 = arith.constant 0 : i32
    %c0_i32_1 = arith.constant 0 : i32
    return %c0_i32, %c0_i32_0 : i32, i32
  }
  func.func @transform_2(%arg0: i32) -> (i32, i32) {
    %c0_i32 = arith.constant 0 : i32
    %c0_i32_0 = arith.constant 0 : i32
    %c0_i32_1 = arith.constant 0 : i32
    return %c0_i32, %c0_i32_0 : i32, i32
  }
  func.func @transform_3(%arg0: i32) -> (i32, i32) {
    %c0_i32 = arith.constant 0 : i32
    %c0_i32_0 = arith.constant 0 : i32
    return %arg0, %c0_i32 : i32, i32
  }
  func.func @transform_4(%arg0: i32) -> (i32, i32) {
    %c0_i32 = arith.constant 0 : i32
    %c0_i32_0 = arith.constant 0 : i32
    return %arg0, %c0_i32 : i32, i32
  }
}

</mosaic_0001>

<bundles_post_ra>
// kernel: resnet_forward.14
= control target key start
LH: loop header
LB: loop body
LE: loop exit
PB: predicated region body
PF: predicated region fallthrough
CT: control target
= control target key end

     0   :  { %s483_s1 = inlined_call_operand.vmem [shape: bf16[128,128], index: 1, kind: input, shape index: {}]   ;;  %s484_s0 = inlined_call_operand.vmem [shape: bf16[128,128], index: 0, kind: input, shape index: {}]   ;;  %s485_s2 = inlined_call_operand.vmem [shape: f32[1,128], index: 2, kind: input, shape index: {}]   ;;  %s486_s3 = inlined_call_operand.vmem [shape: f32[128,128], index: 3, kind: output, shape index: {}]  }
   0x1   :  { %v348_v0 = vld [vmem:[%s483_s1 + $0x38] sm:$0xff]   ;;  %v349_v1 = vld [vmem:[%s483_s1 + $0x30] sm:$0xff]   ;;  %v350_v2 = vld [vmem:[%s483_s1 + $0x28] sm:$0xff]  }
   0x2   :  { %300 = vmatprep.subr.bf16.mxu0 %v348_v0  ;;  %332 = vmatprep.subr.bf16.mxu1 %v348_v0  ;;  %v351_v3 = vld [vmem:[%s483_s1 + $0x20] sm:$0xff]   ;;  %v352_v6 = vld [vmem:[%s483_s1 + $0x18] sm:$0xff]   ;;  %v353_v7 = vld [vmem:[%s483_s1 + $0x10] sm:$0xff]  }
   0x3   :  { %301 = vmatpush3.bf16.msra.mxu0 %v348_v0  ;;  %340 = vmatpush3.bf16.msra.mxu1 %v348_v0  ;;  %v356_v4 = vld [vmem:[%s484_s0] sm:$0xff]   ;;  %v354_v8 = vld [vmem:[%s483_s1 + $0x8] sm:$0xff]   ;;  %v360_v12 = vld [vmem:[%s484_s0 + $0x10] sm:$0xff]  }
   0x4   :  { %302 = vmatprep.subr.bf16.mxu0 %v349_v1  ;;  %333 = vmatprep.subr.bf16.mxu1 %v349_v1  ;;  %v357_v5 = vld [vmem:[%s484_s0 + $0x20] sm:$0xff]   ;;  %v358_v10 = vld [vmem:[%s484_s0 + $0x8] sm:$0xff]   ;;  %v361_v13 = vld [vmem:[%s484_s0 + $0x30] sm:$0xff]  }
   0x5   :  { %316 = vmatprep.mubr.bf16.mxu0 %v356_v4  ;;  %324 = vmatprep.mubr.bf16.mxu1 %v357_v5  ;;  %v355_v9 = vld [vmem:[%s483_s1] sm:$0xff]   ;;  %v359_v11 = vld [vmem:[%s484_s0 + $0x28] sm:$0xff]   ;;  %v362_v14 = vld [vmem:[%s484_s0 + $0x18] sm:$0xff]  }
   0x6   :  { %v363_v15 = vld [vmem:[%s484_s0 + $0x38] sm:$0xff]   ;;  %v267_v16 = vld [vmem:[%s485_s2] ss:$0 sm:$0xff] }
   0x7   :  { %303 = vmatpush3.bf16.msra.mxu0 %v349_v1  ;;  %341 = vmatpush3.bf16.msra.mxu1 %v349_v1 }
   0x8   :  { %304 = vmatprep.subr.bf16.mxu0 %v350_v2  ;;  %334 = vmatprep.subr.bf16.mxu1 %v350_v2 }
   0xb   :  { %305 = vmatpush3.bf16.msra.mxu0 %v350_v2  ;;  %342 = vmatpush3.bf16.msra.mxu1 %v350_v2 }
   0xc   :  { %306 = vmatprep.subr.bf16.mxu0 %v351_v3  ;;  %335 = vmatprep.subr.bf16.mxu1 %v351_v3 }
   0xf   :  { %307 = vmatpush3.bf16.msra.mxu0 %v351_v3  ;;  %343 = vmatpush3.bf16.msra.mxu1 %v351_v3 }
  0x10   :  { %308 = vmatprep.subr.bf16.mxu0 %v352_v6  ;;  %336 = vmatprep.subr.bf16.mxu1 %v352_v6 }
  0x13   :  { %309 = vmatpush3.bf16.msra.mxu0 %v352_v6  ;;  %344 = vmatpush3.bf16.msra.mxu1 %v352_v6 }
  0x14   :  { %310 = vmatprep.subr.bf16.mxu0 %v353_v7  ;;  %337 = vmatprep.subr.bf16.mxu1 %v353_v7 }
  0x17   :  { %311 = vmatpush3.bf16.msra.mxu0 %v353_v7  ;;  %345 = vmatpush3.bf16.msra.mxu1 %v353_v7 }
  0x18   :  { %312 = vmatprep.subr.bf16.mxu0 %v354_v8  ;;  %338 = vmatprep.subr.bf16.mxu1 %v354_v8 }
  0x1b   :  { %313 = vmatpush3.bf16.msra.mxu0 %v354_v8  ;;  %346 = vmatpush3.bf16.msra.mxu1 %v354_v8 }
  0x1c   :  { %314 = vmatprep.subr.bf16.mxu0 %v355_v9  ;;  %339 = vmatprep.subr.bf16.mxu1 %v355_v9 }
  0x1f   :  { %315 = vmatpush3.bf16.msra.mxu0 %v355_v9  ;;  %347 = vmatpush3.bf16.msra.mxu1 %v355_v9 }
  0x22   :  { %317 = vmatmul.mubr.bf16.vlgmr.msra.gmra.mxu0 %v358_v10  ;;  %325 = vmatmul.mubr.bf16.vlgmr.msra.gmra.mxu1 %v359_v11 }
  0x23   :  { %320 = vmatprep.mubr.bf16.mxu0 %v360_v12  ;;  %328 = vmatprep.mubr.bf16.mxu1 %v361_v13 }
  0x2a   :  { %321 = vmatmul.mubr.bf16.gmra.mxu0 %v362_v14  ;;  %329 = vmatmul.mubr.bf16.gmra.mxu1 %v363_v15 }
  0xe2   :  { %v318_v17 = vpop.f32.mrf.mxu0  ;;  %v326_v18 = vpop.f32.mrf.mxu1 }
  0xe3   :  { %v193_v19 = vadd.f32 %v318_v17, %v267_v16  ;;  %v225_v20 = vadd.f32 %v326_v18, %v267_v16 }
  0xe4   :  { %v184_v21 = vpop.f32.mrf.mxu0  ;;  %v216_v22 = vpop.f32.mrf.mxu1 }
  0xe5   :  { %249 = vst [vmem:[%s486_s3 + $0x10] sm:$0xff] %v193_v19  ;;  %257 = vst [vmem:[%s486_s3 + $0x50] sm:$0xff] %v225_v20  ;;  %v185_v23 = vadd.f32 %v267_v16, %v184_v21  ;;  %v217_v24 = vadd.f32 %v267_v16, %v216_v22 }
  0xe6   :  { %v319_v25 = vpop.f32.mrf.mxu0  ;;  %v327_v26 = vpop.f32.mrf.mxu1 }
  0xe7   :  { %247 = vst [vmem:[%s486_s3] sm:$0xff] %v185_v23  ;;  %255 = vst [vmem:[%s486_s3 + $0x40] sm:$0xff] %v217_v24  ;;  %v196_v27 = vadd.f32 %v319_v25, %v267_v16  ;;  %v228_v28 = vadd.f32 %v327_v26, %v267_v16 }
  0xe8   :  { %v187_v29 = vpop.f32.mrf.mxu0  ;;  %v219_v30 = vpop.f32.mrf.mxu1 }
  0xe9   :  { %250 = vst [vmem:[%s486_s3 + $0x18] sm:$0xff] %v196_v27  ;;  %258 = vst [vmem:[%s486_s3 + $0x58] sm:$0xff] %v228_v28  ;;  %v188_v31 = vadd.f32 %v267_v16, %v187_v29  ;;  %v220_v32 = vadd.f32 %v267_v16, %v219_v30 }
  0xea   :  { %v322_v33 = vpop.f32.mrf.mxu0  ;;  %v330_v34 = vpop.f32.mrf.mxu1 }
  0xeb   :  { %248 = vst [vmem:[%s486_s3 + $0x8] sm:$0xff] %v188_v31  ;;  %256 = vst [vmem:[%s486_s3 + $0x48] sm:$0xff] %v220_v32  ;;  %v209_v35 = vadd.f32 %v322_v33, %v267_v16  ;;  %v241_v36 = vadd.f32 %v330_v34, %v267_v16 }
  0xec   :  { %v200_v37 = vpop.f32.mrf.mxu0  ;;  %v232_v38 = vpop.f32.mrf.mxu1 }
  0xed   :  { %253 = vst [vmem:[%s486_s3 + $0x30] sm:$0xff] %v209_v35  ;;  %261 = vst [vmem:[%s486_s3 + $0x70] sm:$0xff] %v241_v36  ;;  %v201_v39 = vadd.f32 %v267_v16, %v200_v37  ;;  %v233_v40 = vadd.f32 %v267_v16, %v232_v38 }
  0xee   :  { %v323_v41 = vpop.f32.mrf.mxu0  ;;  %v331_v42 = vpop.f32.mrf.mxu1 }
  0xef   :  { %251 = vst [vmem:[%s486_s3 + $0x20] sm:$0xff] %v201_v39  ;;  %259 = vst [vmem:[%s486_s3 + $0x60] sm:$0xff] %v233_v40  ;;  %v212_v43 = vadd.f32 %v323_v41, %v267_v16  ;;  %v244_v44 = vadd.f32 %v331_v42, %v267_v16 }
  0xf0   :  { %v203_v45 = vpop.f32.mrf.mxu0  ;;  %v235_v46 = vpop.f32.mrf.mxu1 }
  0xf1   :  { %254 = vst [vmem:[%s486_s3 + $0x38] sm:$0xff] %v212_v43  ;;  %262 = vst [vmem:[%s486_s3 + $0x78] sm:$0xff] %v244_v44  ;;  %v204_v47 = vadd.f32 %v267_v16, %v203_v45  ;;  %v236_v48 = vadd.f32 %v267_v16, %v235_v46 }
  0xf3   :  { %252 = vst [vmem:[%s486_s3 + $0x28] sm:$0xff] %v204_v47  ;;  %260 = vst [vmem:[%s486_s3 + $0x68] sm:$0xff] %v236_v48 }

// kernel: resnet_forward.10
= control target key start
LH: loop header
LB: loop body
LE: loop exit
PB: predicated region body
PF: predicated region fallthrough
CT: control target
= control target key end

     0   :  { %s3663_s12 = smov 0   ;;  %s4531_s0 = inlined_call_operand.vmem [shape: bf16[512,1152], index: 0, kind: input, shape index: {}]   ;;  %s4532_s1 = inlined_call_operand.vmem [shape: bf16[1152,128], index: 1, kind: input, shape index: {}]   ;;  %s4533_s2 = inlined_call_operand.vmem [shape: f32[1,128], index: 2, kind: input, shape index: {}]   ;;  %s4534_s3 = inlined_call_operand.vmem [shape: f32[512,128], index: 3, kind: output, shape index: {}]  }
   0x1 LB: > { %s2582_s13 = sadd.s32 4294967295, %s3641_s12   ;;  %p2586_p0 = scmp.ge.s32.totalorder %s3641_s12, 1  ;;  %s3641_s12 = sphi %s3663_s12, %s13_s12  }
   0x2   : > { %p139_p1 = scmp.lt.s32.totalorder %s3641_s12, 3 }
   0x4   : > { %p140_p2 = pnand %p2586_p0, %p139_p1 }
   0x6   : > { %143 = sbr.rel (%p140_p2) target bundleno = 532 (0x214), region = 32 }
   0xb   : > { %v3355_v0 = vld [vmem:[%s4532_s1 + $0x78] sm:$0xff]   ;;  %s2587_s16 = sshll.u32 %s2582_s13, 5  ;;  %v3357_v2 = vld [vmem:[%s4532_s1 + $0x70] sm:$0xff]   ;;  %v3359_v4 = vld [vmem:[%s4532_s1 + $0x68] sm:$0xff]  }
   0xc   : > { %v3356_v1 = vld [vmem:[%s4532_s1 + $0x38] sm:$0xff]   ;;  %2810 = vmatprep.subr.bf16.mxu0 %v3355_v0  ;;  %3330 = vmatprep.subr.bf16.mxu1 %v3355_v0  ;;  %p165_p3 = scmp.lt.s32.totalorder %s2587_s16, 63  ;;  %v3358_v3 = vld [vmem:[%s4532_s1 + $0x30] sm:$0xff]   ;;  %v3360_v5 = vld [vmem:[%s4532_s1 + $0x28] sm:$0xff]  }
   0xd   : > { %2811 = vmatpush3.bf16.msra.mxu0 %v3356_v1  ;;  %3338 = vmatpush3.bf16.msra.mxu1 %v3356_v1  ;;  %v3361_v6 = vld [vmem:[%s4532_s1 + $0x60] sm:$0xff]   ;;  %v3363_v8 = vld [vmem:[%s4532_s1 + $0x58] sm:$0xff]   ;;  %v3365_v10 = vld [vmem:[%s4532_s1 + $0x50] sm:$0xff]  }
   0xe   : > { %2812 = vmatprep.subr.bf16.mxu0 %v3357_v2  ;;  %3331 = vmatprep.subr.bf16.mxu1 %v3357_v2  ;;  %s4556_s16 = smov (!%p165_p3, %s2587_s16), 63  ;;  %v3362_v7 = vld [vmem:[%s4532_s1 + $0x20] sm:$0xff]   ;;  %v3364_v9 = vld [vmem:[%s4532_s1 + $0x18] sm:$0xff]   ;;  %v3366_v13 = vld [vmem:[%s4532_s1 + $0x10] sm:$0xff]  }
   0xf   : > { %s3346_s29 = smul.u32 36, %s4556_s16  ;;  %v3367_v14 = vld [vmem:[%s4532_s1 + $0x48] sm:$0xff]   ;;  %v3369_v16 = vld [vmem:[%s4532_s1 + $0x40] sm:$0xff]   ;;  %v3377_v18 = vld [vmem:[%s4532_s1 + $0xf8] sm:$0xff]  }
  0x10   : > { %v3368_v15 = vld [vmem:[%s4532_s1 + $0x8] sm:$0xff]   ;;  %v3370_v17 = vld [vmem:[%s4532_s1] sm:$0xff]   ;;  %v3380_v21 = vld [vmem:[%s4532_s1 + $0x178] sm:$0xff]  }
  0x11   : > { %2813 = vmatpush3.bf16.msra.mxu0 %v3358_v3  ;;  %3339 = vmatpush3.bf16.msra.mxu1 %v3358_v3  ;;  %s3704_s9 = scalar_lea.vmem %s4531_s0, %s3346_s29  ;;  %v3378_v22 = vld [vmem:[%s4532_s1 + $0xb8] sm:$0xff]   ;;  %v3379_v23 = vld [vmem:[%s4532_s1 + $0xf0] sm:$0xff]   ;;  %v3389_v31 = vld [vmem:[%s4532_s1 + $0xe8] sm:$0xff]  }
  0x12   : > { %2814 = vmatprep.subr.bf16.mxu0 %v3359_v4  ;;  %3332 = vmatprep.subr.bf16.mxu1 %v3359_v4  ;;  %v3373_v11 = vld [vmem:[%s3704_s9 + $0x4] ss:$36 sps:$4 sm:$0xff]   ;;  %v3382_v24 = vld [vmem:[%s4532_s1 + $0x138] sm:$0xff]   ;;  %v3383_v25 = vld [vmem:[%s3704_s9 + $0x4c] ss:$36 sps:$4 sm:$0xff]  }
  0x13   : > { %v3376_v12 = vld [vmem:[%s3704_s9 + $0x364] ss:$36 sps:$4 sm:$0xff]   ;;  %1689 = vmatprep.mubr.bf16.mxu0 %v3373_v11  ;;  %v3385_v26 = vld [vmem:[%s3704_s9 + $0x3ac] ss:$36 sps:$4 sm:$0xff]   ;;  %v3393_v35 = vld [vmem:[%s3704_s9 + $0x94] ss:$36 sps:$4 sm:$0xff]  }
  0x14   : > { %1785 = vmatprep.mubr.bf16.mxu1 %v3376_v12  ;;  %v3371_v19 = vld [vmem:[%s3704_s9] ss:$36 sps:$4 sm:$0xff]   ;;  %v3381_v27 = vld [vmem:[%s4532_s1 + $0xb0] sm:$0xff]   ;;  %v3387_v29 = vld [vmem:[%s3704_s9 + $0x48] ss:$36 sps:$4 sm:$0xff]  }
  0x15   : > { %2815 = vmatpush3.bf16.msra.mxu0 %v3360_v5  ;;  %3340 = vmatpush3.bf16.msra.mxu1 %v3360_v5  ;;  %v3374_v20 = vld [vmem:[%s3704_s9 + $0x360] ss:$36 sps:$4 sm:$0xff]   ;;  %v3400_v28 = vld [vmem:[%s4532_s1 + $0x170] sm:$0xff]   ;;  %v3388_v30 = vld [vmem:[%s3704_s9 + $0x3a8] ss:$36 sps:$4 sm:$0xff]  }
  0x16   : > { %2816 = vmatprep.subr.bf16.mxu0 %v3361_v6  ;;  %3333 = vmatprep.subr.bf16.mxu1 %v3361_v6  ;;  %v3390_v32 = vld [vmem:[%s4532_s1 + $0xa8] sm:$0xff]   ;;  %v3402_v33 = vld [vmem:[%s4532_s1 + $0x130] sm:$0xff]   ;;  %v3391_v34 = vld [vmem:[%s4532_s1 + $0xe0] sm:$0xff]  }
  0x17   : > { %v3395_v36 = vld [vmem:[%s3704_s9 + $0x3f4] ss:$36 sps:$4 sm:$0xff]   ;;  %v3392_v37 = vld [vmem:[%s4532_s1 + $0xa0] sm:$0xff]   ;;  %v3414_v43 = vld [vmem:[%s4532_s1 + $0x168] sm:$0xff]  }
  0x18   : > { %v3397_v38 = vld [vmem:[%s3704_s9 + $0x90] ss:$36 sps:$4 sm:$0xff]   ;;  %v3399_v40 = vld [vmem:[%s4532_s1 + $0xd8] sm:$0xff]   ;;  %v3416_v46 = vld [vmem:[%s4532_s1 + $0x128] sm:$0xff]  }
  0x19   : > { %2817 = vmatpush3.bf16.msra.mxu0 %v3362_v7  ;;  %3341 = vmatpush3.bf16.msra.mxu1 %v3362_v7  ;;  %v3398_v39 = vld [vmem:[%s3704_s9 + $0x3f0] ss:$36 sps:$4 sm:$0xff]   ;;  %v3401_v41 = vld [vmem:[%s4532_s1 + $0x98] sm:$0xff]   ;;  %v3411_v48 = vld [vmem:[%s4532_s1 + $0xc8] sm:$0xff]  }
  0x1a   : > { %2818 = vmatprep.subr.bf16.mxu0 %v3363_v8  ;;  %3334 = vmatprep.subr.bf16.mxu1 %v3363_v8  ;;  %v3403_v42 = vld [vmem:[%s4532_s1 + $0xd0] sm:$0xff]   ;;  %v3405_v44 = vld [vmem:[%s3704_s9 + $0xdc] ss:$36 sps:$4 sm:$0xff]   ;;  %v3412_v51 = vld [vmem:[%s4532_s1 + $0x88] sm:$0xff]  }
  0x1b   : > { %v3407_v45 = vld [vmem:[%s3704_s9 + $0x43c] ss:$36 sps:$4 sm:$0xff]   ;;  %v3404_v47 = vld [vmem:[%s4532_s1 + $0x90] sm:$0xff]   ;;  %v3417_v53 = vld [vmem:[%s3704_s9 + $0x124] ss:$36 sps:$4 sm:$0xff]  }
  0x1c   : > { %v3409_v49 = vld [vmem:[%s3704_s9 + $0xd8] ss:$36 sps:$4 sm:$0xff]   ;;  %v3413_v52 = vld [vmem:[%s4532_s1 + $0xc0] sm:$0xff]   ;;  %v3421_v54 = vld [vmem:[%s3704_s9 + $0xc] ss:$36 sps:$4 sm:$0xff]  }
  0x1d   : > { %2819 = vmatpush3.bf16.msra.mxu0 %v3364_v9  ;;  %3342 = vmatpush3.bf16.msra.mxu1 %v3364_v9  ;;  %v3410_v50 = vld [vmem:[%s3704_s9 + $0x438] ss:$36 sps:$4 sm:$0xff]   ;;  %v3431_v55 = vld [vmem:[%s4532_s1 + $0x160] sm:$0xff]   ;;  %v3419_v58 = vld [vmem:[%s3704_s9 + $0x8] ss:$36 sps:$4 sm:$0xff]  }
  0x1e   : > { %2820 = vmatprep.subr.bf16.mxu0 %v3365_v10  ;;  %3335 = vmatprep.subr.bf16.mxu1 %v3365_v10  ;;  %v3432_v56 = vld [vmem:[%s4532_s1 + $0x120] sm:$0xff]   ;;  %v3423_v60 = vld [vmem:[%s4532_s1 + $0x1f8] sm:$0xff]   ;;  %v3425_v62 = vld [vmem:[%s3704_s9 + $0x16c] ss:$36 sps:$4 sm:$0xff]  }
  0x1f   : > { %v3415_v57 = vld [vmem:[%s4532_s1 + $0x80] sm:$0xff]   ;;  %v3424_v61 = vld [vmem:[%s4532_s1 + $0x1b8] sm:$0xff]   ;;  %v3439_v1 = vld [vmem:[%s4532_s1 + $0x1f0] sm:$0xff]  }
  0x20   : > { %v3422_v59 = vld [vmem:[%s3704_s9 + $0x120] ss:$36 sps:$4 sm:$0xff]   ;;  %v3427_v63 = vld [vmem:[%s3704_s9 + $0x54] ss:$36 sps:$4 sm:$0xff]   ;;  %v3429_v4 = vld [vmem:[%s3704_s9 + $0x168] ss:$36 sps:$4 sm:$0xff]  }
  0x21   : > { %2821 = vmatpush3.bf16.msra.mxu0 %v3366_v13  ;;  %3343 = vmatpush3.bf16.msra.mxu1 %v3366_v13  ;;  %v3441_v0 = vld [vmem:[%s4532_s1 + $0x158] sm:$0xff]   ;;  %v3440_v3 = vld [vmem:[%s4532_s1 + $0x1b0] sm:$0xff]   ;;  %v3456_v9 = vld [vmem:[%s4532_s1 + $0x1e8] sm:$0xff]  }
  0x22   : > { %2822 = vmatprep.subr.bf16.mxu0 %v3367_v14  ;;  %3336 = vmatprep.subr.bf16.mxu1 %v3367_v14  ;;  %v3442_v2 = vld [vmem:[%s4532_s1 + $0x118] sm:$0xff]   ;;  %v3430_v5 = vld [vmem:[%s3704_s9 + $0x50] ss:$36 sps:$4 sm:$0xff]   ;;  %v3458_v11 = vld [vmem:[%s4532_s1 + $0x1a8] sm:$0xff]  }
  0x23   : > { %v3433_v6 = vld [vmem:[%s3704_s9 + $0x1b4] ss:$36 sps:$4 sm:$0xff]   ;;  %v3435_v7 = vld [vmem:[%s3704_s9 + $0x9c] ss:$36 sps:$4 sm:$0xff]  }
  0x24   : > { %v3455_v8 = vld [vmem:[%s4532_s1 + $0x150] sm:$0xff]   ;;  %v3438_v13 = vld [vmem:[%s3704_s9 + $0x98] ss:$36 sps:$4 sm:$0xff]  }
  0x25   : > { %2823 = vmatpush3.bf16.msra.mxu0 %v3368_v15  ;;  %3344 = vmatpush3.bf16.msra.mxu1 %v3368_v15  ;;  %v3457_v10 = vld [vmem:[%s4532_s1 + $0x110] sm:$0xff]   ;;  %v3443_v14 = vld [vmem:[%s3704_s9 + $0x1fc] ss:$36 sps:$4 sm:$0xff]   ;;  %v3465_v15 = vld [vmem:[%s4532_s1 + $0x148] sm:$0xff]  }
  0x26   : > { %2824 = vmatprep.subr.bf16.mxu0 %v3369_v16  ;;  %3337 = vmatprep.subr.bf16.mxu1 %v3369_v16  ;;  %v3437_v12 = vld [vmem:[%s3704_s9 + $0x1b0] ss:$36 sps:$4 sm:$0xff]   ;;  %v3466_v16 = vld [vmem:[%s4532_s1 + $0x108] sm:$0xff]  }
  0x29   : > { %2825 = vmatpush3.bf16.msra.mxu0 %v3370_v17  ;;  %3345 = vmatpush3.bf16.msra.mxu1 %v3370_v17  ;;  %v3445_v17 = vld [vmem:[%s3704_s9 + $0xe4] ss:$36 sps:$4 sm:$0xff]  }
  0x2a   : > { %2922 = vmatprep.subr.bf16.mxu1 %v3377_v18  ;;  %3034 = vmatprep.subr.bf16.mxu0 %v3380_v21  ;;  %v3473_v18 = vld [vmem:[%s4532_s1 + $0x1e0] sm:$0xff]  }
  0x2b   : > { %v3448_v21 = vld [vmem:[%s3704_s9 + $0xe0] ss:$36 sps:$4 sm:$0xff]  }
  0x2c   : > { %1690 = vmatmul.mubr.bf16.vlgmr.msra.gmra.mxu0 %v3371_v19  ;;  %1786 = vmatmul.mubr.bf16.vlgmr.msra.gmra.mxu1 %v3374_v20  ;;  %v3474_v19 = vld [vmem:[%s4532_s1 + $0x1a0] sm:$0xff]   ;;  %v3447_v20 = vld [vmem:[%s3704_s9 + $0x1f8] ss:$36 sps:$4 sm:$0xff]  }
  0x2d   : > { %2923 = vmatpush3.bf16.msra.mxu1 %v3378_v22  ;;  %3035 = vmatpush3.bf16.msra.mxu0 %v3382_v24  ;;  %v3449_v22 = vld [vmem:[%s3704_s9 + $0x244] ss:$36 sps:$4 sm:$0xff]  }
  0x2e   : > { %2924 = vmatprep.subr.bf16.mxu1 %v3379_v23  ;;  %1697 = vmatprep.mubr.bf16.mxu0 %v3383_v25  ;;  %v3451_v23 = vld [vmem:[%s3704_s9 + $0x12c] ss:$36 sps:$4 sm:$0xff]   ;;  %v3481_v24 = vld [vmem:[%s4532_s1 + $0x140] sm:$0xff]  }
  0x2f   : > { %1793 = vmatprep.mubr.bf16.mxu1 %v3385_v26  ;;  %3036 = vmatprep.subr.bf16.mxu0 %v3400_v28  ;;  %v3482_v25 = vld [vmem:[%s4532_s1 + $0x100] sm:$0xff]   ;;  %v3489_v26 = vld [vmem:[%s4532_s1 + $0x1d8] sm:$0xff]  }
  0x30   : > { %v3490_v28 = vld [vmem:[%s4532_s1 + $0x198] sm:$0xff]  }
  0x31   : > { %2925 = vmatpush3.bf16.msra.mxu1 %v3381_v27  ;;  %3037 = vmatpush3.bf16.msra.mxu0 %v3402_v33  ;;  %v3453_v27 = vld [vmem:[%s3704_s9 + $0x240] ss:$36 sps:$4 sm:$0xff]   ;;  %v3504_v33 = vld [vmem:[%s4532_s1 + $0x1d0] sm:$0xff]  }
  0x32   : > { %2926 = vmatprep.subr.bf16.mxu1 %v3389_v31  ;;  %3038 = vmatprep.subr.bf16.mxu0 %v3414_v43  ;;  %v3459_v31 = vld [vmem:[%s3704_s9 + $0x28c] ss:$36 sps:$4 sm:$0xff]   ;;  %v3475_v43 = vld [vmem:[%s3704_s9 + $0x31c] ss:$36 sps:$4 sm:$0xff]  }
  0x34   : > { %1698 = vmatmul.mubr.bf16.gmra.mxu0 %v3387_v29  ;;  %1794 = vmatmul.mubr.bf16.gmra.mxu1 %v3388_v30  ;;  %v3491_v29 = vld [vmem:[%s4532_s1 + $0x238] sm:$0xff]   ;;  %v3454_v30 = vld [vmem:[%s3704_s9 + $0x128] ss:$36 sps:$4 sm:$0xff]  }
  0x35   : > { %2927 = vmatpush3.bf16.msra.mxu1 %v3390_v32  ;;  %1705 = vmatprep.mubr.bf16.mxu0 %v3393_v35  ;;  %v3461_v32 = vld [vmem:[%s3704_s9 + $0x174] ss:$36 sps:$4 sm:$0xff]  }
  0x36   : > { %2928 = vmatprep.subr.bf16.mxu1 %v3391_v34  ;;  %1801 = vmatprep.mubr.bf16.mxu1 %v3395_v36  ;;  %v3463_v34 = vld [vmem:[%s3704_s9 + $0x288] ss:$36 sps:$4 sm:$0xff]   ;;  %v3505_v35 = vld [vmem:[%s4532_s1 + $0x190] sm:$0xff]  }
  0x37   : > { %3039 = vmatpush3.bf16.msra.mxu0 %v3416_v46  ;;  %v3464_v36 = vld [vmem:[%s3704_s9 + $0x170] ss:$36 sps:$4 sm:$0xff]   ;;  %v3480_v46 = vld [vmem:[%s3704_s9 + $0x200] ss:$36 sps:$4 sm:$0xff]  }
  0x38   : > { %3040 = vmatprep.subr.bf16.mxu0 %v3431_v55  ;;  %v3506_v55 = vld [vmem:[%s4532_s1 + $0x230] sm:$0xff]  }
  0x39   : > { %2929 = vmatpush3.bf16.msra.mxu1 %v3392_v37  ;;  %v3467_v37 = vld [vmem:[%s3704_s9 + $0x2d4] ss:$36 sps:$4 sm:$0xff]  }
  0x3a   : > { %2930 = vmatprep.subr.bf16.mxu1 %v3399_v40  ;;  %v3472_v40 = vld [vmem:[%s3704_s9 + $0x1b8] ss:$36 sps:$4 sm:$0xff]  }
  0x3b   : > { %3041 = vmatpush3.bf16.msra.mxu0 %v3432_v56  ;;  %v3521_v56 = vld [vmem:[%s4532_s1 + $0x228] sm:$0xff]  }
  0x3c   : > { %1706 = vmatmul.mubr.bf16.gmra.mxu0 %v3397_v38  ;;  %1802 = vmatmul.mubr.bf16.gmra.mxu1 %v3398_v39  ;;  %v3469_v38 = vld [vmem:[%s3704_s9 + $0x1bc] ss:$36 sps:$4 sm:$0xff]   ;;  %v3471_v39 = vld [vmem:[%s3704_s9 + $0x2d0] ss:$36 sps:$4 sm:$0xff]  }
  0x3d   : > { %2931 = vmatpush3.bf16.msra.mxu1 %v3401_v41  ;;  %1713 = vmatprep.mubr.bf16.mxu0 %v3405_v44  ;;  %v3519_v41 = vld [vmem:[%s4532_s1 + $0x1c8] sm:$0xff]  }
  0x3e   : > { %2932 = vmatprep.subr.bf16.mxu1 %v3403_v42  ;;  %1809 = vmatprep.mubr.bf16.mxu1 %v3407_v45  ;;  %v3520_v42 = vld [vmem:[%s4532_s1 + $0x188] sm:$0xff]   ;;  %v3479_v45 = vld [vmem:[%s3704_s9 + $0x318] ss:$36 sps:$4 sm:$0xff]  }
  0x3f   : > { %3042 = vmatprep.subr.bf16.mxu0 %v3441_v0  ;;  %v3477_v44 = vld [vmem:[%s3704_s9 + $0x204] ss:$36 sps:$4 sm:$0xff]  }
  0x40   : > { %3043 = vmatpush3.bf16.msra.mxu0 %v3442_v2  ;;  %v3503_v0 = vld [vmem:[%s3704_s9 + $0xa0] ss:$36 sps:$4 sm:$0xff]   ;;  %v3509_v2 = vld [vmem:[%s3704_s9 + $0xec] ss:$36 sps:$4 sm:$0xff]  }
  0x41   : > { %2933 = vmatpush3.bf16.msra.mxu1 %v3404_v47  ;;  %3044 = vmatprep.subr.bf16.mxu0 %v3455_v8  ;;  %v3534_v47 = vld [vmem:[%s4532_s1 + $0x1c0] sm:$0xff]   ;;  %v3515_v8 = vld [vmem:[%s3704_s9 + $0x134] ss:$36 sps:$4 sm:$0xff]  }
  0x42   : > { %2934 = vmatprep.subr.bf16.mxu1 %v3411_v48  ;;  %v3535_v48 = vld [vmem:[%s4532_s1 + $0x180] sm:$0xff]  }
  0x44   : > { %1714 = vmatmul.mubr.bf16.gmra.mxu0 %v3409_v49  ;;  %1810 = vmatmul.mubr.bf16.gmra.mxu1 %v3410_v50  ;;  %v3483_v49 = vld [vmem:[%s3704_s9 + $0x24c] ss:$36 sps:$4 sm:$0xff]   ;;  %v3487_v50 = vld [vmem:[%s3704_s9 + $0x14] ss:$36 sps:$4 sm:$0xff]  }
  0x45   : > { %2935 = vmatpush3.bf16.msra.mxu1 %v3412_v51  ;;  %1721 = vmatprep.mubr.bf16.mxu0 %v3417_v53  ;;  %v3485_v51 = vld [vmem:[%s3704_s9 + $0x10] ss:$36 sps:$4 sm:$0xff]  }
  0x46   : > { %2936 = vmatprep.subr.bf16.mxu1 %v3413_v52  ;;  %1850 = vmatprep.mubr.bf16.mxu1 %v3421_v54  ;;  %v3488_v52 = vld [vmem:[%s3704_s9 + $0x248] ss:$36 sps:$4 sm:$0xff]   ;;  %v3492_v53 = vld [vmem:[%s3704_s9 + $0x294] ss:$36 sps:$4 sm:$0xff]   ;;  %v3494_v54 = vld [vmem:[%s3704_s9 + $0x5c] ss:$36 sps:$4 sm:$0xff]  }
  0x47   : > { %3045 = vmatpush3.bf16.msra.mxu0 %v3457_v10  ;;  %v3517_v10 = vld [vmem:[%s3704_s9 + $0x368] ss:$36 sps:$4 sm:$0xff]  }
  0x48   : > { %3046 = vmatprep.subr.bf16.mxu0 %v3465_v15  ;;  %v3527_v15 = vld [vmem:[%s3704_s9 + $0x178] ss:$36 sps:$4 sm:$0xff]  }
  0x49   : > { %2937 = vmatpush3.bf16.msra.mxu1 %v3415_v57  ;;  %v3496_v57 = vld [vmem:[%s3704_s9 + $0x290] ss:$36 sps:$4 sm:$0xff]  }
  0x4a   : > { %3146 = vmatprep.subr.bf16.mxu1 %v3423_v60  ;;  %v3500_v60 = vld [vmem:[%s3704_s9 + $0xa4] ss:$36 sps:$4 sm:$0xff]  }
  0x4b   : > { %3047 = vmatpush3.bf16.msra.mxu0 %v3466_v16  ;;  %v3528_v16 = vld [vmem:[%s3704_s9 + $0x3fc] ss:$36 sps:$4 sm:$0xff]  }
  0x4c   : > { %1722 = vmatmul.mubr.bf16.gmra.mxu0 %v3422_v59  ;;  %1851 = vmatmul.mubr.bf16.vlgmr.msra.gmra.mxu1 %v3419_v58  ;;  %v3497_v58 = vld [vmem:[%s3704_s9 + $0x58] ss:$36 sps:$4 sm:$0xff]  }
  0x4d   : > { %3147 = vmatpush3.bf16.msra.mxu1 %v3424_v61  ;;  %1729 = vmatprep.mubr.bf16.mxu0 %v3425_v62  ;;  %v3498_v59 = vld [vmem:[%s3704_s9 + $0x2dc] ss:$36 sps:$4 sm:$0xff]  }
  0x4e   : > { %1858 = vmatprep.mubr.bf16.mxu1 %v3427_v63  ;;  %3148 = vmatprep.subr.bf16.mxu1 %v3439_v1  ;;  %v3536_v61 = vld [vmem:[%s4532_s1 + $0x220] sm:$0xff]   ;;  %v3502_v62 = vld [vmem:[%s3704_s9 + $0x2d8] ss:$36 sps:$4 sm:$0xff]  }
  0x4f   : > { %3048 = vmatprep.subr.bf16.mxu0 %v3481_v24  ;;  %v3549_v63 = vld [vmem:[%s4532_s1 + $0x218] sm:$0xff]   ;;  %v3507_v1 = vld [vmem:[%s3704_s9 + $0x324] ss:$36 sps:$4 sm:$0xff]  }
  0x50   : > { %3049 = vmatpush3.bf16.msra.mxu0 %v3482_v25  ;;  %v3543_v24 = vld [vmem:[%s3704_s9 + $0x254] ss:$36 sps:$4 sm:$0xff]   ;;  %v3547_v25 = vld [vmem:[%s3704_s9 + $0x1c] ss:$36 sps:$4 sm:$0xff]  }
  0x51   : > { %3149 = vmatpush3.bf16.msra.mxu1 %v3440_v3  ;;  %3282 = vmatprep.subr.bf16.mxu0 %v3491_v29  ;;  %v3562_v3 = vld [vmem:[%s4532_s1 + $0x210] sm:$0xff]  }
  0x52   : > { %3150 = vmatprep.subr.bf16.mxu1 %v3456_v9  ;;  %v3588_v9 = vld [vmem:[%s4532_s1 + $0x200] sm:$0xff]  }
  0x54   : > { %1730 = vmatmul.mubr.bf16.gmra.mxu0 %v3429_v4  ;;  %1859 = vmatmul.mubr.bf16.gmra.mxu1 %v3430_v5  ;;  %v3511_v4 = vld [vmem:[%s3704_s9 + $0x320] ss:$36 sps:$4 sm:$0xff]   ;;  %v3575_v5 = vld [vmem:[%s4532_s1 + $0x208] sm:$0xff]  }
  0x55   : > { %1737 = vmatprep.mubr.bf16.mxu0 %v3433_v6  ;;  %1866 = vmatprep.mubr.bf16.mxu1 %v3435_v7  ;;  %v3512_v6 = vld [vmem:[%s3704_s9 + $0xe8] ss:$36 sps:$4 sm:$0xff]  }
  0x56   : > { %3151 = vmatpush3.bf16.msra.mxu1 %v3458_v11  ;;  %v3513_v7 = vld [vmem:[%s3704_s9 + $0x36c] ss:$36 sps:$4 sm:$0xff]  }
  0x57   : > { %3152 = vmatprep.subr.bf16.mxu1 %v3473_v18  ;;  %v3518_v11 = vld [vmem:[%s3704_s9 + $0x130] ss:$36 sps:$4 sm:$0xff]   ;;  %v3532_v18 = vld [vmem:[%s3704_s9 + $0x3f8] ss:$36 sps:$4 sm:$0xff]  }
  0x5a   : > { %3153 = vmatpush3.bf16.msra.mxu1 %v3474_v19  ;;  %v3533_v19 = vld [vmem:[%s3704_s9 + $0x1c0] ss:$36 sps:$4 sm:$0xff]  }
  0x5b   : > { %3154 = vmatprep.subr.bf16.mxu1 %v3489_v26  ;;  %v3545_v26 = vld [vmem:[%s3704_s9 + $0x18] ss:$36 sps:$4 sm:$0xff]  }
  0x5c   : > { %1738 = vmatmul.mubr.bf16.gmra.mxu0 %v3437_v12  ;;  %1867 = vmatmul.mubr.bf16.gmra.mxu1 %v3438_v13  ;;  %v3522_v12 = vld [vmem:[%s3704_s9 + $0x3b4] ss:$36 sps:$4 sm:$0xff]   ;;  %v3524_v13 = vld [vmem:[%s3704_s9 + $0x17c] ss:$36 sps:$4 sm:$0xff]  }
  0x5d   : > { %1745 = vmatprep.mubr.bf16.mxu0 %v3443_v14  ;;  %1874 = vmatprep.mubr.bf16.mxu1 %v3445_v17  ;;  %v3526_v14 = vld [vmem:[%s3704_s9 + $0x3b0] ss:$36 sps:$4 sm:$0xff]   ;;  %v3530_v17 = vld [vmem:[%s3704_s9 + $0x1c4] ss:$36 sps:$4 sm:$0xff]  }
  0x5e   : > { %3155 = vmatpush3.bf16.msra.mxu1 %v3490_v28  ;;  %v3550_v28 = vld [vmem:[%s3704_s9 + $0x29c] ss:$36 sps:$4 sm:$0xff]  }
  0x5f   : > { %3156 = vmatprep.subr.bf16.mxu1 %v3504_v33  ;;  %v3558_v33 = vld [vmem:[%s3704_s9 + $0xac] ss:$36 sps:$4 sm:$0xff]  }
  0x62   : > { %3157 = vmatpush3.bf16.msra.mxu1 %v3505_v35  ;;  %v3561_v35 = vld [vmem:[%s3704_s9 + $0xa8] ss:$36 sps:$4 sm:$0xff]  }
  0x63   : > { %3158 = vmatprep.subr.bf16.mxu1 %v3519_v41  ;;  %v3571_v41 = vld [vmem:[%s3704_s9 + $0x13c] ss:$36 sps:$4 sm:$0xff]  }
  0x64   : > { %1746 = vmatmul.mubr.bf16.gmra.mxu0 %v3447_v20  ;;  %1875 = vmatmul.mubr.bf16.gmra.mxu1 %v3448_v21  ;;  %v3537_v20 = vld [vmem:[%s3704_s9 + $0x444] ss:$36 sps:$4 sm:$0xff]   ;;  %v3539_v21 = vld [vmem:[%s3704_s9 + $0x20c] ss:$36 sps:$4 sm:$0xff]  }
  0x65   : > { %1753 = vmatprep.mubr.bf16.mxu0 %v3449_v22  ;;  %1882 = vmatprep.mubr.bf16.mxu1 %v3451_v23  ;;  %v3541_v22 = vld [vmem:[%s3704_s9 + $0x440] ss:$36 sps:$4 sm:$0xff]   ;;  %v3542_v23 = vld [vmem:[%s3704_s9 + $0x208] ss:$36 sps:$4 sm:$0xff]  }
  0x66   : > { %3159 = vmatpush3.bf16.msra.mxu1 %v3520_v42  ;;  %v3573_v42 = vld [vmem:[%s3704_s9 + $0x370] ss:$36 sps:$4 sm:$0xff]  }
  0x67   : > { %3160 = vmatprep.subr.bf16.mxu1 %v3534_v47 }
  0x6a   : > { %3161 = vmatpush3.bf16.msra.mxu1 %v3535_v48 }
  0x6c   : > { %1754 = vmatmul.mubr.bf16.gmra.mxu0 %v3453_v27  ;;  %1883 = vmatmul.mubr.bf16.gmra.mxu1 %v3454_v30  ;;  %v3548_v27 = vld [vmem:[%s3704_s9 + $0x250] ss:$36 sps:$4 sm:$0xff]   ;;  %v3554_v30 = vld [vmem:[%s3704_s9 + $0x298] ss:$36 sps:$4 sm:$0xff]  }
  0x6d   : > { %1761 = vmatprep.mubr.bf16.mxu0 %v3459_v31  ;;  %1890 = vmatprep.mubr.bf16.mxu1 %v3461_v32  ;;  %v3555_v31 = vld [vmem:[%s3704_s9 + $0x60] ss:$36 sps:$4 sm:$0xff]  }
  0x6e   : > { %v3556_v32 = vld [vmem:[%s3704_s9 + $0x2e4] ss:$36 sps:$4 sm:$0xff]  }
  0x74   : > { %1762 = vmatmul.mubr.bf16.gmra.mxu0 %v3463_v34  ;;  %1891 = vmatmul.mubr.bf16.gmra.mxu1 %v3464_v36  ;;  %v3560_v34 = vld [vmem:[%s3704_s9 + $0x2e0] ss:$36 sps:$4 sm:$0xff]   ;;  %v3563_v36 = vld [vmem:[%s3704_s9 + $0x32c] ss:$36 sps:$4 sm:$0xff]  }
  0x75   : > { %1769 = vmatprep.mubr.bf16.mxu0 %v3467_v37  ;;  %1898 = vmatprep.mubr.bf16.mxu1 %v3469_v38  ;;  %v3565_v37 = vld [vmem:[%s3704_s9 + $0xf4] ss:$36 sps:$4 sm:$0xff]   ;;  %v3567_v38 = vld [vmem:[%s3704_s9 + $0x328] ss:$36 sps:$4 sm:$0xff]  }
  0x7c   : > { %1770 = vmatmul.mubr.bf16.gmra.mxu0 %v3471_v39  ;;  %1899 = vmatmul.mubr.bf16.gmra.mxu1 %v3472_v40  ;;  %v3568_v39 = vld [vmem:[%s3704_s9 + $0xf0] ss:$36 sps:$4 sm:$0xff]  }
  0x7d   : > { %1777 = vmatprep.mubr.bf16.mxu0 %v3475_v43  ;;  %1906 = vmatprep.mubr.bf16.mxu1 %v3477_v44  ;;  %v3569_v40 = vld [vmem:[%s3704_s9 + $0x374] ss:$36 sps:$4 sm:$0xff]   ;;  %v3576_v44 = vld [vmem:[%s3704_s9 + $0x3bc] ss:$36 sps:$4 sm:$0xff]  }
  0x7e   : > { %v3574_v43 = vld [vmem:[%s3704_s9 + $0x138] ss:$36 sps:$4 sm:$0xff]  }
  0x84   : > { %1778 = vmatmul.mubr.bf16.gmra.mxu0 %v3479_v45  ;;  %1907 = vmatmul.mubr.bf16.gmra.mxu1 %v3480_v46  ;;  %v3578_v45 = vld [vmem:[%s3704_s9 + $0x184] ss:$36 sps:$4 sm:$0xff]  }
  0x85   : > { %1914 = vmatprep.mubr.bf16.mxu1 %v3483_v49  ;;  %2011 = vmatprep.mubr.bf16.mxu0 %v3487_v50 }
  0x8c   : > { %1915 = vmatmul.mubr.bf16.gmra.mxu1 %v3488_v52  ;;  %2012 = vmatmul.mubr.bf16.vlgmr.msra.gmra.mxu0 %v3485_v51 }
  0x8d   : > { %3283 = vmatpush3.bf16.msra.mxu0 %v3491_v29  ;;  %1922 = vmatprep.mubr.bf16.mxu1 %v3492_v53  ;;  %v3552_v29 = vld [vmem:[%s3704_s9 + $0x64] ss:$36 sps:$4 sm:$0xff]  }
  0x8e   : > { %2019 = vmatprep.mubr.bf16.mxu0 %v3494_v54  ;;  %3284 = vmatprep.subr.bf16.mxu0 %v3506_v55  ;;  %v3580_v54 = vld [vmem:[%s3704_s9 + $0x3b8] ss:$36 sps:$4 sm:$0xff]  }
  0x91   : > { %3285 = vmatpush3.bf16.msra.mxu0 %v3506_v55  ;;  %v3581_v55 = vld [vmem:[%s3704_s9 + $0x180] ss:$36 sps:$4 sm:$0xff]  }
  0x92   : > { %3286 = vmatprep.subr.bf16.mxu0 %v3521_v56 }
  0x94   : > { %1923 = vmatmul.mubr.bf16.gmra.mxu1 %v3496_v57  ;;  %2020 = vmatmul.mubr.bf16.gmra.mxu0 %v3497_v58  ;;  %v3584_v57 = vld [vmem:[%s3704_s9 + $0x1cc] ss:$36 sps:$4 sm:$0xff]  }
  0x95   : > { %1930 = vmatprep.mubr.bf16.mxu1 %v3498_v59  ;;  %2027 = vmatprep.mubr.bf16.mxu0 %v3500_v60 }
  0x96   : > { %3287 = vmatpush3.bf16.msra.mxu0 %v3521_v56  ;;  %v3582_v56 = vld [vmem:[%s3704_s9 + $0x404] ss:$36 sps:$4 sm:$0xff]  }
  0x97   : > { %3288 = vmatprep.subr.bf16.mxu0 %v3536_v61 }
  0x9a   : > { %3289 = vmatpush3.bf16.msra.mxu0 %v3536_v61 }
  0x9b   : > { %3290 = vmatprep.subr.bf16.mxu0 %v3549_v63 }
  0x9c   : > { %1931 = vmatmul.mubr.bf16.gmra.mxu1 %v3502_v62  ;;  %2028 = vmatmul.mubr.bf16.gmra.mxu0 %v3503_v0 }
  0x9d   : > { %1938 = vmatprep.mubr.bf16.mxu1 %v3507_v1  ;;  %2035 = vmatprep.mubr.bf16.mxu0 %v3509_v2 }
  0x9e   : > { %3291 = vmatpush3.bf16.msra.mxu0 %v3549_v63 }
  0x9f   : > { %3292 = vmatprep.subr.bf16.mxu0 %v3562_v3 }
  0xa2   : > { %3293 = vmatpush3.bf16.msra.mxu0 %v3562_v3 }
  0xa3   : > { %3294 = vmatprep.subr.bf16.mxu0 %v3575_v5 }
  0xa4   : > { %1939 = vmatmul.mubr.bf16.gmra.mxu1 %v3511_v4  ;;  %2036 = vmatmul.mubr.bf16.gmra.mxu0 %v3512_v6  ;;  %v3586_v6 = vld [vmem:[%s3704_s9 + $0x400] ss:$36 sps:$4 sm:$0xff]  }
  0xa5   : > { %1946 = vmatprep.mubr.bf16.mxu1 %v3513_v7  ;;  %2043 = vmatprep.mubr.bf16.mxu0 %v3515_v8  ;;  %v3587_v7 = vld [vmem:[%s3704_s9 + $0x1c8] ss:$36 sps:$4 sm:$0xff]  }
  0xa6   : > { %3295 = vmatpush3.bf16.msra.mxu0 %v3575_v5  ;;  %v3589_v8 = vld [vmem:[%s3704_s9 + $0x44c] ss:$36 sps:$4 sm:$0xff]  }
  0xa7   : > { %3296 = vmatprep.subr.bf16.mxu0 %v3588_v9 }
  0xaa   : > { %3297 = vmatpush3.bf16.msra.mxu0 %v3588_v9  ;;  %v3591_v9 = vld [vmem:[%s3704_s9 + $0x214] ss:$36 sps:$4 sm:$0xff]  }
  0xac   : > { %1947 = vmatmul.mubr.bf16.gmra.mxu1 %v3517_v10  ;;  %2044 = vmatmul.mubr.bf16.gmra.mxu0 %v3518_v11 }
  0xad   : > { %1954 = vmatprep.mubr.bf16.mxu1 %v3522_v12  ;;  %2051 = vmatprep.mubr.bf16.mxu0 %v3524_v13 }
  0xb4   : > { %1955 = vmatmul.mubr.bf16.gmra.mxu1 %v3526_v14  ;;  %2052 = vmatmul.mubr.bf16.gmra.mxu0 %v3527_v15 }
  0xb5   : > { %1962 = vmatprep.mubr.bf16.mxu1 %v3528_v16  ;;  %2059 = vmatprep.mubr.bf16.mxu0 %v3530_v17 }
  0xbc   : > { %1963 = vmatmul.mubr.bf16.gmra.mxu1 %v3532_v18  ;;  %2060 = vmatmul.mubr.bf16.gmra.mxu0 %v3533_v19 }
  0xbd   : > { %1970 = vmatprep.mubr.bf16.mxu1 %v3537_v20  ;;  %2067 = vmatprep.mubr.bf16.mxu0 %v3539_v21 }
  0xc4   : > { %1971 = vmatmul.mubr.bf16.gmra.mxu1 %v3541_v22  ;;  %2068 = vmatmul.mubr.bf16.gmra.mxu0 %v3542_v23  ;;  %v3593_v22 = vld [vmem:[%s3704_s9 + $0x448] ss:$36 sps:$4 sm:$0xff]   ;;  %v3594_v23 = vld [vmem:[%s3704_s9 + $0x210] ss:$36 sps:$4 sm:$0xff]  }
  0xc5   : > { %2075 = vmatprep.mubr.bf16.mxu0 %v3543_v24  ;;  %2172 = vmatprep.mubr.bf16.mxu1 %v3547_v25  ;;  %v3597_v24 = vld [vmem:[%s3704_s9 + $0x25c] ss:$36 sps:$4 sm:$0xff]  }
  0xc6   : > { %v3598_v25 = vld [vmem:[%s3704_s9 + $0x20] ss:$36 sps:$4 sm:$0xff]  }
  0xcc   : > { %2076 = vmatmul.mubr.bf16.gmra.mxu0 %v3548_v27  ;;  %2173 = vmatmul.mubr.bf16.vlgmr.msra.gmra.mxu1 %v3545_v26 }
  0xcd   : > { %2083 = vmatprep.mubr.bf16.mxu0 %v3550_v28  ;;  %2180 = vmatprep.mubr.bf16.mxu1 %v3552_v29 }
  0xd4   : > { %2084 = vmatmul.mubr.bf16.gmra.mxu0 %v3554_v30  ;;  %2181 = vmatmul.mubr.bf16.gmra.mxu1 %v3555_v31 }
  0xd5   : > { %2091 = vmatprep.mubr.bf16.mxu0 %v3556_v32  ;;  %2188 = vmatprep.mubr.bf16.mxu1 %v3558_v33 }
  0xdc   : > { %2092 = vmatmul.mubr.bf16.gmra.mxu0 %v3560_v34  ;;  %2189 = vmatmul.mubr.bf16.gmra.mxu1 %v3561_v35 }
  0xdd   : > { %2099 = vmatprep.mubr.bf16.mxu0 %v3563_v36  ;;  %2196 = vmatprep.mubr.bf16.mxu1 %v3565_v37 }
  0xe4   : > { %2100 = vmatmul.mubr.bf16.gmra.mxu0 %v3567_v38  ;;  %2197 = vmatmul.mubr.bf16.gmra.mxu1 %v3568_v39  ;;  %v3595_v38 = vld [vmem:[%s3704_s9 + $0x258] ss:$36 sps:$4 sm:$0xff]   ;;  %v3599_v39 = vld [vmem:[%s3704_s9 + $0x68] ss:$36 sps:$4 sm:$0xff]  }
  0xe5   : > { %2107 = vmatprep.mubr.bf16.mxu0 %v3569_v40  ;;  %2204 = vmatprep.mubr.bf16.mxu1 %v3571_v41  ;;  %v3602_v40 = vld [vmem:[%s3704_s9 + $0x2a4] ss:$36 sps:$4 sm:$0xff]   ;;  %v3603_v41 = vld [vmem:[%s3704_s9 + $0xb0] ss:$36 sps:$4 sm:$0xff]  }
  0xec   : > { %v2826_v46 = vpop.f32.mrf.mxu0  ;;  %v2898_v47 = vpop.f32.mrf.mxu1  ;;  %2108 = vmatmul.mubr.bf16.gmra.mxu0 %v3573_v42  ;;  %2205 = vmatmul.mubr.bf16.gmra.mxu1 %v3574_v43 }
  0xed   : > { %2115 = vmatprep.mubr.bf16.mxu0 %v3576_v44  ;;  %2212 = vmatprep.mubr.bf16.mxu1 %v3578_v45 }
  0xee   : > { %v2827_v48 = vpop.f32.mrf.mxu0  ;;  %v2899_v49 = vpop.f32.mrf.mxu1 }
  0xef   : > { %v3997_v50 = vadd.f32 %v2827_v48, %v2826_v46  ;;  %v3999_v51 = vadd.f32 %v2899_v49, %v2898_v47  ;;  %v4048_v48 = vld [vmem:[%s4533_s2] ss:$0 sm:$0xff] }
  0xf0   : > { %v2829_v52 = vpop.f32.mrf.mxu0  ;;  %v2901_v53 = vpop.f32.mrf.mxu1 }
  0xf2   : > { %v2830_v58 = vpop.f32.mrf.mxu0  ;;  %v2902_v59 = vpop.f32.mrf.mxu1 }
  0xf3   : > { %v4005_v60 = vadd.f32 %v2830_v58, %v2829_v52  ;;  %v4007_v61 = vadd.f32 %v2902_v59, %v2901_v53  ;;  %v1692_v53 = vadd.f32 %v3997_v50, %v4048_v48  ;;  %v3600_v58 = vld [vmem:[%s3704_s9 + $0x2a0] ss:$36 sps:$4 sm:$0xff]   ;;  %v3604_v59 = vld [vmem:[%s3704_s9 + $0xf8] ss:$36 sps:$4 sm:$0xff]  }
  0xf4   : > { %v2832_v62 = vpop.f32.mrf.mxu0  ;;  %v2904_v63 = vpop.f32.mrf.mxu1  ;;  %2116 = vmatmul.mubr.bf16.gmra.mxu0 %v3580_v54  ;;  %2213 = vmatmul.mubr.bf16.gmra.mxu1 %v3581_v55 }
  0xf5   : > { %2123 = vmatprep.mubr.bf16.mxu0 %v3582_v56  ;;  %2220 = vmatprep.mubr.bf16.mxu1 %v3584_v57 }
  0xf6   : > { %v2833_v0 = vpop.f32.mrf.mxu0  ;;  %v2905_v1 = vpop.f32.mrf.mxu1 }
  0xf7   : > { %v4009_v2 = vadd.f32 %v2833_v0, %v2832_v62  ;;  %v4011_v3 = vadd.f32 %v2905_v1, %v2904_v63  ;;  %v3607_v63 = vld [vmem:[%s3704_s9 + $0x2ec] ss:$36 sps:$4 sm:$0xff]   ;;  %v3608_v0 = vld [vmem:[%s3704_s9 + $0x140] ss:$36 sps:$4 sm:$0xff]  }
  0xf8   : > { %v2835_v4 = vpop.f32.mrf.mxu0  ;;  %v2907_v5 = vpop.f32.mrf.mxu1 }
  0xfa   : > { %v2836_v10 = vpop.f32.mrf.mxu0  ;;  %v2908_v11 = vpop.f32.mrf.mxu1 }
  0xfb   : > { %v4017_v12 = vadd.f32 %v2836_v10, %v2835_v4  ;;  %v4019_v13 = vadd.f32 %v2908_v11, %v2907_v5  ;;  %v1695_v5 = vadd.f32 %v4005_v60, %v4048_v48  ;;  %v1700_v60 = vadd.f32 %v4009_v2, %v4048_v48 }
  0xfc   : > { %v2838_v14 = vpop.f32.mrf.mxu0  ;;  %v2910_v15 = vpop.f32.mrf.mxu1  ;;  %2124 = vmatmul.mubr.bf16.gmra.mxu0 %v3586_v6  ;;  %2221 = vmatmul.mubr.bf16.gmra.mxu1 %v3587_v7 }
  0xfd   : > { %2131 = vmatprep.mubr.bf16.mxu0 %v3589_v8  ;;  %2228 = vmatprep.mubr.bf16.mxu1 %v3591_v9 }
  0xfe   : > { %v2839_v16 = vpop.f32.mrf.mxu0  ;;  %v2911_v17 = vpop.f32.mrf.mxu1 }
  0xff   : > { %v4021_v18 = vadd.f32 %v2839_v16, %v2838_v14  ;;  %v4023_v19 = vadd.f32 %v2911_v17, %v2910_v15 }
 0x100   : > { %v2841_v20 = vpop.f32.mrf.mxu0  ;;  %v2913_v21 = vpop.f32.mrf.mxu1 }
 0x102   : > { %v2842_v26 = vpop.f32.mrf.mxu0  ;;  %v2914_v27 = vpop.f32.mrf.mxu1 }
 0x103   : > { %v4029_v28 = vadd.f32 %v2842_v26, %v2841_v20  ;;  %v4031_v29 = vadd.f32 %v2914_v27, %v2913_v21  ;;  %v3605_v20 = vld [vmem:[%s3704_s9 + $0x2e8] ss:$36 sps:$4 sm:$0xff]   ;;  %v1703_v27 = vadd.f32 %v4017_v12, %v4048_v48  ;;  %v1708_v12 = vadd.f32 %v4021_v18, %v4048_v48 }
 0x104   : > { %v2844_v30 = vpop.f32.mrf.mxu0  ;;  %v2916_v31 = vpop.f32.mrf.mxu1  ;;  %2132 = vmatmul.mubr.bf16.gmra.mxu0 %v3593_v22  ;;  %2229 = vmatmul.mubr.bf16.gmra.mxu1 %v3594_v23  ;;  %v3609_v21 = vld [vmem:[%s3704_s9 + $0x188] ss:$36 sps:$4 sm:$0xff]   ;;  %v3612_v23 = vld [vmem:[%s3704_s9 + $0x334] ss:$36 sps:$4 sm:$0xff]  }
 0x105   : > { %2236 = vmatprep.mubr.bf16.mxu1 %v3597_v24  ;;  %3298 = vmatprep.mubr.bf16.mxu0 %v3598_v25  ;;  %v3613_v24 = vld [vmem:[%s3704_s9 + $0x1d0] ss:$36 sps:$4 sm:$0xff]  }
 0x106   : > { %v2845_v32 = vpop.f32.mrf.mxu0  ;;  %v2917_v33 = vpop.f32.mrf.mxu1 }
 0x107   : > { %v4033_v34 = vadd.f32 %v2845_v32, %v2844_v30  ;;  %v4035_v35 = vadd.f32 %v2917_v33, %v2916_v31 }
 0x108   : > { %v2847_v36 = vpop.f32.mrf.mxu0  ;;  %v2919_v37 = vpop.f32.mrf.mxu1 }
 0x10a   : > { %v2848_v42 = vpop.f32.mrf.mxu0  ;;  %v2920_v43 = vpop.f32.mrf.mxu1 }
 0x10b   : > { %v4041_v44 = vadd.f32 %v2848_v42, %v2847_v36  ;;  %v4043_v45 = vadd.f32 %v2920_v43, %v2919_v37  ;;  %v3610_v42 = vld [vmem:[%s3704_s9 + $0x330] ss:$36 sps:$4 sm:$0xff]   ;;  %v3614_v43 = vld [vmem:[%s3704_s9 + $0x218] ss:$36 sps:$4 sm:$0xff]  }
 0x10c   : > { %v2850_v46 = vpop.f32.mrf.mxu0  ;;  %v2938_v47 = vpop.f32.mrf.mxu1  ;;  %2237 = vmatmul.mubr.bf16.gmra.mxu1 %v3595_v38  ;;  %3299 = vmatmul.mubr.bf16.vlgmr.msra.gmra.mxu0 %v3599_v39 }
 0x10d   : > { %2244 = vmatprep.mubr.bf16.mxu1 %v3602_v40  ;;  %3302 = vmatprep.mubr.bf16.mxu0 %v3603_v41 }
 0x10e   : > { %v2851_v49 = vpop.f32.mrf.mxu0  ;;  %v2939_v52 = vpop.f32.mrf.mxu1 }
 0x10f   : > { %v4052_v54 = vadd.f32 %v2851_v49, %v2850_v46  ;;  %v2940_v55 = vadd.f32 %v2939_v52, %v2938_v47  ;;  %v3617_v47 = vld [vmem:[%s3704_s9 + $0x37c] ss:$36 sps:$4 sm:$0xff]  }
 0x110   : > { %v2853_v56 = vpop.f32.mrf.mxu0  ;;  %v2941_v57 = vpop.f32.mrf.mxu1  ;;  %v3618_v49 = vld [vmem:[%s3704_s9 + $0x260] ss:$36 sps:$4 sm:$0xff]  }
 0x111   : > { %v4056_v62 = vadd.f32 %v2940_v55, %v1692_v53  ;;  %v1711_v55 = vadd.f32 %v4029_v28, %v4048_v48  ;;  %v1716_v28 = vadd.f32 %v4033_v34, %v4048_v48 }
 0x112   : > { %v2854_v1 = vpop.f32.mrf.mxu0  ;;  %v2942_v4 = vpop.f32.mrf.mxu1 }
 0x113   : > { %v4062_v6 = vadd.f32 %v2854_v1, %v2853_v56  ;;  %v2943_v50 = vadd.f32 %v2942_v4, %v2941_v57 }
 0x114   : > { %v2856_v7 = vpop.f32.mrf.mxu0  ;;  %v2944_v8 = vpop.f32.mrf.mxu1  ;;  %2245 = vmatmul.mubr.bf16.gmra.mxu1 %v3600_v58  ;;  %3303 = vmatmul.mubr.bf16.gmra.mxu0 %v3604_v59 }
 0x115   : > { %v4064_v9 = vadd.f32 %v2943_v50, %v1695_v5  ;;  %2252 = vmatprep.mubr.bf16.mxu1 %v3607_v63  ;;  %3306 = vmatprep.mubr.bf16.mxu0 %v3608_v0 }
 0x116   : > { %v2857_v10 = vpop.f32.mrf.mxu0  ;;  %v2945_v11 = vpop.f32.mrf.mxu1 }
 0x117   : > { %v4068_v14 = vadd.f32 %v2857_v10, %v2856_v7  ;;  %v2946_v15 = vadd.f32 %v2945_v11, %v2944_v8  ;;  %v3615_v7 = vld [vmem:[%s3704_s9 + $0x378] ss:$36 sps:$4 sm:$0xff]   ;;  %v3619_v8 = vld [vmem:[%s3704_s9 + $0x2a8] ss:$36 sps:$4 sm:$0xff]  }
 0x118   : > { %v2859_v16 = vpop.f32.mrf.mxu0  ;;  %v2947_v17 = vpop.f32.mrf.mxu1  ;;  %v3622_v11 = vld [vmem:[%s3704_s9 + $0x3c4] ss:$36 sps:$4 sm:$0xff]  }
 0x119   : > { %v4072_v22 = vadd.f32 %v2946_v15, %v1700_v60  ;;  %v3623_v60 = vld [vmem:[%s3704_s9 + $0x2f0] ss:$36 sps:$4 sm:$0xff]  }
 0x11a   : > { %v2860_v25 = vpop.f32.mrf.mxu0  ;;  %v2948_v26 = vpop.f32.mrf.mxu1 }
 0x11b   : > { %v4078_v30 = vadd.f32 %v2860_v25, %v2859_v16  ;;  %v2949_v2 = vadd.f32 %v2948_v26, %v2947_v17  ;;  %v1719_v17 = vadd.f32 %v4041_v44, %v4048_v48  ;;  %v1724_v44 = vadd.f32 %v4052_v54, %v4048_v48 }
 0x11c   : > { %v2862_v31 = vpop.f32.mrf.mxu0  ;;  %v2950_v32 = vpop.f32.mrf.mxu1  ;;  %2253 = vmatmul.mubr.bf16.gmra.mxu1 %v3605_v20  ;;  %3307 = vmatmul.mubr.bf16.gmra.mxu0 %v3609_v21 }
 0x11d   : > { %v4080_v33 = vadd.f32 %v2949_v2, %v1703_v27  ;;  %2260 = vmatprep.mubr.bf16.mxu1 %v3612_v23  ;;  %3310 = vmatprep.mubr.bf16.mxu0 %v3613_v24 }
 0x11e   : > { %v2863_v36 = vpop.f32.mrf.mxu0  ;;  %v2951_v37 = vpop.f32.mrf.mxu1 }
 0x11f   : > { %v4084_v38 = vadd.f32 %v2863_v36, %v2862_v31  ;;  %v2952_v39 = vadd.f32 %v2951_v37, %v2950_v32  ;;  %v3620_v36 = vld [vmem:[%s3704_s9 + $0x3c0] ss:$36 sps:$4 sm:$0xff]   ;;  %v3624_v37 = vld [vmem:[%s3704_s9 + $0x338] ss:$36 sps:$4 sm:$0xff]  }
 0x120   : > { %v2865_v40 = vpop.f32.mrf.mxu0  ;;  %v2953_v41 = vpop.f32.mrf.mxu1 }
 0x121   : > { %v4088_v46 = vadd.f32 %v2952_v39, %v1708_v12  ;;  %v3627_v39 = vld [vmem:[%s3704_s9 + $0x40c] ss:$36 sps:$4 sm:$0xff]  }
 0x122   : > { %v2866_v52 = vpop.f32.mrf.mxu0  ;;  %v2954_v53 = vpop.f32.mrf.mxu1 }
 0x123   : > { %v4094_v56 = vadd.f32 %v2866_v52, %v2865_v40  ;;  %v2955_v18 = vadd.f32 %v2954_v53, %v2953_v41  ;;  %v3628_v40 = vld [vmem:[%s3704_s9 + $0x380] ss:$36 sps:$4 sm:$0xff]  }
 0x124   : > { %v2868_v57 = vpop.f32.mrf.mxu0  ;;  %v2956_v58 = vpop.f32.mrf.mxu1  ;;  %2261 = vmatmul.mubr.bf16.gmra.mxu1 %v3610_v42  ;;  %3311 = vmatmul.mubr.bf16.gmra.mxu0 %v3614_v43  ;;  %v1727_v43 = vadd.f32 %v4062_v6, %v4048_v48  ;;  %v1732_v6 = vadd.f32 %v4068_v14, %v4048_v48 }
 0x125   : > { %v4096_v59 = vadd.f32 %v2955_v18, %v1711_v55  ;;  %2268 = vmatprep.mubr.bf16.mxu1 %v3617_v47  ;;  %3314 = vmatprep.mubr.bf16.mxu0 %v3618_v49 }
 0x126   : > { %v2869_v63 = vpop.f32.mrf.mxu0  ;;  %v2957_v0 = vpop.f32.mrf.mxu1 }
 0x127   : > { %v4100_v1 = vadd.f32 %v2869_v63, %v2868_v57  ;;  %v2958_v4 = vadd.f32 %v2957_v0, %v2956_v58 }
 0x128   : > { %v2871_v5 = vpop.f32.mrf.mxu0  ;;  %v2959_v50 = vpop.f32.mrf.mxu1 }
 0x129   : > { %v4104_v10 = vadd.f32 %v2958_v4, %v1716_v28  ;;  %v3625_v28 = vld [vmem:[%s3704_s9 + $0x408] ss:$36 sps:$4 sm:$0xff]  }
 0x12a   : > { %v2872_v15 = vpop.f32.mrf.mxu0  ;;  %v2960_v16 = vpop.f32.mrf.mxu1  ;;  %v3629_v4 = vld [vmem:[%s3704_s9 + $0x3c8] ss:$36 sps:$4 sm:$0xff]  }
 0x12b   : > { %v4110_v20 = vadd.f32 %v2872_v15, %v2871_v5  ;;  %v2961_v34 = vadd.f32 %v2960_v16, %v2959_v50  ;;  %v3632_v50 = vld [vmem:[%s3704_s9 + $0x454] ss:$36 sps:$4 sm:$0xff]  }
 0x12c   : > { %v2874_v21 = vpop.f32.mrf.mxu0  ;;  %v2962_v23 = vpop.f32.mrf.mxu1  ;;  %2269 = vmatmul.mubr.bf16.gmra.mxu1 %v3615_v7  ;;  %3315 = vmatmul.mubr.bf16.gmra.mxu0 %v3619_v8  ;;  %v3633_v7 = vld [vmem:[%s3704_s9 + $0x410] ss:$36 sps:$4 sm:$0xff]  }
 0x12d   : > { %v4112_v24 = vadd.f32 %v2961_v34, %v1719_v17  ;;  %2276 = vmatprep.mubr.bf16.mxu1 %v3622_v11  ;;  %3318 = vmatprep.mubr.bf16.mxu0 %v3623_v60  ;;  %v1735_v60 = vadd.f32 %v4078_v30, %v4048_v48 }
 0x12e   : > { %v2875_v25 = vpop.f32.mrf.mxu0  ;;  %v2963_v26 = vpop.f32.mrf.mxu1 }
 0x12f   : > { %v4116_v27 = vadd.f32 %v2875_v25, %v2874_v21  ;;  %v2964_v2 = vadd.f32 %v2963_v26, %v2962_v23  ;;  %v1740_v25 = vadd.f32 %v4084_v38, %v4048_v48 }
 0x130   : > { %v2877_v31 = vpop.f32.mrf.mxu0  ;;  %v2965_v32 = vpop.f32.mrf.mxu1 }
 0x131   : > { %v4120_v12 = vadd.f32 %v2964_v2, %v1724_v44 }
 0x132   : > { %v2878_v41 = vpop.f32.mrf.mxu0  ;;  %v2966_v42 = vpop.f32.mrf.mxu1 }
 0x133   : > { %v4126_v47 = vadd.f32 %v2878_v41, %v2877_v31  ;;  %v2967_v54 = vadd.f32 %v2966_v42, %v2965_v32  ;;  %v3630_v31 = vld [vmem:[%s3704_s9 + $0x450] ss:$36 sps:$4 sm:$0xff]   ;;  %v3634_v32 = vld [vmem:[%s3704_s9 + $0x458] ss:$36 sps:$4 sm:$0xff]   ;;  %s2590_s9 = sshll.u32 %s4556_s16, 3 }
 0x134   : > { %v2880_v49 = vpop.f32.mrf.mxu0  ;;  %v2968_v52 = vpop.f32.mrf.mxu1  ;;  %2277 = vmatmul.mubr.bf16.gmra.mxu1 %v3620_v36  ;;  %3319 = vmatmul.mubr.bf16.gmra.mxu0 %v3624_v37  ;;  %s4412_s22 = scalar_lea.vmem %s4534_s3, %s2590_s9 }
 0x135   : > { %v4128_v53 = vadd.f32 %v2967_v54, %v1727_v43  ;;  %2284 = vmatprep.mubr.bf16.mxu1 %v3627_v39  ;;  %3322 = vmatprep.mubr.bf16.mxu0 %v3628_v40  ;;  %v1743_v40 = vadd.f32 %v4094_v56, %v4048_v48 }
 0x136   : > { %v2881_v55 = vpop.f32.mrf.mxu0  ;;  %v2969_v18 = vpop.f32.mrf.mxu1 }
 0x137   : > { %v4132_v57 = vadd.f32 %v2881_v55, %v2880_v49  ;;  %v2970_v58 = vadd.f32 %v2969_v18, %v2968_v52  ;;  %v1748_v55 = vadd.f32 %v4100_v1, %v4048_v48 }
 0x138   : > { %v2883_v63 = vpop.f32.mrf.mxu0  ;;  %v2971_v0 = vpop.f32.mrf.mxu1 }
 0x139   : > { %v4136_v5 = vadd.f32 %v2970_v58, %v1732_v6 }
 0x13a   : > { %v2884_v8 = vpop.f32.mrf.mxu0  ;;  %v2972_v11 = vpop.f32.mrf.mxu1 }
 0x13b   : > { %v4142_v15 = vadd.f32 %v2884_v8, %v2883_v63  ;;  %v2973_v14 = vadd.f32 %v2972_v11, %v2971_v0 }
 0x13c   : > { %v2886_v16 = vpop.f32.mrf.mxu0  ;;  %v2974_v17 = vpop.f32.mrf.mxu1  ;;  %2285 = vmatmul.mubr.bf16.gmra.mxu1 %v3625_v28  ;;  %3323 = vmatmul.mubr.bf16.gmra.mxu0 %v3629_v4  ;;  %v1751_v4 = vadd.f32 %v4110_v20, %v4048_v48 }
 0x13d   : > { %v4144_v34 = vadd.f32 %v2973_v14, %v1735_v60  ;;  %2292 = vmatprep.mubr.bf16.mxu1 %v3632_v50  ;;  %3326 = vmatprep.mubr.bf16.mxu0 %v3633_v7 }
 0x13e   : > { %v2887_v21 = vpop.f32.mrf.mxu0  ;;  %v2975_v23 = vpop.f32.mrf.mxu1 }
 0x13f   : > { %v4148_v26 = vadd.f32 %v2887_v21, %v2886_v16  ;;  %v2976_v30 = vadd.f32 %v2975_v23, %v2974_v17  ;;  %v1756_v16 = vadd.f32 %v4116_v27, %v4048_v48 }
 0x140   : > { %v2889_v44 = vpop.f32.mrf.mxu0  ;;  %v2977_v2 = vpop.f32.mrf.mxu1 }
 0x141   : > { %v4152_v36 = vadd.f32 %v2976_v30, %v1740_v25 }
 0x142   : > { %v2890_v37 = vpop.f32.mrf.mxu0  ;;  %v2978_v39 = vpop.f32.mrf.mxu1 }
 0x143   : > { %v4156_v41 = vadd.f32 %v2890_v37, %v2889_v44  ;;  %v2979_v42 = vadd.f32 %v2978_v39, %v2977_v2 }
 0x144   : > { %v2892_v43 = vpop.f32.mrf.mxu0  ;;  %v2980_v54 = vpop.f32.mrf.mxu1  ;;  %2293 = vmatmul.mubr.bf16.gmra.mxu1 %v3630_v31  ;;  %3327 = vmatmul.mubr.bf16.gmra.mxu0 %v3634_v32  ;;  %v1759_v31 = vadd.f32 %v4126_v47, %v4048_v48 }
 0x145   : > { %v4158_v38 = vadd.f32 %v2979_v42, %v1743_v40 }
 0x146   : > { %v2893_v49 = vpop.f32.mrf.mxu0  ;;  %v2981_v52 = vpop.f32.mrf.mxu1 }
 0x147   : > { %v4162_v18 = vadd.f32 %v2893_v49, %v2892_v43  ;;  %v2982_v6 = vadd.f32 %v2981_v52, %v2980_v54 }
 0x148   : > { %v2895_v58 = vpop.f32.mrf.mxu0  ;;  %v2983_v63 = vpop.f32.mrf.mxu1 }
 0x149   : > { %v4164_v56 = vadd.f32 %v2982_v6, %v1748_v55 }
 0x14a   : > { %v2896_v0 = vpop.f32.mrf.mxu0  ;;  %v2984_v28 = vpop.f32.mrf.mxu1 }
 0x14b   : > { %v4168_v50 = vadd.f32 %v2896_v0, %v2895_v58  ;;  %v2985_v7 = vadd.f32 %v2984_v28, %v2983_v63 }
 0x14c   : > { %v2986_v8 = vpop.f32.mrf.mxu1  ;;  %v3050_v11 = vpop.f32.mrf.mxu0 }
 0x14d   : > { %v4170_v60 = vadd.f32 %v2985_v7, %v1751_v4 }
 0x14e   : > { %v2987_v1 = vpop.f32.mrf.mxu1  ;;  %v3051_v14 = vpop.f32.mrf.mxu0 }
 0x14f   : > { %v2988_v17 = vadd.f32 %v2987_v1, %v2986_v8  ;;  %v3052_v21 = vadd.f32 %v3051_v14, %v3050_v11 }
 0x150   : > { %v2989_v23 = vpop.f32.mrf.mxu1  ;;  %v3053_v25 = vpop.f32.mrf.mxu0 }
 0x151   : > { %v4174_v30 = vadd.f32 %v2988_v17, %v1756_v16  ;;  %v4177_v20 = vadd.f32 %v3052_v21, %v4056_v62  ;;  %v1764_v62 = vadd.f32 %v4132_v57, %v4048_v48 }
 0x152   : > { %v2990_v44 = vpop.f32.mrf.mxu1  ;;  %v3054_v2 = vpop.f32.mrf.mxu0 }
 0x153   : > { %v2991_v32 = vadd.f32 %v2990_v44, %v2989_v23  ;;  %v3055_v37 = vadd.f32 %v3054_v2, %v3053_v25 }
 0x154   : > { %v2992_v39 = vpop.f32.mrf.mxu1  ;;  %v3056_v40 = vpop.f32.mrf.mxu0 }
 0x155   : > { %v4181_v42 = vadd.f32 %v2991_v32, %v1759_v31  ;;  %v4184_v27 = vadd.f32 %v3055_v37, %v4064_v9  ;;  %v1767_v9 = vadd.f32 %v4142_v15, %v4048_v48 }
 0x156   : > { %v2993_v43 = vpop.f32.mrf.mxu1  ;;  %v3057_v54 = vpop.f32.mrf.mxu0 }
 0x157   : > { %v2994_v49 = vadd.f32 %v2993_v43, %v2992_v39  ;;  %v3058_v52 = vadd.f32 %v3057_v54, %v3056_v40 }
 0x158   : > { %v2995_v55 = vpop.f32.mrf.mxu1  ;;  %v3059_v6 = vpop.f32.mrf.mxu0 }
 0x159   : > { %v4188_v58 = vadd.f32 %v2994_v49, %v1764_v62  ;;  %v4191_v47 = vadd.f32 %v3058_v52, %v4072_v22  ;;  %v1772_v22 = vadd.f32 %v4148_v26, %v4048_v48 }
 0x15a   : > { %v2996_v63 = vpop.f32.mrf.mxu1  ;;  %v3060_v0 = vpop.f32.mrf.mxu0 }
 0x15b   : > { %v2997_v28 = vadd.f32 %v2996_v63, %v2995_v55  ;;  %v3061_v4 = vadd.f32 %v3060_v0, %v3059_v6 }
 0x15c   : > { %v2998_v7 = vpop.f32.mrf.mxu1  ;;  %v3062_v8 = vpop.f32.mrf.mxu0 }
 0x15d   : > { %v4195_v11 = vadd.f32 %v2997_v28, %v1767_v9  ;;  %v4198_v57 = vadd.f32 %v3061_v4, %v4080_v33  ;;  %v1775_v33 = vadd.f32 %v4156_v41, %v4048_v48 }
 0x15e   : > { %v2999_v1 = vpop.f32.mrf.mxu1  ;;  %v3063_v14 = vpop.f32.mrf.mxu0 }
 0x15f   : > { %v3000_v16 = vadd.f32 %v2999_v1, %v2998_v7  ;;  %v3064_v17 = vadd.f32 %v3063_v14, %v3062_v8 }
 0x160   : > { %v3001_v21 = vpop.f32.mrf.mxu1  ;;  %v3065_v23 = vpop.f32.mrf.mxu0 }
 0x161   : > { %v4202_v25 = vadd.f32 %v3000_v16, %v1772_v22  ;;  %v4205_v15 = vadd.f32 %v3064_v17, %v4088_v46  ;;  %v1780_v46 = vadd.f32 %v4162_v18, %v4048_v48 }
 0x162   : > { %v3002_v44 = vpop.f32.mrf.mxu1  ;;  %v3066_v2 = vpop.f32.mrf.mxu0 }
 0x163   : > { %v3003_v31 = vadd.f32 %v3002_v44, %v3001_v21  ;;  %v3067_v32 = vadd.f32 %v3066_v2, %v3065_v23 }
 0x164   : > { %v3004_v37 = vpop.f32.mrf.mxu1  ;;  %v3068_v39 = vpop.f32.mrf.mxu0 }
 0x165   : > { %v4209_v40 = vadd.f32 %v3003_v31, %v1775_v33  ;;  %v4212_v26 = vadd.f32 %v3067_v32, %v4096_v59  ;;  %v1783_v59 = vadd.f32 %v4168_v50, %v4048_v48 }
 0x166   : > { %v3005_v43 = vpop.f32.mrf.mxu1  ;;  %v3069_v54 = vpop.f32.mrf.mxu0 }
 0x167   : > { %v3006_v62 = vadd.f32 %v3005_v43, %v3004_v37  ;;  %v3070_v49 = vadd.f32 %v3069_v54, %v3068_v39 }
 0x168   : > { %v3007_v52 = vpop.f32.mrf.mxu1  ;;  %v3071_v55 = vpop.f32.mrf.mxu0 }
 0x169   : > { %v4216_v6 = vadd.f32 %v3006_v62, %v1780_v46  ;;  %v4219_v41 = vadd.f32 %v3070_v49, %v4104_v10  ;;  %v1788_v10 = vadd.f32 %v3999_v51, %v4048_v48 }
 0x16a   : > { %v3008_v63 = vpop.f32.mrf.mxu1  ;;  %v3072_v0 = vpop.f32.mrf.mxu0 }
 0x16b   : > { %v3009_v9 = vadd.f32 %v3008_v63, %v3007_v52  ;;  %v3073_v28 = vadd.f32 %v3072_v0, %v3071_v55 }
 0x16c   : > { %v3010_v4 = vpop.f32.mrf.mxu1  ;;  %v3074_v7 = vpop.f32.mrf.mxu0 }
 0x16d   : > { %v4223_v8 = vadd.f32 %v3009_v9, %v1783_v59  ;;  %v4226_v18 = vadd.f32 %v3073_v28, %v4112_v24  ;;  %v1791_v24 = vadd.f32 %v4007_v61, %v4048_v48 }
 0x16e   : > { %v3011_v1 = vpop.f32.mrf.mxu1  ;;  %v3075_v14 = vpop.f32.mrf.mxu0 }
 0x16f   : > { %v3012_v22 = vadd.f32 %v3011_v1, %v3010_v4  ;;  %v3076_v16 = vadd.f32 %v3075_v14, %v3074_v7 }
 0x170   : > { %v3013_v17 = vpop.f32.mrf.mxu1  ;;  %v3077_v21 = vpop.f32.mrf.mxu0 }
 0x171   : > { %v4230_v23 = vadd.f32 %v3012_v22, %v1788_v10  ;;  %v4233_v50 = vadd.f32 %v3076_v16, %v4120_v12  ;;  %v1796_v12 = vadd.f32 %v4011_v3, %v4048_v48 }
 0x172   : > { %v3014_v44 = vpop.f32.mrf.mxu1  ;;  %v3078_v2 = vpop.f32.mrf.mxu0 }
 0x173   : > { %v3015_v33 = vadd.f32 %v3014_v44, %v3013_v17  ;;  %v3079_v31 = vadd.f32 %v3078_v2, %v3077_v21 }
 0x174   : > { %v3016_v32 = vpop.f32.mrf.mxu1  ;;  %v3080_v37 = vpop.f32.mrf.mxu0 }
 0x175   : > { %v4237_v39 = vadd.f32 %v3015_v33, %v1791_v24  ;;  %v4240_v51 = vadd.f32 %v3079_v31, %v4128_v53  ;;  %v1799_v53 = vadd.f32 %v4019_v13, %v4048_v48 }
 0x176   : > { %v3017_v43 = vpop.f32.mrf.mxu1  ;;  %v3081_v54 = vpop.f32.mrf.mxu0 }
 0x177   : > { %v3018_v46 = vadd.f32 %v3017_v43, %v3016_v32  ;;  %v3082_v62 = vadd.f32 %v3081_v54, %v3080_v37 }
 0x178   : > { %v3019_v49 = vpop.f32.mrf.mxu1  ;;  %v3083_v52 = vpop.f32.mrf.mxu0 }
 0x179   : > { %v4244_v55 = vadd.f32 %v3018_v46, %v1796_v12  ;;  %v4247_v61 = vadd.f32 %v3082_v62, %v4136_v5  ;;  %v1804_v5 = vadd.f32 %v4023_v19, %v4048_v48 }
 0x17a   : > { %v3020_v63 = vpop.f32.mrf.mxu1  ;;  %v3084_v0 = vpop.f32.mrf.mxu0 }
 0x17b   : > { %v3021_v59 = vadd.f32 %v3020_v63, %v3019_v49  ;;  %v3085_v9 = vadd.f32 %v3084_v0, %v3083_v52 }
 0x17c   : > { %v3022_v28 = vpop.f32.mrf.mxu1  ;;  %v3086_v4 = vpop.f32.mrf.mxu0 }
 0x17d   : > { %v4251_v7 = vadd.f32 %v3021_v59, %v1799_v53  ;;  %v4254_v3 = vadd.f32 %v3085_v9, %v4144_v34  ;;  %v1807_v34 = vadd.f32 %v4031_v29, %v4048_v48 }
 0x17e   : > { %v3023_v1 = vpop.f32.mrf.mxu1  ;;  %v3087_v14 = vpop.f32.mrf.mxu0 }
 0x17f   : > { %v3024_v10 = vadd.f32 %v3023_v1, %v3022_v28  ;;  %v3088_v22 = vadd.f32 %v3087_v14, %v3086_v4 }
 0x180   : > { %v3025_v16 = vpop.f32.mrf.mxu1  ;;  %v3089_v17 = vpop.f32.mrf.mxu0 }
 0x181   : > { %v4258_v21 = vadd.f32 %v3024_v10, %v1804_v5  ;;  %v4261_v13 = vadd.f32 %v3088_v22, %v4152_v36  ;;  %v1812_v36 = vadd.f32 %v4035_v35, %v4048_v48 }
 0x182   : > { %v3026_v44 = vpop.f32.mrf.mxu1  ;;  %v3090_v2 = vpop.f32.mrf.mxu0 }
 0x183   : > { %v3027_v24 = vadd.f32 %v3026_v44, %v3025_v16  ;;  %v3091_v33 = vadd.f32 %v3090_v2, %v3089_v17 }
 0x184   : > { %v3028_v31 = vpop.f32.mrf.mxu1  ;;  %v3092_v32 = vpop.f32.mrf.mxu0 }
 0x185   : > { %v4265_v37 = vadd.f32 %v3027_v24, %v1807_v34  ;;  %v4268_v19 = vadd.f32 %v3091_v33, %v4158_v38  ;;  %v1815_v38 = vadd.f32 %v4043_v45, %v4048_v48 }
 0x186   : > { %v3029_v43 = vpop.f32.mrf.mxu1  ;;  %v3093_v54 = vpop.f32.mrf.mxu0 }
 0x187   : > { %v3030_v12 = vadd.f32 %v3029_v43, %v3028_v31  ;;  %v3094_v46 = vadd.f32 %v3093_v54, %v3092_v32 }
 0x188   : > { %v3031_v62 = vpop.f32.mrf.mxu1  ;;  %v3095_v49 = vpop.f32.mrf.mxu0 }
 0x189   : > { %v4272_v52 = vadd.f32 %v3030_v12, %v1812_v36  ;;  %v4275_v29 = vadd.f32 %v3094_v46, %v4164_v56 }
 0x18a   : > { %v3032_v63 = vpop.f32.mrf.mxu1  ;;  %v3096_v0 = vpop.f32.mrf.mxu0 }
 0x18b   : > { %v3033_v53 = vadd.f32 %v3032_v63, %v3031_v62  ;;  %v3097_v59 = vadd.f32 %v3096_v0, %v3095_v49 }
 0x18c   : > { %v3098_v9 = vpop.f32.mrf.mxu0  ;;  %v4279_v28 = vpop.f32.mrf.mxu1 }
 0x18d   : > { %v4281_v35 = vadd.f32 %v3033_v53, %v1815_v38  ;;  %v4284_v4 = vadd.f32 %v3097_v59, %v4170_v60 }
 0x18e   : > { %v3099_v1 = vpop.f32.mrf.mxu0  ;;  %v4286_v14 = vpop.f32.mrf.mxu1 }
 0x18f   : > { %v3100_v56 = vadd.f32 %v3099_v1, %v3098_v9 }
 0x190   : > { %v3101_v5 = vpop.f32.mrf.mxu0  ;;  %v4288_v10 = vpop.f32.mrf.mxu1 }
 0x191   : > { %v4291_v22 = vadd.f32 %v3100_v56, %v4174_v30 }
 0x192   : > { %v3102_v45 = vpop.f32.mrf.mxu0  ;;  %v4293_v48 = vpop.f32.mrf.mxu1 }
 0x193   : > { %v3103_v16 = vadd.f32 %v3102_v45, %v3101_v5 }
 0x194   : > { %v3104_v17 = vpop.f32.mrf.mxu0  ;;  %v4295_v44 = vpop.f32.mrf.mxu1 }
 0x195   : > { %v4298_v60 = vadd.f32 %v3103_v16, %v4181_v42 }
 0x196   : > { %v3105_v2 = vpop.f32.mrf.mxu0  ;;  %v4300_v34 = vpop.f32.mrf.mxu1 }
 0x197   : > { %4535 = vst [vmem:[#allocation2_spill] sm:$0xff] %v4298_v60  ;;  %v3106_v24 = vadd.f32 %v3105_v2, %v3104_v17 }
 0x198   : > { %v3107_v33 = vpop.f32.mrf.mxu0  ;;  %v4302_v31 = vpop.f32.mrf.mxu1 }
 0x199   : > { %v4305_v30 = vadd.f32 %v3106_v24, %v4188_v58 }
 0x19a   : > { %v3108_v32 = vpop.f32.mrf.mxu0  ;;  %v4307_v43 = vpop.f32.mrf.mxu1 }
 0x19b   : > { %v3109_v54 = vadd.f32 %v3108_v32, %v3107_v33 }
 0x19c   : > { %v3110_v36 = vpop.f32.mrf.mxu0  ;;  %v4309_v12 = vpop.f32.mrf.mxu1 }
 0x19d   : > { %v4312_v42 = vadd.f32 %v3109_v54, %v4195_v11 }
 0x19e   : > { %v3111_v46 = vpop.f32.mrf.mxu0  ;;  %v4314_v62 = vpop.f32.mrf.mxu1 }
 0x19f   : > { %v3112_v49 = vadd.f32 %v3111_v46, %v3110_v36 }
 0x1a0   : > { %v3113_v63 = vpop.f32.mrf.mxu0  ;;  %v4316_v0 = vpop.f32.mrf.mxu1 }
 0x1a1   : > { %v4319_v58 = vadd.f32 %v3112_v49, %v4202_v25 }
 0x1a2   : > { %v3114_v38 = vpop.f32.mrf.mxu0  ;;  %v4321_v53 = vpop.f32.mrf.mxu1 }
 0x1a3   : > { %4536 = vst [vmem:[#allocation3_spill] sm:$0xff] %v4319_v58  ;;  %v3115_v59 = vadd.f32 %v3114_v38, %v3113_v63 }
 0x1a4   : > { %v3116_v9 = vpop.f32.mrf.mxu0  ;;  %v4323_v1 = vpop.f32.mrf.mxu1 }
 0x1a5   : > { %v4326_v11 = vadd.f32 %v3115_v59, %v4209_v40 }
 0x1a6   : > { %v3117_v56 = vpop.f32.mrf.mxu0  ;;  %v4328_v5 = vpop.f32.mrf.mxu1 }
 0x1a7   : > { %4537 = vst [vmem:[#allocation4_spill] sm:$0xff] %v4326_v11  ;;  %v3118_v45 = vadd.f32 %v3117_v56, %v3116_v9 }
 0x1a8   : > { %v3119_v16 = vpop.f32.mrf.mxu0  ;;  %v4330_v17 = vpop.f32.mrf.mxu1 }
 0x1a9   : > { %v4333_v25 = vadd.f32 %v3118_v45, %v4216_v6 }
 0x1aa   : > { %v3120_v2 = vpop.f32.mrf.mxu0  ;;  %v4335_v24 = vpop.f32.mrf.mxu1 }
 0x1ab   : > { %4538 = vst [vmem:[#allocation5_spill] sm:$0xff] %v4333_v25  ;;  %v3121_v33 = vadd.f32 %v3120_v2, %v3119_v16 }
 0x1ac   : > { %v3122_v32 = vpop.f32.mrf.mxu0  ;;  %v4337_v54 = vpop.f32.mrf.mxu1 }
 0x1ad   : > { %v4340_v40 = vadd.f32 %v3121_v33, %v4223_v8 }
 0x1ae   : > { %v3123_v36 = vpop.f32.mrf.mxu0  ;;  %v4342_v46 = vpop.f32.mrf.mxu1 }
 0x1af   : > { %4539 = vst [vmem:[#allocation6_spill] sm:$0xff] %v4340_v40  ;;  %v3124_v49 = vadd.f32 %v3123_v36, %v3122_v32 }
 0x1b0   : > { %v3125_v63 = vpop.f32.mrf.mxu0  ;;  %v4344_v38 = vpop.f32.mrf.mxu1 }
 0x1b1   : > { %v4347_v6 = vadd.f32 %v3124_v49, %v4230_v23 }
 0x1b2   : > { %v3126_v59 = vpop.f32.mrf.mxu0  ;;  %v4349_v9 = vpop.f32.mrf.mxu1 }
 0x1b3   : > { %4540 = vst [vmem:[#allocation7_spill] sm:$0xff] %v4347_v6  ;;  %v3127_v56 = vadd.f32 %v3126_v59, %v3125_v63 }
 0x1b4   : > { %v3128_v45 = vpop.f32.mrf.mxu0  ;;  %v4351_v16 = vpop.f32.mrf.mxu1 }
 0x1b5   : > { %v4354_v8 = vadd.f32 %v3127_v56, %v4237_v39 }
 0x1b6   : > { %v3129_v2 = vpop.f32.mrf.mxu0  ;;  %v4356_v33 = vpop.f32.mrf.mxu1 }
 0x1b7   : > { %4541 = vst [vmem:[#allocation8_spill] sm:$0xff] %v4354_v8  ;;  %v3130_v32 = vadd.f32 %v3129_v2, %v3128_v45 }
 0x1b8   : > { %v3131_v36 = vpop.f32.mrf.mxu0  ;;  %v4358_v11 = vpop.f32.mrf.mxu1 }
 0x1b9   : > { %v4361_v23 = vadd.f32 %v3130_v32, %v4244_v55 }
 0x1ba   : > { %v3132_v49 = vpop.f32.mrf.mxu0  ;;  %v4363_v6 = vpop.f32.mrf.mxu1 }
 0x1bb   : > { %4542 = vst [vmem:[#allocation9_spill] sm:$0xff] %v4361_v23  ;;  %v3133_v63 = vadd.f32 %v3132_v49, %v3131_v36 }
 0x1bc   : > { %v3134_v59 = vpop.f32.mrf.mxu0  ;;  %v4365_v40 = vpop.f32.mrf.mxu1 }
 0x1bd   : > { %v4368_v39 = vadd.f32 %v3133_v63, %v4251_v7 }
 0x1be   : > { %v3135_v56 = vpop.f32.mrf.mxu0  ;;  %v4370_v8 = vpop.f32.mrf.mxu1 }
 0x1bf   : > { %4543 = vst [vmem:[#allocation10_spill] sm:$0xff] %v4368_v39  ;;  %v3136_v45 = vadd.f32 %v3135_v56, %v3134_v59  ;;  %v3170_v59 = vadd.f32 %v4300_v34, %v4295_v44 }
 0x1c0   : > { %v3137_v2 = vpop.f32.mrf.mxu0  ;;  %v4372_v58 = vpop.f32.mrf.mxu1 }
 0x1c1   : > { %v4375_v55 = vadd.f32 %v3136_v45, %v4258_v21  ;;  %v2183_v44 = vadd.f32 %v3170_v59, %v4191_v47  ;;  %v3176_v59 = vadd.f32 %v4314_v62, %v4309_v12  ;;  %v3179_v62 = vadd.f32 %v4321_v53, %v4316_v0 }
 0x1c2   : > { %v3138_v32 = vpop.f32.mrf.mxu0  ;;  %v4377_v23 = vpop.f32.mrf.mxu1  ;;  %v3188_v0 = vadd.f32 %v4342_v46, %v4337_v54  ;;  %v3191_v54 = vadd.f32 %v4349_v9, %v4344_v38  ;;  %v3200_v9 = vadd.f32 %v4370_v8, %v4365_v40 }
 0x1c3   : > { %4544 = vst [vmem:[#allocation11_spill] sm:$0xff] %v4375_v55  ;;  %v3139_v36 = vadd.f32 %v3138_v32, %v3137_v2  ;;  %v3164_v2 = vadd.f32 %v4286_v14, %v4279_v28  ;;  %v3203_v40 = vadd.f32 %v4377_v23, %v4372_v58 }
 0x1c4   : > { %v3140_v49 = vpop.f32.mrf.mxu0  ;;  %v4379_v25 = vpop.f32.mrf.mxu1 }
 0x1c5   : > { %v4382_v7 = vadd.f32 %v3139_v36, %v4265_v37  ;;  %v3173_v37 = vadd.f32 %v4307_v43, %v4302_v31  ;;  %v2175_v14 = vadd.f32 %v3164_v2, %v4177_v20  ;;  %v3182_v43 = vadd.f32 %v4328_v5, %v4323_v1 }
 0x1c6   : > { %v3141_v63 = vpop.f32.mrf.mxu0  ;;  %v4384_v39 = vpop.f32.mrf.mxu1  ;;  %v3185_v1 = vadd.f32 %v4335_v24, %v4330_v17  ;;  %v3194_v17 = vadd.f32 %v4356_v33, %v4351_v16  ;;  %v3197_v16 = vadd.f32 %v4363_v6, %v4358_v11 }
 0x1c7   : > { %v3142_v56 = vadd.f32 %v3141_v63, %v3140_v49  ;;  %v3167_v63 = vadd.f32 %v4293_v48, %v4288_v10  ;;  %v3206_v6 = vadd.f32 %v4384_v39, %v4379_v25 }
 0x1c8   : > { %v3143_v21 = vpop.f32.mrf.mxu0  ;;  %v4388_v45 = vpop.f32.mrf.mxu1 }
 0x1c9   : > { %v4393_v32 = vadd.f32 %v3142_v56, %v4272_v52  ;;  %v2178_v2 = vadd.f32 %v3167_v63, %v4184_v27 }
 0x1ca   : > { %v3144_v55 = vpop.f32.mrf.mxu0  ;;  %v4395_v60 = vpop.f32.mrf.mxu1 }
 0x1cb   : > { %v3145_v36 = vadd.f32 %v3144_v55, %v3143_v21  ;;  %v3209_v39 = vadd.f32 %v4395_v60, %v4388_v45 }
 0x1cc   : > { %v4401_v34 = vpop.f32.mrf.mxu1  ;;  %v3300_v49 = vpop.f32.mrf.mxu0 }
 0x1cd   : > { %v4406_v28 = vadd.f32 %v3145_v36, %v4281_v35  ;;  %v2344_v52 = vadd.f32 %v3300_v49, %v2183_v44  ;;  %v2186_v35 = vadd.f32 %v3173_v37, %v4198_v57  ;;  %v2199_v37 = vadd.f32 %v3182_v43, %v4219_v41 }
 0x1ce   : > { %v4414_v31 = vpop.f32.mrf.mxu1  ;;  %v2335_v47 = vpop.f32.mrf.mxu0  ;;  %v2202_v43 = vadd.f32 %v3185_v1, %v4226_v18 }
 0x1cf   : > { %v2464_v10 = vmax.f32 %v2344_v52, 0.0  ;;  %v2336_v48 = vadd.f32 %v2335_v47, %v2175_v14  ;;  %v2191_v52 = vadd.f32 %v3176_v59, %v4205_v15  ;;  %v3212_v58 = vadd.f32 %v4414_v31, %v4401_v34 }
 0x1d0   : > { %v4419_v55 = vpop.f32.mrf.mxu1  ;;  %v3301_v20 = vpop.f32.mrf.mxu0 }
 0x1d1   : > { %2496 = vst [vmem:[%s4412_s22 + $0x10] sm:$0xff] %v2464_v10  ;;  %v2462_v56 = vmax.f32 %v2336_v48, 0.0  ;;  %v2347_v21 = vadd.f32 %v3301_v20, %v2186_v35  ;;  %v2194_v35 = vadd.f32 %v3179_v62, %v4212_v26  ;;  %v2210_v62 = vadd.f32 %v3191_v54, %v4240_v51 }
 0x1d2   : > { %v4425_v36 = vpop.f32.mrf.mxu1  ;;  %v2338_v44 = vpop.f32.mrf.mxu0 }
 0x1d3   : > { %2494 = vst [vmem:[%s4412_s22] sm:$0xff] %v2462_v56  ;;  %v2465_v57 = vmax.f32 %v2347_v21, 0.0  ;;  %v2339_v5 = vadd.f32 %v2338_v44, %v2178_v2  ;;  %v2215_v56 = vadd.f32 %v3194_v17, %v4247_v61  ;;  %v2207_v44 = vadd.f32 %v3188_v0, %v4233_v50 }
 0x1d4   : > { %v4431_v49 = vpop.f32.mrf.mxu1  ;;  %v3304_v12 = vpop.f32.mrf.mxu0  ;;  %v3215_v34 = vadd.f32 %v4425_v36, %v4419_v55 }
 0x1d5   : > { %2497 = vst [vmem:[%s4412_s22 + $0x18] sm:$0xff] %v2465_v57  ;;  %v2463_v27 = vmax.f32 %v2339_v5, 0.0  ;;  %v2360_v63 = vadd.f32 %v3304_v12, %v2199_v37  ;;  %v2218_v5 = vadd.f32 %v3197_v16, %v4254_v3 }
 0x1d6   : > { %v3217_v14 = vpop.f32.mrf.mxu1  ;;  %v2351_v47 = vpop.f32.mrf.mxu0 }
 0x1d7   : > { %2495 = vst [vmem:[%s4412_s22 + $0x8] sm:$0xff] %v2463_v27  ;;  %v2468_v41 = vmax.f32 %v2360_v63, 0.0  ;;  %v2352_v24 = vadd.f32 %v2351_v47, %v2191_v52  ;;  %v2231_v52 = vadd.f32 %v3206_v6, %v4275_v29  ;;  %v3218_v60 = vadd.f32 %v3217_v14, %v4431_v49  ;;  %v4545_v6 = vld [vmem:[#allocation2_spill] sm:$0xff] }
 0x1d8   : > { %v4441_v10 = vpop.f32.mrf.mxu1  ;;  %v3305_v48 = vpop.f32.mrf.mxu0  ;;  %v2234_v29 = vadd.f32 %v3209_v39, %v4284_v4  ;;  %v4547_v39 = vld [vmem:[#allocation3_spill] sm:$0xff] }
 0x1d9   : > { %2500 = vst [vmem:[%s4412_s22 + $0x30] sm:$0xff] %v2468_v41  ;;  %v2466_v15 = vmax.f32 %v2352_v24, 0.0  ;;  %v2363_v53 = vadd.f32 %v3305_v48, %v2202_v43  ;;  %v2223_v41 = vadd.f32 %v3200_v9, %v4261_v13  ;;  %v2226_v13 = vadd.f32 %v3203_v40, %v4268_v19 }
 0x1da   : > { %v3220_v20 = vpop.f32.mrf.mxu1  ;;  %v2354_v59 = vpop.f32.mrf.mxu0  ;;  %v2247_v4 = vadd.f32 %v3218_v60, %v4305_v30  ;;  %v2239_v19 = vadd.f32 %v3212_v58, %v4291_v22  ;;  %v2242_v22 = vadd.f32 %v3215_v34, %v4545_v6  ;;  %v4549_v60 = vld [vmem:[#allocation4_spill] sm:$0xff] }
 0x1db   : > { %2498 = vst [vmem:[%s4412_s22 + $0x20] sm:$0xff] %v2466_v15  ;;  %v2469_v18 = vmax.f32 %v2363_v53, 0.0  ;;  %v2355_v33 = vadd.f32 %v2354_v59, %v2194_v35  ;;  %v3221_v49 = vadd.f32 %v3220_v20, %v4441_v10 }
 0x1dc   : > { %v4451_v21 = vpop.f32.mrf.mxu1  ;;  %v3308_v2 = vpop.f32.mrf.mxu0 }
 0x1dd   : > { %2501 = vst [vmem:[%s4412_s22 + $0x38] sm:$0xff] %v2469_v18  ;;  %v2467_v26 = vmax.f32 %v2355_v33, 0.0  ;;  %v2376_v46 = vadd.f32 %v3308_v2, %v2215_v56  ;;  %v2250_v30 = vadd.f32 %v3221_v49, %v4312_v42 }
 0x1de   : > { %v4457_v1 = vpop.f32.mrf.mxu1  ;;  %v2367_v11 = vpop.f32.mrf.mxu0 }
 0x1df   : > { %2499 = vst [vmem:[%s4412_s22 + $0x28] sm:$0xff] %v2467_v26  ;;  %v2472_v61 = vmax.f32 %v2376_v46, 0.0  ;;  %v2368_v57 = vadd.f32 %v2367_v11, %v2207_v44  ;;  %v3224_v55 = vadd.f32 %v4457_v1, %v4451_v21 }
 0x1e0   : > { %v4463_v37 = vpop.f32.mrf.mxu1  ;;  %v3309_v38 = vpop.f32.mrf.mxu0 }
 0x1e1   : > { %2504 = vst [vmem:[%s4412_s22 + $0x50] sm:$0xff] %v2472_v61  ;;  %v2470_v50 = vmax.f32 %v2368_v57, 0.0  ;;  %v2379_v12 = vadd.f32 %v3309_v38, %v2218_v5 }
 0x1e2   : > { %v4469_v27 = vpop.f32.mrf.mxu1  ;;  %v2370_v25 = vpop.f32.mrf.mxu0 }
 0x1e3   : > { %2502 = vst [vmem:[%s4412_s22 + $0x40] sm:$0xff] %v2470_v50  ;;  %v2473_v3 = vmax.f32 %v2379_v12, 0.0  ;;  %v2371_v63 = vadd.f32 %v2370_v25, %v2210_v62  ;;  %v4546_v50 = vld [vmem:[#allocation5_spill] sm:$0xff]  ;;  %v3227_v21 = vadd.f32 %v4469_v27, %v4463_v37 }
 0x1e4   : > { %v3228_v47 = vpop.f32.mrf.mxu1  ;;  %v3312_v17 = vpop.f32.mrf.mxu0 }
 0x1e5   : > { %2505 = vst [vmem:[%s4412_s22 + $0x58] sm:$0xff] %v2473_v3  ;;  %v2471_v51 = vmax.f32 %v2371_v63, 0.0  ;;  %v2392_v8 = vadd.f32 %v3312_v17, %v2231_v52  ;;  %v2255_v3 = vadd.f32 %v3224_v55, %v4547_v39 }
 0x1e6   : > { %v3229_v24 = vpop.f32.mrf.mxu1  ;;  %v2383_v43 = vpop.f32.mrf.mxu0 }
 0x1e7   : > { %2503 = vst [vmem:[%s4412_s22 + $0x48] sm:$0xff] %v2471_v51  ;;  %v2476_v45 = vmax.f32 %v2392_v8, 0.0  ;;  %v2384_v48 = vadd.f32 %v2383_v43, %v2223_v41  ;;  %v3230_v10 = vadd.f32 %v3229_v24, %v3228_v47  ;;  %v4548_v51 = vld [vmem:[#allocation6_spill] sm:$0xff] }
 0x1e8   : > { %v3231_v0 = vpop.f32.mrf.mxu1  ;;  %v3313_v15 = vpop.f32.mrf.mxu0 }
 0x1e9   : > { %2508 = vst [vmem:[%s4412_s22 + $0x70] sm:$0xff] %v2476_v45  ;;  %v2474_v23 = vmax.f32 %v2384_v48, 0.0  ;;  %v2395_v53 = vadd.f32 %v3313_v15, %v2234_v29  ;;  %v2263_v42 = vadd.f32 %v3230_v10, %v4546_v50  ;;  %v2258_v45 = vadd.f32 %v3227_v21, %v4549_v60 }
 0x1ea   : > { %v3232_v35 = vpop.f32.mrf.mxu1  ;;  %v2386_v59 = vpop.f32.mrf.mxu0 }
 0x1eb   : > { %2506 = vst [vmem:[%s4412_s22 + $0x60] sm:$0xff] %v2474_v23  ;;  %v2477_v14 = vmax.f32 %v2395_v53, 0.0  ;;  %v2387_v16 = vadd.f32 %v2386_v59, %v2226_v13  ;;  %v3233_v5 = vadd.f32 %v3232_v35, %v3231_v0  ;;  %v4550_v23 = vld [vmem:[#allocation9_spill] sm:$0xff] }
 0x1ec   : > { %v3234_v18 = vpop.f32.mrf.mxu1  ;;  %v3316_v33 = vpop.f32.mrf.mxu0 }
 0x1ed   : > { %2509 = vst [vmem:[%s4412_s22 + $0x78] sm:$0xff] %v2477_v14  ;;  %v2475_v31 = vmax.f32 %v2387_v16, 0.0  ;;  %v2408_v56 = vadd.f32 %v3316_v33, %v2247_v4  ;;  %v2266_v8 = vadd.f32 %v3233_v5, %v4548_v51  ;;  %v4551_v16 = vld [vmem:[#allocation7_spill] sm:$0xff] }
 0x1ee   : > { %v3235_v2 = vpop.f32.mrf.mxu1  ;;  %v2399_v54 = vpop.f32.mrf.mxu0  ;;  %v4554_v5 = vld [vmem:[#allocation11_spill] sm:$0xff] }
 0x1ef   : > { %2507 = vst [vmem:[%s4412_s22 + $0x68] sm:$0xff] %v2475_v31  ;;  %v2480_v20 = vmax.f32 %v2408_v56, 0.0  ;;  %v2400_v26 = vadd.f32 %v2399_v54, %v2239_v19  ;;  %v3236_v43 = vadd.f32 %v3235_v2, %v3234_v18  ;;  %v4552_v56 = vld [vmem:[#allocation10_spill] sm:$0xff] }
 0x1f0   : > { %v3237_v46 = vpop.f32.mrf.mxu1  ;;  %v3317_v44 = vpop.f32.mrf.mxu0 }
 0x1f1   : > { %2512 = vst [vmem:[%s4412_s22 + $0x90] sm:$0xff] %v2480_v20  ;;  %v2478_v36 = vmax.f32 %v2400_v26, 0.0  ;;  %v2411_v11 = vadd.f32 %v3317_v44, %v2250_v30  ;;  %v2271_v4 = vadd.f32 %v3236_v43, %v4551_v16  ;;  %v4553_v30 = vld [vmem:[#allocation8_spill] sm:$0xff] }
 0x1f2   : > { %v3238_v61 = vpop.f32.mrf.mxu1  ;;  %v2402_v57 = vpop.f32.mrf.mxu0 }
 0x1f3   : > { %2510 = vst [vmem:[%s4412_s22 + $0x80] sm:$0xff] %v2478_v36  ;;  %v2481_v38 = vmax.f32 %v2411_v11, 0.0  ;;  %v2403_v9 = vadd.f32 %v2402_v57, %v2242_v22  ;;  %v3239_v59 = vadd.f32 %v3238_v61, %v3237_v46 }
 0x1f4   : > { %v3240_v12 = vpop.f32.mrf.mxu1  ;;  %v3320_v62 = vpop.f32.mrf.mxu0 }
 0x1f5   : > { %2513 = vst [vmem:[%s4412_s22 + $0x98] sm:$0xff] %v2481_v38  ;;  %v2479_v1 = vmax.f32 %v2403_v9, 0.0  ;;  %v2424_v25 = vadd.f32 %v3320_v62, %v2263_v42  ;;  %v2274_v46 = vadd.f32 %v3239_v59, %v4553_v30 }
 0x1f6   : > { %v3241_v63 = vpop.f32.mrf.mxu1  ;;  %v2415_v52 = vpop.f32.mrf.mxu0 }
 0x1f7   : > { %2511 = vst [vmem:[%s4412_s22 + $0x88] sm:$0xff] %v2479_v1  ;;  %v2484_v47 = vmax.f32 %v2424_v25, 0.0  ;;  %v3242_v17 = vadd.f32 %v3241_v63, %v3240_v12  ;;  %v2416_v40 = vadd.f32 %v2415_v52, %v2255_v3 }
 0x1f8   : > { %v3243_v41 = vpop.f32.mrf.mxu1  ;;  %v3321_v24 = vpop.f32.mrf.mxu0 }
 0x1f9   : > { %2516 = vst [vmem:[%s4412_s22 + $0xb0] sm:$0xff] %v2484_v47  ;;  %v2482_v37 = vmax.f32 %v2416_v40, 0.0  ;;  %v2427_v27 = vadd.f32 %v3321_v24, %v2266_v8  ;;  %v2279_v53 = vadd.f32 %v3242_v17, %v4550_v23 }
 0x1fa   : > { %v3244_v48 = vpop.f32.mrf.mxu1  ;;  %v2418_v29 = vpop.f32.mrf.mxu0 }
 0x1fb   : > { %2514 = vst [vmem:[%s4412_s22 + $0xa0] sm:$0xff] %v2482_v37  ;;  %v2485_v0 = vmax.f32 %v2427_v27, 0.0  ;;  %v3245_v15 = vadd.f32 %v3244_v48, %v3243_v41  ;;  %v2419_v58 = vadd.f32 %v2418_v29, %v2258_v45 }
 0x1fc   : > { %v3246_v13 = vpop.f32.mrf.mxu1  ;;  %v3324_v35 = vpop.f32.mrf.mxu0 }
 0x1fd   : > { %2517 = vst [vmem:[%s4412_s22 + $0xb8] sm:$0xff] %v2485_v0  ;;  %v2483_v49 = vmax.f32 %v2419_v58, 0.0  ;;  %v2440_v14 = vadd.f32 %v3324_v35, %v2279_v53  ;;  %v2282_v19 = vadd.f32 %v3245_v15, %v4552_v56 }
 0x1fe   : > { %v3247_v18 = vpop.f32.mrf.mxu1  ;;  %v2431_v33 = vpop.f32.mrf.mxu0 }
 0x1ff   : > { %2515 = vst [vmem:[%s4412_s22 + $0xa8] sm:$0xff] %v2483_v49  ;;  %v2488_v34 = vmax.f32 %v2440_v14, 0.0  ;;  %v2432_v31 = vadd.f32 %v2431_v33, %v2271_v4  ;;  %v3248_v10 = vadd.f32 %v3247_v18, %v3246_v13 }
 0x200   : > { %v3249_v2 = vpop.f32.mrf.mxu1  ;;  %v3325_v54 = vpop.f32.mrf.mxu0 }
 0x201   : > { %2520 = vst [vmem:[%s4412_s22 + $0xd0] sm:$0xff] %v2488_v34  ;;  %v2486_v20 = vmax.f32 %v2432_v31, 0.0  ;;  %v2443_v26 = vadd.f32 %v3325_v54, %v2282_v19  ;;  %v2287_v38 = vadd.f32 %v3248_v10, %v4554_v5 }
 0x202   : > { %v3250_v44 = vpop.f32.mrf.mxu1  ;;  %v2434_v55 = vpop.f32.mrf.mxu0 }
 0x203   : > { %2518 = vst [vmem:[%s4412_s22 + $0xc0] sm:$0xff] %v2486_v20  ;;  %v2489_v36 = vmax.f32 %v2443_v26, 0.0  ;;  %v2435_v11 = vadd.f32 %v2434_v55, %v2274_v46  ;;  %v3251_v61 = vadd.f32 %v3250_v44, %v3249_v2 }
 0x204   : > { %v3252_v6 = vpop.f32.mrf.mxu1  ;;  %v3328_v22 = vpop.f32.mrf.mxu0 }
 0x205   : > { %2521 = vst [vmem:[%s4412_s22 + $0xd8] sm:$0xff] %v2489_v36  ;;  %v2487_v57 = vmax.f32 %v2435_v11, 0.0  ;;  %v2290_v39 = vadd.f32 %v3251_v61, %v4382_v7 }
 0x206   : > { %v3253_v9 = vpop.f32.mrf.mxu1  ;;  %v2447_v50 = vpop.f32.mrf.mxu0 }
 0x207   : > { %2519 = vst [vmem:[%s4412_s22 + $0xc8] sm:$0xff] %v2487_v57  ;;  %v3254_v42 = vadd.f32 %v3253_v9, %v3252_v6  ;;  %v2448_v12 = vadd.f32 %v2447_v50, %v2287_v38 }
 0x208   : > { %v3255_v62 = vpop.f32.mrf.mxu1  ;;  %v3329_v21 = vpop.f32.mrf.mxu0 }
 0x209   : > { %v2295_v1 = vadd.f32 %v3254_v42, %v4393_v32  ;;  %v2490_v25 = vmax.f32 %v2448_v12, 0.0 }
 0x20a   : > { %v3256_v3 = vpop.f32.mrf.mxu1  ;;  %v2450_v63 = vpop.f32.mrf.mxu0 }
 0x20b   : > { %v2456_v52 = vadd.f32 %v3328_v22, %v2295_v1  ;;  %2522 = vst [vmem:[%s4412_s22 + $0xe0] sm:$0xff] %v2490_v25  ;;  %v3257_v47 = vadd.f32 %v3256_v3, %v3255_v62  ;;  %v2451_v17 = vadd.f32 %v2450_v63, %v2290_v39 }
 0x20d   : > { %v2492_v40 = vmax.f32 %v2456_v52, 0.0  ;;  %v2298_v51 = vadd.f32 %v3257_v47, %v4406_v28  ;;  %v2491_v8 = vmax.f32 %v2451_v17, 0.0 }
 0x20f   : > { %2524 = vst [vmem:[%s4412_s22 + $0xf0] sm:$0xff] %v2492_v40  ;;  %v2459_v41 = vadd.f32 %v3329_v21, %v2298_v51  ;;  %2523 = vst [vmem:[%s4412_s22 + $0xe8] sm:$0xff] %v2491_v8 }
 0x211   : > { %v2493_v24 = vmax.f32 %v2459_v41, 0.0 }
 0x213   : > { %2525 = vst [vmem:[%s4412_s22 + $0xf8] sm:$0xff] %v2493_v24 }
 0x214 PF: > { %s13_s12 = sadd.s32 1, %s3641_s12  }
 0x215   : > { %p10_p4 = scmp.ge.s32.totalorder %s13_s12, 4  }
 0x217   :  { %12 = sbr.rel (!%p10_p4) target bundleno = 1 (0x1), region = 62 }

// kernel: resnet_forward.12
= control target key start
LH: loop header
LB: loop body
LE: loop exit
PB: predicated region body
PF: predicated region fallthrough
CT: control target
= control target key end

     0   :  { %s3795_s15 = smov 0   ;;  %s4706_s0 = inlined_call_operand.vmem [shape: bf16[512,1152], index: 0, kind: input, shape index: {}]   ;;  %s4707_s1 = inlined_call_operand.vmem [shape: bf16[1152,128], index: 1, kind: input, shape index: {}]   ;;  %s4708_s2 = inlined_call_operand.vmem [shape: f32[1,128], index: 2, kind: input, shape index: {}]   ;;  %s4709_s3 = inlined_call_operand.vmem [shape: f32[512,128], index: 3, kind: input, shape index: {}]   ;;  %s4710_s4 = inlined_call_operand.vmem [shape: f32[512,128], index: 4, kind: output, shape index: {}]  }
   0x1 LB: > { %s2707_s16 = sadd.s32 4294967295, %s3768_s15   ;;  %p2711_p0 = scmp.ge.s32.totalorder %s3768_s15, 1  ;;  %s3768_s15 = sphi %s3795_s15, %s14_s15  }
   0x2   : > { %p175_p1 = scmp.lt.s32.totalorder %s3768_s15, 3 }
   0x4   : > { %p176_p2 = pnand %p2711_p0, %p175_p1 }
   0x6   : > { %179 = sbr.rel (%p176_p2) target bundleno = 534 (0x216), region = 36 }
   0xb   : > { %v3482_v0 = vld [vmem:[%s4707_s1 + $0x78] sm:$0xff]   ;;  %s2712_s19 = sshll.u32 %s2707_s16, 5  ;;  %v3484_v2 = vld [vmem:[%s4707_s1 + $0x70] sm:$0xff]   ;;  %v3486_v4 = vld [vmem:[%s4707_s1 + $0x68] sm:$0xff]  }
   0xc   : > { %v3483_v1 = vld [vmem:[%s4707_s1 + $0x38] sm:$0xff]   ;;  %2937 = vmatprep.subr.bf16.mxu0 %v3482_v0  ;;  %3457 = vmatprep.subr.bf16.mxu1 %v3482_v0  ;;  %p208_p3 = scmp.lt.s32.totalorder %s2712_s19, 63  ;;  %v3485_v3 = vld [vmem:[%s4707_s1 + $0x30] sm:$0xff]   ;;  %v3487_v5 = vld [vmem:[%s4707_s1 + $0x28] sm:$0xff]  }
   0xd   : > { %2938 = vmatpush3.bf16.msra.mxu0 %v3483_v1  ;;  %3465 = vmatpush3.bf16.msra.mxu1 %v3483_v1  ;;  %v3488_v6 = vld [vmem:[%s4707_s1 + $0x60] sm:$0xff]   ;;  %v3490_v8 = vld [vmem:[%s4707_s1 + $0x58] sm:$0xff]   ;;  %v3492_v10 = vld [vmem:[%s4707_s1 + $0x50] sm:$0xff]  }
   0xe   : > { %2939 = vmatprep.subr.bf16.mxu0 %v3484_v2  ;;  %3458 = vmatprep.subr.bf16.mxu1 %v3484_v2  ;;  %s4734_s19 = smov (!%p208_p3, %s2712_s19), 63  ;;  %v3489_v7 = vld [vmem:[%s4707_s1 + $0x20] sm:$0xff]   ;;  %v3491_v9 = vld [vmem:[%s4707_s1 + $0x18] sm:$0xff]   ;;  %v3493_v13 = vld [vmem:[%s4707_s1 + $0x10] sm:$0xff]  }
   0xf   : > { %s3473_s6 = smul.u32 36, %s4734_s19  ;;  %v3494_v14 = vld [vmem:[%s4707_s1 + $0x48] sm:$0xff]   ;;  %v3496_v16 = vld [vmem:[%s4707_s1 + $0x40] sm:$0xff]   ;;  %v3504_v18 = vld [vmem:[%s4707_s1 + $0xf8] sm:$0xff]  }
  0x10   : > { %v3495_v15 = vld [vmem:[%s4707_s1 + $0x8] sm:$0xff]   ;;  %v3497_v17 = vld [vmem:[%s4707_s1] sm:$0xff]   ;;  %v3507_v21 = vld [vmem:[%s4707_s1 + $0x178] sm:$0xff]  }
  0x11   : > { %2940 = vmatpush3.bf16.msra.mxu0 %v3485_v3  ;;  %3466 = vmatpush3.bf16.msra.mxu1 %v3485_v3  ;;  %s3836_s13 = scalar_lea.vmem %s4706_s0, %s3473_s6  ;;  %v3505_v22 = vld [vmem:[%s4707_s1 + $0xb8] sm:$0xff]   ;;  %v3506_v23 = vld [vmem:[%s4707_s1 + $0xf0] sm:$0xff]   ;;  %v3516_v31 = vld [vmem:[%s4707_s1 + $0xe8] sm:$0xff]  }
  0x12   : > { %2941 = vmatprep.subr.bf16.mxu0 %v3486_v4  ;;  %3459 = vmatprep.subr.bf16.mxu1 %v3486_v4  ;;  %v3500_v11 = vld [vmem:[%s3836_s13 + $0x4] ss:$36 sps:$4 sm:$0xff]   ;;  %v3509_v24 = vld [vmem:[%s4707_s1 + $0x138] sm:$0xff]   ;;  %v3510_v25 = vld [vmem:[%s3836_s13 + $0x4c] ss:$36 sps:$4 sm:$0xff]  }
  0x13   : > { %v3503_v12 = vld [vmem:[%s3836_s13 + $0x364] ss:$36 sps:$4 sm:$0xff]   ;;  %1738 = vmatprep.mubr.bf16.mxu0 %v3500_v11  ;;  %v3512_v26 = vld [vmem:[%s3836_s13 + $0x3ac] ss:$36 sps:$4 sm:$0xff]   ;;  %v3520_v35 = vld [vmem:[%s3836_s13 + $0x94] ss:$36 sps:$4 sm:$0xff]  }
  0x14   : > { %1834 = vmatprep.mubr.bf16.mxu1 %v3503_v12  ;;  %v3498_v19 = vld [vmem:[%s3836_s13] ss:$36 sps:$4 sm:$0xff]   ;;  %v3508_v27 = vld [vmem:[%s4707_s1 + $0xb0] sm:$0xff]   ;;  %v3514_v29 = vld [vmem:[%s3836_s13 + $0x48] ss:$36 sps:$4 sm:$0xff]  }
  0x15   : > { %2942 = vmatpush3.bf16.msra.mxu0 %v3487_v5  ;;  %3467 = vmatpush3.bf16.msra.mxu1 %v3487_v5  ;;  %v3501_v20 = vld [vmem:[%s3836_s13 + $0x360] ss:$36 sps:$4 sm:$0xff]   ;;  %v3527_v28 = vld [vmem:[%s4707_s1 + $0x170] sm:$0xff]   ;;  %v3515_v30 = vld [vmem:[%s3836_s13 + $0x3a8] ss:$36 sps:$4 sm:$0xff]  }
  0x16   : > { %2943 = vmatprep.subr.bf16.mxu0 %v3488_v6  ;;  %3460 = vmatprep.subr.bf16.mxu1 %v3488_v6  ;;  %v3517_v32 = vld [vmem:[%s4707_s1 + $0xa8] sm:$0xff]   ;;  %v3529_v33 = vld [vmem:[%s4707_s1 + $0x130] sm:$0xff]   ;;  %v3518_v34 = vld [vmem:[%s4707_s1 + $0xe0] sm:$0xff]  }
  0x17   : > { %v3522_v36 = vld [vmem:[%s3836_s13 + $0x3f4] ss:$36 sps:$4 sm:$0xff]   ;;  %v3519_v37 = vld [vmem:[%s4707_s1 + $0xa0] sm:$0xff]   ;;  %v3541_v43 = vld [vmem:[%s4707_s1 + $0x168] sm:$0xff]  }
  0x18   : > { %v3524_v38 = vld [vmem:[%s3836_s13 + $0x90] ss:$36 sps:$4 sm:$0xff]   ;;  %v3526_v40 = vld [vmem:[%s4707_s1 + $0xd8] sm:$0xff]   ;;  %v3543_v46 = vld [vmem:[%s4707_s1 + $0x128] sm:$0xff]  }
  0x19   : > { %2944 = vmatpush3.bf16.msra.mxu0 %v3489_v7  ;;  %3468 = vmatpush3.bf16.msra.mxu1 %v3489_v7  ;;  %v3525_v39 = vld [vmem:[%s3836_s13 + $0x3f0] ss:$36 sps:$4 sm:$0xff]   ;;  %v3528_v41 = vld [vmem:[%s4707_s1 + $0x98] sm:$0xff]   ;;  %v3538_v48 = vld [vmem:[%s4707_s1 + $0xc8] sm:$0xff]  }
  0x1a   : > { %2945 = vmatprep.subr.bf16.mxu0 %v3490_v8  ;;  %3461 = vmatprep.subr.bf16.mxu1 %v3490_v8  ;;  %v3530_v42 = vld [vmem:[%s4707_s1 + $0xd0] sm:$0xff]   ;;  %v3532_v44 = vld [vmem:[%s3836_s13 + $0xdc] ss:$36 sps:$4 sm:$0xff]   ;;  %v3539_v51 = vld [vmem:[%s4707_s1 + $0x88] sm:$0xff]  }
  0x1b   : > { %v3534_v45 = vld [vmem:[%s3836_s13 + $0x43c] ss:$36 sps:$4 sm:$0xff]   ;;  %v3531_v47 = vld [vmem:[%s4707_s1 + $0x90] sm:$0xff]   ;;  %v3544_v53 = vld [vmem:[%s3836_s13 + $0x124] ss:$36 sps:$4 sm:$0xff]  }
  0x1c   : > { %v3536_v49 = vld [vmem:[%s3836_s13 + $0xd8] ss:$36 sps:$4 sm:$0xff]   ;;  %v3540_v52 = vld [vmem:[%s4707_s1 + $0xc0] sm:$0xff]   ;;  %v3548_v54 = vld [vmem:[%s3836_s13 + $0xc] ss:$36 sps:$4 sm:$0xff]  }
  0x1d   : > { %2946 = vmatpush3.bf16.msra.mxu0 %v3491_v9  ;;  %3469 = vmatpush3.bf16.msra.mxu1 %v3491_v9  ;;  %v3537_v50 = vld [vmem:[%s3836_s13 + $0x438] ss:$36 sps:$4 sm:$0xff]   ;;  %v3558_v55 = vld [vmem:[%s4707_s1 + $0x160] sm:$0xff]   ;;  %v3546_v58 = vld [vmem:[%s3836_s13 + $0x8] ss:$36 sps:$4 sm:$0xff]  }
  0x1e   : > { %2947 = vmatprep.subr.bf16.mxu0 %v3492_v10  ;;  %3462 = vmatprep.subr.bf16.mxu1 %v3492_v10  ;;  %v3559_v56 = vld [vmem:[%s4707_s1 + $0x120] sm:$0xff]   ;;  %v3550_v60 = vld [vmem:[%s4707_s1 + $0x1f8] sm:$0xff]   ;;  %v3552_v62 = vld [vmem:[%s3836_s13 + $0x16c] ss:$36 sps:$4 sm:$0xff]  }
  0x1f   : > { %v3542_v57 = vld [vmem:[%s4707_s1 + $0x80] sm:$0xff]   ;;  %v3551_v61 = vld [vmem:[%s4707_s1 + $0x1b8] sm:$0xff]   ;;  %v3566_v1 = vld [vmem:[%s4707_s1 + $0x1f0] sm:$0xff]  }
  0x20   : > { %v3549_v59 = vld [vmem:[%s3836_s13 + $0x120] ss:$36 sps:$4 sm:$0xff]   ;;  %v3554_v63 = vld [vmem:[%s3836_s13 + $0x54] ss:$36 sps:$4 sm:$0xff]   ;;  %v3556_v4 = vld [vmem:[%s3836_s13 + $0x168] ss:$36 sps:$4 sm:$0xff]  }
  0x21   : > { %2948 = vmatpush3.bf16.msra.mxu0 %v3493_v13  ;;  %3470 = vmatpush3.bf16.msra.mxu1 %v3493_v13  ;;  %v3568_v0 = vld [vmem:[%s4707_s1 + $0x158] sm:$0xff]   ;;  %v3567_v3 = vld [vmem:[%s4707_s1 + $0x1b0] sm:$0xff]   ;;  %v3583_v9 = vld [vmem:[%s4707_s1 + $0x1e8] sm:$0xff]  }
  0x22   : > { %2949 = vmatprep.subr.bf16.mxu0 %v3494_v14  ;;  %3463 = vmatprep.subr.bf16.mxu1 %v3494_v14  ;;  %v3569_v2 = vld [vmem:[%s4707_s1 + $0x118] sm:$0xff]   ;;  %v3557_v5 = vld [vmem:[%s3836_s13 + $0x50] ss:$36 sps:$4 sm:$0xff]   ;;  %v3585_v11 = vld [vmem:[%s4707_s1 + $0x1a8] sm:$0xff]  }
  0x23   : > { %v3560_v6 = vld [vmem:[%s3836_s13 + $0x1b4] ss:$36 sps:$4 sm:$0xff]   ;;  %v3562_v7 = vld [vmem:[%s3836_s13 + $0x9c] ss:$36 sps:$4 sm:$0xff]  }
  0x24   : > { %v3582_v8 = vld [vmem:[%s4707_s1 + $0x150] sm:$0xff]   ;;  %v3565_v13 = vld [vmem:[%s3836_s13 + $0x98] ss:$36 sps:$4 sm:$0xff]  }
  0x25   : > { %2950 = vmatpush3.bf16.msra.mxu0 %v3495_v15  ;;  %3471 = vmatpush3.bf16.msra.mxu1 %v3495_v15  ;;  %v3584_v10 = vld [vmem:[%s4707_s1 + $0x110] sm:$0xff]   ;;  %v3570_v14 = vld [vmem:[%s3836_s13 + $0x1fc] ss:$36 sps:$4 sm:$0xff]   ;;  %v3592_v15 = vld [vmem:[%s4707_s1 + $0x148] sm:$0xff]  }
  0x26   : > { %2951 = vmatprep.subr.bf16.mxu0 %v3496_v16  ;;  %3464 = vmatprep.subr.bf16.mxu1 %v3496_v16  ;;  %v3564_v12 = vld [vmem:[%s3836_s13 + $0x1b0] ss:$36 sps:$4 sm:$0xff]   ;;  %v3593_v16 = vld [vmem:[%s4707_s1 + $0x108] sm:$0xff]  }
  0x29   : > { %2952 = vmatpush3.bf16.msra.mxu0 %v3497_v17  ;;  %3472 = vmatpush3.bf16.msra.mxu1 %v3497_v17  ;;  %v3572_v17 = vld [vmem:[%s3836_s13 + $0xe4] ss:$36 sps:$4 sm:$0xff]  }
  0x2a   : > { %3049 = vmatprep.subr.bf16.mxu1 %v3504_v18  ;;  %3161 = vmatprep.subr.bf16.mxu0 %v3507_v21  ;;  %v3600_v18 = vld [vmem:[%s4707_s1 + $0x1e0] sm:$0xff]  }
  0x2b   : > { %v3575_v21 = vld [vmem:[%s3836_s13 + $0xe0] ss:$36 sps:$4 sm:$0xff]  }
  0x2c   : > { %1739 = vmatmul.mubr.bf16.vlgmr.msra.gmra.mxu0 %v3498_v19  ;;  %1835 = vmatmul.mubr.bf16.vlgmr.msra.gmra.mxu1 %v3501_v20  ;;  %v3601_v19 = vld [vmem:[%s4707_s1 + $0x1a0] sm:$0xff]   ;;  %v3574_v20 = vld [vmem:[%s3836_s13 + $0x1f8] ss:$36 sps:$4 sm:$0xff]  }
  0x2d   : > { %3050 = vmatpush3.bf16.msra.mxu1 %v3505_v22  ;;  %3162 = vmatpush3.bf16.msra.mxu0 %v3509_v24  ;;  %v3576_v22 = vld [vmem:[%s3836_s13 + $0x244] ss:$36 sps:$4 sm:$0xff]  }
  0x2e   : > { %3051 = vmatprep.subr.bf16.mxu1 %v3506_v23  ;;  %1746 = vmatprep.mubr.bf16.mxu0 %v3510_v25  ;;  %v3578_v23 = vld [vmem:[%s3836_s13 + $0x12c] ss:$36 sps:$4 sm:$0xff]   ;;  %v3608_v24 = vld [vmem:[%s4707_s1 + $0x140] sm:$0xff]  }
  0x2f   : > { %1842 = vmatprep.mubr.bf16.mxu1 %v3512_v26  ;;  %3163 = vmatprep.subr.bf16.mxu0 %v3527_v28  ;;  %v3609_v25 = vld [vmem:[%s4707_s1 + $0x100] sm:$0xff]   ;;  %v3616_v26 = vld [vmem:[%s4707_s1 + $0x1d8] sm:$0xff]  }
  0x30   : > { %v3617_v28 = vld [vmem:[%s4707_s1 + $0x198] sm:$0xff]  }
  0x31   : > { %3052 = vmatpush3.bf16.msra.mxu1 %v3508_v27  ;;  %3164 = vmatpush3.bf16.msra.mxu0 %v3529_v33  ;;  %v3580_v27 = vld [vmem:[%s3836_s13 + $0x240] ss:$36 sps:$4 sm:$0xff]   ;;  %v3631_v33 = vld [vmem:[%s4707_s1 + $0x1d0] sm:$0xff]  }
  0x32   : > { %3053 = vmatprep.subr.bf16.mxu1 %v3516_v31  ;;  %3165 = vmatprep.subr.bf16.mxu0 %v3541_v43  ;;  %v3586_v31 = vld [vmem:[%s3836_s13 + $0x28c] ss:$36 sps:$4 sm:$0xff]   ;;  %v3602_v43 = vld [vmem:[%s3836_s13 + $0x31c] ss:$36 sps:$4 sm:$0xff]  }
  0x34   : > { %1747 = vmatmul.mubr.bf16.gmra.mxu0 %v3514_v29  ;;  %1843 = vmatmul.mubr.bf16.gmra.mxu1 %v3515_v30  ;;  %v3618_v29 = vld [vmem:[%s4707_s1 + $0x238] sm:$0xff]   ;;  %v3581_v30 = vld [vmem:[%s3836_s13 + $0x128] ss:$36 sps:$4 sm:$0xff]  }
  0x35   : > { %3054 = vmatpush3.bf16.msra.mxu1 %v3517_v32  ;;  %1754 = vmatprep.mubr.bf16.mxu0 %v3520_v35  ;;  %v3588_v32 = vld [vmem:[%s3836_s13 + $0x174] ss:$36 sps:$4 sm:$0xff]  }
  0x36   : > { %3055 = vmatprep.subr.bf16.mxu1 %v3518_v34  ;;  %1850 = vmatprep.mubr.bf16.mxu1 %v3522_v36  ;;  %v3590_v34 = vld [vmem:[%s3836_s13 + $0x288] ss:$36 sps:$4 sm:$0xff]   ;;  %v3632_v35 = vld [vmem:[%s4707_s1 + $0x190] sm:$0xff]  }
  0x37   : > { %3166 = vmatpush3.bf16.msra.mxu0 %v3543_v46  ;;  %v3591_v36 = vld [vmem:[%s3836_s13 + $0x170] ss:$36 sps:$4 sm:$0xff]   ;;  %v3607_v46 = vld [vmem:[%s3836_s13 + $0x200] ss:$36 sps:$4 sm:$0xff]  }
  0x38   : > { %3167 = vmatprep.subr.bf16.mxu0 %v3558_v55  ;;  %v3633_v55 = vld [vmem:[%s4707_s1 + $0x230] sm:$0xff]  }
  0x39   : > { %3056 = vmatpush3.bf16.msra.mxu1 %v3519_v37  ;;  %v3594_v37 = vld [vmem:[%s3836_s13 + $0x2d4] ss:$36 sps:$4 sm:$0xff]  }
  0x3a   : > { %3057 = vmatprep.subr.bf16.mxu1 %v3526_v40  ;;  %v3599_v40 = vld [vmem:[%s3836_s13 + $0x1b8] ss:$36 sps:$4 sm:$0xff]  }
  0x3b   : > { %3168 = vmatpush3.bf16.msra.mxu0 %v3559_v56  ;;  %v3648_v56 = vld [vmem:[%s4707_s1 + $0x228] sm:$0xff]  }
  0x3c   : > { %1755 = vmatmul.mubr.bf16.gmra.mxu0 %v3524_v38  ;;  %1851 = vmatmul.mubr.bf16.gmra.mxu1 %v3525_v39  ;;  %v3596_v38 = vld [vmem:[%s3836_s13 + $0x1bc] ss:$36 sps:$4 sm:$0xff]   ;;  %v3598_v39 = vld [vmem:[%s3836_s13 + $0x2d0] ss:$36 sps:$4 sm:$0xff]  }
  0x3d   : > { %3058 = vmatpush3.bf16.msra.mxu1 %v3528_v41  ;;  %1762 = vmatprep.mubr.bf16.mxu0 %v3532_v44  ;;  %v3646_v41 = vld [vmem:[%s4707_s1 + $0x1c8] sm:$0xff]  }
  0x3e   : > { %3059 = vmatprep.subr.bf16.mxu1 %v3530_v42  ;;  %1858 = vmatprep.mubr.bf16.mxu1 %v3534_v45  ;;  %v3647_v42 = vld [vmem:[%s4707_s1 + $0x188] sm:$0xff]   ;;  %v3606_v45 = vld [vmem:[%s3836_s13 + $0x318] ss:$36 sps:$4 sm:$0xff]  }
  0x3f   : > { %3169 = vmatprep.subr.bf16.mxu0 %v3568_v0  ;;  %v3604_v44 = vld [vmem:[%s3836_s13 + $0x204] ss:$36 sps:$4 sm:$0xff]  }
  0x40   : > { %3170 = vmatpush3.bf16.msra.mxu0 %v3569_v2  ;;  %v3630_v0 = vld [vmem:[%s3836_s13 + $0xa0] ss:$36 sps:$4 sm:$0xff]   ;;  %v3636_v2 = vld [vmem:[%s3836_s13 + $0xec] ss:$36 sps:$4 sm:$0xff]  }
  0x41   : > { %3060 = vmatpush3.bf16.msra.mxu1 %v3531_v47  ;;  %3171 = vmatprep.subr.bf16.mxu0 %v3582_v8  ;;  %v3661_v47 = vld [vmem:[%s4707_s1 + $0x1c0] sm:$0xff]   ;;  %v3642_v8 = vld [vmem:[%s3836_s13 + $0x134] ss:$36 sps:$4 sm:$0xff]  }
  0x42   : > { %3061 = vmatprep.subr.bf16.mxu1 %v3538_v48  ;;  %v3662_v48 = vld [vmem:[%s4707_s1 + $0x180] sm:$0xff]  }
  0x44   : > { %1763 = vmatmul.mubr.bf16.gmra.mxu0 %v3536_v49  ;;  %1859 = vmatmul.mubr.bf16.gmra.mxu1 %v3537_v50  ;;  %v3610_v49 = vld [vmem:[%s3836_s13 + $0x24c] ss:$36 sps:$4 sm:$0xff]   ;;  %v3614_v50 = vld [vmem:[%s3836_s13 + $0x14] ss:$36 sps:$4 sm:$0xff]  }
  0x45   : > { %3062 = vmatpush3.bf16.msra.mxu1 %v3539_v51  ;;  %1770 = vmatprep.mubr.bf16.mxu0 %v3544_v53  ;;  %v3612_v51 = vld [vmem:[%s3836_s13 + $0x10] ss:$36 sps:$4 sm:$0xff]  }
  0x46   : > { %3063 = vmatprep.subr.bf16.mxu1 %v3540_v52  ;;  %1899 = vmatprep.mubr.bf16.mxu1 %v3548_v54  ;;  %v3615_v52 = vld [vmem:[%s3836_s13 + $0x248] ss:$36 sps:$4 sm:$0xff]   ;;  %v3619_v53 = vld [vmem:[%s3836_s13 + $0x294] ss:$36 sps:$4 sm:$0xff]   ;;  %v3621_v54 = vld [vmem:[%s3836_s13 + $0x5c] ss:$36 sps:$4 sm:$0xff]  }
  0x47   : > { %3172 = vmatpush3.bf16.msra.mxu0 %v3584_v10  ;;  %v3644_v10 = vld [vmem:[%s3836_s13 + $0x368] ss:$36 sps:$4 sm:$0xff]  }
  0x48   : > { %3173 = vmatprep.subr.bf16.mxu0 %v3592_v15  ;;  %v3654_v15 = vld [vmem:[%s3836_s13 + $0x178] ss:$36 sps:$4 sm:$0xff]  }
  0x49   : > { %3064 = vmatpush3.bf16.msra.mxu1 %v3542_v57  ;;  %v3623_v57 = vld [vmem:[%s3836_s13 + $0x290] ss:$36 sps:$4 sm:$0xff]  }
  0x4a   : > { %3273 = vmatprep.subr.bf16.mxu1 %v3550_v60  ;;  %v3627_v60 = vld [vmem:[%s3836_s13 + $0xa4] ss:$36 sps:$4 sm:$0xff]  }
  0x4b   : > { %3174 = vmatpush3.bf16.msra.mxu0 %v3593_v16  ;;  %v3655_v16 = vld [vmem:[%s3836_s13 + $0x3fc] ss:$36 sps:$4 sm:$0xff]  }
  0x4c   : > { %1771 = vmatmul.mubr.bf16.gmra.mxu0 %v3549_v59  ;;  %1900 = vmatmul.mubr.bf16.vlgmr.msra.gmra.mxu1 %v3546_v58  ;;  %v3624_v58 = vld [vmem:[%s3836_s13 + $0x58] ss:$36 sps:$4 sm:$0xff]  }
  0x4d   : > { %3274 = vmatpush3.bf16.msra.mxu1 %v3551_v61  ;;  %1778 = vmatprep.mubr.bf16.mxu0 %v3552_v62  ;;  %v3625_v59 = vld [vmem:[%s3836_s13 + $0x2dc] ss:$36 sps:$4 sm:$0xff]  }
  0x4e   : > { %1907 = vmatprep.mubr.bf16.mxu1 %v3554_v63  ;;  %3275 = vmatprep.subr.bf16.mxu1 %v3566_v1  ;;  %v3663_v61 = vld [vmem:[%s4707_s1 + $0x220] sm:$0xff]   ;;  %v3629_v62 = vld [vmem:[%s3836_s13 + $0x2d8] ss:$36 sps:$4 sm:$0xff]  }
  0x4f   : > { %3175 = vmatprep.subr.bf16.mxu0 %v3608_v24  ;;  %v3676_v63 = vld [vmem:[%s4707_s1 + $0x218] sm:$0xff]   ;;  %v3634_v1 = vld [vmem:[%s3836_s13 + $0x324] ss:$36 sps:$4 sm:$0xff]  }
  0x50   : > { %3176 = vmatpush3.bf16.msra.mxu0 %v3609_v25  ;;  %v3670_v24 = vld [vmem:[%s3836_s13 + $0x254] ss:$36 sps:$4 sm:$0xff]   ;;  %v3674_v25 = vld [vmem:[%s3836_s13 + $0x1c] ss:$36 sps:$4 sm:$0xff]  }
  0x51   : > { %3276 = vmatpush3.bf16.msra.mxu1 %v3567_v3  ;;  %3409 = vmatprep.subr.bf16.mxu0 %v3618_v29  ;;  %v3689_v3 = vld [vmem:[%s4707_s1 + $0x210] sm:$0xff]  }
  0x52   : > { %3277 = vmatprep.subr.bf16.mxu1 %v3583_v9  ;;  %v3715_v9 = vld [vmem:[%s4707_s1 + $0x200] sm:$0xff]  }
  0x54   : > { %1779 = vmatmul.mubr.bf16.gmra.mxu0 %v3556_v4  ;;  %1908 = vmatmul.mubr.bf16.gmra.mxu1 %v3557_v5  ;;  %v3638_v4 = vld [vmem:[%s3836_s13 + $0x320] ss:$36 sps:$4 sm:$0xff]   ;;  %v3702_v5 = vld [vmem:[%s4707_s1 + $0x208] sm:$0xff]  }
  0x55   : > { %1786 = vmatprep.mubr.bf16.mxu0 %v3560_v6  ;;  %1915 = vmatprep.mubr.bf16.mxu1 %v3562_v7  ;;  %v3639_v6 = vld [vmem:[%s3836_s13 + $0xe8] ss:$36 sps:$4 sm:$0xff]  }
  0x56   : > { %3278 = vmatpush3.bf16.msra.mxu1 %v3585_v11  ;;  %v3640_v7 = vld [vmem:[%s3836_s13 + $0x36c] ss:$36 sps:$4 sm:$0xff]  }
  0x57   : > { %3279 = vmatprep.subr.bf16.mxu1 %v3600_v18  ;;  %v3645_v11 = vld [vmem:[%s3836_s13 + $0x130] ss:$36 sps:$4 sm:$0xff]   ;;  %v3659_v18 = vld [vmem:[%s3836_s13 + $0x3f8] ss:$36 sps:$4 sm:$0xff]  }
  0x5a   : > { %3280 = vmatpush3.bf16.msra.mxu1 %v3601_v19  ;;  %v3660_v19 = vld [vmem:[%s3836_s13 + $0x1c0] ss:$36 sps:$4 sm:$0xff]  }
  0x5b   : > { %3281 = vmatprep.subr.bf16.mxu1 %v3616_v26  ;;  %v3672_v26 = vld [vmem:[%s3836_s13 + $0x18] ss:$36 sps:$4 sm:$0xff]  }
  0x5c   : > { %1787 = vmatmul.mubr.bf16.gmra.mxu0 %v3564_v12  ;;  %1916 = vmatmul.mubr.bf16.gmra.mxu1 %v3565_v13  ;;  %v3649_v12 = vld [vmem:[%s3836_s13 + $0x3b4] ss:$36 sps:$4 sm:$0xff]   ;;  %v3651_v13 = vld [vmem:[%s3836_s13 + $0x17c] ss:$36 sps:$4 sm:$0xff]  }
  0x5d   : > { %1794 = vmatprep.mubr.bf16.mxu0 %v3570_v14  ;;  %1923 = vmatprep.mubr.bf16.mxu1 %v3572_v17  ;;  %v3653_v14 = vld [vmem:[%s3836_s13 + $0x3b0] ss:$36 sps:$4 sm:$0xff]   ;;  %v3657_v17 = vld [vmem:[%s3836_s13 + $0x1c4] ss:$36 sps:$4 sm:$0xff]  }
  0x5e   : > { %3282 = vmatpush3.bf16.msra.mxu1 %v3617_v28  ;;  %v3677_v28 = vld [vmem:[%s3836_s13 + $0x29c] ss:$36 sps:$4 sm:$0xff]  }
  0x5f   : > { %3283 = vmatprep.subr.bf16.mxu1 %v3631_v33  ;;  %v3685_v33 = vld [vmem:[%s3836_s13 + $0xac] ss:$36 sps:$4 sm:$0xff]  }
  0x62   : > { %3284 = vmatpush3.bf16.msra.mxu1 %v3632_v35  ;;  %v3688_v35 = vld [vmem:[%s3836_s13 + $0xa8] ss:$36 sps:$4 sm:$0xff]  }
  0x63   : > { %3285 = vmatprep.subr.bf16.mxu1 %v3646_v41  ;;  %v3698_v41 = vld [vmem:[%s3836_s13 + $0x13c] ss:$36 sps:$4 sm:$0xff]  }
  0x64   : > { %1795 = vmatmul.mubr.bf16.gmra.mxu0 %v3574_v20  ;;  %1924 = vmatmul.mubr.bf16.gmra.mxu1 %v3575_v21  ;;  %v3664_v20 = vld [vmem:[%s3836_s13 + $0x444] ss:$36 sps:$4 sm:$0xff]   ;;  %v3666_v21 = vld [vmem:[%s3836_s13 + $0x20c] ss:$36 sps:$4 sm:$0xff]  }
  0x65   : > { %1802 = vmatprep.mubr.bf16.mxu0 %v3576_v22  ;;  %1931 = vmatprep.mubr.bf16.mxu1 %v3578_v23  ;;  %v3668_v22 = vld [vmem:[%s3836_s13 + $0x440] ss:$36 sps:$4 sm:$0xff]   ;;  %v3669_v23 = vld [vmem:[%s3836_s13 + $0x208] ss:$36 sps:$4 sm:$0xff]  }
  0x66   : > { %3286 = vmatpush3.bf16.msra.mxu1 %v3647_v42  ;;  %v3700_v42 = vld [vmem:[%s3836_s13 + $0x370] ss:$36 sps:$4 sm:$0xff]  }
  0x67   : > { %3287 = vmatprep.subr.bf16.mxu1 %v3661_v47 }
  0x6a   : > { %3288 = vmatpush3.bf16.msra.mxu1 %v3662_v48 }
  0x6c   : > { %1803 = vmatmul.mubr.bf16.gmra.mxu0 %v3580_v27  ;;  %1932 = vmatmul.mubr.bf16.gmra.mxu1 %v3581_v30  ;;  %v3675_v27 = vld [vmem:[%s3836_s13 + $0x250] ss:$36 sps:$4 sm:$0xff]   ;;  %v3681_v30 = vld [vmem:[%s3836_s13 + $0x298] ss:$36 sps:$4 sm:$0xff]  }
  0x6d   : > { %1810 = vmatprep.mubr.bf16.mxu0 %v3586_v31  ;;  %1939 = vmatprep.mubr.bf16.mxu1 %v3588_v32  ;;  %v3682_v31 = vld [vmem:[%s3836_s13 + $0x60] ss:$36 sps:$4 sm:$0xff]  }
  0x6e   : > { %v3683_v32 = vld [vmem:[%s3836_s13 + $0x2e4] ss:$36 sps:$4 sm:$0xff]  }
  0x74   : > { %1811 = vmatmul.mubr.bf16.gmra.mxu0 %v3590_v34  ;;  %1940 = vmatmul.mubr.bf16.gmra.mxu1 %v3591_v36  ;;  %v3687_v34 = vld [vmem:[%s3836_s13 + $0x2e0] ss:$36 sps:$4 sm:$0xff]   ;;  %v3690_v36 = vld [vmem:[%s3836_s13 + $0x32c] ss:$36 sps:$4 sm:$0xff]  }
  0x75   : > { %1818 = vmatprep.mubr.bf16.mxu0 %v3594_v37  ;;  %1947 = vmatprep.mubr.bf16.mxu1 %v3596_v38  ;;  %v3692_v37 = vld [vmem:[%s3836_s13 + $0xf4] ss:$36 sps:$4 sm:$0xff]   ;;  %v3694_v38 = vld [vmem:[%s3836_s13 + $0x328] ss:$36 sps:$4 sm:$0xff]  }
  0x7c   : > { %1819 = vmatmul.mubr.bf16.gmra.mxu0 %v3598_v39  ;;  %1948 = vmatmul.mubr.bf16.gmra.mxu1 %v3599_v40  ;;  %v3695_v39 = vld [vmem:[%s3836_s13 + $0xf0] ss:$36 sps:$4 sm:$0xff]  }
  0x7d   : > { %1826 = vmatprep.mubr.bf16.mxu0 %v3602_v43  ;;  %1955 = vmatprep.mubr.bf16.mxu1 %v3604_v44  ;;  %v3696_v40 = vld [vmem:[%s3836_s13 + $0x374] ss:$36 sps:$4 sm:$0xff]   ;;  %v3703_v44 = vld [vmem:[%s3836_s13 + $0x3bc] ss:$36 sps:$4 sm:$0xff]  }
  0x7e   : > { %v3701_v43 = vld [vmem:[%s3836_s13 + $0x138] ss:$36 sps:$4 sm:$0xff]  }
  0x84   : > { %1827 = vmatmul.mubr.bf16.gmra.mxu0 %v3606_v45  ;;  %1956 = vmatmul.mubr.bf16.gmra.mxu1 %v3607_v46  ;;  %v3705_v45 = vld [vmem:[%s3836_s13 + $0x184] ss:$36 sps:$4 sm:$0xff]  }
  0x85   : > { %1963 = vmatprep.mubr.bf16.mxu1 %v3610_v49  ;;  %2060 = vmatprep.mubr.bf16.mxu0 %v3614_v50 }
  0x8c   : > { %1964 = vmatmul.mubr.bf16.gmra.mxu1 %v3615_v52  ;;  %2061 = vmatmul.mubr.bf16.vlgmr.msra.gmra.mxu0 %v3612_v51 }
  0x8d   : > { %3410 = vmatpush3.bf16.msra.mxu0 %v3618_v29  ;;  %1971 = vmatprep.mubr.bf16.mxu1 %v3619_v53  ;;  %v3679_v29 = vld [vmem:[%s3836_s13 + $0x64] ss:$36 sps:$4 sm:$0xff]  }
  0x8e   : > { %2068 = vmatprep.mubr.bf16.mxu0 %v3621_v54  ;;  %3411 = vmatprep.subr.bf16.mxu0 %v3633_v55  ;;  %v3707_v54 = vld [vmem:[%s3836_s13 + $0x3b8] ss:$36 sps:$4 sm:$0xff]  }
  0x91   : > { %3412 = vmatpush3.bf16.msra.mxu0 %v3633_v55  ;;  %v3708_v55 = vld [vmem:[%s3836_s13 + $0x180] ss:$36 sps:$4 sm:$0xff]  }
  0x92   : > { %3413 = vmatprep.subr.bf16.mxu0 %v3648_v56 }
  0x94   : > { %1972 = vmatmul.mubr.bf16.gmra.mxu1 %v3623_v57  ;;  %2069 = vmatmul.mubr.bf16.gmra.mxu0 %v3624_v58  ;;  %v3711_v57 = vld [vmem:[%s3836_s13 + $0x1cc] ss:$36 sps:$4 sm:$0xff]  }
  0x95   : > { %1979 = vmatprep.mubr.bf16.mxu1 %v3625_v59  ;;  %2076 = vmatprep.mubr.bf16.mxu0 %v3627_v60 }
  0x96   : > { %3414 = vmatpush3.bf16.msra.mxu0 %v3648_v56  ;;  %v3709_v56 = vld [vmem:[%s3836_s13 + $0x404] ss:$36 sps:$4 sm:$0xff]  }
  0x97   : > { %3415 = vmatprep.subr.bf16.mxu0 %v3663_v61 }
  0x9a   : > { %3416 = vmatpush3.bf16.msra.mxu0 %v3663_v61 }
  0x9b   : > { %3417 = vmatprep.subr.bf16.mxu0 %v3676_v63 }
  0x9c   : > { %1980 = vmatmul.mubr.bf16.gmra.mxu1 %v3629_v62  ;;  %2077 = vmatmul.mubr.bf16.gmra.mxu0 %v3630_v0 }
  0x9d   : > { %1987 = vmatprep.mubr.bf16.mxu1 %v3634_v1  ;;  %2084 = vmatprep.mubr.bf16.mxu0 %v3636_v2 }
  0x9e   : > { %3418 = vmatpush3.bf16.msra.mxu0 %v3676_v63 }
  0x9f   : > { %3419 = vmatprep.subr.bf16.mxu0 %v3689_v3 }
  0xa2   : > { %3420 = vmatpush3.bf16.msra.mxu0 %v3689_v3 }
  0xa3   : > { %3421 = vmatprep.subr.bf16.mxu0 %v3702_v5 }
  0xa4   : > { %1988 = vmatmul.mubr.bf16.gmra.mxu1 %v3638_v4  ;;  %2085 = vmatmul.mubr.bf16.gmra.mxu0 %v3639_v6  ;;  %v3713_v6 = vld [vmem:[%s3836_s13 + $0x400] ss:$36 sps:$4 sm:$0xff]  }
  0xa5   : > { %1995 = vmatprep.mubr.bf16.mxu1 %v3640_v7  ;;  %2092 = vmatprep.mubr.bf16.mxu0 %v3642_v8  ;;  %v3714_v7 = vld [vmem:[%s3836_s13 + $0x1c8] ss:$36 sps:$4 sm:$0xff]  }
  0xa6   : > { %3422 = vmatpush3.bf16.msra.mxu0 %v3702_v5  ;;  %v3716_v8 = vld [vmem:[%s3836_s13 + $0x44c] ss:$36 sps:$4 sm:$0xff]  }
  0xa7   : > { %3423 = vmatprep.subr.bf16.mxu0 %v3715_v9 }
  0xaa   : > { %3424 = vmatpush3.bf16.msra.mxu0 %v3715_v9  ;;  %v3718_v9 = vld [vmem:[%s3836_s13 + $0x214] ss:$36 sps:$4 sm:$0xff]  }
  0xac   : > { %1996 = vmatmul.mubr.bf16.gmra.mxu1 %v3644_v10  ;;  %2093 = vmatmul.mubr.bf16.gmra.mxu0 %v3645_v11 }
  0xad   : > { %2003 = vmatprep.mubr.bf16.mxu1 %v3649_v12  ;;  %2100 = vmatprep.mubr.bf16.mxu0 %v3651_v13 }
  0xb4   : > { %2004 = vmatmul.mubr.bf16.gmra.mxu1 %v3653_v14  ;;  %2101 = vmatmul.mubr.bf16.gmra.mxu0 %v3654_v15 }
  0xb5   : > { %2011 = vmatprep.mubr.bf16.mxu1 %v3655_v16  ;;  %2108 = vmatprep.mubr.bf16.mxu0 %v3657_v17 }
  0xbc   : > { %2012 = vmatmul.mubr.bf16.gmra.mxu1 %v3659_v18  ;;  %2109 = vmatmul.mubr.bf16.gmra.mxu0 %v3660_v19 }
  0xbd   : > { %2019 = vmatprep.mubr.bf16.mxu1 %v3664_v20  ;;  %2116 = vmatprep.mubr.bf16.mxu0 %v3666_v21 }
  0xc4   : > { %2020 = vmatmul.mubr.bf16.gmra.mxu1 %v3668_v22  ;;  %2117 = vmatmul.mubr.bf16.gmra.mxu0 %v3669_v23  ;;  %v3720_v22 = vld [vmem:[%s3836_s13 + $0x448] ss:$36 sps:$4 sm:$0xff]   ;;  %v3721_v23 = vld [vmem:[%s3836_s13 + $0x210] ss:$36 sps:$4 sm:$0xff]  }
  0xc5   : > { %2124 = vmatprep.mubr.bf16.mxu0 %v3670_v24  ;;  %2221 = vmatprep.mubr.bf16.mxu1 %v3674_v25  ;;  %v3724_v24 = vld [vmem:[%s3836_s13 + $0x25c] ss:$36 sps:$4 sm:$0xff]  }
  0xc6   : > { %v3725_v25 = vld [vmem:[%s3836_s13 + $0x20] ss:$36 sps:$4 sm:$0xff]  }
  0xcc   : > { %2125 = vmatmul.mubr.bf16.gmra.mxu0 %v3675_v27  ;;  %2222 = vmatmul.mubr.bf16.vlgmr.msra.gmra.mxu1 %v3672_v26 }
  0xcd   : > { %2132 = vmatprep.mubr.bf16.mxu0 %v3677_v28  ;;  %2229 = vmatprep.mubr.bf16.mxu1 %v3679_v29 }
  0xd4   : > { %2133 = vmatmul.mubr.bf16.gmra.mxu0 %v3681_v30  ;;  %2230 = vmatmul.mubr.bf16.gmra.mxu1 %v3682_v31 }
  0xd5   : > { %2140 = vmatprep.mubr.bf16.mxu0 %v3683_v32  ;;  %2237 = vmatprep.mubr.bf16.mxu1 %v3685_v33 }
  0xdc   : > { %2141 = vmatmul.mubr.bf16.gmra.mxu0 %v3687_v34  ;;  %2238 = vmatmul.mubr.bf16.gmra.mxu1 %v3688_v35 }
  0xdd   : > { %2148 = vmatprep.mubr.bf16.mxu0 %v3690_v36  ;;  %2245 = vmatprep.mubr.bf16.mxu1 %v3692_v37 }
  0xe4   : > { %2149 = vmatmul.mubr.bf16.gmra.mxu0 %v3694_v38  ;;  %2246 = vmatmul.mubr.bf16.gmra.mxu1 %v3695_v39  ;;  %v3722_v38 = vld [vmem:[%s3836_s13 + $0x258] ss:$36 sps:$4 sm:$0xff]   ;;  %v3726_v39 = vld [vmem:[%s3836_s13 + $0x68] ss:$36 sps:$4 sm:$0xff]  }
  0xe5   : > { %2156 = vmatprep.mubr.bf16.mxu0 %v3696_v40  ;;  %2253 = vmatprep.mubr.bf16.mxu1 %v3698_v41  ;;  %v3729_v40 = vld [vmem:[%s3836_s13 + $0x2a4] ss:$36 sps:$4 sm:$0xff]   ;;  %v3730_v41 = vld [vmem:[%s3836_s13 + $0xb0] ss:$36 sps:$4 sm:$0xff]  }
  0xec   : > { %v2953_v46 = vpop.f32.mrf.mxu0  ;;  %v3025_v47 = vpop.f32.mrf.mxu1  ;;  %2157 = vmatmul.mubr.bf16.gmra.mxu0 %v3700_v42  ;;  %2254 = vmatmul.mubr.bf16.gmra.mxu1 %v3701_v43 }
  0xed   : > { %2164 = vmatprep.mubr.bf16.mxu0 %v3703_v44  ;;  %2261 = vmatprep.mubr.bf16.mxu1 %v3705_v45 }
  0xee   : > { %v2954_v48 = vpop.f32.mrf.mxu0  ;;  %v3026_v49 = vpop.f32.mrf.mxu1 }
  0xef   : > { %v4129_v50 = vadd.f32 %v2954_v48, %v2953_v46  ;;  %v4131_v51 = vadd.f32 %v3026_v49, %v3025_v47  ;;  %v4180_v48 = vld [vmem:[%s4708_s2] ss:$0 sm:$0xff] }
  0xf0   : > { %v2956_v52 = vpop.f32.mrf.mxu0  ;;  %v3028_v53 = vpop.f32.mrf.mxu1 }
  0xf2   : > { %v2957_v58 = vpop.f32.mrf.mxu0  ;;  %v3029_v59 = vpop.f32.mrf.mxu1 }
  0xf3   : > { %v4137_v60 = vadd.f32 %v2957_v58, %v2956_v52  ;;  %v4139_v61 = vadd.f32 %v3029_v59, %v3028_v53  ;;  %v1741_v53 = vadd.f32 %v4129_v50, %v4180_v48  ;;  %v3727_v58 = vld [vmem:[%s3836_s13 + $0x2a0] ss:$36 sps:$4 sm:$0xff]   ;;  %v3731_v59 = vld [vmem:[%s3836_s13 + $0xf8] ss:$36 sps:$4 sm:$0xff]  }
  0xf4   : > { %v2959_v62 = vpop.f32.mrf.mxu0  ;;  %v3031_v63 = vpop.f32.mrf.mxu1  ;;  %2165 = vmatmul.mubr.bf16.gmra.mxu0 %v3707_v54  ;;  %2262 = vmatmul.mubr.bf16.gmra.mxu1 %v3708_v55 }
  0xf5   : > { %2172 = vmatprep.mubr.bf16.mxu0 %v3709_v56  ;;  %2269 = vmatprep.mubr.bf16.mxu1 %v3711_v57 }
  0xf6   : > { %v2960_v0 = vpop.f32.mrf.mxu0  ;;  %v3032_v1 = vpop.f32.mrf.mxu1 }
  0xf7   : > { %v4141_v2 = vadd.f32 %v2960_v0, %v2959_v62  ;;  %v4143_v3 = vadd.f32 %v3032_v1, %v3031_v63  ;;  %v3734_v63 = vld [vmem:[%s3836_s13 + $0x2ec] ss:$36 sps:$4 sm:$0xff]   ;;  %v3735_v0 = vld [vmem:[%s3836_s13 + $0x140] ss:$36 sps:$4 sm:$0xff]  }
  0xf8   : > { %v2962_v4 = vpop.f32.mrf.mxu0  ;;  %v3034_v5 = vpop.f32.mrf.mxu1 }
  0xfa   : > { %v2963_v10 = vpop.f32.mrf.mxu0  ;;  %v3035_v11 = vpop.f32.mrf.mxu1 }
  0xfb   : > { %v4149_v12 = vadd.f32 %v2963_v10, %v2962_v4  ;;  %v4151_v13 = vadd.f32 %v3035_v11, %v3034_v5  ;;  %v1744_v5 = vadd.f32 %v4137_v60, %v4180_v48  ;;  %v1749_v60 = vadd.f32 %v4141_v2, %v4180_v48 }
  0xfc   : > { %v2965_v14 = vpop.f32.mrf.mxu0  ;;  %v3037_v15 = vpop.f32.mrf.mxu1  ;;  %2173 = vmatmul.mubr.bf16.gmra.mxu0 %v3713_v6  ;;  %2270 = vmatmul.mubr.bf16.gmra.mxu1 %v3714_v7 }
  0xfd   : > { %2180 = vmatprep.mubr.bf16.mxu0 %v3716_v8  ;;  %2277 = vmatprep.mubr.bf16.mxu1 %v3718_v9 }
  0xfe   : > { %v2966_v16 = vpop.f32.mrf.mxu0  ;;  %v3038_v17 = vpop.f32.mrf.mxu1 }
  0xff   : > { %v4153_v18 = vadd.f32 %v2966_v16, %v2965_v14  ;;  %v4155_v19 = vadd.f32 %v3038_v17, %v3037_v15 }
 0x100   : > { %v2968_v20 = vpop.f32.mrf.mxu0  ;;  %v3040_v21 = vpop.f32.mrf.mxu1 }
 0x102   : > { %v2969_v26 = vpop.f32.mrf.mxu0  ;;  %v3041_v27 = vpop.f32.mrf.mxu1 }
 0x103   : > { %v4161_v28 = vadd.f32 %v2969_v26, %v2968_v20  ;;  %v4163_v29 = vadd.f32 %v3041_v27, %v3040_v21  ;;  %v3732_v20 = vld [vmem:[%s3836_s13 + $0x2e8] ss:$36 sps:$4 sm:$0xff]   ;;  %v1752_v27 = vadd.f32 %v4149_v12, %v4180_v48  ;;  %v1757_v12 = vadd.f32 %v4153_v18, %v4180_v48 }
 0x104   : > { %v2971_v30 = vpop.f32.mrf.mxu0  ;;  %v3043_v31 = vpop.f32.mrf.mxu1  ;;  %2181 = vmatmul.mubr.bf16.gmra.mxu0 %v3720_v22  ;;  %2278 = vmatmul.mubr.bf16.gmra.mxu1 %v3721_v23  ;;  %v3736_v21 = vld [vmem:[%s3836_s13 + $0x188] ss:$36 sps:$4 sm:$0xff]   ;;  %v3739_v23 = vld [vmem:[%s3836_s13 + $0x334] ss:$36 sps:$4 sm:$0xff]  }
 0x105   : > { %2285 = vmatprep.mubr.bf16.mxu1 %v3724_v24  ;;  %3425 = vmatprep.mubr.bf16.mxu0 %v3725_v25  ;;  %v3740_v24 = vld [vmem:[%s3836_s13 + $0x1d0] ss:$36 sps:$4 sm:$0xff]  }
 0x106   : > { %v2972_v32 = vpop.f32.mrf.mxu0  ;;  %v3044_v33 = vpop.f32.mrf.mxu1 }
 0x107   : > { %v4165_v34 = vadd.f32 %v2972_v32, %v2971_v30  ;;  %v4167_v35 = vadd.f32 %v3044_v33, %v3043_v31 }
 0x108   : > { %v2974_v36 = vpop.f32.mrf.mxu0  ;;  %v3046_v37 = vpop.f32.mrf.mxu1 }
 0x10a   : > { %v2975_v42 = vpop.f32.mrf.mxu0  ;;  %v3047_v43 = vpop.f32.mrf.mxu1 }
 0x10b   : > { %v4173_v44 = vadd.f32 %v2975_v42, %v2974_v36  ;;  %v4175_v45 = vadd.f32 %v3047_v43, %v3046_v37  ;;  %v3737_v42 = vld [vmem:[%s3836_s13 + $0x330] ss:$36 sps:$4 sm:$0xff]   ;;  %v3741_v43 = vld [vmem:[%s3836_s13 + $0x218] ss:$36 sps:$4 sm:$0xff]  }
 0x10c   : > { %v2977_v46 = vpop.f32.mrf.mxu0  ;;  %v3065_v47 = vpop.f32.mrf.mxu1  ;;  %2286 = vmatmul.mubr.bf16.gmra.mxu1 %v3722_v38  ;;  %3426 = vmatmul.mubr.bf16.vlgmr.msra.gmra.mxu0 %v3726_v39 }
 0x10d   : > { %2293 = vmatprep.mubr.bf16.mxu1 %v3729_v40  ;;  %3429 = vmatprep.mubr.bf16.mxu0 %v3730_v41 }
 0x10e   : > { %v2978_v49 = vpop.f32.mrf.mxu0  ;;  %v3066_v52 = vpop.f32.mrf.mxu1 }
 0x10f   : > { %v4184_v54 = vadd.f32 %v2978_v49, %v2977_v46  ;;  %v3067_v55 = vadd.f32 %v3066_v52, %v3065_v47  ;;  %v3744_v47 = vld [vmem:[%s3836_s13 + $0x37c] ss:$36 sps:$4 sm:$0xff]  }
 0x110   : > { %v2980_v56 = vpop.f32.mrf.mxu0  ;;  %v3068_v57 = vpop.f32.mrf.mxu1  ;;  %v3745_v49 = vld [vmem:[%s3836_s13 + $0x260] ss:$36 sps:$4 sm:$0xff]  }
 0x111   : > { %v4188_v62 = vadd.f32 %v3067_v55, %v1741_v53  ;;  %v1760_v55 = vadd.f32 %v4161_v28, %v4180_v48  ;;  %v1765_v28 = vadd.f32 %v4165_v34, %v4180_v48 }
 0x112   : > { %v2981_v1 = vpop.f32.mrf.mxu0  ;;  %v3069_v4 = vpop.f32.mrf.mxu1 }
 0x113   : > { %v4194_v6 = vadd.f32 %v2981_v1, %v2980_v56  ;;  %v3070_v50 = vadd.f32 %v3069_v4, %v3068_v57 }
 0x114   : > { %v2983_v7 = vpop.f32.mrf.mxu0  ;;  %v3071_v8 = vpop.f32.mrf.mxu1  ;;  %2294 = vmatmul.mubr.bf16.gmra.mxu1 %v3727_v58  ;;  %3430 = vmatmul.mubr.bf16.gmra.mxu0 %v3731_v59 }
 0x115   : > { %v4196_v9 = vadd.f32 %v3070_v50, %v1744_v5  ;;  %2301 = vmatprep.mubr.bf16.mxu1 %v3734_v63  ;;  %3433 = vmatprep.mubr.bf16.mxu0 %v3735_v0 }
 0x116   : > { %v2984_v10 = vpop.f32.mrf.mxu0  ;;  %v3072_v11 = vpop.f32.mrf.mxu1 }
 0x117   : > { %v4200_v14 = vadd.f32 %v2984_v10, %v2983_v7  ;;  %v3073_v15 = vadd.f32 %v3072_v11, %v3071_v8  ;;  %v3742_v7 = vld [vmem:[%s3836_s13 + $0x378] ss:$36 sps:$4 sm:$0xff]   ;;  %v3746_v8 = vld [vmem:[%s3836_s13 + $0x2a8] ss:$36 sps:$4 sm:$0xff]  }
 0x118   : > { %v2986_v16 = vpop.f32.mrf.mxu0  ;;  %v3074_v17 = vpop.f32.mrf.mxu1  ;;  %v3749_v11 = vld [vmem:[%s3836_s13 + $0x3c4] ss:$36 sps:$4 sm:$0xff]  }
 0x119   : > { %v4204_v22 = vadd.f32 %v3073_v15, %v1749_v60  ;;  %v3750_v60 = vld [vmem:[%s3836_s13 + $0x2f0] ss:$36 sps:$4 sm:$0xff]  }
 0x11a   : > { %v2987_v25 = vpop.f32.mrf.mxu0  ;;  %v3075_v26 = vpop.f32.mrf.mxu1 }
 0x11b   : > { %v4210_v30 = vadd.f32 %v2987_v25, %v2986_v16  ;;  %v3076_v2 = vadd.f32 %v3075_v26, %v3074_v17  ;;  %v1768_v17 = vadd.f32 %v4173_v44, %v4180_v48  ;;  %v1773_v44 = vadd.f32 %v4184_v54, %v4180_v48 }
 0x11c   : > { %v2989_v31 = vpop.f32.mrf.mxu0  ;;  %v3077_v32 = vpop.f32.mrf.mxu1  ;;  %2302 = vmatmul.mubr.bf16.gmra.mxu1 %v3732_v20  ;;  %3434 = vmatmul.mubr.bf16.gmra.mxu0 %v3736_v21 }
 0x11d   : > { %v4212_v33 = vadd.f32 %v3076_v2, %v1752_v27  ;;  %2309 = vmatprep.mubr.bf16.mxu1 %v3739_v23  ;;  %3437 = vmatprep.mubr.bf16.mxu0 %v3740_v24 }
 0x11e   : > { %v2990_v36 = vpop.f32.mrf.mxu0  ;;  %v3078_v37 = vpop.f32.mrf.mxu1 }
 0x11f   : > { %v4216_v38 = vadd.f32 %v2990_v36, %v2989_v31  ;;  %v3079_v39 = vadd.f32 %v3078_v37, %v3077_v32  ;;  %v3747_v36 = vld [vmem:[%s3836_s13 + $0x3c0] ss:$36 sps:$4 sm:$0xff]   ;;  %v3751_v37 = vld [vmem:[%s3836_s13 + $0x338] ss:$36 sps:$4 sm:$0xff]  }
 0x120   : > { %v2992_v40 = vpop.f32.mrf.mxu0  ;;  %v3080_v41 = vpop.f32.mrf.mxu1 }
 0x121   : > { %v4220_v46 = vadd.f32 %v3079_v39, %v1757_v12  ;;  %v3754_v39 = vld [vmem:[%s3836_s13 + $0x40c] ss:$36 sps:$4 sm:$0xff]  }
 0x122   : > { %v2993_v52 = vpop.f32.mrf.mxu0  ;;  %v3081_v53 = vpop.f32.mrf.mxu1 }
 0x123   : > { %v4226_v56 = vadd.f32 %v2993_v52, %v2992_v40  ;;  %v3082_v18 = vadd.f32 %v3081_v53, %v3080_v41  ;;  %v3755_v40 = vld [vmem:[%s3836_s13 + $0x380] ss:$36 sps:$4 sm:$0xff]  }
 0x124   : > { %v2995_v57 = vpop.f32.mrf.mxu0  ;;  %v3083_v58 = vpop.f32.mrf.mxu1  ;;  %2310 = vmatmul.mubr.bf16.gmra.mxu1 %v3737_v42  ;;  %3438 = vmatmul.mubr.bf16.gmra.mxu0 %v3741_v43  ;;  %v1776_v43 = vadd.f32 %v4194_v6, %v4180_v48  ;;  %v1781_v6 = vadd.f32 %v4200_v14, %v4180_v48 }
 0x125   : > { %v4228_v59 = vadd.f32 %v3082_v18, %v1760_v55  ;;  %2317 = vmatprep.mubr.bf16.mxu1 %v3744_v47  ;;  %3441 = vmatprep.mubr.bf16.mxu0 %v3745_v49 }
 0x126   : > { %v2996_v63 = vpop.f32.mrf.mxu0  ;;  %v3084_v0 = vpop.f32.mrf.mxu1 }
 0x127   : > { %v4232_v1 = vadd.f32 %v2996_v63, %v2995_v57  ;;  %v3085_v4 = vadd.f32 %v3084_v0, %v3083_v58 }
 0x128   : > { %v2998_v5 = vpop.f32.mrf.mxu0  ;;  %v3086_v50 = vpop.f32.mrf.mxu1 }
 0x129   : > { %v4236_v10 = vadd.f32 %v3085_v4, %v1765_v28  ;;  %v3752_v28 = vld [vmem:[%s3836_s13 + $0x408] ss:$36 sps:$4 sm:$0xff]  }
 0x12a   : > { %v2999_v15 = vpop.f32.mrf.mxu0  ;;  %v3087_v16 = vpop.f32.mrf.mxu1  ;;  %v3756_v4 = vld [vmem:[%s3836_s13 + $0x3c8] ss:$36 sps:$4 sm:$0xff]  }
 0x12b   : > { %v4242_v20 = vadd.f32 %v2999_v15, %v2998_v5  ;;  %v3088_v34 = vadd.f32 %v3087_v16, %v3086_v50  ;;  %v3759_v50 = vld [vmem:[%s3836_s13 + $0x454] ss:$36 sps:$4 sm:$0xff]  }
 0x12c   : > { %v3001_v21 = vpop.f32.mrf.mxu0  ;;  %v3089_v23 = vpop.f32.mrf.mxu1  ;;  %2318 = vmatmul.mubr.bf16.gmra.mxu1 %v3742_v7  ;;  %3442 = vmatmul.mubr.bf16.gmra.mxu0 %v3746_v8  ;;  %v3760_v7 = vld [vmem:[%s3836_s13 + $0x410] ss:$36 sps:$4 sm:$0xff]  }
 0x12d   : > { %v4244_v24 = vadd.f32 %v3088_v34, %v1768_v17  ;;  %2325 = vmatprep.mubr.bf16.mxu1 %v3749_v11  ;;  %3445 = vmatprep.mubr.bf16.mxu0 %v3750_v60  ;;  %v1784_v60 = vadd.f32 %v4210_v30, %v4180_v48 }
 0x12e   : > { %v3002_v25 = vpop.f32.mrf.mxu0  ;;  %v3090_v26 = vpop.f32.mrf.mxu1 }
 0x12f   : > { %v4248_v27 = vadd.f32 %v3002_v25, %v3001_v21  ;;  %v3091_v2 = vadd.f32 %v3090_v26, %v3089_v23  ;;  %v1789_v25 = vadd.f32 %v4216_v38, %v4180_v48 }
 0x130   : > { %v3004_v31 = vpop.f32.mrf.mxu0  ;;  %v3092_v32 = vpop.f32.mrf.mxu1 }
 0x131   : > { %v4252_v12 = vadd.f32 %v3091_v2, %v1773_v44 }
 0x132   : > { %v3005_v41 = vpop.f32.mrf.mxu0  ;;  %v3093_v42 = vpop.f32.mrf.mxu1 }
 0x133   : > { %v4258_v47 = vadd.f32 %v3005_v41, %v3004_v31  ;;  %v3094_v54 = vadd.f32 %v3093_v42, %v3092_v32  ;;  %v3757_v31 = vld [vmem:[%s3836_s13 + $0x450] ss:$36 sps:$4 sm:$0xff]   ;;  %v3761_v32 = vld [vmem:[%s3836_s13 + $0x458] ss:$36 sps:$4 sm:$0xff]   ;;  %s2715_s13 = sshll.u32 %s4734_s19, 3 }
 0x134   : > { %v3007_v49 = vpop.f32.mrf.mxu0  ;;  %v3095_v52 = vpop.f32.mrf.mxu1  ;;  %2326 = vmatmul.mubr.bf16.gmra.mxu1 %v3747_v36  ;;  %3446 = vmatmul.mubr.bf16.gmra.mxu0 %v3751_v37  ;;  %s4531_s5 = scalar_lea.vmem %s4709_s3, %s2715_s13  ;;  %s4556_s7 = scalar_lea.vmem %s4710_s4, %s2715_s13 }
 0x135   : > { %v4260_v53 = vadd.f32 %v3094_v54, %v1776_v43  ;;  %2333 = vmatprep.mubr.bf16.mxu1 %v3754_v39  ;;  %3449 = vmatprep.mubr.bf16.mxu0 %v3755_v40  ;;  %v1792_v40 = vadd.f32 %v4226_v56, %v4180_v48 }
 0x136   : > { %v3008_v55 = vpop.f32.mrf.mxu0  ;;  %v3096_v18 = vpop.f32.mrf.mxu1 }
 0x137   : > { %v4264_v57 = vadd.f32 %v3008_v55, %v3007_v49  ;;  %v3097_v58 = vadd.f32 %v3096_v18, %v3095_v52  ;;  %v1797_v55 = vadd.f32 %v4232_v1, %v4180_v48 }
 0x138   : > { %v3010_v63 = vpop.f32.mrf.mxu0  ;;  %v3098_v0 = vpop.f32.mrf.mxu1 }
 0x139   : > { %v4268_v5 = vadd.f32 %v3097_v58, %v1781_v6 }
 0x13a   : > { %v3011_v8 = vpop.f32.mrf.mxu0  ;;  %v3099_v11 = vpop.f32.mrf.mxu1 }
 0x13b   : > { %v4274_v15 = vadd.f32 %v3011_v8, %v3010_v63  ;;  %v3100_v14 = vadd.f32 %v3099_v11, %v3098_v0 }
 0x13c   : > { %v3013_v16 = vpop.f32.mrf.mxu0  ;;  %v3101_v17 = vpop.f32.mrf.mxu1  ;;  %2334 = vmatmul.mubr.bf16.gmra.mxu1 %v3752_v28  ;;  %3450 = vmatmul.mubr.bf16.gmra.mxu0 %v3756_v4  ;;  %v1800_v4 = vadd.f32 %v4242_v20, %v4180_v48 }
 0x13d   : > { %v4276_v34 = vadd.f32 %v3100_v14, %v1784_v60  ;;  %2341 = vmatprep.mubr.bf16.mxu1 %v3759_v50  ;;  %3453 = vmatprep.mubr.bf16.mxu0 %v3760_v7 }
 0x13e   : > { %v3014_v21 = vpop.f32.mrf.mxu0  ;;  %v3102_v23 = vpop.f32.mrf.mxu1 }
 0x13f   : > { %v4280_v26 = vadd.f32 %v3014_v21, %v3013_v16  ;;  %v3103_v30 = vadd.f32 %v3102_v23, %v3101_v17  ;;  %v1805_v16 = vadd.f32 %v4248_v27, %v4180_v48 }
 0x140   : > { %v3016_v44 = vpop.f32.mrf.mxu0  ;;  %v3104_v2 = vpop.f32.mrf.mxu1 }
 0x141   : > { %v4284_v36 = vadd.f32 %v3103_v30, %v1789_v25 }
 0x142   : > { %v3017_v37 = vpop.f32.mrf.mxu0  ;;  %v3105_v39 = vpop.f32.mrf.mxu1 }
 0x143   : > { %v4288_v41 = vadd.f32 %v3017_v37, %v3016_v44  ;;  %v3106_v42 = vadd.f32 %v3105_v39, %v3104_v2 }
 0x144   : > { %v3019_v43 = vpop.f32.mrf.mxu0  ;;  %v3107_v54 = vpop.f32.mrf.mxu1  ;;  %2342 = vmatmul.mubr.bf16.gmra.mxu1 %v3757_v31  ;;  %3454 = vmatmul.mubr.bf16.gmra.mxu0 %v3761_v32  ;;  %v1808_v31 = vadd.f32 %v4258_v47, %v4180_v48 }
 0x145   : > { %v4290_v38 = vadd.f32 %v3106_v42, %v1792_v40 }
 0x146   : > { %v3020_v49 = vpop.f32.mrf.mxu0  ;;  %v3108_v52 = vpop.f32.mrf.mxu1 }
 0x147   : > { %v4294_v18 = vadd.f32 %v3020_v49, %v3019_v43  ;;  %v3109_v6 = vadd.f32 %v3108_v52, %v3107_v54 }
 0x148   : > { %v3022_v58 = vpop.f32.mrf.mxu0  ;;  %v3110_v63 = vpop.f32.mrf.mxu1 }
 0x149   : > { %v4296_v56 = vadd.f32 %v3109_v6, %v1797_v55 }
 0x14a   : > { %v3023_v0 = vpop.f32.mrf.mxu0  ;;  %v3111_v28 = vpop.f32.mrf.mxu1 }
 0x14b   : > { %v4300_v50 = vadd.f32 %v3023_v0, %v3022_v58  ;;  %v3112_v7 = vadd.f32 %v3111_v28, %v3110_v63 }
 0x14c   : > { %v3113_v8 = vpop.f32.mrf.mxu1  ;;  %v3177_v11 = vpop.f32.mrf.mxu0 }
 0x14d   : > { %v4302_v60 = vadd.f32 %v3112_v7, %v1800_v4 }
 0x14e   : > { %v3114_v1 = vpop.f32.mrf.mxu1  ;;  %v3178_v14 = vpop.f32.mrf.mxu0 }
 0x14f   : > { %v3115_v17 = vadd.f32 %v3114_v1, %v3113_v8  ;;  %v3179_v21 = vadd.f32 %v3178_v14, %v3177_v11 }
 0x150   : > { %v3116_v23 = vpop.f32.mrf.mxu1  ;;  %v3180_v25 = vpop.f32.mrf.mxu0 }
 0x151   : > { %v4306_v30 = vadd.f32 %v3115_v17, %v1805_v16  ;;  %v4309_v20 = vadd.f32 %v3179_v21, %v4188_v62  ;;  %v1813_v62 = vadd.f32 %v4264_v57, %v4180_v48 }
 0x152   : > { %v3117_v44 = vpop.f32.mrf.mxu1  ;;  %v3181_v2 = vpop.f32.mrf.mxu0 }
 0x153   : > { %v3118_v32 = vadd.f32 %v3117_v44, %v3116_v23  ;;  %v3182_v37 = vadd.f32 %v3181_v2, %v3180_v25 }
 0x154   : > { %v3119_v39 = vpop.f32.mrf.mxu1  ;;  %v3183_v40 = vpop.f32.mrf.mxu0 }
 0x155   : > { %v4313_v42 = vadd.f32 %v3118_v32, %v1808_v31  ;;  %v4316_v27 = vadd.f32 %v3182_v37, %v4196_v9  ;;  %v1816_v9 = vadd.f32 %v4274_v15, %v4180_v48 }
 0x156   : > { %v3120_v43 = vpop.f32.mrf.mxu1  ;;  %v3184_v54 = vpop.f32.mrf.mxu0 }
 0x157   : > { %v3121_v49 = vadd.f32 %v3120_v43, %v3119_v39  ;;  %v3185_v52 = vadd.f32 %v3184_v54, %v3183_v40 }
 0x158   : > { %v3122_v55 = vpop.f32.mrf.mxu1  ;;  %v3186_v6 = vpop.f32.mrf.mxu0 }
 0x159   : > { %v4320_v58 = vadd.f32 %v3121_v49, %v1813_v62  ;;  %v4323_v47 = vadd.f32 %v3185_v52, %v4204_v22  ;;  %v1821_v22 = vadd.f32 %v4280_v26, %v4180_v48 }
 0x15a   : > { %v3123_v63 = vpop.f32.mrf.mxu1  ;;  %v3187_v0 = vpop.f32.mrf.mxu0 }
 0x15b   : > { %v3124_v28 = vadd.f32 %v3123_v63, %v3122_v55  ;;  %v3188_v4 = vadd.f32 %v3187_v0, %v3186_v6 }
 0x15c   : > { %v3125_v7 = vpop.f32.mrf.mxu1  ;;  %v3189_v8 = vpop.f32.mrf.mxu0 }
 0x15d   : > { %v4327_v11 = vadd.f32 %v3124_v28, %v1816_v9  ;;  %v4330_v57 = vadd.f32 %v3188_v4, %v4212_v33  ;;  %v1824_v33 = vadd.f32 %v4288_v41, %v4180_v48 }
 0x15e   : > { %v3126_v1 = vpop.f32.mrf.mxu1  ;;  %v3190_v14 = vpop.f32.mrf.mxu0 }
 0x15f   : > { %v3127_v16 = vadd.f32 %v3126_v1, %v3125_v7  ;;  %v3191_v17 = vadd.f32 %v3190_v14, %v3189_v8 }
 0x160   : > { %v3128_v21 = vpop.f32.mrf.mxu1  ;;  %v3192_v23 = vpop.f32.mrf.mxu0 }
 0x161   : > { %v4334_v25 = vadd.f32 %v3127_v16, %v1821_v22  ;;  %v4337_v15 = vadd.f32 %v3191_v17, %v4220_v46  ;;  %v1829_v46 = vadd.f32 %v4294_v18, %v4180_v48 }
 0x162   : > { %v3129_v44 = vpop.f32.mrf.mxu1  ;;  %v3193_v2 = vpop.f32.mrf.mxu0 }
 0x163   : > { %v3130_v31 = vadd.f32 %v3129_v44, %v3128_v21  ;;  %v3194_v32 = vadd.f32 %v3193_v2, %v3192_v23 }
 0x164   : > { %v3131_v37 = vpop.f32.mrf.mxu1  ;;  %v3195_v39 = vpop.f32.mrf.mxu0 }
 0x165   : > { %v4341_v40 = vadd.f32 %v3130_v31, %v1824_v33  ;;  %v4344_v26 = vadd.f32 %v3194_v32, %v4228_v59  ;;  %v1832_v59 = vadd.f32 %v4300_v50, %v4180_v48 }
 0x166   : > { %v3132_v43 = vpop.f32.mrf.mxu1  ;;  %v3196_v54 = vpop.f32.mrf.mxu0 }
 0x167   : > { %v3133_v62 = vadd.f32 %v3132_v43, %v3131_v37  ;;  %v3197_v49 = vadd.f32 %v3196_v54, %v3195_v39 }
 0x168   : > { %v3134_v52 = vpop.f32.mrf.mxu1  ;;  %v3198_v55 = vpop.f32.mrf.mxu0 }
 0x169   : > { %v4348_v6 = vadd.f32 %v3133_v62, %v1829_v46  ;;  %v4351_v41 = vadd.f32 %v3197_v49, %v4236_v10  ;;  %v1837_v10 = vadd.f32 %v4131_v51, %v4180_v48 }
 0x16a   : > { %v3135_v63 = vpop.f32.mrf.mxu1  ;;  %v3199_v0 = vpop.f32.mrf.mxu0 }
 0x16b   : > { %v3136_v9 = vadd.f32 %v3135_v63, %v3134_v52  ;;  %v3200_v28 = vadd.f32 %v3199_v0, %v3198_v55 }
 0x16c   : > { %v3137_v4 = vpop.f32.mrf.mxu1  ;;  %v3201_v7 = vpop.f32.mrf.mxu0 }
 0x16d   : > { %v4355_v8 = vadd.f32 %v3136_v9, %v1832_v59  ;;  %v4358_v18 = vadd.f32 %v3200_v28, %v4244_v24  ;;  %v1840_v24 = vadd.f32 %v4139_v61, %v4180_v48 }
 0x16e   : > { %v3138_v1 = vpop.f32.mrf.mxu1  ;;  %v3202_v14 = vpop.f32.mrf.mxu0 }
 0x16f   : > { %v3139_v22 = vadd.f32 %v3138_v1, %v3137_v4  ;;  %v3203_v16 = vadd.f32 %v3202_v14, %v3201_v7 }
 0x170   : > { %v3140_v17 = vpop.f32.mrf.mxu1  ;;  %v3204_v21 = vpop.f32.mrf.mxu0 }
 0x171   : > { %v4362_v23 = vadd.f32 %v3139_v22, %v1837_v10  ;;  %v4365_v50 = vadd.f32 %v3203_v16, %v4252_v12  ;;  %v1845_v12 = vadd.f32 %v4143_v3, %v4180_v48 }
 0x172   : > { %v3141_v44 = vpop.f32.mrf.mxu1  ;;  %v3205_v2 = vpop.f32.mrf.mxu0 }
 0x173   : > { %v3142_v33 = vadd.f32 %v3141_v44, %v3140_v17  ;;  %v3206_v31 = vadd.f32 %v3205_v2, %v3204_v21 }
 0x174   : > { %v3143_v32 = vpop.f32.mrf.mxu1  ;;  %v3207_v37 = vpop.f32.mrf.mxu0 }
 0x175   : > { %v4369_v39 = vadd.f32 %v3142_v33, %v1840_v24  ;;  %v4372_v51 = vadd.f32 %v3206_v31, %v4260_v53  ;;  %v1848_v53 = vadd.f32 %v4151_v13, %v4180_v48 }
 0x176   : > { %v3144_v43 = vpop.f32.mrf.mxu1  ;;  %v3208_v54 = vpop.f32.mrf.mxu0 }
 0x177   : > { %v3145_v46 = vadd.f32 %v3144_v43, %v3143_v32  ;;  %v3209_v62 = vadd.f32 %v3208_v54, %v3207_v37 }
 0x178   : > { %v3146_v49 = vpop.f32.mrf.mxu1  ;;  %v3210_v52 = vpop.f32.mrf.mxu0 }
 0x179   : > { %v4376_v55 = vadd.f32 %v3145_v46, %v1845_v12  ;;  %v4379_v61 = vadd.f32 %v3209_v62, %v4268_v5  ;;  %v1853_v5 = vadd.f32 %v4155_v19, %v4180_v48 }
 0x17a   : > { %v3147_v63 = vpop.f32.mrf.mxu1  ;;  %v3211_v0 = vpop.f32.mrf.mxu0 }
 0x17b   : > { %v3148_v59 = vadd.f32 %v3147_v63, %v3146_v49  ;;  %v3212_v9 = vadd.f32 %v3211_v0, %v3210_v52 }
 0x17c   : > { %v3149_v28 = vpop.f32.mrf.mxu1  ;;  %v3213_v4 = vpop.f32.mrf.mxu0 }
 0x17d   : > { %v4383_v7 = vadd.f32 %v3148_v59, %v1848_v53  ;;  %v4386_v3 = vadd.f32 %v3212_v9, %v4276_v34  ;;  %v1856_v34 = vadd.f32 %v4163_v29, %v4180_v48 }
 0x17e   : > { %v3150_v1 = vpop.f32.mrf.mxu1  ;;  %v3214_v14 = vpop.f32.mrf.mxu0 }
 0x17f   : > { %v3151_v10 = vadd.f32 %v3150_v1, %v3149_v28  ;;  %v3215_v22 = vadd.f32 %v3214_v14, %v3213_v4 }
 0x180   : > { %v3152_v16 = vpop.f32.mrf.mxu1  ;;  %v3216_v17 = vpop.f32.mrf.mxu0 }
 0x181   : > { %v4390_v21 = vadd.f32 %v3151_v10, %v1853_v5  ;;  %v4393_v13 = vadd.f32 %v3215_v22, %v4284_v36  ;;  %v1861_v36 = vadd.f32 %v4167_v35, %v4180_v48 }
 0x182   : > { %v3153_v44 = vpop.f32.mrf.mxu1  ;;  %v3217_v2 = vpop.f32.mrf.mxu0 }
 0x183   : > { %v3154_v24 = vadd.f32 %v3153_v44, %v3152_v16  ;;  %v3218_v33 = vadd.f32 %v3217_v2, %v3216_v17 }
 0x184   : > { %v3155_v31 = vpop.f32.mrf.mxu1  ;;  %v3219_v32 = vpop.f32.mrf.mxu0 }
 0x185   : > { %v4397_v37 = vadd.f32 %v3154_v24, %v1856_v34  ;;  %v4400_v19 = vadd.f32 %v3218_v33, %v4290_v38  ;;  %v1864_v38 = vadd.f32 %v4175_v45, %v4180_v48 }
 0x186   : > { %v3156_v43 = vpop.f32.mrf.mxu1  ;;  %v3220_v54 = vpop.f32.mrf.mxu0 }
 0x187   : > { %v3157_v12 = vadd.f32 %v3156_v43, %v3155_v31  ;;  %v3221_v46 = vadd.f32 %v3220_v54, %v3219_v32 }
 0x188   : > { %v3158_v62 = vpop.f32.mrf.mxu1  ;;  %v3222_v49 = vpop.f32.mrf.mxu0 }
 0x189   : > { %v4404_v52 = vadd.f32 %v3157_v12, %v1861_v36  ;;  %v4407_v29 = vadd.f32 %v3221_v46, %v4296_v56 }
 0x18a   : > { %v3159_v63 = vpop.f32.mrf.mxu1  ;;  %v3223_v0 = vpop.f32.mrf.mxu0 }
 0x18b   : > { %v3160_v53 = vadd.f32 %v3159_v63, %v3158_v62  ;;  %v3224_v59 = vadd.f32 %v3223_v0, %v3222_v49 }
 0x18c   : > { %v3225_v9 = vpop.f32.mrf.mxu0  ;;  %v4411_v28 = vpop.f32.mrf.mxu1 }
 0x18d   : > { %v4413_v35 = vadd.f32 %v3160_v53, %v1864_v38  ;;  %v4416_v4 = vadd.f32 %v3224_v59, %v4302_v60 }
 0x18e   : > { %v3226_v1 = vpop.f32.mrf.mxu0  ;;  %v4418_v14 = vpop.f32.mrf.mxu1 }
 0x18f   : > { %v3227_v56 = vadd.f32 %v3226_v1, %v3225_v9 }
 0x190   : > { %v3228_v5 = vpop.f32.mrf.mxu0  ;;  %v4420_v10 = vpop.f32.mrf.mxu1 }
 0x191   : > { %v4423_v22 = vadd.f32 %v3227_v56, %v4306_v30 }
 0x192   : > { %v3229_v45 = vpop.f32.mrf.mxu0  ;;  %v4425_v48 = vpop.f32.mrf.mxu1 }
 0x193   : > { %v3230_v16 = vadd.f32 %v3229_v45, %v3228_v5 }
 0x194   : > { %v3231_v17 = vpop.f32.mrf.mxu0  ;;  %v4427_v44 = vpop.f32.mrf.mxu1 }
 0x195   : > { %v4430_v60 = vadd.f32 %v3230_v16, %v4313_v42 }
 0x196   : > { %v3232_v2 = vpop.f32.mrf.mxu0  ;;  %v4432_v34 = vpop.f32.mrf.mxu1 }
 0x197   : > { %v3233_v24 = vadd.f32 %v3232_v2, %v3231_v17 }
 0x198   : > { %v3234_v33 = vpop.f32.mrf.mxu0  ;;  %v4434_v31 = vpop.f32.mrf.mxu1 }
 0x199   : > { %v4437_v30 = vadd.f32 %v3233_v24, %v4320_v58 }
 0x19a   : > { %v3235_v32 = vpop.f32.mrf.mxu0  ;;  %v4439_v43 = vpop.f32.mrf.mxu1 }
 0x19b   : > { %v3236_v54 = vadd.f32 %v3235_v32, %v3234_v33 }
 0x19c   : > { %v3237_v36 = vpop.f32.mrf.mxu0  ;;  %v4441_v12 = vpop.f32.mrf.mxu1 }
 0x19d   : > { %v4444_v42 = vadd.f32 %v3236_v54, %v4327_v11 }
 0x19e   : > { %v3238_v46 = vpop.f32.mrf.mxu0  ;;  %v4446_v62 = vpop.f32.mrf.mxu1 }
 0x19f   : > { %v3239_v49 = vadd.f32 %v3238_v46, %v3237_v36 }
 0x1a0   : > { %v3240_v63 = vpop.f32.mrf.mxu0  ;;  %v4448_v0 = vpop.f32.mrf.mxu1 }
 0x1a1   : > { %v4451_v58 = vadd.f32 %v3239_v49, %v4334_v25 }
 0x1a2   : > { %v3241_v38 = vpop.f32.mrf.mxu0  ;;  %v4453_v53 = vpop.f32.mrf.mxu1 }
 0x1a3   : > { %4711 = vst [vmem:[#allocation2_spill] sm:$0xff] %v4451_v58  ;;  %v3242_v59 = vadd.f32 %v3241_v38, %v3240_v63 }
 0x1a4   : > { %v3243_v9 = vpop.f32.mrf.mxu0  ;;  %v4455_v1 = vpop.f32.mrf.mxu1 }
 0x1a5   : > { %v4458_v11 = vadd.f32 %v3242_v59, %v4341_v40 }
 0x1a6   : > { %v3244_v56 = vpop.f32.mrf.mxu0  ;;  %v4460_v5 = vpop.f32.mrf.mxu1 }
 0x1a7   : > { %4712 = vst [vmem:[#allocation3_spill] sm:$0xff] %v4458_v11  ;;  %v3245_v45 = vadd.f32 %v3244_v56, %v3243_v9 }
 0x1a8   : > { %v3246_v16 = vpop.f32.mrf.mxu0  ;;  %v4462_v17 = vpop.f32.mrf.mxu1 }
 0x1a9   : > { %v4465_v25 = vadd.f32 %v3245_v45, %v4348_v6 }
 0x1aa   : > { %v3247_v2 = vpop.f32.mrf.mxu0  ;;  %v4467_v24 = vpop.f32.mrf.mxu1 }
 0x1ab   : > { %4713 = vst [vmem:[#allocation4_spill] sm:$0xff] %v4465_v25  ;;  %v3248_v33 = vadd.f32 %v3247_v2, %v3246_v16 }
 0x1ac   : > { %v3249_v32 = vpop.f32.mrf.mxu0  ;;  %v4469_v54 = vpop.f32.mrf.mxu1 }
 0x1ad   : > { %v4472_v40 = vadd.f32 %v3248_v33, %v4355_v8 }
 0x1ae   : > { %v3250_v36 = vpop.f32.mrf.mxu0  ;;  %v4474_v46 = vpop.f32.mrf.mxu1 }
 0x1af   : > { %4714 = vst [vmem:[#allocation5_spill] sm:$0xff] %v4472_v40  ;;  %v3251_v49 = vadd.f32 %v3250_v36, %v3249_v32 }
 0x1b0   : > { %v3252_v63 = vpop.f32.mrf.mxu0  ;;  %v4476_v38 = vpop.f32.mrf.mxu1 }
 0x1b1   : > { %v4479_v6 = vadd.f32 %v3251_v49, %v4362_v23 }
 0x1b2   : > { %v3253_v59 = vpop.f32.mrf.mxu0  ;;  %v4481_v9 = vpop.f32.mrf.mxu1 }
 0x1b3   : > { %4715 = vst [vmem:[#allocation6_spill] sm:$0xff] %v4479_v6  ;;  %v3254_v56 = vadd.f32 %v3253_v59, %v3252_v63 }
 0x1b4   : > { %v3255_v45 = vpop.f32.mrf.mxu0  ;;  %v4483_v16 = vpop.f32.mrf.mxu1 }
 0x1b5   : > { %v4486_v8 = vadd.f32 %v3254_v56, %v4369_v39 }
 0x1b6   : > { %v3256_v2 = vpop.f32.mrf.mxu0  ;;  %v4488_v33 = vpop.f32.mrf.mxu1 }
 0x1b7   : > { %4716 = vst [vmem:[#allocation7_spill] sm:$0xff] %v4486_v8  ;;  %v3257_v32 = vadd.f32 %v3256_v2, %v3255_v45 }
 0x1b8   : > { %v3258_v36 = vpop.f32.mrf.mxu0  ;;  %v4490_v11 = vpop.f32.mrf.mxu1 }
 0x1b9   : > { %v4493_v23 = vadd.f32 %v3257_v32, %v4376_v55 }
 0x1ba   : > { %v3259_v49 = vpop.f32.mrf.mxu0  ;;  %v4495_v6 = vpop.f32.mrf.mxu1 }
 0x1bb   : > { %4717 = vst [vmem:[#allocation8_spill] sm:$0xff] %v4493_v23  ;;  %v3260_v63 = vadd.f32 %v3259_v49, %v3258_v36 }
 0x1bc   : > { %v3261_v59 = vpop.f32.mrf.mxu0  ;;  %v4497_v40 = vpop.f32.mrf.mxu1 }
 0x1bd   : > { %v4500_v39 = vadd.f32 %v3260_v63, %v4383_v7 }
 0x1be   : > { %v3262_v56 = vpop.f32.mrf.mxu0  ;;  %v4502_v8 = vpop.f32.mrf.mxu1 }
 0x1bf   : > { %4718 = vst [vmem:[#allocation9_spill] sm:$0xff] %v4500_v39  ;;  %v3263_v45 = vadd.f32 %v3262_v56, %v3261_v59  ;;  %v3297_v59 = vadd.f32 %v4432_v34, %v4427_v44  ;;  %v3300_v44 = vadd.f32 %v4439_v43, %v4434_v31  ;;  %v2511_v43 = vld [vmem:[%s4531_s5] sm:$0xff] }
 0x1c0   : > { %v3264_v2 = vpop.f32.mrf.mxu0  ;;  %v4504_v58 = vpop.f32.mrf.mxu1 }
 0x1c1   : > { %v4507_v55 = vadd.f32 %v3263_v45, %v4390_v21 }
 0x1c2   : > { %v3265_v32 = vpop.f32.mrf.mxu0  ;;  %v4509_v23 = vpop.f32.mrf.mxu1 }
 0x1c3   : > { %4719 = vst [vmem:[#allocation10_spill] sm:$0xff] %v4507_v55  ;;  %v3266_v36 = vadd.f32 %v3265_v32, %v3264_v2  ;;  %v3291_v2 = vadd.f32 %v4418_v14, %v4411_v28 }
 0x1c4   : > { %v3267_v49 = vpop.f32.mrf.mxu0  ;;  %v4511_v25 = vpop.f32.mrf.mxu1 }
 0x1c5   : > { %v4514_v7 = vadd.f32 %v3266_v36, %v4397_v37 }
 0x1c6   : > { %v3268_v63 = vpop.f32.mrf.mxu0  ;;  %v4516_v39 = vpop.f32.mrf.mxu1 }
 0x1c7   : > { %4720 = vst [vmem:[#allocation11_spill] sm:$0xff] %v4514_v7  ;;  %v3269_v56 = vadd.f32 %v3268_v63, %v3267_v49  ;;  %v2232_v49 = vadd.f32 %v3297_v59, %v4323_v47  ;;  %v2513_v63 = vld [vmem:[%s4531_s5 + $0x10] sm:$0xff]  ;;  %v3309_v47 = vadd.f32 %v4460_v5, %v4455_v1  ;;  %v2235_v59 = vadd.f32 %v3300_v44, %v4330_v57 }
 0x1c8   : > { %v3270_v21 = vpop.f32.mrf.mxu0  ;;  %v4521_v45 = vpop.f32.mrf.mxu1  ;;  %v3303_v1 = vadd.f32 %v4446_v62, %v4441_v12  ;;  %v3306_v62 = vadd.f32 %v4453_v53, %v4448_v0  ;;  %v3321_v0 = vadd.f32 %v4488_v33, %v4483_v16 }
 0x1c9   : > { %v4526_v32 = vadd.f32 %v3269_v56, %v4404_v52  ;;  %v3294_v52 = vadd.f32 %v4425_v48, %v4420_v10  ;;  %v2248_v12 = vadd.f32 %v3309_v47, %v4351_v41 }
 0x1ca   : > { %v3271_v37 = vpop.f32.mrf.mxu0  ;;  %v4533_v36 = vpop.f32.mrf.mxu1 }
 0x1cb   : > { %4721 = vst [vmem:[#allocation12_spill] sm:$0xff] %v4526_v32  ;;  %v3272_v34 = vadd.f32 %v3271_v37, %v3270_v21  ;;  %v2224_v32 = vadd.f32 %v3291_v2, %v4309_v20  ;;  %v2514_v21 = vld [vmem:[%s4531_s5 + $0x18] sm:$0xff]  ;;  %v2227_v2 = vadd.f32 %v3294_v52, %v4316_v27 }
 0x1cc   : > { %v4540_v28 = vpop.f32.mrf.mxu1  ;;  %v3427_v14 = vpop.f32.mrf.mxu0 }
 0x1cd   : > { %v4544_v56 = vadd.f32 %v3272_v34, %v4413_v35  ;;  %v2393_v7 = vadd.f32 %v3427_v14, %v2232_v49  ;;  %v2512_v34 = vld [vmem:[%s4531_s5 + $0x8] sm:$0xff] }
 0x1ce   : > { %v4547_v55 = vpop.f32.mrf.mxu1  ;;  %v2384_v31 = vpop.f32.mrf.mxu0 }
 0x1cf   : > { %v2545_v10 = vadd.f32 %v2513_v63, %v2393_v7  ;;  %v2385_v48 = vadd.f32 %v2384_v31, %v2224_v32  ;;  %v3312_v32 = vadd.f32 %v4467_v24, %v4462_v17  ;;  %v2517_v31 = vld [vmem:[%s4531_s5 + $0x30] sm:$0xff] }
 0x1d0   : > { %v4558_v35 = vpop.f32.mrf.mxu1  ;;  %v3428_v20 = vpop.f32.mrf.mxu0 }
 0x1d1   : > { %v2577_v5 = vmax.f32 %v2545_v10, 0.0  ;;  %v2543_v7 = vadd.f32 %v2511_v43, %v2385_v48  ;;  %v2396_v57 = vadd.f32 %v3428_v20, %v2235_v59  ;;  %v2240_v10 = vadd.f32 %v3303_v1, %v4337_v15  ;;  %v2515_v20 = vld [vmem:[%s4531_s5 + $0x20] sm:$0xff] }
 0x1d2   : > { %v4566_v37 = vpop.f32.mrf.mxu1  ;;  %v2387_v44 = vpop.f32.mrf.mxu0  ;;  %v2251_v41 = vadd.f32 %v3312_v32, %v4358_v18  ;;  %v2243_v15 = vadd.f32 %v3306_v62, %v4344_v26  ;;  %v3315_v1 = vadd.f32 %v4474_v46, %v4469_v54  ;;  %v2264_v54 = vadd.f32 %v3321_v0, %v4379_v61  ;;  %v2521_v62 = vld [vmem:[%s4531_s5 + $0x50] sm:$0xff]  ;;  %v2522_v0 = vld [vmem:[%s4531_s5 + $0x58] sm:$0xff] }
 0x1d3   : > { %2609 = vst [vmem:[%s4556_s7 + $0x10] sm:$0xff] %v2577_v5  ;;  %v2575_v49 = vmax.f32 %v2543_v7, 0.0  ;;  %v2546_v14 = vadd.f32 %v2514_v21, %v2396_v57  ;;  %v2388_v27 = vadd.f32 %v2387_v44, %v2227_v2  ;;  %v2518_v7 = vld [vmem:[%s4531_s5 + $0x38] sm:$0xff]  ;;  %v3324_v57 = vadd.f32 %v4495_v6, %v4490_v11 }
 0x1d4   : > { %v4573_v52 = vpop.f32.mrf.mxu1  ;;  %v3431_v63 = vpop.f32.mrf.mxu0  ;;  %v3318_v46 = vadd.f32 %v4481_v9, %v4476_v38  ;;  %v3333_v38 = vadd.f32 %v4516_v39, %v4511_v25 }
 0x1d5   : > { %2607 = vst [vmem:[%s4556_s7] sm:$0xff] %v2575_v49  ;;  %v2578_v17 = vmax.f32 %v2546_v14, 0.0  ;;  %v2544_v24 = vadd.f32 %v2512_v34, %v2388_v27  ;;  %v2409_v43 = vadd.f32 %v3431_v63, %v2248_v12  ;;  %v2516_v34 = vld [vmem:[%s4531_s5 + $0x28] sm:$0xff]  ;;  %v2267_v61 = vadd.f32 %v3324_v57, %v4386_v3 }
 0x1d6   : > { %v4578_v48 = vpop.f32.mrf.mxu1  ;;  %v2400_v59 = vpop.f32.mrf.mxu0 }
 0x1d7   : > { %2610 = vst [vmem:[%s4556_s7 + $0x18] sm:$0xff] %v2578_v17  ;;  %v2576_v53 = vmax.f32 %v2544_v24, 0.0  ;;  %v2549_v47 = vadd.f32 %v2517_v31, %v2409_v43  ;;  %v2401_v21 = vadd.f32 %v2400_v59, %v2240_v10  ;;  %v2256_v31 = vadd.f32 %v3315_v1, %v4365_v50  ;;  %v2519_v43 = vld [vmem:[%s4531_s5 + $0x40] sm:$0xff] }
 0x1d8   : > { %v4585_v2 = vpop.f32.mrf.mxu1  ;;  %v3432_v5 = vpop.f32.mrf.mxu0  ;;  %v2259_v50 = vadd.f32 %v3318_v46, %v4372_v51 }
 0x1d9   : > { %2608 = vst [vmem:[%s4556_s7 + $0x8] sm:$0xff] %v2576_v53  ;;  %v2581_v18 = vmax.f32 %v2549_v47, 0.0  ;;  %v2547_v16 = vadd.f32 %v2515_v20, %v2401_v21  ;;  %v2412_v33 = vadd.f32 %v3432_v5, %v2251_v41  ;;  %v3327_v53 = vadd.f32 %v4502_v8, %v4497_v40 }
 0x1da   : > { %v4594_v32 = vpop.f32.mrf.mxu1  ;;  %v2403_v44 = vpop.f32.mrf.mxu0  ;;  %v3336_v47 = vadd.f32 %v4533_v36, %v4521_v45  ;;  %v2280_v40 = vadd.f32 %v3333_v38, %v4407_v29  ;;  %v3330_v8 = vadd.f32 %v4509_v23, %v4504_v58  ;;  %v3345_v29 = vadd.f32 %v4578_v48, %v4573_v52 }
 0x1db   : > { %2613 = vst [vmem:[%s4556_s7 + $0x30] sm:$0xff] %v2581_v18  ;;  %v2579_v49 = vmax.f32 %v2547_v16, 0.0  ;;  %v2550_v26 = vadd.f32 %v2518_v7, %v2412_v33  ;;  %v2404_v14 = vadd.f32 %v2403_v44, %v2243_v15  ;;  %v2520_v7 = vld [vmem:[%s4531_s5 + $0x48] sm:$0xff]  ;;  %v2525_v33 = vld [vmem:[%s4531_s5 + $0x70] sm:$0xff]  ;;  %v2272_v44 = vadd.f32 %v3327_v53, %v4393_v13  ;;  %v2527_v53 = vld [vmem:[%s4531_s5 + $0x80] sm:$0xff] }
 0x1dc   : > { %v4601_v27 = vpop.f32.mrf.mxu1  ;;  %v3435_v12 = vpop.f32.mrf.mxu0  ;;  %v3339_v13 = vadd.f32 %v4547_v55, %v4540_v28  ;;  %v3348_v48 = vadd.f32 %v4594_v32, %v4585_v2  ;;  %v2296_v55 = vadd.f32 %v3345_v29, %v4437_v30  ;;  %v3342_v28 = vadd.f32 %v4566_v37, %v4558_v35 }
 0x1dd   : > { %2611 = vst [vmem:[%s4556_s7 + $0x20] sm:$0xff] %v2579_v49  ;;  %v2582_v11 = vmax.f32 %v2550_v26, 0.0  ;;  %v2548_v6 = vadd.f32 %v2516_v34, %v2404_v14  ;;  %v2425_v63 = vadd.f32 %v3435_v12, %v2264_v54  ;;  %v2523_v26 = vld [vmem:[%s4531_s5 + $0x60] sm:$0xff]  ;;  %v2283_v14 = vadd.f32 %v3336_v47, %v4416_v4 }
 0x1de   : > { %v4606_v17 = vpop.f32.mrf.mxu1  ;;  %v2416_v24 = vpop.f32.mrf.mxu0 }
 0x1df   : > { %2614 = vst [vmem:[%s4556_s7 + $0x38] sm:$0xff] %v2582_v11  ;;  %v2580_v9 = vmax.f32 %v2548_v6, 0.0  ;;  %v2553_v10 = vadd.f32 %v2521_v62, %v2425_v63  ;;  %v2417_v59 = vadd.f32 %v2416_v24, %v2256_v31  ;;  %v2526_v62 = vld [vmem:[%s4531_s5 + $0x78] sm:$0xff]  ;;  %v2275_v11 = vadd.f32 %v3330_v8, %v4400_v19  ;;  %v2524_v24 = vld [vmem:[%s4531_s5 + $0x68] sm:$0xff] }
 0x1e0   : > { %v4613_v20 = vpop.f32.mrf.mxu1  ;;  %v3436_v41 = vpop.f32.mrf.mxu0 }
 0x1e1   : > { %2612 = vst [vmem:[%s4556_s7 + $0x28] sm:$0xff] %v2580_v9  ;;  %v2585_v3 = vmax.f32 %v2553_v10, 0.0  ;;  %v2551_v25 = vadd.f32 %v2519_v43, %v2417_v59  ;;  %v2428_v39 = vadd.f32 %v3436_v41, %v2267_v61  ;;  %v2529_v10 = vld [vmem:[%s4531_s5 + $0x90] sm:$0xff]  ;;  %v2288_v41 = vadd.f32 %v3339_v13, %v4423_v22 }
 0x1e2   : > { %v4622_v21 = vpop.f32.mrf.mxu1  ;;  %v2419_v5 = vpop.f32.mrf.mxu0  ;;  %v3351_v22 = vadd.f32 %v4606_v17, %v4601_v27 }
 0x1e3   : > { %2617 = vst [vmem:[%s4556_s7 + $0x50] sm:$0xff] %v2585_v3  ;;  %v2583_v15 = vmax.f32 %v2551_v25, 0.0  ;;  %v2554_v51 = vadd.f32 %v2522_v0, %v2428_v39  ;;  %v2420_v1 = vadd.f32 %v2419_v5, %v2259_v50  ;;  %v2299_v3 = vadd.f32 %v3348_v48, %v4444_v42  ;;  %v2530_v5 = vld [vmem:[%s4531_s5 + $0x98] sm:$0xff] }
 0x1e4   : > { %v3355_v18 = vpop.f32.mrf.mxu1  ;;  %v3439_v16 = vpop.f32.mrf.mxu0  ;;  %v3354_v27 = vadd.f32 %v4622_v21, %v4613_v20 }
 0x1e5   : > { %2615 = vst [vmem:[%s4556_s7 + $0x40] sm:$0xff] %v2583_v15  ;;  %v2586_v45 = vmax.f32 %v2554_v51, 0.0  ;;  %v2552_v36 = vadd.f32 %v2520_v7, %v2420_v1  ;;  %v2441_v57 = vadd.f32 %v3439_v16, %v2280_v40  ;;  %v2291_v7 = vadd.f32 %v3342_v28, %v4430_v60  ;;  %v4722_v60 = vld [vmem:[#allocation4_spill] sm:$0xff] }
 0x1e6   : > { %v3356_v34 = vpop.f32.mrf.mxu1  ;;  %v2432_v49 = vpop.f32.mrf.mxu0  ;;  %v4726_v28 = vld [vmem:[#allocation8_spill] sm:$0xff] }
 0x1e7   : > { %2618 = vst [vmem:[%s4556_s7 + $0x58] sm:$0xff] %v2586_v45  ;;  %v2584_v58 = vmax.f32 %v2552_v36, 0.0  ;;  %v2557_v23 = vadd.f32 %v2525_v33, %v2441_v57  ;;  %v2433_v54 = vadd.f32 %v2432_v49, %v2272_v44  ;;  %v3357_v30 = vadd.f32 %v3356_v34, %v3355_v18  ;;  %v2528_v18 = vld [vmem:[%s4531_s5 + $0x88] sm:$0xff]  ;;  %v2533_v44 = vld [vmem:[%s4531_s5 + $0xb0] sm:$0xff] }
 0x1e8   : > { %v3358_v46 = vpop.f32.mrf.mxu1  ;;  %v3440_v12 = vpop.f32.mrf.mxu0 }
 0x1e9   : > { %2616 = vst [vmem:[%s4556_s7 + $0x48] sm:$0xff] %v2584_v58  ;;  %v2589_v4 = vmax.f32 %v2557_v23, 0.0  ;;  %v2555_v6 = vadd.f32 %v2523_v26, %v2433_v54  ;;  %v2444_v52 = vadd.f32 %v3440_v12, %v2283_v14  ;;  %v2312_v36 = vadd.f32 %v3357_v30, %v4722_v60  ;;  %v4723_v14 = vld [vmem:[#allocation2_spill] sm:$0xff] }
 0x1ea   : > { %v3359_v63 = vpop.f32.mrf.mxu1  ;;  %v2435_v31 = vpop.f32.mrf.mxu0  ;;  %v2304_v29 = vadd.f32 %v3351_v22, %v4723_v14  ;;  %v2531_v54 = vld [vmem:[%s4531_s5 + $0xa0] sm:$0xff] }
 0x1eb   : > { %2621 = vst [vmem:[%s4556_s7 + $0x70] sm:$0xff] %v2589_v4  ;;  %v2587_v43 = vmax.f32 %v2555_v6, 0.0  ;;  %v2558_v61 = vadd.f32 %v2526_v62, %v2444_v52  ;;  %v2436_v19 = vadd.f32 %v2435_v31, %v2275_v11  ;;  %v3360_v1 = vadd.f32 %v3359_v63, %v3358_v46  ;;  %v4724_v46 = vld [vmem:[#allocation5_spill] sm:$0xff]  ;;  %v4725_v52 = vld [vmem:[#allocation3_spill] sm:$0xff] }
 0x1ec   : > { %v3361_v38 = vpop.f32.mrf.mxu1  ;;  %v3443_v9 = vpop.f32.mrf.mxu0  ;;  %v2534_v6 = vld [vmem:[%s4531_s5 + $0xb8] sm:$0xff]  ;;  %v2307_v48 = vadd.f32 %v3354_v27, %v4725_v52 }
 0x1ed   : > { %2619 = vst [vmem:[%s4556_s7 + $0x60] sm:$0xff] %v2587_v43  ;;  %v2590_v2 = vmax.f32 %v2558_v61, 0.0  ;;  %v2556_v32 = vadd.f32 %v2524_v24, %v2436_v19  ;;  %v2457_v59 = vadd.f32 %v3443_v9, %v2296_v55  ;;  %v2315_v12 = vadd.f32 %v3360_v1, %v4724_v46  ;;  %v2532_v55 = vld [vmem:[%s4531_s5 + $0xa8] sm:$0xff] }
 0x1ee   : > { %v3362_v0 = vpop.f32.mrf.mxu1  ;;  %v2448_v50 = vpop.f32.mrf.mxu0 }
 0x1ef   : > { %2622 = vst [vmem:[%s4556_s7 + $0x78] sm:$0xff] %v2590_v2  ;;  %v2588_v35 = vmax.f32 %v2556_v32, 0.0  ;;  %v2561_v37 = vadd.f32 %v2529_v10, %v2457_v59  ;;  %v2449_v25 = vadd.f32 %v2448_v50, %v2288_v41  ;;  %v3363_v63 = vadd.f32 %v3362_v0, %v3361_v38  ;;  %v2537_v50 = vld [vmem:[%s4531_s5 + $0xd0] sm:$0xff] }
 0x1f0   : > { %v3364_v39 = vpop.f32.mrf.mxu1  ;;  %v3444_v47 = vpop.f32.mrf.mxu0 }
 0x1f1   : > { %2620 = vst [vmem:[%s4556_s7 + $0x68] sm:$0xff] %v2588_v35  ;;  %v2593_v15 = vmax.f32 %v2561_v37, 0.0  ;;  %v2559_v42 = vadd.f32 %v2527_v53, %v2449_v25  ;;  %v2460_v51 = vadd.f32 %v3444_v47, %v2299_v3  ;;  %v4727_v35 = vld [vmem:[#allocation6_spill] sm:$0xff] }
 0x1f2   : > { %v3365_v40 = vpop.f32.mrf.mxu1  ;;  %v2451_v8 = vpop.f32.mrf.mxu0  ;;  %v2320_v37 = vadd.f32 %v3363_v63, %v4727_v35  ;;  %v4732_v63 = vld [vmem:[#allocation11_spill] sm:$0xff] }
 0x1f3   : > { %2625 = vst [vmem:[%s4556_s7 + $0x90] sm:$0xff] %v2593_v15  ;;  %v2591_v16 = vmax.f32 %v2559_v42, 0.0  ;;  %v2562_v33 = vadd.f32 %v2530_v5, %v2460_v51  ;;  %v2452_v45 = vadd.f32 %v2451_v8, %v2291_v7  ;;  %v3366_v41 = vadd.f32 %v3365_v40, %v3364_v39  ;;  %v2535_v5 = vld [vmem:[%s4531_s5 + $0xc0] sm:$0xff]  ;;  %v4728_v15 = vld [vmem:[#allocation9_spill] sm:$0xff]  ;;  %v4729_v8 = vld [vmem:[#allocation7_spill] sm:$0xff] }
 0x1f4   : > { %v3367_v17 = vpop.f32.mrf.mxu1  ;;  %v3447_v57 = vpop.f32.mrf.mxu0  ;;  %v2538_v40 = vld [vmem:[%s4531_s5 + $0xd8] sm:$0xff] }
 0x1f5   : > { %2623 = vst [vmem:[%s4556_s7 + $0x80] sm:$0xff] %v2591_v16  ;;  %v2594_v34 = vmax.f32 %v2562_v33, 0.0  ;;  %v2560_v49 = vadd.f32 %v2528_v18, %v2452_v45  ;;  %v2473_v26 = vadd.f32 %v3447_v57, %v2312_v36  ;;  %v2323_v18 = vadd.f32 %v3366_v41, %v4729_v8  ;;  %v2542_v41 = vld [vmem:[%s4531_s5 + $0xf8] sm:$0xff] }
 0x1f6   : > { %v3368_v58 = vpop.f32.mrf.mxu1  ;;  %v2464_v23 = vpop.f32.mrf.mxu0 }
 0x1f7   : > { %2626 = vst [vmem:[%s4556_s7 + $0x98] sm:$0xff] %v2594_v34  ;;  %v2592_v62 = vmax.f32 %v2560_v49, 0.0  ;;  %v2565_v20 = vadd.f32 %v2533_v44, %v2473_v26  ;;  %v3369_v21 = vadd.f32 %v3368_v58, %v3367_v17  ;;  %v2465_v11 = vadd.f32 %v2464_v23, %v2304_v29  ;;  %v2536_v17 = vld [vmem:[%s4531_s5 + $0xc8] sm:$0xff]  ;;  %v4730_v23 = vld [vmem:[#allocation10_spill] sm:$0xff] }
 0x1f8   : > { %v3370_v13 = vpop.f32.mrf.mxu1  ;;  %v3448_v4 = vpop.f32.mrf.mxu0 }
 0x1f9   : > { %2624 = vst [vmem:[%s4556_s7 + $0x88] sm:$0xff] %v2592_v62  ;;  %v2597_v31 = vmax.f32 %v2565_v20, 0.0  ;;  %v2563_v24 = vadd.f32 %v2531_v54, %v2465_v11  ;;  %v2476_v43 = vadd.f32 %v3448_v4, %v2315_v12  ;;  %v2328_v9 = vadd.f32 %v3369_v21, %v4726_v28  ;;  %v2539_v62 = vld [vmem:[%s4531_s5 + $0xe0] sm:$0xff] }
 0x1fa   : > { %v3371_v61 = vpop.f32.mrf.mxu1  ;;  %v2467_v19 = vpop.f32.mrf.mxu0 }
 0x1fb   : > { %2629 = vst [vmem:[%s4556_s7 + $0xb0] sm:$0xff] %v2597_v31  ;;  %v2595_v10 = vmax.f32 %v2563_v24, 0.0  ;;  %v2566_v2 = vadd.f32 %v2534_v6, %v2476_v43  ;;  %v3372_v32 = vadd.f32 %v3371_v61, %v3370_v13  ;;  %v2468_v59 = vadd.f32 %v2467_v19, %v2307_v48  ;;  %v4731_v6 = vld [vmem:[#allocation12_spill] sm:$0xff]  ;;  %v2540_v19 = vld [vmem:[%s4531_s5 + $0xe8] sm:$0xff] }
 0x1fc   : > { %v3373_v38 = vpop.f32.mrf.mxu1  ;;  %v3451_v0 = vpop.f32.mrf.mxu0  ;;  %v2541_v24 = vld [vmem:[%s4531_s5 + $0xf0] sm:$0xff] }
 0x1fd   : > { %2627 = vst [vmem:[%s4556_s7 + $0xa0] sm:$0xff] %v2595_v10  ;;  %v2598_v53 = vmax.f32 %v2566_v2, 0.0  ;;  %v2564_v3 = vadd.f32 %v2532_v55, %v2468_v59  ;;  %v2489_v30 = vadd.f32 %v3451_v0, %v2328_v9  ;;  %v2331_v42 = vadd.f32 %v3372_v32, %v4728_v15 }
 0x1fe   : > { %v3374_v25 = vpop.f32.mrf.mxu1  ;;  %v2480_v47 = vpop.f32.mrf.mxu0 }
 0x1ff   : > { %2630 = vst [vmem:[%s4556_s7 + $0xb8] sm:$0xff] %v2598_v53  ;;  %v2596_v7 = vmax.f32 %v2564_v3, 0.0  ;;  %v2569_v22 = vadd.f32 %v2537_v50, %v2489_v30  ;;  %v2481_v39 = vadd.f32 %v2480_v47, %v2320_v37  ;;  %v3375_v33 = vadd.f32 %v3374_v25, %v3373_v38 }
 0x200   : > { %v3376_v51 = vpop.f32.mrf.mxu1  ;;  %v3452_v1 = vpop.f32.mrf.mxu0 }
 0x201   : > { %2628 = vst [vmem:[%s4556_s7 + $0xa8] sm:$0xff] %v2596_v7  ;;  %v2601_v16 = vmax.f32 %v2569_v22, 0.0  ;;  %v2567_v45 = vadd.f32 %v2535_v5, %v2481_v39  ;;  %v2492_v60 = vadd.f32 %v3452_v1, %v2331_v42  ;;  %v2336_v54 = vadd.f32 %v3375_v33, %v4730_v23 }
 0x202   : > { %v3377_v36 = vpop.f32.mrf.mxu1  ;;  %v2483_v27 = vpop.f32.mrf.mxu0 }
 0x203   : > { %2633 = vst [vmem:[%s4556_s7 + $0xd0] sm:$0xff] %v2601_v16  ;;  %v2599_v57 = vmax.f32 %v2567_v45, 0.0  ;;  %v2570_v44 = vadd.f32 %v2538_v40, %v2492_v60  ;;  %v2484_v34 = vadd.f32 %v2483_v27, %v2323_v18  ;;  %v3378_v29 = vadd.f32 %v3377_v36, %v3376_v51 }
 0x204   : > { %v3379_v49 = vpop.f32.mrf.mxu1  ;;  %v3455_v26 = vpop.f32.mrf.mxu0 }
 0x205   : > { %2631 = vst [vmem:[%s4556_s7 + $0xc0] sm:$0xff] %v2599_v57  ;;  %v2602_v14 = vmax.f32 %v2570_v44, 0.0  ;;  %v2568_v58 = vadd.f32 %v2536_v17, %v2484_v34  ;;  %v2339_v31 = vadd.f32 %v3378_v29, %v4732_v63 }
 0x206   : > { %v3380_v46 = vpop.f32.mrf.mxu1  ;;  %v2496_v12 = vpop.f32.mrf.mxu0 }
 0x207   : > { %2634 = vst [vmem:[%s4556_s7 + $0xd8] sm:$0xff] %v2602_v14  ;;  %v2600_v20 = vmax.f32 %v2568_v58, 0.0  ;;  %v3381_v21 = vadd.f32 %v3380_v46, %v3379_v49  ;;  %v2497_v11 = vadd.f32 %v2496_v12, %v2336_v54 }
 0x208   : > { %v3382_v13 = vpop.f32.mrf.mxu1  ;;  %v3456_v4 = vpop.f32.mrf.mxu0 }
 0x209   : > { %2632 = vst [vmem:[%s4556_s7 + $0xc8] sm:$0xff] %v2600_v20  ;;  %v2344_v52 = vadd.f32 %v3381_v21, %v4731_v6  ;;  %v2571_v48 = vadd.f32 %v2539_v62, %v2497_v11 }
 0x20a   : > { %v3383_v43 = vpop.f32.mrf.mxu1  ;;  %v2499_v61 = vpop.f32.mrf.mxu0 }
 0x20b   : > { %v2505_v55 = vadd.f32 %v3455_v26, %v2344_v52  ;;  %v2603_v28 = vmax.f32 %v2571_v48, 0.0  ;;  %v3384_v9 = vadd.f32 %v3383_v43, %v3382_v13  ;;  %v2500_v10 = vadd.f32 %v2499_v61, %v2339_v31 }
 0x20d   : > { %v2573_v2 = vadd.f32 %v2541_v24, %v2505_v55  ;;  %2635 = vst [vmem:[%s4556_s7 + $0xe0] sm:$0xff] %v2603_v28  ;;  %v2347_v32 = vadd.f32 %v3384_v9, %v4544_v56  ;;  %v2572_v59 = vadd.f32 %v2540_v19, %v2500_v10 }
 0x20f   : > { %v2605_v38 = vmax.f32 %v2573_v2, 0.0  ;;  %v2508_v0 = vadd.f32 %v3456_v4, %v2347_v32  ;;  %v2604_v50 = vmax.f32 %v2572_v59, 0.0 }
 0x211   : > { %2637 = vst [vmem:[%s4556_s7 + $0xf0] sm:$0xff] %v2605_v38  ;;  %v2574_v53 = vadd.f32 %v2542_v41, %v2508_v0  ;;  %2636 = vst [vmem:[%s4556_s7 + $0xe8] sm:$0xff] %v2604_v50 }
 0x213   : > { %v2606_v3 = vmax.f32 %v2574_v53, 0.0 }
 0x215   : > { %2638 = vst [vmem:[%s4556_s7 + $0xf8] sm:$0xff] %v2606_v3 }
 0x216 PF: > { %s14_s15 = sadd.s32 1, %s3768_s15  }
 0x217   : > { %p11_p4 = scmp.ge.s32.totalorder %s14_s15, 4  }
 0x219   :  { %13 = sbr.rel (!%p11_p4) target bundleno = 1 (0x1), region = 69 }

// kernel: resnet_forward.13
= control target key start
LH: loop header
LB: loop body
LE: loop exit
PB: predicated region body
PF: predicated region fallthrough
CT: control target
= control target key end

     0   :  { %s2861_s1 = inlined_call_operand.vmem [shape: bf16[1152,128], index: 1, kind: input, shape index: {}]   ;;  %s2862_s0 = inlined_call_operand.vmem [shape: bf16[128,1152], index: 0, kind: input, shape index: {}]   ;;  %s2863_s2 = inlined_call_operand.vmem [shape: f32[1,128], index: 2, kind: input, shape index: {}]   ;;  %s2864_s3 = inlined_call_operand.vmem [shape: f32[128,128], index: 3, kind: output, shape index: {}]  }
   0x1   :  { %v2032_v0 = vld [vmem:[%s2861_s1 + $0x78] sm:$0xff]   ;;  %v2036_v4 = vld [vmem:[%s2861_s1 + $0x70] sm:$0xff]   ;;  %v2040_v8 = vld [vmem:[%s2861_s1 + $0x68] sm:$0xff]  }
   0x2   :  { %v2033_v1 = vld [vmem:[%s2861_s1 + $0xf8] sm:$0xff]   ;;  %1712 = vmatprep.subr.bf16.mxu0 %v2032_v0  ;;  %v2037_v5 = vld [vmem:[%s2861_s1 + $0xf0] sm:$0xff]   ;;  %v2041_v9 = vld [vmem:[%s2861_s1 + $0xe8] sm:$0xff]  }
   0x3   :  { %v2034_v2 = vld [vmem:[%s2861_s1 + $0x38] sm:$0xff]   ;;  %1776 = vmatprep.subr.bf16.mxu1 %v2033_v1  ;;  %v2038_v6 = vld [vmem:[%s2861_s1 + $0x30] sm:$0xff]   ;;  %v2042_v10 = vld [vmem:[%s2861_s1 + $0x28] sm:$0xff]  }
   0x4   :  { %v2035_v3 = vld [vmem:[%s2861_s1 + $0xb8] sm:$0xff]   ;;  %1713 = vmatpush3.bf16.msra.mxu0 %v2034_v2  ;;  %v2039_v7 = vld [vmem:[%s2861_s1 + $0xb0] sm:$0xff]   ;;  %v2043_v11 = vld [vmem:[%s2861_s1 + $0xa8] sm:$0xff]  }
   0x5   :  { %1777 = vmatpush3.bf16.msra.mxu1 %v2035_v3  ;;  %1714 = vmatprep.subr.bf16.mxu0 %v2036_v4  ;;  %v2044_v12 = vld [vmem:[%s2861_s1 + $0x60] sm:$0xff]   ;;  %v2048_v16 = vld [vmem:[%s2861_s1 + $0x58] sm:$0xff]   ;;  %v2052_v20 = vld [vmem:[%s2861_s1 + $0x50] sm:$0xff]  }
   0x6   :  { %1778 = vmatprep.subr.bf16.mxu1 %v2037_v5  ;;  %v2045_v13 = vld [vmem:[%s2861_s1 + $0xe0] sm:$0xff]   ;;  %v2049_v17 = vld [vmem:[%s2861_s1 + $0xd8] sm:$0xff]   ;;  %v2053_v21 = vld [vmem:[%s2861_s1 + $0xd0] sm:$0xff]  }
   0x7   :  { %v2046_v14 = vld [vmem:[%s2861_s1 + $0x20] sm:$0xff]   ;;  %v2050_v18 = vld [vmem:[%s2861_s1 + $0x18] sm:$0xff]   ;;  %v2054_v22 = vld [vmem:[%s2861_s1 + $0x10] sm:$0xff]  }
   0x8   :  { %1715 = vmatpush3.bf16.msra.mxu0 %v2038_v6  ;;  %v2047_v15 = vld [vmem:[%s2861_s1 + $0xa0] sm:$0xff]   ;;  %v2051_v19 = vld [vmem:[%s2861_s1 + $0x98] sm:$0xff]   ;;  %v2055_v23 = vld [vmem:[%s2861_s1 + $0x90] sm:$0xff]  }
   0x9   :  { %1779 = vmatpush3.bf16.msra.mxu1 %v2039_v7  ;;  %1716 = vmatprep.subr.bf16.mxu0 %v2040_v8  ;;  %v2056_v24 = vld [vmem:[%s2861_s1 + $0x48] sm:$0xff]   ;;  %v2060_v28 = vld [vmem:[%s2861_s1 + $0x40] sm:$0xff]   ;;  %v2070_v36 = vld [vmem:[%s2861_s1 + $0x178] sm:$0xff]  }
   0xa   :  { %1780 = vmatprep.subr.bf16.mxu1 %v2041_v9  ;;  %v2057_v25 = vld [vmem:[%s2861_s1 + $0xc8] sm:$0xff]   ;;  %v2061_v29 = vld [vmem:[%s2861_s1 + $0xc0] sm:$0xff]   ;;  %v2071_v37 = vld [vmem:[%s2861_s1 + $0x1f8] sm:$0xff]  }
   0xb   :  { %v2058_v26 = vld [vmem:[%s2861_s1 + $0x8] sm:$0xff]   ;;  %v2062_v30 = vld [vmem:[%s2861_s1] sm:$0xff]   ;;  %v2072_v38 = vld [vmem:[%s2861_s1 + $0x138] sm:$0xff]  }
   0xc   :  { %1717 = vmatpush3.bf16.msra.mxu0 %v2042_v10  ;;  %v2059_v27 = vld [vmem:[%s2861_s1 + $0x88] sm:$0xff]   ;;  %v2063_v31 = vld [vmem:[%s2861_s1 + $0x80] sm:$0xff]   ;;  %v2073_v39 = vld [vmem:[%s2861_s1 + $0x1b8] sm:$0xff]  }
   0xd   :  { %1781 = vmatpush3.bf16.msra.mxu1 %v2043_v11  ;;  %1718 = vmatprep.subr.bf16.mxu0 %v2044_v12  ;;  %v2064_v32 = vld [vmem:[%s2862_s0] ss:$36 sps:$4 sm:$0xff]   ;;  %v2067_v34 = vld [vmem:[%s2862_s0 + $0x8] ss:$36 sps:$4 sm:$0xff]   ;;  %v2076_v41 = vld [vmem:[%s2862_s0 + $0x54] ss:$36 sps:$4 sm:$0xff]  }
   0xe   :  { %1782 = vmatprep.subr.bf16.mxu1 %v2045_v13  ;;  %v2066_v33 = vld [vmem:[%s2862_s0 + $0x4] ss:$36 sps:$4 sm:$0xff]   ;;  %v2069_v35 = vld [vmem:[%s2862_s0 + $0xc] ss:$36 sps:$4 sm:$0xff]   ;;  %v2084_v48 = vld [vmem:[%s2862_s0 + $0x94] ss:$36 sps:$4 sm:$0xff]  }
   0xf   :  { %1078 = vmatprep.mubr.bf16.mxu0 %v2066_v33  ;;  %1175 = vmatprep.mubr.bf16.mxu1 %v2069_v35  ;;  %v2074_v40 = vld [vmem:[%s2862_s0 + $0x4c] ss:$36 sps:$4 sm:$0xff]   ;;  %v2086_v49 = vld [vmem:[%s2862_s0 + $0x9c] ss:$36 sps:$4 sm:$0xff]   ;;  %v2096_v57 = vld [vmem:[%s2862_s0 + $0xe4] ss:$36 sps:$4 sm:$0xff]  }
  0x10   :  { %1719 = vmatpush3.bf16.msra.mxu0 %v2046_v14  ;;  %v2078_v42 = vld [vmem:[%s2862_s0 + $0x48] ss:$36 sps:$4 sm:$0xff]   ;;  %v2079_v43 = vld [vmem:[%s2862_s0 + $0x50] ss:$36 sps:$4 sm:$0xff]   ;;  %v2089_v51 = vld [vmem:[%s2862_s0 + $0x98] ss:$36 sps:$4 sm:$0xff]  }
  0x11   :  { %1783 = vmatpush3.bf16.msra.mxu1 %v2047_v15  ;;  %1720 = vmatprep.subr.bf16.mxu0 %v2048_v16  ;;  %v2080_v44 = vld [vmem:[%s2861_s1 + $0x170] sm:$0xff]   ;;  %v2090_v52 = vld [vmem:[%s2861_s1 + $0x168] sm:$0xff]   ;;  %v2094_v56 = vld [vmem:[%s2862_s0 + $0xdc] ss:$36 sps:$4 sm:$0xff]  }
  0x12   :  { %1784 = vmatprep.subr.bf16.mxu1 %v2049_v17  ;;  %v2081_v45 = vld [vmem:[%s2861_s1 + $0x1f0] sm:$0xff]   ;;  %v2091_v53 = vld [vmem:[%s2861_s1 + $0x1e8] sm:$0xff]   ;;  %v2098_v58 = vld [vmem:[%s2862_s0 + $0xd8] ss:$36 sps:$4 sm:$0xff]  }
  0x13   :  { %v2082_v46 = vld [vmem:[%s2861_s1 + $0x130] sm:$0xff]   ;;  %v2092_v54 = vld [vmem:[%s2861_s1 + $0x128] sm:$0xff]   ;;  %v2099_v59 = vld [vmem:[%s2862_s0 + $0xe0] ss:$36 sps:$4 sm:$0xff]  }
  0x14   :  { %1721 = vmatpush3.bf16.msra.mxu0 %v2050_v18  ;;  %v2083_v47 = vld [vmem:[%s2861_s1 + $0x1b0] sm:$0xff]   ;;  %v2093_v55 = vld [vmem:[%s2861_s1 + $0x1a8] sm:$0xff]   ;;  %v2100_v60 = vld [vmem:[%s2861_s1 + $0x160] sm:$0xff]  }
  0x15   :  { %1785 = vmatpush3.bf16.msra.mxu1 %v2051_v19  ;;  %1722 = vmatprep.subr.bf16.mxu0 %v2052_v20  ;;  %v2088_v50 = vld [vmem:[%s2862_s0 + $0x90] ss:$36 sps:$4 sm:$0xff]   ;;  %v2101_v61 = vld [vmem:[%s2861_s1 + $0x1e0] sm:$0xff]   ;;  %v2110_v3 = vld [vmem:[%s2861_s1 + $0x158] sm:$0xff]  }
  0x16   :  { %1786 = vmatprep.subr.bf16.mxu1 %v2053_v21  ;;  %v2102_v62 = vld [vmem:[%s2861_s1 + $0x120] sm:$0xff]   ;;  %v2106_v1 = vld [vmem:[%s2862_s0 + $0x12c] ss:$36 sps:$4 sm:$0xff]   ;;  %v2111_v5 = vld [vmem:[%s2861_s1 + $0x1d8] sm:$0xff]  }
  0x17   :  { %v2103_v63 = vld [vmem:[%s2861_s1 + $0x1a0] sm:$0xff]   ;;  %v2109_v4 = vld [vmem:[%s2862_s0 + $0x128] ss:$36 sps:$4 sm:$0xff]   ;;  %v2112_v6 = vld [vmem:[%s2861_s1 + $0x118] sm:$0xff]  }
  0x18   :  { %1723 = vmatpush3.bf16.msra.mxu0 %v2054_v22  ;;  %v2104_v0 = vld [vmem:[%s2862_s0 + $0x124] ss:$36 sps:$4 sm:$0xff]   ;;  %v2113_v7 = vld [vmem:[%s2861_s1 + $0x198] sm:$0xff]   ;;  %v2114_v8 = vld [vmem:[%s2862_s0 + $0x16c] ss:$36 sps:$4 sm:$0xff]  }
  0x19   :  { %1787 = vmatpush3.bf16.msra.mxu1 %v2055_v23  ;;  %1724 = vmatprep.subr.bf16.mxu0 %v2056_v24  ;;  %v2108_v2 = vld [vmem:[%s2862_s0 + $0x120] ss:$36 sps:$4 sm:$0xff]   ;;  %v2116_v9 = vld [vmem:[%s2862_s0 + $0x174] ss:$36 sps:$4 sm:$0xff]   ;;  %v2118_v12 = vld [vmem:[%s2862_s0 + $0x168] ss:$36 sps:$4 sm:$0xff]  }
  0x1a   :  { %1788 = vmatprep.subr.bf16.mxu1 %v2057_v25  ;;  %v2120_v10 = vld [vmem:[%s2861_s1 + $0x150] sm:$0xff]   ;;  %v2126_v17 = vld [vmem:[%s2862_s0 + $0x1bc] ss:$36 sps:$4 sm:$0xff]   ;;  %v2130_v18 = vld [vmem:[%s2861_s1 + $0x148] sm:$0xff]  }
  0x1b   :  { %v2121_v11 = vld [vmem:[%s2861_s1 + $0x1d0] sm:$0xff]   ;;  %v2131_v19 = vld [vmem:[%s2861_s1 + $0x1c8] sm:$0xff]   ;;  %v2129_v23 = vld [vmem:[%s2862_s0 + $0x1b8] ss:$36 sps:$4 sm:$0xff]  }
  0x1c   :  { %1725 = vmatpush3.bf16.msra.mxu0 %v2058_v26  ;;  %v2122_v13 = vld [vmem:[%s2861_s1 + $0x110] sm:$0xff]   ;;  %v2132_v20 = vld [vmem:[%s2861_s1 + $0x108] sm:$0xff]   ;;  %v2134_v24 = vld [vmem:[%s2862_s0 + $0x1fc] ss:$36 sps:$4 sm:$0xff]  }
  0x1d   :  { %1789 = vmatpush3.bf16.msra.mxu1 %v2059_v27  ;;  %1726 = vmatprep.subr.bf16.mxu0 %v2060_v28  ;;  %v2123_v14 = vld [vmem:[%s2861_s1 + $0x190] sm:$0xff]   ;;  %v2133_v21 = vld [vmem:[%s2861_s1 + $0x188] sm:$0xff]   ;;  %v2140_v26 = vld [vmem:[%s2861_s1 + $0x140] sm:$0xff]  }
  0x1e   :  { %1790 = vmatprep.subr.bf16.mxu1 %v2061_v29  ;;  %v2119_v15 = vld [vmem:[%s2862_s0 + $0x170] ss:$36 sps:$4 sm:$0xff]   ;;  %v2136_v25 = vld [vmem:[%s2862_s0 + $0x204] ss:$36 sps:$4 sm:$0xff]  }
  0x1f   :  { %v2124_v16 = vld [vmem:[%s2862_s0 + $0x1b4] ss:$36 sps:$4 sm:$0xff]   ;;  %v2141_v27 = vld [vmem:[%s2861_s1 + $0x1c0] sm:$0xff]  }
  0x20   :  { %1727 = vmatpush3.bf16.msra.mxu0 %v2062_v30  ;;  %v2128_v22 = vld [vmem:[%s2862_s0 + $0x1b0] ss:$36 sps:$4 sm:$0xff]   ;;  %v2142_v28 = vld [vmem:[%s2861_s1 + $0x100] sm:$0xff]   ;;  %v2138_v30 = vld [vmem:[%s2862_s0 + $0x1f8] ss:$36 sps:$4 sm:$0xff]  }
  0x21   :  { %1791 = vmatpush3.bf16.msra.mxu1 %v2063_v31  ;;  %1840 = vmatprep.subr.bf16.mxu0 %v2070_v36  ;;  %v2143_v29 = vld [vmem:[%s2861_s1 + $0x180] sm:$0xff]   ;;  %v2146_v33 = vld [vmem:[%s2862_s0 + $0x14] ss:$36 sps:$4 sm:$0xff]  }
  0x22   :  { %1904 = vmatprep.subr.bf16.mxu1 %v2071_v37  ;;  %v2139_v31 = vld [vmem:[%s2862_s0 + $0x200] ss:$36 sps:$4 sm:$0xff]   ;;  %v2144_v35 = vld [vmem:[%s2862_s0 + $0x10] ss:$36 sps:$4 sm:$0xff]   ;;  %v2147_v36 = vld [vmem:[%s2862_s0 + $0x18] ss:$36 sps:$4 sm:$0xff]  }
  0x23   :  { %1079 = vmatmul.mubr.bf16.vlgmr.msra.gmra.mxu0 %v2064_v32  ;;  %v2150_v32 = vld [vmem:[%s2861_s1 + $0x238] sm:$0xff]  }
  0x24   :  { %1176 = vmatmul.mubr.bf16.vlgmr.msra.gmra.mxu1 %v2067_v34  ;;  %1841 = vmatpush3.bf16.msra.mxu0 %v2072_v38  ;;  %v2149_v34 = vld [vmem:[%s2862_s0 + $0x1c] ss:$36 sps:$4 sm:$0xff]   ;;  %v2153_v38 = vld [vmem:[%s2862_s0 + $0x64] ss:$36 sps:$4 sm:$0xff]  }
  0x25   :  { %1905 = vmatpush3.bf16.msra.mxu1 %v2073_v39  ;;  %1086 = vmatprep.mubr.bf16.mxu0 %v2074_v40  ;;  %v2151_v37 = vld [vmem:[%s2862_s0 + $0x5c] ss:$36 sps:$4 sm:$0xff]   ;;  %v2157_v39 = vld [vmem:[%s2861_s1 + $0x230] sm:$0xff]   ;;  %v2164_v40 = vld [vmem:[%s2861_s1 + $0x228] sm:$0xff]  }
  0x26   :  { %1183 = vmatprep.mubr.bf16.mxu1 %v2076_v41  ;;  %1842 = vmatprep.subr.bf16.mxu0 %v2080_v44  ;;  %v2155_v41 = vld [vmem:[%s2862_s0 + $0x58] ss:$36 sps:$4 sm:$0xff]   ;;  %v2160_v44 = vld [vmem:[%s2862_s0 + $0xac] ss:$36 sps:$4 sm:$0xff]  }
  0x27   :  { %1906 = vmatprep.subr.bf16.mxu1 %v2081_v45  ;;  %v2171_v45 = vld [vmem:[%s2861_s1 + $0x220] sm:$0xff]  }
  0x28   :  { %1843 = vmatpush3.bf16.msra.mxu0 %v2082_v46  ;;  %v2178_v46 = vld [vmem:[%s2861_s1 + $0x218] sm:$0xff]  }
  0x29   :  { %1907 = vmatpush3.bf16.msra.mxu1 %v2083_v47  ;;  %1844 = vmatprep.subr.bf16.mxu0 %v2090_v52  ;;  %v2162_v47 = vld [vmem:[%s2862_s0 + $0xa0] ss:$36 sps:$4 sm:$0xff]   ;;  %v2169_v52 = vld [vmem:[%s2862_s0 + $0xe8] ss:$36 sps:$4 sm:$0xff]  }
  0x2a   :  { %1908 = vmatprep.subr.bf16.mxu1 %v2091_v53  ;;  %v2192_v53 = vld [vmem:[%s2861_s1 + $0x208] sm:$0xff]  }
  0x2b   :  { %1087 = vmatmul.mubr.bf16.gmra.mxu0 %v2078_v42  ;;  %v2156_v42 = vld [vmem:[%s2862_s0 + $0x60] ss:$36 sps:$4 sm:$0xff]  }
  0x2c   :  { %1184 = vmatmul.mubr.bf16.gmra.mxu1 %v2079_v43  ;;  %1094 = vmatprep.mubr.bf16.mxu0 %v2084_v48  ;;  %v2158_v43 = vld [vmem:[%s2862_s0 + $0xa4] ss:$36 sps:$4 sm:$0xff]  }
  0x2d   :  { %1191 = vmatprep.mubr.bf16.mxu1 %v2086_v49  ;;  %1845 = vmatpush3.bf16.msra.mxu0 %v2092_v54  ;;  %v2163_v48 = vld [vmem:[%s2862_s0 + $0xa8] ss:$36 sps:$4 sm:$0xff]   ;;  %v2170_v54 = vld [vmem:[%s2862_s0 + $0xf0] ss:$36 sps:$4 sm:$0xff]  }
  0x2e   :  { %1909 = vmatpush3.bf16.msra.mxu1 %v2093_v55  ;;  %1846 = vmatprep.subr.bf16.mxu0 %v2100_v60  ;;  %v2165_v49 = vld [vmem:[%s2862_s0 + $0xec] ss:$36 sps:$4 sm:$0xff]   ;;  %v2172_v55 = vld [vmem:[%s2862_s0 + $0x134] ss:$36 sps:$4 sm:$0xff]   ;;  %v2179_v60 = vld [vmem:[%s2862_s0 + $0x17c] ss:$36 sps:$4 sm:$0xff]  }
  0x2f   :  { %1910 = vmatprep.subr.bf16.mxu1 %v2101_v61  ;;  %v2181_v61 = vld [vmem:[%s2862_s0 + $0x184] ss:$36 sps:$4 sm:$0xff]  }
  0x31   :  { %1847 = vmatpush3.bf16.msra.mxu0 %v2102_v62  ;;  %v2183_v62 = vld [vmem:[%s2862_s0 + $0x178] ss:$36 sps:$4 sm:$0xff]  }
  0x32   :  { %1911 = vmatpush3.bf16.msra.mxu1 %v2103_v63  ;;  %1848 = vmatprep.subr.bf16.mxu0 %v2110_v3  ;;  %v2184_v63 = vld [vmem:[%s2862_s0 + $0x180] ss:$36 sps:$4 sm:$0xff]   ;;  %v2191_v3 = vld [vmem:[%s2862_s0 + $0x1c8] ss:$36 sps:$4 sm:$0xff]  }
  0x33   :  { %1095 = vmatmul.mubr.bf16.gmra.mxu0 %v2088_v50  ;;  %1912 = vmatprep.subr.bf16.mxu1 %v2111_v5  ;;  %v2167_v50 = vld [vmem:[%s2862_s0 + $0xf4] ss:$36 sps:$4 sm:$0xff]  }
  0x34   :  { %1192 = vmatmul.mubr.bf16.gmra.mxu1 %v2089_v51  ;;  %1102 = vmatprep.mubr.bf16.mxu0 %v2094_v56  ;;  %v2185_v51 = vld [vmem:[%s2861_s1 + $0x210] sm:$0xff]   ;;  %v2174_v56 = vld [vmem:[%s2862_s0 + $0x13c] ss:$36 sps:$4 sm:$0xff]  }
  0x35   :  { %1199 = vmatprep.mubr.bf16.mxu1 %v2096_v57  ;;  %1849 = vmatpush3.bf16.msra.mxu0 %v2112_v6  ;;  %v2199_v57 = vld [vmem:[%s2861_s1 + $0x200] sm:$0xff]   ;;  %v2195_v5 = vld [vmem:[%s2862_s0 + $0x214] ss:$36 sps:$4 sm:$0xff]   ;;  %v2197_v6 = vld [vmem:[%s2862_s0 + $0x208] ss:$36 sps:$4 sm:$0xff]  }
  0x36   :  { %1913 = vmatpush3.bf16.msra.mxu1 %v2113_v7  ;;  %1850 = vmatprep.subr.bf16.mxu0 %v2120_v10  ;;  %v2198_v7 = vld [vmem:[%s2862_s0 + $0x210] ss:$36 sps:$4 sm:$0xff]   ;;  %v2202_v10 = vld [vmem:[%s2862_s0 + $0x68] ss:$36 sps:$4 sm:$0xff]  }
  0x37   :  { %1914 = vmatprep.subr.bf16.mxu1 %v2121_v11  ;;  %v2203_v11 = vld [vmem:[%s2862_s0 + $0x188] ss:$36 sps:$4 sm:$0xff]  }
  0x39   :  { %1851 = vmatpush3.bf16.msra.mxu0 %v2122_v13  ;;  %v2205_v13 = vld [vmem:[%s2862_s0 + $0x1d0] ss:$36 sps:$4 sm:$0xff]  }
  0x3a   :  { %1915 = vmatpush3.bf16.msra.mxu1 %v2123_v14  ;;  %1852 = vmatprep.subr.bf16.mxu0 %v2130_v18  ;;  %v2206_v14 = vld [vmem:[%s2862_s0 + $0xf8] ss:$36 sps:$4 sm:$0xff]   ;;  %v2663_v18 = vld [vmem:[%s2863_s2] ss:$0 sm:$0xff] }
  0x3b   :  { %1103 = vmatmul.mubr.bf16.gmra.mxu0 %v2098_v58  ;;  %1916 = vmatprep.subr.bf16.mxu1 %v2131_v19  ;;  %v2176_v58 = vld [vmem:[%s2862_s0 + $0x130] ss:$36 sps:$4 sm:$0xff]  }
  0x3c   :  { %1200 = vmatmul.mubr.bf16.gmra.mxu1 %v2099_v59  ;;  %1110 = vmatprep.mubr.bf16.mxu0 %v2104_v0  ;;  %v2177_v59 = vld [vmem:[%s2862_s0 + $0x138] ss:$36 sps:$4 sm:$0xff]   ;;  %v2186_v0 = vld [vmem:[%s2862_s0 + $0x1c4] ss:$36 sps:$4 sm:$0xff]  }
  0x3d   :  { %1207 = vmatprep.mubr.bf16.mxu1 %v2106_v1  ;;  %1853 = vmatpush3.bf16.msra.mxu0 %v2132_v20  ;;  %v2188_v1 = vld [vmem:[%s2862_s0 + $0x1cc] ss:$36 sps:$4 sm:$0xff]  }
  0x3e   :  { %1917 = vmatpush3.bf16.msra.mxu1 %v2133_v21  ;;  %1854 = vmatprep.subr.bf16.mxu0 %v2140_v26 }
  0x3f   :  { %1918 = vmatprep.subr.bf16.mxu1 %v2141_v27 }
  0x41   :  { %1855 = vmatpush3.bf16.msra.mxu0 %v2142_v28 }
  0x42   :  { %1919 = vmatpush3.bf16.msra.mxu1 %v2143_v29  ;;  %1984 = vmatprep.subr.bf16.mxu0 %v2150_v32 }
  0x43   :  { %1111 = vmatmul.mubr.bf16.gmra.mxu0 %v2108_v2  ;;  %2016 = vmatprep.subr.bf16.mxu1 %v2150_v32  ;;  %v2190_v2 = vld [vmem:[%s2862_s0 + $0x1c0] ss:$36 sps:$4 sm:$0xff]  }
  0x44   :  { %1208 = vmatmul.mubr.bf16.gmra.mxu1 %v2109_v4  ;;  %1118 = vmatprep.mubr.bf16.mxu0 %v2114_v8  ;;  %v2193_v4 = vld [vmem:[%s2862_s0 + $0x20c] ss:$36 sps:$4 sm:$0xff]   ;;  %v2200_v8 = vld [vmem:[%s2862_s0 + $0x20] ss:$36 sps:$4 sm:$0xff]  }
  0x45   :  { %1215 = vmatprep.mubr.bf16.mxu1 %v2116_v9  ;;  %v2201_v9 = vld [vmem:[%s2862_s0 + $0x140] ss:$36 sps:$4 sm:$0xff]  }
  0x4b   :  { %1119 = vmatmul.mubr.bf16.gmra.mxu0 %v2118_v12  ;;  %v2204_v12 = vld [vmem:[%s2862_s0 + $0xb0] ss:$36 sps:$4 sm:$0xff]  }
  0x4c   :  { %1216 = vmatmul.mubr.bf16.gmra.mxu1 %v2119_v15  ;;  %1126 = vmatprep.mubr.bf16.mxu0 %v2124_v16  ;;  %v2207_v15 = vld [vmem:[%s2862_s0 + $0x218] ss:$36 sps:$4 sm:$0xff]  }
  0x4d   :  { %1223 = vmatprep.mubr.bf16.mxu1 %v2126_v17 }
  0x53   :  { %1127 = vmatmul.mubr.bf16.gmra.mxu0 %v2128_v22 }
  0x54   :  { %1224 = vmatmul.mubr.bf16.gmra.mxu1 %v2129_v23  ;;  %1134 = vmatprep.mubr.bf16.mxu0 %v2134_v24 }
  0x55   :  { %1231 = vmatprep.mubr.bf16.mxu1 %v2136_v25 }
  0x5b   :  { %1135 = vmatmul.mubr.bf16.gmra.mxu0 %v2138_v30 }
  0x5c   :  { %1232 = vmatmul.mubr.bf16.gmra.mxu1 %v2139_v31  ;;  %1272 = vmatprep.mubr.bf16.mxu0 %v2146_v33 }
  0x5d   :  { %1369 = vmatprep.mubr.bf16.mxu1 %v2149_v34 }
  0x63   :  { %1273 = vmatmul.mubr.bf16.vlgmr.msra.gmra.mxu0 %v2144_v35 }
  0x64   :  { %1370 = vmatmul.mubr.bf16.vlgmr.msra.gmra.mxu1 %v2147_v36  ;;  %1985 = vmatpush3.bf16.msra.mxu0 %v2150_v32 }
  0x65   :  { %2024 = vmatpush3.bf16.msra.mxu1 %v2150_v32  ;;  %1280 = vmatprep.mubr.bf16.mxu0 %v2151_v37 }
  0x66   :  { %1377 = vmatprep.mubr.bf16.mxu1 %v2153_v38  ;;  %1986 = vmatprep.subr.bf16.mxu0 %v2157_v39 }
  0x67   :  { %2017 = vmatprep.subr.bf16.mxu1 %v2157_v39 }
  0x68   :  { %1987 = vmatpush3.bf16.msra.mxu0 %v2157_v39 }
  0x69   :  { %2025 = vmatpush3.bf16.msra.mxu1 %v2157_v39  ;;  %1988 = vmatprep.subr.bf16.mxu0 %v2164_v40 }
  0x6a   :  { %2018 = vmatprep.subr.bf16.mxu1 %v2164_v40 }
  0x6b   :  { %1281 = vmatmul.mubr.bf16.gmra.mxu0 %v2155_v41 }
  0x6c   :  { %1378 = vmatmul.mubr.bf16.gmra.mxu1 %v2156_v42  ;;  %1288 = vmatprep.mubr.bf16.mxu0 %v2158_v43 }
  0x6d   :  { %1385 = vmatprep.mubr.bf16.mxu1 %v2160_v44  ;;  %1989 = vmatpush3.bf16.msra.mxu0 %v2164_v40 }
  0x6e   :  { %2026 = vmatpush3.bf16.msra.mxu1 %v2164_v40  ;;  %1990 = vmatprep.subr.bf16.mxu0 %v2171_v45 }
  0x6f   :  { %2019 = vmatprep.subr.bf16.mxu1 %v2171_v45 }
  0x71   :  { %1991 = vmatpush3.bf16.msra.mxu0 %v2171_v45 }
  0x72   :  { %2027 = vmatpush3.bf16.msra.mxu1 %v2171_v45  ;;  %1992 = vmatprep.subr.bf16.mxu0 %v2178_v46 }
  0x73   :  { %1289 = vmatmul.mubr.bf16.gmra.mxu0 %v2162_v47  ;;  %2020 = vmatprep.subr.bf16.mxu1 %v2178_v46 }
  0x74   :  { %1386 = vmatmul.mubr.bf16.gmra.mxu1 %v2163_v48  ;;  %1296 = vmatprep.mubr.bf16.mxu0 %v2165_v49 }
  0x75   :  { %1393 = vmatprep.mubr.bf16.mxu1 %v2167_v50  ;;  %1993 = vmatpush3.bf16.msra.mxu0 %v2178_v46 }
  0x76   :  { %2028 = vmatpush3.bf16.msra.mxu1 %v2178_v46  ;;  %1994 = vmatprep.subr.bf16.mxu0 %v2185_v51 }
  0x77   :  { %2021 = vmatprep.subr.bf16.mxu1 %v2185_v51 }
  0x79   :  { %1995 = vmatpush3.bf16.msra.mxu0 %v2185_v51 }
  0x7a   :  { %2029 = vmatpush3.bf16.msra.mxu1 %v2185_v51  ;;  %1996 = vmatprep.subr.bf16.mxu0 %v2192_v53 }
  0x7b   :  { %1297 = vmatmul.mubr.bf16.gmra.mxu0 %v2169_v52  ;;  %2022 = vmatprep.subr.bf16.mxu1 %v2192_v53 }
  0x7c   :  { %1394 = vmatmul.mubr.bf16.gmra.mxu1 %v2170_v54  ;;  %1304 = vmatprep.mubr.bf16.mxu0 %v2172_v55 }
  0x7d   :  { %1401 = vmatprep.mubr.bf16.mxu1 %v2174_v56  ;;  %1997 = vmatpush3.bf16.msra.mxu0 %v2192_v53 }
  0x7e   :  { %2030 = vmatpush3.bf16.msra.mxu1 %v2192_v53  ;;  %1998 = vmatprep.subr.bf16.mxu0 %v2199_v57 }
  0x7f   :  { %2023 = vmatprep.subr.bf16.mxu1 %v2199_v57 }
  0x81   :  { %1999 = vmatpush3.bf16.msra.mxu0 %v2199_v57 }
  0x82   :  { %2031 = vmatpush3.bf16.msra.mxu1 %v2199_v57 }
  0x83   :  { %1305 = vmatmul.mubr.bf16.gmra.mxu0 %v2176_v58 }
  0x84   :  { %1402 = vmatmul.mubr.bf16.gmra.mxu1 %v2177_v59  ;;  %1312 = vmatprep.mubr.bf16.mxu0 %v2179_v60 }
  0x85   :  { %1409 = vmatprep.mubr.bf16.mxu1 %v2181_v61 }
  0x8b   :  { %1313 = vmatmul.mubr.bf16.gmra.mxu0 %v2183_v62 }
  0x8c   :  { %1410 = vmatmul.mubr.bf16.gmra.mxu1 %v2184_v63  ;;  %1320 = vmatprep.mubr.bf16.mxu0 %v2186_v0 }
  0x8d   :  { %1417 = vmatprep.mubr.bf16.mxu1 %v2188_v1 }
  0x93   :  { %1321 = vmatmul.mubr.bf16.gmra.mxu0 %v2190_v2 }
  0x94   :  { %1418 = vmatmul.mubr.bf16.gmra.mxu1 %v2191_v3  ;;  %1328 = vmatprep.mubr.bf16.mxu0 %v2193_v4 }
  0x95   :  { %1425 = vmatprep.mubr.bf16.mxu1 %v2195_v5 }
  0x9b   :  { %1329 = vmatmul.mubr.bf16.gmra.mxu0 %v2197_v6 }
  0x9c   :  { %1426 = vmatmul.mubr.bf16.gmra.mxu1 %v2198_v7  ;;  %2000 = vmatprep.mubr.bf16.mxu0 %v2200_v8 }
  0x9d   :  { %2008 = vmatprep.mubr.bf16.mxu1 %v2201_v9 }
  0xa3   :  { %2001 = vmatmul.mubr.bf16.vlgmr.msra.gmra.mxu0 %v2202_v10 }
  0xa4   :  { %2009 = vmatmul.mubr.bf16.vlgmr.msra.gmra.mxu1 %v2203_v11  ;;  %2004 = vmatprep.mubr.bf16.mxu0 %v2204_v12 }
  0xa5   :  { %2012 = vmatprep.mubr.bf16.mxu1 %v2205_v13 }
  0xab   :  { %2005 = vmatmul.mubr.bf16.gmra.mxu0 %v2206_v14 }
  0xac   :  { %2013 = vmatmul.mubr.bf16.gmra.mxu1 %v2207_v15 }
  0xe3   :  { %v1728_v16 = vpop.f32.mrf.mxu0 }
  0xe4   :  { %v1792_v17 = vpop.f32.mrf.mxu1 }
  0xe5   :  { %v1729_v19 = vpop.f32.mrf.mxu0 }
  0xe6   :  { %v1730_v20 = vadd.f32 %v1729_v19, %v1728_v16  ;;  %v1793_v21 = vpop.f32.mrf.mxu1 }
  0xe7   :  { %v1794_v22 = vadd.f32 %v1793_v21, %v1792_v17  ;;  %v1731_v23 = vpop.f32.mrf.mxu0 }
  0xe8   :  { %v1081_v24 = vadd.f32 %v1730_v20, %v2663_v18  ;;  %v1795_v25 = vpop.f32.mrf.mxu1 }
  0xe9   :  { %v1732_v26 = vpop.f32.mrf.mxu0 }
  0xea   :  { %v2666_v27 = vadd.f32 %v1794_v22, %v1081_v24  ;;  %v1733_v28 = vadd.f32 %v1732_v26, %v1731_v23  ;;  %v1796_v29 = vpop.f32.mrf.mxu1 }
  0xeb   :  { %v1797_v30 = vadd.f32 %v1796_v29, %v1795_v25  ;;  %v1734_v31 = vpop.f32.mrf.mxu0 }
  0xec   :  { %v1084_v32 = vadd.f32 %v1733_v28, %v2663_v18  ;;  %v1798_v33 = vpop.f32.mrf.mxu1 }
  0xed   :  { %v1735_v34 = vpop.f32.mrf.mxu0 }
  0xee   :  { %v2669_v35 = vadd.f32 %v1797_v30, %v1084_v32  ;;  %v1736_v36 = vadd.f32 %v1735_v34, %v1734_v31  ;;  %v1799_v37 = vpop.f32.mrf.mxu1 }
  0xef   :  { %v1800_v38 = vadd.f32 %v1799_v37, %v1798_v33  ;;  %v1737_v39 = vpop.f32.mrf.mxu0 }
  0xf0   :  { %v1089_v40 = vadd.f32 %v1736_v36, %v2663_v18  ;;  %v1801_v41 = vpop.f32.mrf.mxu1 }
  0xf1   :  { %v1738_v42 = vpop.f32.mrf.mxu0 }
  0xf2   :  { %v2672_v43 = vadd.f32 %v1800_v38, %v1089_v40  ;;  %v1739_v44 = vadd.f32 %v1738_v42, %v1737_v39  ;;  %v1802_v45 = vpop.f32.mrf.mxu1 }
  0xf3   :  { %v1803_v46 = vadd.f32 %v1802_v45, %v1801_v41  ;;  %v1740_v47 = vpop.f32.mrf.mxu0 }
  0xf4   :  { %v1092_v48 = vadd.f32 %v1739_v44, %v2663_v18  ;;  %v1804_v49 = vpop.f32.mrf.mxu1 }
  0xf5   :  { %v1741_v50 = vpop.f32.mrf.mxu0 }
  0xf6   :  { %v2675_v51 = vadd.f32 %v1803_v46, %v1092_v48  ;;  %v1742_v52 = vadd.f32 %v1741_v50, %v1740_v47  ;;  %v1805_v53 = vpop.f32.mrf.mxu1 }
  0xf7   :  { %v1806_v54 = vadd.f32 %v1805_v53, %v1804_v49  ;;  %v1743_v55 = vpop.f32.mrf.mxu0 }
  0xf8   :  { %v1097_v56 = vadd.f32 %v1742_v52, %v2663_v18  ;;  %v1807_v57 = vpop.f32.mrf.mxu1 }
  0xf9   :  { %v1744_v58 = vpop.f32.mrf.mxu0 }
  0xfa   :  { %v2678_v59 = vadd.f32 %v1806_v54, %v1097_v56  ;;  %v1745_v60 = vadd.f32 %v1744_v58, %v1743_v55  ;;  %v1808_v61 = vpop.f32.mrf.mxu1 }
  0xfb   :  { %v1809_v62 = vadd.f32 %v1808_v61, %v1807_v57  ;;  %v1746_v63 = vpop.f32.mrf.mxu0 }
  0xfc   :  { %v1100_v0 = vadd.f32 %v1745_v60, %v2663_v18  ;;  %v1810_v1 = vpop.f32.mrf.mxu1 }
  0xfd   :  { %v1747_v2 = vpop.f32.mrf.mxu0 }
  0xfe   :  { %v2681_v3 = vadd.f32 %v1809_v62, %v1100_v0  ;;  %v1748_v4 = vadd.f32 %v1747_v2, %v1746_v63  ;;  %v1811_v5 = vpop.f32.mrf.mxu1 }
  0xff   :  { %v1812_v6 = vadd.f32 %v1811_v5, %v1810_v1  ;;  %v1749_v7 = vpop.f32.mrf.mxu0 }
 0x100   :  { %v1105_v8 = vadd.f32 %v1748_v4, %v2663_v18  ;;  %v1813_v9 = vpop.f32.mrf.mxu1 }
 0x101   :  { %v1750_v10 = vpop.f32.mrf.mxu0 }
 0x102   :  { %v2684_v11 = vadd.f32 %v1812_v6, %v1105_v8  ;;  %v1751_v12 = vadd.f32 %v1750_v10, %v1749_v7  ;;  %v1814_v13 = vpop.f32.mrf.mxu1 }
 0x103   :  { %v1815_v14 = vadd.f32 %v1814_v13, %v1813_v9  ;;  %v1752_v15 = vpop.f32.mrf.mxu0 }
 0x104   :  { %v1108_v16 = vadd.f32 %v1751_v12, %v2663_v18  ;;  %v1816_v17 = vpop.f32.mrf.mxu1 }
 0x105   :  { %v1753_v19 = vpop.f32.mrf.mxu0 }
 0x106   :  { %v2687_v20 = vadd.f32 %v1815_v14, %v1108_v16  ;;  %v1754_v21 = vadd.f32 %v1753_v19, %v1752_v15  ;;  %v1817_v22 = vpop.f32.mrf.mxu1 }
 0x107   :  { %v1818_v23 = vadd.f32 %v1817_v22, %v1816_v17  ;;  %v1755_v24 = vpop.f32.mrf.mxu0 }
 0x108   :  { %2865 = vst [vmem:[#allocation2_spill] sm:$0xff] %v2687_v20  ;;  %v1113_v25 = vadd.f32 %v1754_v21, %v2663_v18  ;;  %v1819_v26 = vpop.f32.mrf.mxu1 }
 0x109   :  { %v1756_v28 = vpop.f32.mrf.mxu0 }
 0x10a   :  { %v2690_v29 = vadd.f32 %v1818_v23, %v1113_v25  ;;  %v1757_v30 = vadd.f32 %v1756_v28, %v1755_v24  ;;  %v1820_v31 = vpop.f32.mrf.mxu1 }
 0x10b   :  { %v1821_v32 = vadd.f32 %v1820_v31, %v1819_v26  ;;  %v1758_v33 = vpop.f32.mrf.mxu0 }
 0x10c   :  { %v1116_v34 = vadd.f32 %v1757_v30, %v2663_v18  ;;  %v1822_v36 = vpop.f32.mrf.mxu1 }
 0x10d   :  { %v1759_v37 = vpop.f32.mrf.mxu0 }
 0x10e   :  { %v2693_v38 = vadd.f32 %v1821_v32, %v1116_v34  ;;  %v1760_v39 = vadd.f32 %v1759_v37, %v1758_v33  ;;  %v1823_v40 = vpop.f32.mrf.mxu1 }
 0x10f   :  { %v1824_v41 = vadd.f32 %v1823_v40, %v1822_v36  ;;  %v1761_v42 = vpop.f32.mrf.mxu0 }
 0x110   :  { %2866 = vst [vmem:[#allocation3_spill] sm:$0xff] %v2693_v38  ;;  %v1121_v44 = vadd.f32 %v1760_v39, %v2663_v18  ;;  %v1825_v45 = vpop.f32.mrf.mxu1 }
 0x111   :  { %v1762_v46 = vpop.f32.mrf.mxu0 }
 0x112   :  { %v2696_v47 = vadd.f32 %v1824_v41, %v1121_v44  ;;  %v1763_v48 = vadd.f32 %v1762_v46, %v1761_v42  ;;  %v1826_v49 = vpop.f32.mrf.mxu1 }
 0x113   :  { %v1827_v50 = vadd.f32 %v1826_v49, %v1825_v45  ;;  %v1764_v52 = vpop.f32.mrf.mxu0 }
 0x114   :  { %v1124_v53 = vadd.f32 %v1763_v48, %v2663_v18  ;;  %v1828_v54 = vpop.f32.mrf.mxu1 }
 0x115   :  { %v1765_v55 = vpop.f32.mrf.mxu0 }
 0x116   :  { %v2699_v56 = vadd.f32 %v1827_v50, %v1124_v53  ;;  %v1766_v57 = vadd.f32 %v1765_v55, %v1764_v52  ;;  %v1829_v58 = vpop.f32.mrf.mxu1 }
 0x117   :  { %v1830_v60 = vadd.f32 %v1829_v58, %v1828_v54  ;;  %v1767_v61 = vpop.f32.mrf.mxu0 }
 0x118   :  { %v1129_v62 = vadd.f32 %v1766_v57, %v2663_v18  ;;  %v1831_v63 = vpop.f32.mrf.mxu1 }
 0x119   :  { %v1768_v0 = vpop.f32.mrf.mxu0 }
 0x11a   :  { %v2702_v1 = vadd.f32 %v1830_v60, %v1129_v62  ;;  %v1769_v2 = vadd.f32 %v1768_v0, %v1767_v61  ;;  %v1832_v4 = vpop.f32.mrf.mxu1 }
 0x11b   :  { %v1833_v5 = vadd.f32 %v1832_v4, %v1831_v63  ;;  %v1770_v6 = vpop.f32.mrf.mxu0 }
 0x11c   :  { %2867 = vst [vmem:[#allocation4_spill] sm:$0xff] %v2702_v1  ;;  %v1132_v7 = vadd.f32 %v1769_v2, %v2663_v18  ;;  %v1834_v8 = vpop.f32.mrf.mxu1 }
 0x11d   :  { %v1771_v9 = vpop.f32.mrf.mxu0 }
 0x11e   :  { %v2705_v10 = vadd.f32 %v1833_v5, %v1132_v7  ;;  %v1772_v12 = vadd.f32 %v1771_v9, %v1770_v6  ;;  %v1835_v13 = vpop.f32.mrf.mxu1 }
 0x11f   :  { %v1836_v14 = vadd.f32 %v1835_v13, %v1834_v8  ;;  %v1773_v15 = vpop.f32.mrf.mxu0 }
 0x120   :  { %2868 = vst [vmem:[#allocation5_spill] sm:$0xff] %v2705_v10  ;;  %v1137_v16 = vadd.f32 %v1772_v12, %v2663_v18  ;;  %v1837_v17 = vpop.f32.mrf.mxu1 }
 0x121   :  { %v1774_v19 = vpop.f32.mrf.mxu0 }
 0x122   :  { %v2708_v21 = vadd.f32 %v1836_v14, %v1137_v16  ;;  %v1775_v22 = vadd.f32 %v1774_v19, %v1773_v15  ;;  %v1838_v23 = vpop.f32.mrf.mxu1 }
 0x123   :  { %v1839_v24 = vadd.f32 %v1838_v23, %v1837_v17  ;;  %v1856_v25 = vpop.f32.mrf.mxu0 }
 0x124   :  { %2869 = vst [vmem:[#allocation6_spill] sm:$0xff] %v2708_v21  ;;  %v1140_v26 = vadd.f32 %v1775_v22, %v2663_v18  ;;  %v2711_v28 = vpop.f32.mrf.mxu1 }
 0x125   :  { %v1857_v30 = vpop.f32.mrf.mxu0 }
 0x126   :  { %v2713_v31 = vadd.f32 %v1839_v24, %v1140_v26  ;;  %v1921_v32 = vpop.f32.mrf.mxu1 }
 0x127   :  { %v1859_v33 = vpop.f32.mrf.mxu0 }
 0x128   :  { %2870 = vst [vmem:[#allocation7_spill] sm:$0xff] %v2713_v31  ;;  %v1923_v34 = vpop.f32.mrf.mxu1 }
 0x129   :  { %v1860_v36 = vpop.f32.mrf.mxu0 }
 0x12a   :  { %v1924_v37 = vpop.f32.mrf.mxu1  ;;  %v1861_v20 = vadd.f32 %v1860_v36, %v1859_v33 }
 0x12b   :  { %v1862_v39 = vpop.f32.mrf.mxu0  ;;  %v1925_v33 = vadd.f32 %v1924_v37, %v1923_v34 }
 0x12c   :  { %v2715_v40 = vpop.f32.mrf.mxu1 }
 0x12d   :  { %v1863_v41 = vpop.f32.mrf.mxu0 }
 0x12e   :  { %v2717_v42 = vpop.f32.mrf.mxu1  ;;  %v1864_v21 = vadd.f32 %v1863_v41, %v1862_v39 }
 0x12f   :  { %v1865_v44 = vpop.f32.mrf.mxu0 }
 0x130   :  { %v2719_v45 = vpop.f32.mrf.mxu1  ;;  %v1283_v36 = vadd.f32 %v1864_v21, %v2672_v43 }
 0x131   :  { %v1866_v18 = vpop.f32.mrf.mxu0 }
 0x132   :  { %v2721_v46 = vpop.f32.mrf.mxu1 }
 0x133   :  { %v1868_v48 = vpop.f32.mrf.mxu0  ;;  %v1931_v43 = vadd.f32 %v2721_v46, %v2719_v45 }
 0x134   :  { %v2723_v49 = vpop.f32.mrf.mxu1 }
 0x135   :  { %v1869_v50 = vpop.f32.mrf.mxu0 }
 0x136   :  { %v2725_v52 = vpop.f32.mrf.mxu1 }
 0x137   :  { %v1871_v53 = vpop.f32.mrf.mxu0  ;;  %v1934_v21 = vadd.f32 %v2725_v52, %v2723_v49 }
 0x138   :  { %v2727_v54 = vpop.f32.mrf.mxu1 }
 0x139   :  { %2871 = vst [vmem:[#allocation8_spill] sm:$0xff] %v2727_v54  ;;  %v1872_v55 = vpop.f32.mrf.mxu0 }
 0x13a   :  { %v2729_v57 = vpop.f32.mrf.mxu1 }
 0x13b   :  { %2872 = vst [vmem:[#allocation9_spill] sm:$0xff] %v2729_v57  ;;  %v1874_v58 = vpop.f32.mrf.mxu0 }
 0x13c   :  { %v2731_v60 = vpop.f32.mrf.mxu1 }
 0x13d   :  { %v1875_v61 = vpop.f32.mrf.mxu0 }
 0x13e   :  { %v2733_v62 = vpop.f32.mrf.mxu1  ;;  %v1876_v39 = vadd.f32 %v1875_v61, %v1874_v58 }
 0x13f   :  { %2873 = vst [vmem:[#allocation10_spill] sm:$0xff] %v2733_v62  ;;  %v2735_v63 = vpop.f32.mrf.mxu0  ;;  %v1922_v62 = vadd.f32 %v1921_v32, %v2711_v28  ;;  %v1928_v28 = vadd.f32 %v2717_v42, %v2715_v40 }
 0x140   :  { %2874 = vst [vmem:[#allocation11_spill] sm:$0xff] %v2735_v63  ;;  %v2737_v0 = vpop.f32.mrf.mxu1  ;;  %v1299_v37 = vadd.f32 %v1876_v39, %v2684_v11  ;;  %v2891_v39 = vld [vmem:[#allocation4_spill] sm:$0xff] }
 0x141   :  { %2875 = vst [vmem:[#allocation12_spill] sm:$0xff] %v2737_v0  ;;  %v2739_v2 = vpop.f32.mrf.mxu0  ;;  %v1858_v0 = vadd.f32 %v1857_v30, %v1856_v25  ;;  %v1278_v25 = vadd.f32 %v1861_v20, %v2669_v35  ;;  %v1380_v42 = vadd.f32 %v1928_v28, %v1283_v36 }
 0x142   :  { %2876 = vst [vmem:[#allocation13_spill] sm:$0xff] %v2739_v2  ;;  %v2741_v4 = vpop.f32.mrf.mxu1  ;;  %v1870_v2 = vadd.f32 %v1869_v50, %v1868_v48  ;;  %v1873_v48 = vadd.f32 %v1872_v55, %v1871_v53 }
 0x143   :  { %2877 = vst [vmem:[#allocation14_spill] sm:$0xff] %v2741_v4  ;;  %v1880_v5 = vpop.f32.mrf.mxu0  ;;  %v1275_v38 = vadd.f32 %v1858_v0, %v2666_v27 }
 0x144   :  { %v2743_v6 = vpop.f32.mrf.mxu1 }
 0x145   :  { %2878 = vst [vmem:[#allocation15_spill] sm:$0xff] %v2743_v6  ;;  %v1881_v7 = vpop.f32.mrf.mxu0  ;;  %v1372_v32 = vadd.f32 %v1922_v62, %v1275_v38 }
 0x146   :  { %v1945_v8 = vpop.f32.mrf.mxu1  ;;  %v1882_v41 = vadd.f32 %v1881_v7, %v1880_v5  ;;  %v2883_v49 = vld [vmem:[#allocation10_spill] sm:$0xff] }
 0x147   :  { %v1883_v9 = vpop.f32.mrf.mxu0  ;;  %v1940_v52 = vadd.f32 %v2883_v49, %v2731_v60 }
 0x148   :  { %v2745_v12 = vpop.f32.mrf.mxu1  ;;  %v1307_v53 = vadd.f32 %v1882_v41, %v2690_v29  ;;  %v2895_v49 = vld [vmem:[#allocation12_spill] sm:$0xff] }
 0x149   :  { %2879 = vst [vmem:[#allocation16_spill] sm:$0xff] %v2745_v12  ;;  %v1884_v13 = vpop.f32.mrf.mxu0  ;;  %v1867_v12 = vadd.f32 %v1866_v18, %v1865_v44  ;;  %v1291_v18 = vadd.f32 %v1870_v2, %v2678_v59  ;;  %v1375_v59 = vadd.f32 %v1925_v33, %v1278_v25  ;;  %v2885_v2 = vld [vmem:[#allocation3_spill] sm:$0xff]  ;;  %v2890_v33 = vld [vmem:[#allocation6_spill] sm:$0xff] }
 0x14a   :  { %v2747_v14 = vpop.f32.mrf.mxu1  ;;  %v1885_v34 = vadd.f32 %v1884_v13, %v1883_v9 }
 0x14b   :  { %2880 = vst [vmem:[#allocation17_spill] sm:$0xff] %v2747_v14  ;;  %v1886_v15 = vpop.f32.mrf.mxu0  ;;  %v1286_v44 = vadd.f32 %v1867_v12, %v2675_v51  ;;  %v2784_v58 = vadd.f32 %v1934_v21, %v1291_v18  ;;  %v2886_v12 = vld [vmem:[#allocation11_spill] sm:$0xff]  ;;  %v2892_v21 = vld [vmem:[#allocation2_spill] sm:$0xff] }
 0x14c   :  { %v1950_v16 = vpop.f32.mrf.mxu1  ;;  %v2884_v61 = vld [vmem:[#allocation15_spill] sm:$0xff]  ;;  %v1310_v5 = vadd.f32 %v1885_v34, %v2885_v2 }
 0x14d   :  { %v1887_v17 = vpop.f32.mrf.mxu0  ;;  %v1383_v46 = vadd.f32 %v1931_v43, %v1286_v44  ;;  %v1946_v62 = vadd.f32 %v1945_v8, %v2884_v61 }
 0x14e   :  { %v1951_v19 = vpop.f32.mrf.mxu1  ;;  %v1888_v6 = vadd.f32 %v1887_v17, %v1886_v15 }
 0x14f   :  { %v1889_v22 = vpop.f32.mrf.mxu0  ;;  %v1952_v55 = vadd.f32 %v1951_v19, %v1950_v16  ;;  %v1404_v17 = vadd.f32 %v1946_v62, %v1307_v53  ;;  %v1396_v19 = vadd.f32 %v1940_v52, %v1299_v37  ;;  %v2896_v52 = vld [vmem:[#allocation14_spill] sm:$0xff] }
 0x150   :  { %v1953_v23 = vpop.f32.mrf.mxu1  ;;  %v1315_v35 = vadd.f32 %v1888_v6, %v2696_v47  ;;  %v2781_v47 = vadd.f32 %v1873_v48, %v2681_v3 }
 0x151   :  { %v1890_v24 = vpop.f32.mrf.mxu0 }
 0x152   :  { %v1954_v26 = vpop.f32.mrf.mxu1  ;;  %v1891_v27 = vadd.f32 %v1890_v24, %v1889_v22  ;;  %v1412_v29 = vadd.f32 %v1952_v55, %v1315_v35  ;;  %v2888_v22 = vld [vmem:[#allocation16_spill] sm:$0xff]  ;;  %v2889_v60 = vld [vmem:[#allocation17_spill] sm:$0xff] }
 0x153   :  { %v1892_v57 = vpop.f32.mrf.mxu0  ;;  %v1955_v6 = vadd.f32 %v1954_v26, %v1953_v23  ;;  %v1949_v24 = vadd.f32 %v2889_v60, %v2888_v22 }
 0x154   :  { %v2749_v54 = vpop.f32.mrf.mxu1  ;;  %v1318_v38 = vadd.f32 %v1891_v27, %v2699_v56  ;;  %v2887_v56 = vld [vmem:[#allocation13_spill] sm:$0xff] }
 0x155   :  { %2881 = vst [vmem:[#allocation18_spill] sm:$0xff] %v2749_v54  ;;  %v1893_v10 = vpop.f32.mrf.mxu0  ;;  %v1879_v13 = vadd.f32 %v2887_v56, %v2886_v12  ;;  %v1407_v27 = vadd.f32 %v1949_v24, %v1310_v5 }
 0x156   :  { %v2751_v4 = vpop.f32.mrf.mxu1  ;;  %v1894_v7 = vadd.f32 %v1893_v10, %v1892_v57  ;;  %v1415_v25 = vadd.f32 %v1955_v6, %v1318_v38 }
 0x157   :  { %v2753_v31 = vpop.f32.mrf.mxu0  ;;  %v1302_v34 = vadd.f32 %v1879_v13, %v2892_v21 }
 0x158   :  { %v2755_v1 = vpop.f32.mrf.mxu1  ;;  %v1323_v41 = vadd.f32 %v1894_v7, %v2891_v39 }
 0x159   :  { %2882 = vst [vmem:[#allocation19_spill] sm:$0xff] %v2755_v1  ;;  %v2757_v14 = vpop.f32.mrf.mxu0 }
 0x15a   :  { %v2759_v63 = vpop.f32.mrf.mxu1  ;;  %v1897_v28 = vadd.f32 %v2757_v14, %v2753_v31 }
 0x15b   :  { %v1898_v54 = vpop.f32.mrf.mxu0 }
 0x15c   :  { %v2764_v30 = vpop.f32.mrf.mxu1  ;;  %v2893_v37 = vld [vmem:[#allocation18_spill] sm:$0xff] }
 0x15d   :  { %v1899_v1 = vpop.f32.mrf.mxu0  ;;  %v1958_v53 = vadd.f32 %v2751_v4, %v2893_v37  ;;  %v1943_v4 = vadd.f32 %v2896_v52, %v2895_v49 }
 0x15e   :  { %v1963_v50 = vpop.f32.mrf.mxu1  ;;  %v1900_v11 = vadd.f32 %v1899_v1, %v1898_v54 }
 0x15f   :  { %v1901_v20 = vpop.f32.mrf.mxu0  ;;  %v1964_v35 = vadd.f32 %v1963_v50, %v2764_v30  ;;  %v2894_v30 = vld [vmem:[#allocation7_spill] sm:$0xff] }
 0x160   :  { %v2776_v51 = vpop.f32.mrf.mxu1  ;;  %v1331_v36 = vadd.f32 %v1900_v11, %v2890_v33  ;;  %v1420_v11 = vadd.f32 %v1958_v53, %v1323_v41 }
 0x161   :  { %v1902_v40 = vpop.f32.mrf.mxu0 }
 0x162   :  { %v1966_v45 = vpop.f32.mrf.mxu1  ;;  %v1903_v23 = vadd.f32 %v1902_v40, %v1901_v20 }
 0x163   :  { %v2002_v0 = vpop.f32.mrf.mxu0  ;;  %v1967_v2 = vadd.f32 %v1966_v45, %v2776_v51  ;;  %v2900_v51 = vld [vmem:[#allocation19_spill] sm:$0xff] }
 0x164   :  { %v1477_v3 = vadd.f32 %v2002_v0, %v1380_v42  ;;  %v2010_v9 = vpop.f32.mrf.mxu1  ;;  %v1334_v50 = vadd.f32 %v1903_v23, %v2894_v30  ;;  %v2897_v0 = vld [vmem:[#allocation5_spill] sm:$0xff]  ;;  %v1961_v45 = vadd.f32 %v2759_v63, %v2900_v51 }
 0x165   :  { %v1509_v15 = vadd.f32 %v2010_v9, %v1412_v29  ;;  %v1468_v16 = vpop.f32.mrf.mxu0  ;;  %v1326_v29 = vadd.f32 %v1897_v28, %v2897_v0  ;;  %v2899_v9 = vld [vmem:[#allocation9_spill] sm:$0xff] }
 0x166   :  { %v1533_v8 = vmax.f32 %v1477_v3, 0.0  ;;  %v1469_v1 = vadd.f32 %v1468_v16, %v1372_v32  ;;  %v1500_v54 = vpop.f32.mrf.mxu1  ;;  %v2898_v3 = vld [vmem:[#allocation8_spill] sm:$0xff]  ;;  %v1399_v16 = vadd.f32 %v1943_v4, %v1302_v34  ;;  %v1431_v60 = vadd.f32 %v1967_v2, %v1334_v50 }
 0x167   :  { %v1541_v10 = vmax.f32 %v1509_v15, 0.0  ;;  %v1501_v57 = vadd.f32 %v1500_v54, %v1404_v17  ;;  %v2003_v26 = vpop.f32.mrf.mxu0  ;;  %v1937_v12 = vadd.f32 %v2899_v9, %v2898_v3  ;;  %v1423_v33 = vadd.f32 %v1961_v45, %v1326_v29 }
 0x168   :  { %1549 = vst [vmem:[%s2864_s3 + $0x10] sm:$0xff] %v1533_v8  ;;  %v1531_v44 = vmax.f32 %v1469_v1, 0.0  ;;  %v1480_v18 = vadd.f32 %v2003_v26, %v1383_v46  ;;  %v2011_v48 = vpop.f32.mrf.mxu1  ;;  %v1428_v46 = vadd.f32 %v1964_v35, %v1331_v36 }
 0x169   :  { %1557 = vst [vmem:[%s2864_s3 + $0x50] sm:$0xff] %v1541_v10  ;;  %v1539_v20 = vmax.f32 %v1501_v57, 0.0  ;;  %v1512_v32 = vadd.f32 %v2011_v48, %v1415_v25  ;;  %v1471_v43 = vpop.f32.mrf.mxu0  ;;  %v1391_v1 = vadd.f32 %v1937_v12, %v2781_v47 }
 0x16a   :  { %1547 = vst [vmem:[%s2864_s3] sm:$0xff] %v1531_v44  ;;  %v1534_v55 = vmax.f32 %v1480_v18, 0.0  ;;  %v1472_v31 = vadd.f32 %v1471_v43, %v1375_v59  ;;  %v1503_v14 = vpop.f32.mrf.mxu1 }
 0x16b   :  { %1555 = vst [vmem:[%s2864_s3 + $0x40] sm:$0xff] %v1539_v20  ;;  %v1542_v40 = vmax.f32 %v1512_v32, 0.0  ;;  %v1504_v42 = vadd.f32 %v1503_v14, %v1407_v27  ;;  %v2006_v38 = vpop.f32.mrf.mxu0 }
 0x16c   :  { %1550 = vst [vmem:[%s2864_s3 + $0x18] sm:$0xff] %v1534_v55  ;;  %v1532_v61 = vmax.f32 %v1472_v31, 0.0  ;;  %v1493_v59 = vadd.f32 %v2006_v38, %v1396_v19  ;;  %v2014_v62 = vpop.f32.mrf.mxu1 }
 0x16d   :  { %1558 = vst [vmem:[%s2864_s3 + $0x58] sm:$0xff] %v1542_v40  ;;  %v1540_v5 = vmax.f32 %v1504_v42, 0.0  ;;  %v1525_v6 = vadd.f32 %v2014_v62, %v1428_v46  ;;  %v1484_v7 = vpop.f32.mrf.mxu0 }
 0x16e   :  { %1548 = vst [vmem:[%s2864_s3 + $0x8] sm:$0xff] %v1532_v61  ;;  %v1537_v56 = vmax.f32 %v1493_v59, 0.0  ;;  %v1485_v13 = vadd.f32 %v1484_v7, %v2784_v58  ;;  %v1516_v15 = vpop.f32.mrf.mxu1 }
 0x16f   :  { %1556 = vst [vmem:[%s2864_s3 + $0x48] sm:$0xff] %v1540_v5  ;;  %v1545_v17 = vmax.f32 %v1525_v6, 0.0  ;;  %v1517_v19 = vadd.f32 %v1516_v15, %v1420_v11  ;;  %v2007_v22 = vpop.f32.mrf.mxu0 }
 0x170   :  { %1553 = vst [vmem:[%s2864_s3 + $0x30] sm:$0xff] %v1537_v56  ;;  %v1535_v24 = vmax.f32 %v1485_v13, 0.0  ;;  %v1496_v8 = vadd.f32 %v2007_v22, %v1399_v16  ;;  %v2015_v58 = vpop.f32.mrf.mxu1 }
 0x171   :  { %1561 = vst [vmem:[%s2864_s3 + $0x70] sm:$0xff] %v1545_v17  ;;  %v1543_v63 = vmax.f32 %v1517_v19, 0.0  ;;  %v1528_v54 = vadd.f32 %v2015_v58, %v1431_v60  ;;  %v1487_v25 = vpop.f32.mrf.mxu0 }
 0x172   :  { %1551 = vst [vmem:[%s2864_s3 + $0x20] sm:$0xff] %v1535_v24  ;;  %v1538_v36 = vmax.f32 %v1496_v8, 0.0  ;;  %v1488_v23 = vadd.f32 %v1487_v25, %v1391_v1  ;;  %v1519_v10 = vpop.f32.mrf.mxu1 }
 0x173   :  { %1559 = vst [vmem:[%s2864_s3 + $0x60] sm:$0xff] %v1543_v63  ;;  %v1546_v47 = vmax.f32 %v1528_v54, 0.0  ;;  %v1520_v57 = vadd.f32 %v1519_v10, %v1423_v33 }
 0x174   :  { %1554 = vst [vmem:[%s2864_s3 + $0x38] sm:$0xff] %v1538_v36  ;;  %v1536_v26 = vmax.f32 %v1488_v23, 0.0 }
 0x175   :  { %1562 = vst [vmem:[%s2864_s3 + $0x78] sm:$0xff] %v1546_v47  ;;  %v1544_v39 = vmax.f32 %v1520_v57, 0.0 }
 0x176   :  { %1552 = vst [vmem:[%s2864_s3 + $0x28] sm:$0xff] %v1536_v26 }
 0x177   :  { %1560 = vst [vmem:[%s2864_s3 + $0x68] sm:$0xff] %v1544_v39 }

// kernel: resnet_forward.17
= control target key start
LH: loop header
LB: loop body
LE: loop exit
PB: predicated region body
PF: predicated region fallthrough
CT: control target
= control target key end

     0   :  { %s275_s1 = inlined_call_operand.vmem [shape: bf16[128,128], index: 1, kind: input, shape index: {}]   ;;  %s276_s0 = inlined_call_operand.vmem [shape: bf16[32,128], index: 0, kind: input, shape index: {}]   ;;  %s277_s2 = inlined_call_operand.vmem [shape: f32[1,128], index: 2, kind: input, shape index: {}]   ;;  %s278_s3 = inlined_call_operand.vmem [shape: f32[32,128], index: 3, kind: output, shape index: {}]  }
   0x1   :  { %v200_v0 = vld [vmem:[%s275_s1 + $0x38] sm:$0xff]   ;;  %v201_v1 = vld [vmem:[%s275_s1 + $0x30] sm:$0xff]   ;;  %v202_v2 = vld [vmem:[%s275_s1 + $0x28] sm:$0xff]  }
   0x2   :  { %180 = vmatprep.subr.bf16.mxu0 %v200_v0  ;;  %v203_v3 = vld [vmem:[%s275_s1 + $0x20] sm:$0xff]   ;;  %v204_v5 = vld [vmem:[%s275_s1 + $0x18] sm:$0xff]   ;;  %v205_v6 = vld [vmem:[%s275_s1 + $0x10] sm:$0xff]  }
   0x3   :  { %181 = vmatpush3.bf16.msra.mxu0 %v200_v0  ;;  %v208_v4 = vld [vmem:[%s276_s0] sm:$0xff]   ;;  %v206_v7 = vld [vmem:[%s275_s1 + $0x8] sm:$0xff]  }
   0x4   :  { %182 = vmatprep.subr.bf16.mxu0 %v201_v1  ;;  %196 = vmatprep.mubr.bf16.mxu0 %v208_v4  ;;  %v207_v8 = vld [vmem:[%s275_s1] sm:$0xff]   ;;  %v209_v9 = vld [vmem:[%s276_s0 + $0x8] sm:$0xff]  }
   0x5   :  { %v159_v10 = vld [vmem:[%s277_s2] ss:$0 sm:$0xff] }
   0x7   :  { %183 = vmatpush3.bf16.msra.mxu0 %v201_v1 }
   0x8   :  { %184 = vmatprep.subr.bf16.mxu0 %v202_v2 }
   0xb   :  { %185 = vmatpush3.bf16.msra.mxu0 %v202_v2 }
   0xc   :  { %186 = vmatprep.subr.bf16.mxu0 %v203_v3 }
   0xf   :  { %187 = vmatpush3.bf16.msra.mxu0 %v203_v3 }
  0x10   :  { %188 = vmatprep.subr.bf16.mxu0 %v204_v5 }
  0x13   :  { %189 = vmatpush3.bf16.msra.mxu0 %v204_v5 }
  0x14   :  { %190 = vmatprep.subr.bf16.mxu0 %v205_v6 }
  0x17   :  { %191 = vmatpush3.bf16.msra.mxu0 %v205_v6 }
  0x18   :  { %192 = vmatprep.subr.bf16.mxu0 %v206_v7 }
  0x1b   :  { %193 = vmatpush3.bf16.msra.mxu0 %v206_v7 }
  0x1c   :  { %194 = vmatprep.subr.bf16.mxu0 %v207_v8 }
  0x1f   :  { %195 = vmatpush3.bf16.msra.mxu0 %v207_v8 }
  0x22   :  { %197 = vmatmul.mubr.bf16.vlgmr.msra.gmra.mxu0 %v209_v9 }
  0xe2   :  { %v198_v11 = vpop.f32.mrf.mxu0 }
  0xe3   :  { %v145_v12 = vadd.f32 %v198_v11, %v159_v10 }
  0xe4   :  { %v136_v13 = vpop.f32.mrf.mxu0 }
  0xe5   :  { %153 = vst [vmem:[%s278_s3 + $0x10] sm:$0xff] %v145_v12  ;;  %v137_v14 = vadd.f32 %v159_v10, %v136_v13 }
  0xe6   :  { %v199_v15 = vpop.f32.mrf.mxu0 }
  0xe7   :  { %151 = vst [vmem:[%s278_s3] sm:$0xff] %v137_v14  ;;  %v148_v16 = vadd.f32 %v199_v15, %v159_v10 }
  0xe8   :  { %v139_v17 = vpop.f32.mrf.mxu0 }
  0xe9   :  { %154 = vst [vmem:[%s278_s3 + $0x18] sm:$0xff] %v148_v16  ;;  %v140_v18 = vadd.f32 %v159_v10, %v139_v17 }
  0xeb   :  { %152 = vst [vmem:[%s278_s3 + $0x8] sm:$0xff] %v140_v18 }

// kernel: resnet_forward.15
= control target key start
LH: loop header
LB: loop body
LE: loop exit
PB: predicated region body
PF: predicated region fallthrough
CT: control target
= control target key end

     0   :  { %s2937_s1 = inlined_call_operand.vmem [shape: bf16[1152,128], index: 1, kind: input, shape index: {}]   ;;  %s2938_s0 = inlined_call_operand.vmem [shape: bf16[128,1152], index: 0, kind: input, shape index: {}]   ;;  %s2939_s2 = inlined_call_operand.vmem [shape: f32[1,128], index: 2, kind: input, shape index: {}]   ;;  %s2940_s3 = inlined_call_operand.vmem [shape: f32[128,128], index: 3, kind: input, shape index: {}]   ;;  %s2941_s4 = inlined_call_operand.vmem [shape: f32[128,128], index: 4, kind: output, shape index: {}]  }
   0x1   :  { %v2067_v0 = vld [vmem:[%s2937_s1 + $0x78] sm:$0xff]   ;;  %v2071_v4 = vld [vmem:[%s2937_s1 + $0x70] sm:$0xff]   ;;  %v2075_v8 = vld [vmem:[%s2937_s1 + $0x68] sm:$0xff]  }
   0x2   :  { %v2068_v1 = vld [vmem:[%s2937_s1 + $0xf8] sm:$0xff]   ;;  %1747 = vmatprep.subr.bf16.mxu0 %v2067_v0  ;;  %v2072_v5 = vld [vmem:[%s2937_s1 + $0xf0] sm:$0xff]   ;;  %v2076_v9 = vld [vmem:[%s2937_s1 + $0xe8] sm:$0xff]  }
   0x3   :  { %v2069_v2 = vld [vmem:[%s2937_s1 + $0x38] sm:$0xff]   ;;  %1811 = vmatprep.subr.bf16.mxu1 %v2068_v1  ;;  %v2073_v6 = vld [vmem:[%s2937_s1 + $0x30] sm:$0xff]   ;;  %v2077_v10 = vld [vmem:[%s2937_s1 + $0x28] sm:$0xff]  }
   0x4   :  { %v2070_v3 = vld [vmem:[%s2937_s1 + $0xb8] sm:$0xff]   ;;  %1748 = vmatpush3.bf16.msra.mxu0 %v2069_v2  ;;  %v2074_v7 = vld [vmem:[%s2937_s1 + $0xb0] sm:$0xff]   ;;  %v2078_v11 = vld [vmem:[%s2937_s1 + $0xa8] sm:$0xff]  }
   0x5   :  { %1812 = vmatpush3.bf16.msra.mxu1 %v2070_v3  ;;  %1749 = vmatprep.subr.bf16.mxu0 %v2071_v4  ;;  %v2079_v12 = vld [vmem:[%s2937_s1 + $0x60] sm:$0xff]   ;;  %v2083_v16 = vld [vmem:[%s2937_s1 + $0x58] sm:$0xff]   ;;  %v2087_v20 = vld [vmem:[%s2937_s1 + $0x50] sm:$0xff]  }
   0x6   :  { %1813 = vmatprep.subr.bf16.mxu1 %v2072_v5  ;;  %v2080_v13 = vld [vmem:[%s2937_s1 + $0xe0] sm:$0xff]   ;;  %v2084_v17 = vld [vmem:[%s2937_s1 + $0xd8] sm:$0xff]   ;;  %v2088_v21 = vld [vmem:[%s2937_s1 + $0xd0] sm:$0xff]  }
   0x7   :  { %v2081_v14 = vld [vmem:[%s2937_s1 + $0x20] sm:$0xff]   ;;  %v2085_v18 = vld [vmem:[%s2937_s1 + $0x18] sm:$0xff]   ;;  %v2089_v22 = vld [vmem:[%s2937_s1 + $0x10] sm:$0xff]  }
   0x8   :  { %1750 = vmatpush3.bf16.msra.mxu0 %v2073_v6  ;;  %v2082_v15 = vld [vmem:[%s2937_s1 + $0xa0] sm:$0xff]   ;;  %v2086_v19 = vld [vmem:[%s2937_s1 + $0x98] sm:$0xff]   ;;  %v2090_v23 = vld [vmem:[%s2937_s1 + $0x90] sm:$0xff]  }
   0x9   :  { %1814 = vmatpush3.bf16.msra.mxu1 %v2074_v7  ;;  %1751 = vmatprep.subr.bf16.mxu0 %v2075_v8  ;;  %v2091_v24 = vld [vmem:[%s2937_s1 + $0x48] sm:$0xff]   ;;  %v2095_v28 = vld [vmem:[%s2937_s1 + $0x40] sm:$0xff]   ;;  %v2105_v36 = vld [vmem:[%s2937_s1 + $0x178] sm:$0xff]  }
   0xa   :  { %1815 = vmatprep.subr.bf16.mxu1 %v2076_v9  ;;  %v2092_v25 = vld [vmem:[%s2937_s1 + $0xc8] sm:$0xff]   ;;  %v2096_v29 = vld [vmem:[%s2937_s1 + $0xc0] sm:$0xff]   ;;  %v2106_v37 = vld [vmem:[%s2937_s1 + $0x1f8] sm:$0xff]  }
   0xb   :  { %v2093_v26 = vld [vmem:[%s2937_s1 + $0x8] sm:$0xff]   ;;  %v2097_v30 = vld [vmem:[%s2937_s1] sm:$0xff]   ;;  %v2107_v38 = vld [vmem:[%s2937_s1 + $0x138] sm:$0xff]  }
   0xc   :  { %1752 = vmatpush3.bf16.msra.mxu0 %v2077_v10  ;;  %v2094_v27 = vld [vmem:[%s2937_s1 + $0x88] sm:$0xff]   ;;  %v2098_v31 = vld [vmem:[%s2937_s1 + $0x80] sm:$0xff]   ;;  %v2108_v39 = vld [vmem:[%s2937_s1 + $0x1b8] sm:$0xff]  }
   0xd   :  { %1816 = vmatpush3.bf16.msra.mxu1 %v2078_v11  ;;  %1753 = vmatprep.subr.bf16.mxu0 %v2079_v12  ;;  %v2099_v32 = vld [vmem:[%s2938_s0] ss:$36 sps:$4 sm:$0xff]   ;;  %v2102_v34 = vld [vmem:[%s2938_s0 + $0x8] ss:$36 sps:$4 sm:$0xff]   ;;  %v2111_v41 = vld [vmem:[%s2938_s0 + $0x54] ss:$36 sps:$4 sm:$0xff]  }
   0xe   :  { %1817 = vmatprep.subr.bf16.mxu1 %v2080_v13  ;;  %v2101_v33 = vld [vmem:[%s2938_s0 + $0x4] ss:$36 sps:$4 sm:$0xff]   ;;  %v2104_v35 = vld [vmem:[%s2938_s0 + $0xc] ss:$36 sps:$4 sm:$0xff]   ;;  %v2119_v48 = vld [vmem:[%s2938_s0 + $0x94] ss:$36 sps:$4 sm:$0xff]  }
   0xf   :  { %1081 = vmatprep.mubr.bf16.mxu0 %v2101_v33  ;;  %1178 = vmatprep.mubr.bf16.mxu1 %v2104_v35  ;;  %v2109_v40 = vld [vmem:[%s2938_s0 + $0x4c] ss:$36 sps:$4 sm:$0xff]   ;;  %v2121_v49 = vld [vmem:[%s2938_s0 + $0x9c] ss:$36 sps:$4 sm:$0xff]   ;;  %v2131_v57 = vld [vmem:[%s2938_s0 + $0xe4] ss:$36 sps:$4 sm:$0xff]  }
  0x10   :  { %1754 = vmatpush3.bf16.msra.mxu0 %v2081_v14  ;;  %v2113_v42 = vld [vmem:[%s2938_s0 + $0x48] ss:$36 sps:$4 sm:$0xff]   ;;  %v2114_v43 = vld [vmem:[%s2938_s0 + $0x50] ss:$36 sps:$4 sm:$0xff]   ;;  %v2124_v51 = vld [vmem:[%s2938_s0 + $0x98] ss:$36 sps:$4 sm:$0xff]  }
  0x11   :  { %1818 = vmatpush3.bf16.msra.mxu1 %v2082_v15  ;;  %1755 = vmatprep.subr.bf16.mxu0 %v2083_v16  ;;  %v2115_v44 = vld [vmem:[%s2937_s1 + $0x170] sm:$0xff]   ;;  %v2125_v52 = vld [vmem:[%s2937_s1 + $0x168] sm:$0xff]   ;;  %v2129_v56 = vld [vmem:[%s2938_s0 + $0xdc] ss:$36 sps:$4 sm:$0xff]  }
  0x12   :  { %1819 = vmatprep.subr.bf16.mxu1 %v2084_v17  ;;  %v2116_v45 = vld [vmem:[%s2937_s1 + $0x1f0] sm:$0xff]   ;;  %v2126_v53 = vld [vmem:[%s2937_s1 + $0x1e8] sm:$0xff]   ;;  %v2133_v58 = vld [vmem:[%s2938_s0 + $0xd8] ss:$36 sps:$4 sm:$0xff]  }
  0x13   :  { %v2117_v46 = vld [vmem:[%s2937_s1 + $0x130] sm:$0xff]   ;;  %v2127_v54 = vld [vmem:[%s2937_s1 + $0x128] sm:$0xff]   ;;  %v2134_v59 = vld [vmem:[%s2938_s0 + $0xe0] ss:$36 sps:$4 sm:$0xff]  }
  0x14   :  { %1756 = vmatpush3.bf16.msra.mxu0 %v2085_v18  ;;  %v2118_v47 = vld [vmem:[%s2937_s1 + $0x1b0] sm:$0xff]   ;;  %v2128_v55 = vld [vmem:[%s2937_s1 + $0x1a8] sm:$0xff]   ;;  %v2135_v60 = vld [vmem:[%s2937_s1 + $0x160] sm:$0xff]  }
  0x15   :  { %1820 = vmatpush3.bf16.msra.mxu1 %v2086_v19  ;;  %1757 = vmatprep.subr.bf16.mxu0 %v2087_v20  ;;  %v2123_v50 = vld [vmem:[%s2938_s0 + $0x90] ss:$36 sps:$4 sm:$0xff]   ;;  %v2136_v61 = vld [vmem:[%s2937_s1 + $0x1e0] sm:$0xff]   ;;  %v2145_v3 = vld [vmem:[%s2937_s1 + $0x158] sm:$0xff]  }
  0x16   :  { %1821 = vmatprep.subr.bf16.mxu1 %v2088_v21  ;;  %v2137_v62 = vld [vmem:[%s2937_s1 + $0x120] sm:$0xff]   ;;  %v2141_v1 = vld [vmem:[%s2938_s0 + $0x12c] ss:$36 sps:$4 sm:$0xff]   ;;  %v2146_v5 = vld [vmem:[%s2937_s1 + $0x1d8] sm:$0xff]  }
  0x17   :  { %v2138_v63 = vld [vmem:[%s2937_s1 + $0x1a0] sm:$0xff]   ;;  %v2144_v4 = vld [vmem:[%s2938_s0 + $0x128] ss:$36 sps:$4 sm:$0xff]   ;;  %v2147_v6 = vld [vmem:[%s2937_s1 + $0x118] sm:$0xff]  }
  0x18   :  { %1758 = vmatpush3.bf16.msra.mxu0 %v2089_v22  ;;  %v2139_v0 = vld [vmem:[%s2938_s0 + $0x124] ss:$36 sps:$4 sm:$0xff]   ;;  %v2148_v7 = vld [vmem:[%s2937_s1 + $0x198] sm:$0xff]   ;;  %v2149_v8 = vld [vmem:[%s2938_s0 + $0x16c] ss:$36 sps:$4 sm:$0xff]  }
  0x19   :  { %1822 = vmatpush3.bf16.msra.mxu1 %v2090_v23  ;;  %1759 = vmatprep.subr.bf16.mxu0 %v2091_v24  ;;  %v2143_v2 = vld [vmem:[%s2938_s0 + $0x120] ss:$36 sps:$4 sm:$0xff]   ;;  %v2151_v9 = vld [vmem:[%s2938_s0 + $0x174] ss:$36 sps:$4 sm:$0xff]   ;;  %v2153_v12 = vld [vmem:[%s2938_s0 + $0x168] ss:$36 sps:$4 sm:$0xff]  }
  0x1a   :  { %1823 = vmatprep.subr.bf16.mxu1 %v2092_v25  ;;  %v2155_v10 = vld [vmem:[%s2937_s1 + $0x150] sm:$0xff]   ;;  %v2161_v17 = vld [vmem:[%s2938_s0 + $0x1bc] ss:$36 sps:$4 sm:$0xff]   ;;  %v2165_v18 = vld [vmem:[%s2937_s1 + $0x148] sm:$0xff]  }
  0x1b   :  { %v2156_v11 = vld [vmem:[%s2937_s1 + $0x1d0] sm:$0xff]   ;;  %v2166_v19 = vld [vmem:[%s2937_s1 + $0x1c8] sm:$0xff]   ;;  %v2164_v23 = vld [vmem:[%s2938_s0 + $0x1b8] ss:$36 sps:$4 sm:$0xff]  }
  0x1c   :  { %1760 = vmatpush3.bf16.msra.mxu0 %v2093_v26  ;;  %v2157_v13 = vld [vmem:[%s2937_s1 + $0x110] sm:$0xff]   ;;  %v2167_v20 = vld [vmem:[%s2937_s1 + $0x108] sm:$0xff]   ;;  %v2169_v24 = vld [vmem:[%s2938_s0 + $0x1fc] ss:$36 sps:$4 sm:$0xff]  }
  0x1d   :  { %1824 = vmatpush3.bf16.msra.mxu1 %v2094_v27  ;;  %1761 = vmatprep.subr.bf16.mxu0 %v2095_v28  ;;  %v2158_v14 = vld [vmem:[%s2937_s1 + $0x190] sm:$0xff]   ;;  %v2168_v21 = vld [vmem:[%s2937_s1 + $0x188] sm:$0xff]   ;;  %v2175_v26 = vld [vmem:[%s2937_s1 + $0x140] sm:$0xff]  }
  0x1e   :  { %1825 = vmatprep.subr.bf16.mxu1 %v2096_v29  ;;  %v2154_v15 = vld [vmem:[%s2938_s0 + $0x170] ss:$36 sps:$4 sm:$0xff]   ;;  %v2171_v25 = vld [vmem:[%s2938_s0 + $0x204] ss:$36 sps:$4 sm:$0xff]  }
  0x1f   :  { %v2159_v16 = vld [vmem:[%s2938_s0 + $0x1b4] ss:$36 sps:$4 sm:$0xff]   ;;  %v2176_v27 = vld [vmem:[%s2937_s1 + $0x1c0] sm:$0xff]  }
  0x20   :  { %1762 = vmatpush3.bf16.msra.mxu0 %v2097_v30  ;;  %v2163_v22 = vld [vmem:[%s2938_s0 + $0x1b0] ss:$36 sps:$4 sm:$0xff]   ;;  %v2177_v28 = vld [vmem:[%s2937_s1 + $0x100] sm:$0xff]   ;;  %v2173_v30 = vld [vmem:[%s2938_s0 + $0x1f8] ss:$36 sps:$4 sm:$0xff]  }
  0x21   :  { %1826 = vmatpush3.bf16.msra.mxu1 %v2098_v31  ;;  %1875 = vmatprep.subr.bf16.mxu0 %v2105_v36  ;;  %v2178_v29 = vld [vmem:[%s2937_s1 + $0x180] sm:$0xff]   ;;  %v2181_v33 = vld [vmem:[%s2938_s0 + $0x14] ss:$36 sps:$4 sm:$0xff]  }
  0x22   :  { %1939 = vmatprep.subr.bf16.mxu1 %v2106_v37  ;;  %v2174_v31 = vld [vmem:[%s2938_s0 + $0x200] ss:$36 sps:$4 sm:$0xff]   ;;  %v2179_v35 = vld [vmem:[%s2938_s0 + $0x10] ss:$36 sps:$4 sm:$0xff]   ;;  %v2182_v36 = vld [vmem:[%s2938_s0 + $0x18] ss:$36 sps:$4 sm:$0xff]  }
  0x23   :  { %1082 = vmatmul.mubr.bf16.vlgmr.msra.gmra.mxu0 %v2099_v32  ;;  %v2185_v32 = vld [vmem:[%s2937_s1 + $0x238] sm:$0xff]  }
  0x24   :  { %1179 = vmatmul.mubr.bf16.vlgmr.msra.gmra.mxu1 %v2102_v34  ;;  %1876 = vmatpush3.bf16.msra.mxu0 %v2107_v38  ;;  %v2184_v34 = vld [vmem:[%s2938_s0 + $0x1c] ss:$36 sps:$4 sm:$0xff]   ;;  %v2188_v38 = vld [vmem:[%s2938_s0 + $0x64] ss:$36 sps:$4 sm:$0xff]  }
  0x25   :  { %1940 = vmatpush3.bf16.msra.mxu1 %v2108_v39  ;;  %1089 = vmatprep.mubr.bf16.mxu0 %v2109_v40  ;;  %v2186_v37 = vld [vmem:[%s2938_s0 + $0x5c] ss:$36 sps:$4 sm:$0xff]   ;;  %v2192_v39 = vld [vmem:[%s2937_s1 + $0x230] sm:$0xff]   ;;  %v2199_v40 = vld [vmem:[%s2937_s1 + $0x228] sm:$0xff]  }
  0x26   :  { %1186 = vmatprep.mubr.bf16.mxu1 %v2111_v41  ;;  %1877 = vmatprep.subr.bf16.mxu0 %v2115_v44  ;;  %v2190_v41 = vld [vmem:[%s2938_s0 + $0x58] ss:$36 sps:$4 sm:$0xff]   ;;  %v2195_v44 = vld [vmem:[%s2938_s0 + $0xac] ss:$36 sps:$4 sm:$0xff]  }
  0x27   :  { %1941 = vmatprep.subr.bf16.mxu1 %v2116_v45  ;;  %v2206_v45 = vld [vmem:[%s2937_s1 + $0x220] sm:$0xff]  }
  0x28   :  { %1878 = vmatpush3.bf16.msra.mxu0 %v2117_v46  ;;  %v2213_v46 = vld [vmem:[%s2937_s1 + $0x218] sm:$0xff]  }
  0x29   :  { %1942 = vmatpush3.bf16.msra.mxu1 %v2118_v47  ;;  %1879 = vmatprep.subr.bf16.mxu0 %v2125_v52  ;;  %v2197_v47 = vld [vmem:[%s2938_s0 + $0xa0] ss:$36 sps:$4 sm:$0xff]   ;;  %v2204_v52 = vld [vmem:[%s2938_s0 + $0xe8] ss:$36 sps:$4 sm:$0xff]  }
  0x2a   :  { %1943 = vmatprep.subr.bf16.mxu1 %v2126_v53  ;;  %v2227_v53 = vld [vmem:[%s2937_s1 + $0x208] sm:$0xff]  }
  0x2b   :  { %1090 = vmatmul.mubr.bf16.gmra.mxu0 %v2113_v42  ;;  %v2191_v42 = vld [vmem:[%s2938_s0 + $0x60] ss:$36 sps:$4 sm:$0xff]  }
  0x2c   :  { %1187 = vmatmul.mubr.bf16.gmra.mxu1 %v2114_v43  ;;  %1097 = vmatprep.mubr.bf16.mxu0 %v2119_v48  ;;  %v2193_v43 = vld [vmem:[%s2938_s0 + $0xa4] ss:$36 sps:$4 sm:$0xff]  }
  0x2d   :  { %1194 = vmatprep.mubr.bf16.mxu1 %v2121_v49  ;;  %1880 = vmatpush3.bf16.msra.mxu0 %v2127_v54  ;;  %v2198_v48 = vld [vmem:[%s2938_s0 + $0xa8] ss:$36 sps:$4 sm:$0xff]   ;;  %v2205_v54 = vld [vmem:[%s2938_s0 + $0xf0] ss:$36 sps:$4 sm:$0xff]  }
  0x2e   :  { %1944 = vmatpush3.bf16.msra.mxu1 %v2128_v55  ;;  %1881 = vmatprep.subr.bf16.mxu0 %v2135_v60  ;;  %v2200_v49 = vld [vmem:[%s2938_s0 + $0xec] ss:$36 sps:$4 sm:$0xff]   ;;  %v2207_v55 = vld [vmem:[%s2938_s0 + $0x134] ss:$36 sps:$4 sm:$0xff]   ;;  %v2214_v60 = vld [vmem:[%s2938_s0 + $0x17c] ss:$36 sps:$4 sm:$0xff]  }
  0x2f   :  { %1945 = vmatprep.subr.bf16.mxu1 %v2136_v61  ;;  %v2216_v61 = vld [vmem:[%s2938_s0 + $0x184] ss:$36 sps:$4 sm:$0xff]  }
  0x31   :  { %1882 = vmatpush3.bf16.msra.mxu0 %v2137_v62  ;;  %v2218_v62 = vld [vmem:[%s2938_s0 + $0x178] ss:$36 sps:$4 sm:$0xff]  }
  0x32   :  { %1946 = vmatpush3.bf16.msra.mxu1 %v2138_v63  ;;  %1883 = vmatprep.subr.bf16.mxu0 %v2145_v3  ;;  %v2219_v63 = vld [vmem:[%s2938_s0 + $0x180] ss:$36 sps:$4 sm:$0xff]   ;;  %v2226_v3 = vld [vmem:[%s2938_s0 + $0x1c8] ss:$36 sps:$4 sm:$0xff]  }
  0x33   :  { %1098 = vmatmul.mubr.bf16.gmra.mxu0 %v2123_v50  ;;  %1947 = vmatprep.subr.bf16.mxu1 %v2146_v5  ;;  %v2202_v50 = vld [vmem:[%s2938_s0 + $0xf4] ss:$36 sps:$4 sm:$0xff]  }
  0x34   :  { %1195 = vmatmul.mubr.bf16.gmra.mxu1 %v2124_v51  ;;  %1105 = vmatprep.mubr.bf16.mxu0 %v2129_v56  ;;  %v2220_v51 = vld [vmem:[%s2937_s1 + $0x210] sm:$0xff]   ;;  %v2209_v56 = vld [vmem:[%s2938_s0 + $0x13c] ss:$36 sps:$4 sm:$0xff]  }
  0x35   :  { %1202 = vmatprep.mubr.bf16.mxu1 %v2131_v57  ;;  %1884 = vmatpush3.bf16.msra.mxu0 %v2147_v6  ;;  %v2234_v57 = vld [vmem:[%s2937_s1 + $0x200] sm:$0xff]   ;;  %v2230_v5 = vld [vmem:[%s2938_s0 + $0x214] ss:$36 sps:$4 sm:$0xff]   ;;  %v2232_v6 = vld [vmem:[%s2938_s0 + $0x208] ss:$36 sps:$4 sm:$0xff]  }
  0x36   :  { %1948 = vmatpush3.bf16.msra.mxu1 %v2148_v7  ;;  %1885 = vmatprep.subr.bf16.mxu0 %v2155_v10  ;;  %v2233_v7 = vld [vmem:[%s2938_s0 + $0x210] ss:$36 sps:$4 sm:$0xff]   ;;  %v2237_v10 = vld [vmem:[%s2938_s0 + $0x68] ss:$36 sps:$4 sm:$0xff]  }
  0x37   :  { %1949 = vmatprep.subr.bf16.mxu1 %v2156_v11  ;;  %v2238_v11 = vld [vmem:[%s2938_s0 + $0x188] ss:$36 sps:$4 sm:$0xff]  }
  0x39   :  { %1886 = vmatpush3.bf16.msra.mxu0 %v2157_v13  ;;  %v2240_v13 = vld [vmem:[%s2938_s0 + $0x1d0] ss:$36 sps:$4 sm:$0xff]  }
  0x3a   :  { %1950 = vmatpush3.bf16.msra.mxu1 %v2158_v14  ;;  %1887 = vmatprep.subr.bf16.mxu0 %v2165_v18  ;;  %v2241_v14 = vld [vmem:[%s2938_s0 + $0xf8] ss:$36 sps:$4 sm:$0xff]   ;;  %v2703_v18 = vld [vmem:[%s2939_s2] ss:$0 sm:$0xff] }
  0x3b   :  { %1106 = vmatmul.mubr.bf16.gmra.mxu0 %v2133_v58  ;;  %1951 = vmatprep.subr.bf16.mxu1 %v2166_v19  ;;  %v2211_v58 = vld [vmem:[%s2938_s0 + $0x130] ss:$36 sps:$4 sm:$0xff]  }
  0x3c   :  { %1203 = vmatmul.mubr.bf16.gmra.mxu1 %v2134_v59  ;;  %1113 = vmatprep.mubr.bf16.mxu0 %v2139_v0  ;;  %v2212_v59 = vld [vmem:[%s2938_s0 + $0x138] ss:$36 sps:$4 sm:$0xff]   ;;  %v2221_v0 = vld [vmem:[%s2938_s0 + $0x1c4] ss:$36 sps:$4 sm:$0xff]  }
  0x3d   :  { %1210 = vmatprep.mubr.bf16.mxu1 %v2141_v1  ;;  %1888 = vmatpush3.bf16.msra.mxu0 %v2167_v20  ;;  %v2223_v1 = vld [vmem:[%s2938_s0 + $0x1cc] ss:$36 sps:$4 sm:$0xff]  }
  0x3e   :  { %1952 = vmatpush3.bf16.msra.mxu1 %v2168_v21  ;;  %1889 = vmatprep.subr.bf16.mxu0 %v2175_v26 }
  0x3f   :  { %1953 = vmatprep.subr.bf16.mxu1 %v2176_v27 }
  0x41   :  { %1890 = vmatpush3.bf16.msra.mxu0 %v2177_v28 }
  0x42   :  { %1954 = vmatpush3.bf16.msra.mxu1 %v2178_v29  ;;  %2019 = vmatprep.subr.bf16.mxu0 %v2185_v32 }
  0x43   :  { %1114 = vmatmul.mubr.bf16.gmra.mxu0 %v2143_v2  ;;  %2051 = vmatprep.subr.bf16.mxu1 %v2185_v32  ;;  %v2225_v2 = vld [vmem:[%s2938_s0 + $0x1c0] ss:$36 sps:$4 sm:$0xff]  }
  0x44   :  { %1211 = vmatmul.mubr.bf16.gmra.mxu1 %v2144_v4  ;;  %1121 = vmatprep.mubr.bf16.mxu0 %v2149_v8  ;;  %v2228_v4 = vld [vmem:[%s2938_s0 + $0x20c] ss:$36 sps:$4 sm:$0xff]   ;;  %v2235_v8 = vld [vmem:[%s2938_s0 + $0x20] ss:$36 sps:$4 sm:$0xff]  }
  0x45   :  { %1218 = vmatprep.mubr.bf16.mxu1 %v2151_v9  ;;  %v2236_v9 = vld [vmem:[%s2938_s0 + $0x140] ss:$36 sps:$4 sm:$0xff]  }
  0x4b   :  { %1122 = vmatmul.mubr.bf16.gmra.mxu0 %v2153_v12  ;;  %v2239_v12 = vld [vmem:[%s2938_s0 + $0xb0] ss:$36 sps:$4 sm:$0xff]  }
  0x4c   :  { %1219 = vmatmul.mubr.bf16.gmra.mxu1 %v2154_v15  ;;  %1129 = vmatprep.mubr.bf16.mxu0 %v2159_v16  ;;  %v2242_v15 = vld [vmem:[%s2938_s0 + $0x218] ss:$36 sps:$4 sm:$0xff]  }
  0x4d   :  { %1226 = vmatprep.mubr.bf16.mxu1 %v2161_v17 }
  0x53   :  { %1130 = vmatmul.mubr.bf16.gmra.mxu0 %v2163_v22 }
  0x54   :  { %1227 = vmatmul.mubr.bf16.gmra.mxu1 %v2164_v23  ;;  %1137 = vmatprep.mubr.bf16.mxu0 %v2169_v24 }
  0x55   :  { %1234 = vmatprep.mubr.bf16.mxu1 %v2171_v25 }
  0x5b   :  { %1138 = vmatmul.mubr.bf16.gmra.mxu0 %v2173_v30 }
  0x5c   :  { %1235 = vmatmul.mubr.bf16.gmra.mxu1 %v2174_v31  ;;  %1275 = vmatprep.mubr.bf16.mxu0 %v2181_v33 }
  0x5d   :  { %1372 = vmatprep.mubr.bf16.mxu1 %v2184_v34 }
  0x63   :  { %1276 = vmatmul.mubr.bf16.vlgmr.msra.gmra.mxu0 %v2179_v35 }
  0x64   :  { %1373 = vmatmul.mubr.bf16.vlgmr.msra.gmra.mxu1 %v2182_v36  ;;  %2020 = vmatpush3.bf16.msra.mxu0 %v2185_v32 }
  0x65   :  { %2059 = vmatpush3.bf16.msra.mxu1 %v2185_v32  ;;  %1283 = vmatprep.mubr.bf16.mxu0 %v2186_v37 }
  0x66   :  { %1380 = vmatprep.mubr.bf16.mxu1 %v2188_v38  ;;  %2021 = vmatprep.subr.bf16.mxu0 %v2192_v39 }
  0x67   :  { %2052 = vmatprep.subr.bf16.mxu1 %v2192_v39 }
  0x68   :  { %2022 = vmatpush3.bf16.msra.mxu0 %v2192_v39 }
  0x69   :  { %2060 = vmatpush3.bf16.msra.mxu1 %v2192_v39  ;;  %2023 = vmatprep.subr.bf16.mxu0 %v2199_v40 }
  0x6a   :  { %2053 = vmatprep.subr.bf16.mxu1 %v2199_v40 }
  0x6b   :  { %1284 = vmatmul.mubr.bf16.gmra.mxu0 %v2190_v41 }
  0x6c   :  { %1381 = vmatmul.mubr.bf16.gmra.mxu1 %v2191_v42  ;;  %1291 = vmatprep.mubr.bf16.mxu0 %v2193_v43 }
  0x6d   :  { %1388 = vmatprep.mubr.bf16.mxu1 %v2195_v44  ;;  %2024 = vmatpush3.bf16.msra.mxu0 %v2199_v40 }
  0x6e   :  { %2061 = vmatpush3.bf16.msra.mxu1 %v2199_v40  ;;  %2025 = vmatprep.subr.bf16.mxu0 %v2206_v45 }
  0x6f   :  { %2054 = vmatprep.subr.bf16.mxu1 %v2206_v45 }
  0x71   :  { %2026 = vmatpush3.bf16.msra.mxu0 %v2206_v45 }
  0x72   :  { %2062 = vmatpush3.bf16.msra.mxu1 %v2206_v45  ;;  %2027 = vmatprep.subr.bf16.mxu0 %v2213_v46 }
  0x73   :  { %1292 = vmatmul.mubr.bf16.gmra.mxu0 %v2197_v47  ;;  %2055 = vmatprep.subr.bf16.mxu1 %v2213_v46 }
  0x74   :  { %1389 = vmatmul.mubr.bf16.gmra.mxu1 %v2198_v48  ;;  %1299 = vmatprep.mubr.bf16.mxu0 %v2200_v49 }
  0x75   :  { %1396 = vmatprep.mubr.bf16.mxu1 %v2202_v50  ;;  %2028 = vmatpush3.bf16.msra.mxu0 %v2213_v46 }
  0x76   :  { %2063 = vmatpush3.bf16.msra.mxu1 %v2213_v46  ;;  %2029 = vmatprep.subr.bf16.mxu0 %v2220_v51 }
  0x77   :  { %2056 = vmatprep.subr.bf16.mxu1 %v2220_v51 }
  0x79   :  { %2030 = vmatpush3.bf16.msra.mxu0 %v2220_v51 }
  0x7a   :  { %2064 = vmatpush3.bf16.msra.mxu1 %v2220_v51  ;;  %2031 = vmatprep.subr.bf16.mxu0 %v2227_v53 }
  0x7b   :  { %1300 = vmatmul.mubr.bf16.gmra.mxu0 %v2204_v52  ;;  %2057 = vmatprep.subr.bf16.mxu1 %v2227_v53 }
  0x7c   :  { %1397 = vmatmul.mubr.bf16.gmra.mxu1 %v2205_v54  ;;  %1307 = vmatprep.mubr.bf16.mxu0 %v2207_v55 }
  0x7d   :  { %1404 = vmatprep.mubr.bf16.mxu1 %v2209_v56  ;;  %2032 = vmatpush3.bf16.msra.mxu0 %v2227_v53 }
  0x7e   :  { %2065 = vmatpush3.bf16.msra.mxu1 %v2227_v53  ;;  %2033 = vmatprep.subr.bf16.mxu0 %v2234_v57 }
  0x7f   :  { %2058 = vmatprep.subr.bf16.mxu1 %v2234_v57 }
  0x81   :  { %2034 = vmatpush3.bf16.msra.mxu0 %v2234_v57 }
  0x82   :  { %2066 = vmatpush3.bf16.msra.mxu1 %v2234_v57 }
  0x83   :  { %1308 = vmatmul.mubr.bf16.gmra.mxu0 %v2211_v58 }
  0x84   :  { %1405 = vmatmul.mubr.bf16.gmra.mxu1 %v2212_v59  ;;  %1315 = vmatprep.mubr.bf16.mxu0 %v2214_v60 }
  0x85   :  { %1412 = vmatprep.mubr.bf16.mxu1 %v2216_v61 }
  0x8b   :  { %1316 = vmatmul.mubr.bf16.gmra.mxu0 %v2218_v62 }
  0x8c   :  { %1413 = vmatmul.mubr.bf16.gmra.mxu1 %v2219_v63  ;;  %1323 = vmatprep.mubr.bf16.mxu0 %v2221_v0 }
  0x8d   :  { %1420 = vmatprep.mubr.bf16.mxu1 %v2223_v1 }
  0x93   :  { %1324 = vmatmul.mubr.bf16.gmra.mxu0 %v2225_v2 }
  0x94   :  { %1421 = vmatmul.mubr.bf16.gmra.mxu1 %v2226_v3  ;;  %1331 = vmatprep.mubr.bf16.mxu0 %v2228_v4 }
  0x95   :  { %1428 = vmatprep.mubr.bf16.mxu1 %v2230_v5 }
  0x9b   :  { %1332 = vmatmul.mubr.bf16.gmra.mxu0 %v2232_v6 }
  0x9c   :  { %1429 = vmatmul.mubr.bf16.gmra.mxu1 %v2233_v7  ;;  %2035 = vmatprep.mubr.bf16.mxu0 %v2235_v8 }
  0x9d   :  { %2043 = vmatprep.mubr.bf16.mxu1 %v2236_v9 }
  0xa3   :  { %2036 = vmatmul.mubr.bf16.vlgmr.msra.gmra.mxu0 %v2237_v10 }
  0xa4   :  { %2044 = vmatmul.mubr.bf16.vlgmr.msra.gmra.mxu1 %v2238_v11  ;;  %2039 = vmatprep.mubr.bf16.mxu0 %v2239_v12 }
  0xa5   :  { %2047 = vmatprep.mubr.bf16.mxu1 %v2240_v13 }
  0xab   :  { %2040 = vmatmul.mubr.bf16.gmra.mxu0 %v2241_v14 }
  0xac   :  { %2048 = vmatmul.mubr.bf16.gmra.mxu1 %v2242_v15 }
  0xe3   :  { %v1763_v16 = vpop.f32.mrf.mxu0 }
  0xe4   :  { %v1827_v17 = vpop.f32.mrf.mxu1 }
  0xe5   :  { %v1764_v19 = vpop.f32.mrf.mxu0 }
  0xe6   :  { %v1765_v20 = vadd.f32 %v1764_v19, %v1763_v16  ;;  %v1828_v21 = vpop.f32.mrf.mxu1 }
  0xe7   :  { %v1829_v22 = vadd.f32 %v1828_v21, %v1827_v17  ;;  %v1766_v23 = vpop.f32.mrf.mxu0 }
  0xe8   :  { %v1084_v24 = vadd.f32 %v1765_v20, %v2703_v18  ;;  %v1830_v25 = vpop.f32.mrf.mxu1 }
  0xe9   :  { %v1767_v26 = vpop.f32.mrf.mxu0 }
  0xea   :  { %v2706_v27 = vadd.f32 %v1829_v22, %v1084_v24  ;;  %v1768_v28 = vadd.f32 %v1767_v26, %v1766_v23  ;;  %v1831_v29 = vpop.f32.mrf.mxu1 }
  0xeb   :  { %v1832_v30 = vadd.f32 %v1831_v29, %v1830_v25  ;;  %v1769_v31 = vpop.f32.mrf.mxu0 }
  0xec   :  { %v1087_v32 = vadd.f32 %v1768_v28, %v2703_v18  ;;  %v1833_v33 = vpop.f32.mrf.mxu1 }
  0xed   :  { %v1770_v34 = vpop.f32.mrf.mxu0 }
  0xee   :  { %v2709_v35 = vadd.f32 %v1832_v30, %v1087_v32  ;;  %v1771_v36 = vadd.f32 %v1770_v34, %v1769_v31  ;;  %v1834_v37 = vpop.f32.mrf.mxu1 }
  0xef   :  { %v1835_v38 = vadd.f32 %v1834_v37, %v1833_v33  ;;  %v1772_v39 = vpop.f32.mrf.mxu0 }
  0xf0   :  { %v1092_v40 = vadd.f32 %v1771_v36, %v2703_v18  ;;  %v1836_v41 = vpop.f32.mrf.mxu1 }
  0xf1   :  { %v1773_v42 = vpop.f32.mrf.mxu0 }
  0xf2   :  { %v2712_v43 = vadd.f32 %v1835_v38, %v1092_v40  ;;  %v1774_v44 = vadd.f32 %v1773_v42, %v1772_v39  ;;  %v1837_v45 = vpop.f32.mrf.mxu1 }
  0xf3   :  { %v1838_v46 = vadd.f32 %v1837_v45, %v1836_v41  ;;  %v1775_v47 = vpop.f32.mrf.mxu0 }
  0xf4   :  { %v1095_v48 = vadd.f32 %v1774_v44, %v2703_v18  ;;  %v1839_v49 = vpop.f32.mrf.mxu1 }
  0xf5   :  { %v1776_v50 = vpop.f32.mrf.mxu0 }
  0xf6   :  { %v2715_v51 = vadd.f32 %v1838_v46, %v1095_v48  ;;  %v1777_v52 = vadd.f32 %v1776_v50, %v1775_v47  ;;  %v1840_v53 = vpop.f32.mrf.mxu1 }
  0xf7   :  { %v1841_v54 = vadd.f32 %v1840_v53, %v1839_v49  ;;  %v1778_v55 = vpop.f32.mrf.mxu0 }
  0xf8   :  { %v1100_v56 = vadd.f32 %v1777_v52, %v2703_v18  ;;  %v1842_v57 = vpop.f32.mrf.mxu1 }
  0xf9   :  { %v1779_v58 = vpop.f32.mrf.mxu0 }
  0xfa   :  { %v2718_v59 = vadd.f32 %v1841_v54, %v1100_v56  ;;  %v1780_v60 = vadd.f32 %v1779_v58, %v1778_v55  ;;  %v1843_v61 = vpop.f32.mrf.mxu1 }
  0xfb   :  { %v1844_v62 = vadd.f32 %v1843_v61, %v1842_v57  ;;  %v1781_v63 = vpop.f32.mrf.mxu0 }
  0xfc   :  { %v1103_v0 = vadd.f32 %v1780_v60, %v2703_v18  ;;  %v1845_v1 = vpop.f32.mrf.mxu1 }
  0xfd   :  { %v1782_v2 = vpop.f32.mrf.mxu0 }
  0xfe   :  { %v2721_v3 = vadd.f32 %v1844_v62, %v1103_v0  ;;  %v1783_v4 = vadd.f32 %v1782_v2, %v1781_v63  ;;  %v1846_v5 = vpop.f32.mrf.mxu1 }
  0xff   :  { %v1847_v6 = vadd.f32 %v1846_v5, %v1845_v1  ;;  %v1784_v7 = vpop.f32.mrf.mxu0 }
 0x100   :  { %2942 = vst [vmem:[#allocation2_spill] sm:$0xff] %v2721_v3  ;;  %v1108_v8 = vadd.f32 %v1783_v4, %v2703_v18  ;;  %v1848_v9 = vpop.f32.mrf.mxu1 }
 0x101   :  { %v1785_v10 = vpop.f32.mrf.mxu0 }
 0x102   :  { %v2724_v11 = vadd.f32 %v1847_v6, %v1108_v8  ;;  %v1786_v12 = vadd.f32 %v1785_v10, %v1784_v7  ;;  %v1849_v13 = vpop.f32.mrf.mxu1 }
 0x103   :  { %v1850_v14 = vadd.f32 %v1849_v13, %v1848_v9  ;;  %v1787_v15 = vpop.f32.mrf.mxu0 }
 0x104   :  { %v1111_v16 = vadd.f32 %v1786_v12, %v2703_v18  ;;  %v1851_v17 = vpop.f32.mrf.mxu1 }
 0x105   :  { %v1788_v19 = vpop.f32.mrf.mxu0 }
 0x106   :  { %v2727_v20 = vadd.f32 %v1850_v14, %v1111_v16  ;;  %v1789_v21 = vadd.f32 %v1788_v19, %v1787_v15  ;;  %v1852_v22 = vpop.f32.mrf.mxu1 }
 0x107   :  { %v1853_v23 = vadd.f32 %v1852_v22, %v1851_v17  ;;  %v1790_v24 = vpop.f32.mrf.mxu0 }
 0x108   :  { %v1116_v25 = vadd.f32 %v1789_v21, %v2703_v18  ;;  %v1854_v26 = vpop.f32.mrf.mxu1 }
 0x109   :  { %v1791_v28 = vpop.f32.mrf.mxu0 }
 0x10a   :  { %v2730_v29 = vadd.f32 %v1853_v23, %v1116_v25  ;;  %v1792_v30 = vadd.f32 %v1791_v28, %v1790_v24  ;;  %v1855_v31 = vpop.f32.mrf.mxu1 }
 0x10b   :  { %v1856_v32 = vadd.f32 %v1855_v31, %v1854_v26  ;;  %v1793_v33 = vpop.f32.mrf.mxu0 }
 0x10c   :  { %v1119_v34 = vadd.f32 %v1792_v30, %v2703_v18  ;;  %v1857_v36 = vpop.f32.mrf.mxu1 }
 0x10d   :  { %v1794_v37 = vpop.f32.mrf.mxu0 }
 0x10e   :  { %v2733_v38 = vadd.f32 %v1856_v32, %v1119_v34  ;;  %v1795_v39 = vadd.f32 %v1794_v37, %v1793_v33  ;;  %v1858_v40 = vpop.f32.mrf.mxu1 }
 0x10f   :  { %v1859_v41 = vadd.f32 %v1858_v40, %v1857_v36  ;;  %v1796_v42 = vpop.f32.mrf.mxu0 }
 0x110   :  { %2943 = vst [vmem:[#allocation3_spill] sm:$0xff] %v2733_v38  ;;  %v1124_v44 = vadd.f32 %v1795_v39, %v2703_v18  ;;  %v1860_v45 = vpop.f32.mrf.mxu1 }
 0x111   :  { %v1797_v46 = vpop.f32.mrf.mxu0 }
 0x112   :  { %v2736_v47 = vadd.f32 %v1859_v41, %v1124_v44  ;;  %v1798_v48 = vadd.f32 %v1797_v46, %v1796_v42  ;;  %v1861_v49 = vpop.f32.mrf.mxu1 }
 0x113   :  { %v1862_v50 = vadd.f32 %v1861_v49, %v1860_v45  ;;  %v1799_v52 = vpop.f32.mrf.mxu0 }
 0x114   :  { %v1127_v53 = vadd.f32 %v1798_v48, %v2703_v18  ;;  %v1863_v54 = vpop.f32.mrf.mxu1 }
 0x115   :  { %v1800_v55 = vpop.f32.mrf.mxu0 }
 0x116   :  { %v2739_v56 = vadd.f32 %v1862_v50, %v1127_v53  ;;  %v1801_v57 = vadd.f32 %v1800_v55, %v1799_v52  ;;  %v1864_v58 = vpop.f32.mrf.mxu1 }
 0x117   :  { %v1865_v60 = vadd.f32 %v1864_v58, %v1863_v54  ;;  %v1802_v61 = vpop.f32.mrf.mxu0 }
 0x118   :  { %2944 = vst [vmem:[#allocation4_spill] sm:$0xff] %v2739_v56  ;;  %v1132_v62 = vadd.f32 %v1801_v57, %v2703_v18  ;;  %v1866_v63 = vpop.f32.mrf.mxu1 }
 0x119   :  { %v1803_v0 = vpop.f32.mrf.mxu0 }
 0x11a   :  { %v2742_v1 = vadd.f32 %v1865_v60, %v1132_v62  ;;  %v1804_v2 = vadd.f32 %v1803_v0, %v1802_v61  ;;  %v1867_v4 = vpop.f32.mrf.mxu1 }
 0x11b   :  { %v1868_v5 = vadd.f32 %v1867_v4, %v1866_v63  ;;  %v1805_v6 = vpop.f32.mrf.mxu0 }
 0x11c   :  { %2945 = vst [vmem:[#allocation5_spill] sm:$0xff] %v2742_v1  ;;  %v1135_v7 = vadd.f32 %v1804_v2, %v2703_v18  ;;  %v1869_v8 = vpop.f32.mrf.mxu1 }
 0x11d   :  { %v1806_v9 = vpop.f32.mrf.mxu0 }
 0x11e   :  { %v2745_v10 = vadd.f32 %v1868_v5, %v1135_v7  ;;  %v1807_v12 = vadd.f32 %v1806_v9, %v1805_v6  ;;  %v1870_v13 = vpop.f32.mrf.mxu1 }
 0x11f   :  { %v1871_v14 = vadd.f32 %v1870_v13, %v1869_v8  ;;  %v1808_v15 = vpop.f32.mrf.mxu0 }
 0x120   :  { %2946 = vst [vmem:[#allocation6_spill] sm:$0xff] %v2745_v10  ;;  %v1140_v16 = vadd.f32 %v1807_v12, %v2703_v18  ;;  %v1872_v17 = vpop.f32.mrf.mxu1 }
 0x121   :  { %v1809_v19 = vpop.f32.mrf.mxu0 }
 0x122   :  { %v2748_v21 = vadd.f32 %v1871_v14, %v1140_v16  ;;  %v1810_v22 = vadd.f32 %v1809_v19, %v1808_v15  ;;  %v1873_v23 = vpop.f32.mrf.mxu1 }
 0x123   :  { %v1874_v24 = vadd.f32 %v1873_v23, %v1872_v17  ;;  %v1891_v25 = vpop.f32.mrf.mxu0 }
 0x124   :  { %2947 = vst [vmem:[#allocation7_spill] sm:$0xff] %v2748_v21  ;;  %v1143_v26 = vadd.f32 %v1810_v22, %v2703_v18  ;;  %v1955_v28 = vpop.f32.mrf.mxu1 }
 0x125   :  { %v1892_v30 = vpop.f32.mrf.mxu0 }
 0x126   :  { %v2751_v31 = vadd.f32 %v1874_v24, %v1143_v26  ;;  %v1956_v32 = vpop.f32.mrf.mxu1  ;;  %v1893_v1 = vadd.f32 %v1892_v30, %v1891_v25 }
 0x127   :  { %v1894_v33 = vpop.f32.mrf.mxu0  ;;  %v1957_v56 = vadd.f32 %v1956_v32, %v1955_v28 }
 0x128   :  { %2948 = vst [vmem:[#allocation8_spill] sm:$0xff] %v2751_v31  ;;  %v1958_v34 = vpop.f32.mrf.mxu1 }
 0x129   :  { %v1895_v36 = vpop.f32.mrf.mxu0 }
 0x12a   :  { %v1959_v37 = vpop.f32.mrf.mxu1  ;;  %v1896_v3 = vadd.f32 %v1895_v36, %v1894_v33 }
 0x12b   :  { %v1897_v39 = vpop.f32.mrf.mxu0  ;;  %v1960_v30 = vadd.f32 %v1959_v37, %v1958_v34 }
 0x12c   :  { %v1961_v40 = vpop.f32.mrf.mxu1  ;;  %v1281_v38 = vadd.f32 %v1896_v3, %v2709_v35 }
 0x12d   :  { %v1898_v41 = vpop.f32.mrf.mxu0 }
 0x12e   :  { %v1962_v42 = vpop.f32.mrf.mxu1  ;;  %v2792_v34 = vadd.f32 %v1960_v30, %v1281_v38  ;;  %v1544_v30 = vld [vmem:[%s2940_s3 + $0x50] sm:$0xff] }
 0x12f   :  { %v1900_v44 = vpop.f32.mrf.mxu0 }
 0x130   :  { %v1964_v45 = vpop.f32.mrf.mxu1 }
 0x131   :  { %v1901_v46 = vpop.f32.mrf.mxu0 }
 0x132   :  { %v1965_v48 = vpop.f32.mrf.mxu1 }
 0x133   :  { %v1903_v49 = vpop.f32.mrf.mxu0 }
 0x134   :  { %v1967_v50 = vpop.f32.mrf.mxu1 }
 0x135   :  { %v1904_v18 = vpop.f32.mrf.mxu0 }
 0x136   :  { %v1968_v52 = vpop.f32.mrf.mxu1 }
 0x137   :  { %v2753_v53 = vpop.f32.mrf.mxu0 }
 0x138   :  { %v2755_v54 = vpop.f32.mrf.mxu1 }
 0x139   :  { %v1907_v55 = vpop.f32.mrf.mxu0 }
 0x13a   :  { %v2757_v57 = vpop.f32.mrf.mxu1 }
 0x13b   :  { %v1909_v58 = vpop.f32.mrf.mxu0 }
 0x13c   :  { %v2759_v60 = vpop.f32.mrf.mxu1 }
 0x13d   :  { %2949 = vst [vmem:[#allocation9_spill] sm:$0xff] %v2759_v60  ;;  %v1910_v61 = vpop.f32.mrf.mxu0  ;;  %v1278_v60 = vadd.f32 %v1893_v1, %v2706_v27  ;;  %v1966_v27 = vadd.f32 %v1965_v48, %v1964_v45  ;;  %v1969_v1 = vadd.f32 %v1968_v52, %v1967_v50  ;;  %v2800_v45 = vadd.f32 %v2757_v57, %v2755_v54 }
 0x13e   :  { %v2761_v62 = vpop.f32.mrf.mxu1 }
 0x13f   :  { %2950 = vst [vmem:[#allocation10_spill] sm:$0xff] %v2761_v62  ;;  %v1912_v63 = vpop.f32.mrf.mxu0 }
 0x140   :  { %v2763_v0 = vpop.f32.mrf.mxu1 }
 0x141   :  { %2951 = vst [vmem:[#allocation11_spill] sm:$0xff] %v2763_v0  ;;  %v1913_v2 = vpop.f32.mrf.mxu0 }
 0x142   :  { %v2765_v4 = vpop.f32.mrf.mxu1 }
 0x143   :  { %2952 = vst [vmem:[#allocation12_spill] sm:$0xff] %v2765_v4  ;;  %v1915_v5 = vpop.f32.mrf.mxu0  ;;  %v1905_v4 = vadd.f32 %v1904_v18, %v1903_v49  ;;  %v1914_v49 = vadd.f32 %v1913_v2, %v1912_v63 }
 0x144   :  { %v2767_v6 = vpop.f32.mrf.mxu1 }
 0x145   :  { %2953 = vst [vmem:[#allocation13_spill] sm:$0xff] %v2767_v6  ;;  %v1916_v7 = vpop.f32.mrf.mxu0  ;;  %v1294_v36 = vadd.f32 %v1905_v4, %v2718_v59  ;;  %v1305_v50 = vadd.f32 %v1914_v49, %v2727_v20 }
 0x146   :  { %v2769_v8 = vpop.f32.mrf.mxu1  ;;  %v1917_v18 = vadd.f32 %v1916_v7, %v1915_v5  ;;  %v2962_v63 = vld [vmem:[#allocation10_spill] sm:$0xff] }
 0x147   :  { %2954 = vst [vmem:[#allocation14_spill] sm:$0xff] %v2769_v8  ;;  %v1918_v9 = vpop.f32.mrf.mxu0  ;;  %v1899_v8 = vadd.f32 %v1898_v41, %v1897_v39 }
 0x148   :  { %v2771_v12 = vpop.f32.mrf.mxu1  ;;  %v2963_v54 = vld [vmem:[#allocation11_spill] sm:$0xff] }
 0x149   :  { %2955 = vst [vmem:[#allocation15_spill] sm:$0xff] %v2771_v12  ;;  %v1919_v13 = vpop.f32.mrf.mxu0  ;;  %v1902_v12 = vadd.f32 %v1901_v46, %v1900_v44  ;;  %v1963_v44 = vadd.f32 %v1962_v42, %v1961_v40  ;;  %v1911_v46 = vadd.f32 %v1910_v61, %v1909_v58  ;;  %v2796_v42 = vadd.f32 %v1969_v1, %v1294_v36  ;;  %v2961_v61 = vld [vmem:[#allocation9_spill] sm:$0xff] }
 0x14a   :  { %v2773_v14 = vpop.f32.mrf.mxu1  ;;  %v1920_v28 = vadd.f32 %v1919_v13, %v1918_v9  ;;  %v1975_v2 = vadd.f32 %v2962_v63, %v2961_v61  ;;  %v2964_v57 = vld [vmem:[#allocation12_spill] sm:$0xff]  ;;  %v2967_v9 = vld [vmem:[#allocation2_spill] sm:$0xff]  ;;  %v1545_v61 = vld [vmem:[%s2940_s3 + $0x58] sm:$0xff] }
 0x14b   :  { %2956 = vst [vmem:[#allocation16_spill] sm:$0xff] %v2773_v14  ;;  %v1921_v15 = vpop.f32.mrf.mxu0  ;;  %v1289_v33 = vadd.f32 %v1902_v12, %v2715_v51  ;;  %v1908_v51 = vadd.f32 %v1907_v55, %v2753_v53  ;;  %v1302_v48 = vadd.f32 %v1911_v46, %v2724_v11  ;;  %v1978_v4 = vadd.f32 %v2964_v57, %v2963_v54  ;;  %v1543_v57 = vld [vmem:[%s2940_s3 + $0x48] sm:$0xff] }
 0x14c   :  { %v1985_v16 = vpop.f32.mrf.mxu1  ;;  %v2965_v11 = vld [vmem:[#allocation13_spill] sm:$0xff] }
 0x14d   :  { %v1922_v17 = vpop.f32.mrf.mxu0  ;;  %v1386_v40 = vadd.f32 %v1966_v27, %v1289_v33  ;;  %v2818_v12 = vadd.f32 %v1908_v51, %v2967_v9  ;;  %v1399_v36 = vadd.f32 %v1975_v2, %v1302_v48 }
 0x14e   :  { %v1986_v19 = vpop.f32.mrf.mxu1  ;;  %v1923_v39 = vadd.f32 %v1922_v17, %v1921_v15  ;;  %v2966_v5 = vld [vmem:[#allocation14_spill] sm:$0xff]  ;;  %v1536_v17 = vld [vmem:[%s2940_s3 + $0x10] sm:$0xff] }
 0x14f   :  { %v1924_v22 = vpop.f32.mrf.mxu0  ;;  %v1987_v53 = vadd.f32 %v1986_v19, %v1985_v16  ;;  %v1981_v20 = vadd.f32 %v2966_v5, %v2965_v11  ;;  %v2973_v11 = vld [vmem:[#allocation8_spill] sm:$0xff] }
 0x150   :  { %v1988_v23 = vpop.f32.mrf.mxu1  ;;  %v1318_v59 = vadd.f32 %v1923_v39, %v2736_v47  ;;  %v2960_v47 = vld [vmem:[#allocation4_spill] sm:$0xff]  ;;  %v2968_v13 = vld [vmem:[#allocation15_spill] sm:$0xff]  ;;  %v2828_v39 = vadd.f32 %v1978_v4, %v1305_v50 }
 0x151   :  { %v1925_v24 = vpop.f32.mrf.mxu0 }
 0x152   :  { %v1989_v26 = vpop.f32.mrf.mxu1  ;;  %v1926_v35 = vadd.f32 %v1925_v24, %v1924_v22  ;;  %v2969_v15 = vld [vmem:[#allocation16_spill] sm:$0xff]  ;;  %v1415_v19 = vadd.f32 %v1987_v53, %v1318_v59  ;;  %v1542_v59 = vld [vmem:[%s2940_s3 + $0x40] sm:$0xff] }
 0x153   :  { %v1927_v10 = vpop.f32.mrf.mxu0  ;;  %v1984_v16 = vadd.f32 %v2969_v15, %v2968_v13  ;;  %v2974_v15 = vld [vmem:[#allocation6_spill] sm:$0xff] }
 0x154   :  { %v2775_v31 = vpop.f32.mrf.mxu1  ;;  %v1321_v55 = vadd.f32 %v1926_v35, %v2960_v47 }
 0x155   :  { %2957 = vst [vmem:[#allocation17_spill] sm:$0xff] %v2775_v31  ;;  %v1928_v21 = vpop.f32.mrf.mxu0  ;;  %v1286_v31 = vadd.f32 %v1899_v8, %v2712_v43  ;;  %v1375_v8 = vadd.f32 %v1957_v56, %v1278_v60  ;;  %v1310_v56 = vadd.f32 %v1917_v18, %v2730_v29 }
 0x156   :  { %v2777_v6 = vpop.f32.mrf.mxu1  ;;  %v1929_v58 = vadd.f32 %v1928_v21, %v1927_v10  ;;  %v1990_v10 = vadd.f32 %v1989_v26, %v1988_v23  ;;  %v1534_v26 = vld [vmem:[%s2940_s3] sm:$0xff] }
 0x157   :  { %v2779_v14 = vpop.f32.mrf.mxu0  ;;  %v1383_v32 = vadd.f32 %v1963_v44, %v1286_v31  ;;  %v2959_v31 = vld [vmem:[#allocation3_spill] sm:$0xff]  ;;  %v1407_v33 = vadd.f32 %v1981_v20, %v1310_v56 }
 0x158   :  { %v2781_v0 = vpop.f32.mrf.mxu1  ;;  %v1313_v52 = vadd.f32 %v1920_v28, %v2959_v31  ;;  %v1418_v49 = vadd.f32 %v1990_v10, %v1321_v55  ;;  %v2972_v28 = vld [vmem:[#allocation7_spill] sm:$0xff] }
 0x159   :  { %2958 = vst [vmem:[#allocation18_spill] sm:$0xff] %v2781_v0  ;;  %v2783_v62 = vpop.f32.mrf.mxu0 }
 0x15a   :  { %v2788_v25 = vpop.f32.mrf.mxu1  ;;  %v1410_v18 = vadd.f32 %v1984_v16, %v1313_v52  ;;  %v1932_v48 = vadd.f32 %v2783_v62, %v2779_v14 }
 0x15b   :  { %v1933_v41 = vpop.f32.mrf.mxu0 }
 0x15c   :  { %v1997_v0 = vpop.f32.mrf.mxu1  ;;  %v2971_v27 = vld [vmem:[#allocation17_spill] sm:$0xff]  ;;  %v1329_v16 = vadd.f32 %v1932_v48, %v2974_v15 }
 0x15d   :  { %v1934_v3 = vpop.f32.mrf.mxu0  ;;  %v1993_v1 = vadd.f32 %v2777_v6, %v2971_v27  ;;  %v1537_v6 = vld [vmem:[%s2940_s3 + $0x18] sm:$0xff] }
 0x15e   :  { %v1998_v43 = vpop.f32.mrf.mxu1  ;;  %v1935_v7 = vadd.f32 %v1934_v3, %v1933_v41  ;;  %v2970_v41 = vld [vmem:[#allocation5_spill] sm:$0xff] }
 0x15f   :  { %v1936_v37 = vpop.f32.mrf.mxu0  ;;  %v1326_v44 = vadd.f32 %v1929_v58, %v2970_v41  ;;  %v1999_v52 = vadd.f32 %v1998_v43, %v1997_v0  ;;  %v1549_v48 = vld [vmem:[%s2940_s3 + $0x78] sm:$0xff] }
 0x160   :  { %v2805_v38 = vpop.f32.mrf.mxu1  ;;  %v1334_v35 = vadd.f32 %v1935_v7, %v2972_v28 }
 0x161   :  { %v1937_v60 = vpop.f32.mrf.mxu0 }
 0x162   :  { %v2815_v29 = vpop.f32.mrf.mxu1  ;;  %v1938_v50 = vadd.f32 %v1937_v60, %v1936_v37  ;;  %v1535_v37 = vld [vmem:[%s2940_s3 + $0x8] sm:$0xff]  ;;  %v1423_v60 = vadd.f32 %v1993_v1, %v1326_v44  ;;  %v1431_v4 = vadd.f32 %v1999_v52, %v1334_v35  ;;  %v1541_v35 = vld [vmem:[%s2940_s3 + $0x38] sm:$0xff] }
 0x163   :  { %v2037_v21 = vpop.f32.mrf.mxu0 }
 0x164   :  { %v1480_v22 = vadd.f32 %v2037_v21, %v1383_v32  ;;  %v2045_v24 = vpop.f32.mrf.mxu1  ;;  %v1337_v5 = vadd.f32 %v1938_v50, %v2973_v11  ;;  %v1394_v50 = vadd.f32 %v2800_v45, %v2818_v12 }
 0x165   :  { %v1512_v46 = vadd.f32 %v2045_v24, %v1415_v19  ;;  %v1471_v23 = vpop.f32.mrf.mxu0  ;;  %v2002_v24 = vadd.f32 %v2815_v29, %v2805_v38 }
 0x166   :  { %v1552_v3 = vadd.f32 %v1536_v17, %v1480_v22  ;;  %v1472_v32 = vadd.f32 %v1471_v23, %v1375_v8  ;;  %v1503_v51 = vpop.f32.mrf.mxu1  ;;  %v1548_v22 = vld [vmem:[%s2940_s3 + $0x70] sm:$0xff] }
 0x167   :  { %v1560_v56 = vadd.f32 %v1544_v30, %v1512_v46  ;;  %v1504_v31 = vadd.f32 %v1503_v51, %v1407_v33  ;;  %v2038_v53 = vpop.f32.mrf.mxu0  ;;  %v2975_v46 = vld [vmem:[#allocation18_spill] sm:$0xff] }
 0x168   :  { %v1568_v47 = vmax.f32 %v1552_v3, 0.0  ;;  %v1550_v55 = vadd.f32 %v1534_v26, %v1472_v32  ;;  %v1483_v8 = vadd.f32 %v2038_v53, %v1386_v40  ;;  %v2046_v58 = vpop.f32.mrf.mxu1  ;;  %v1996_v23 = vadd.f32 %v2788_v25, %v2975_v46 }
 0x169   :  { %v1576_v63 = vmax.f32 %v1560_v56, 0.0  ;;  %v1558_v2 = vadd.f32 %v1542_v59, %v1504_v31  ;;  %v1515_v62 = vadd.f32 %v2046_v58, %v1418_v49  ;;  %v1474_v14 = vpop.f32.mrf.mxu0  ;;  %v1434_v3 = vadd.f32 %v2002_v24, %v1337_v5 }
 0x16a   :  { %1584 = vst [vmem:[%s2941_s4 + $0x10] sm:$0xff] %v1568_v47  ;;  %v1566_v0 = vmax.f32 %v1550_v55, 0.0  ;;  %v1553_v43 = vadd.f32 %v1537_v6, %v1483_v8  ;;  %v1475_v40 = vadd.f32 %v1474_v14, %v2792_v34  ;;  %v1506_v54 = vpop.f32.mrf.mxu1  ;;  %v1540_v34 = vld [vmem:[%s2940_s3 + $0x30] sm:$0xff]  ;;  %v1426_v52 = vadd.f32 %v1996_v23, %v1329_v16  ;;  %v1547_v8 = vld [vmem:[%s2940_s3 + $0x68] sm:$0xff] }
 0x16b   :  { %1592 = vst [vmem:[%s2941_s4 + $0x50] sm:$0xff] %v1576_v63  ;;  %v1574_v20 = vmax.f32 %v1558_v2, 0.0  ;;  %v1561_v7 = vadd.f32 %v1545_v61, %v1515_v62  ;;  %v1507_v9 = vadd.f32 %v1506_v54, %v1410_v18  ;;  %v2041_v13 = vpop.f32.mrf.mxu0  ;;  %v1546_v18 = vld [vmem:[%s2940_s3 + $0x60] sm:$0xff] }
 0x16c   :  { %1582 = vst [vmem:[%s2941_s4] sm:$0xff] %v1566_v0  ;;  %v1569_v10 = vmax.f32 %v1553_v43, 0.0  ;;  %v1551_v21 = vadd.f32 %v1535_v37, %v1475_v40  ;;  %v1496_v17 = vadd.f32 %v2041_v13, %v1399_v36  ;;  %v2049_v19 = vpop.f32.mrf.mxu1  ;;  %v1538_v36 = vld [vmem:[%s2940_s3 + $0x20] sm:$0xff] }
 0x16d   :  { %1590 = vst [vmem:[%s2941_s4 + $0x40] sm:$0xff] %v1574_v20  ;;  %v1577_v30 = vmax.f32 %v1561_v7, 0.0  ;;  %v1559_v33 = vadd.f32 %v1543_v57, %v1507_v9  ;;  %v1528_v41 = vadd.f32 %v2049_v19, %v1431_v4  ;;  %v1487_v44 = vpop.f32.mrf.mxu0 }
 0x16e   :  { %1585 = vst [vmem:[%s2941_s4 + $0x18] sm:$0xff] %v1569_v10  ;;  %v1567_v38 = vmax.f32 %v1551_v21, 0.0  ;;  %v1556_v29 = vadd.f32 %v1540_v34, %v1496_v17  ;;  %v1488_v26 = vadd.f32 %v1487_v44, %v2796_v42  ;;  %v1519_v49 = vpop.f32.mrf.mxu1 }
 0x16f   :  { %1593 = vst [vmem:[%s2941_s4 + $0x58] sm:$0xff] %v1577_v30  ;;  %v1575_v27 = vmax.f32 %v1559_v33, 0.0  ;;  %v1564_v1 = vadd.f32 %v1548_v22, %v1528_v41  ;;  %v1520_v25 = vadd.f32 %v1519_v49, %v1423_v60  ;;  %v2042_v28 = vpop.f32.mrf.mxu0 }
 0x170   :  { %1583 = vst [vmem:[%s2941_s4 + $0x8] sm:$0xff] %v1567_v38  ;;  %v1572_v42 = vmax.f32 %v1556_v29, 0.0  ;;  %v1554_v32 = vadd.f32 %v1538_v36, %v1488_v26  ;;  %v1499_v51 = vadd.f32 %v2042_v28, %v2828_v39  ;;  %v2050_v59 = vpop.f32.mrf.mxu1  ;;  %v1539_v39 = vld [vmem:[%s2940_s3 + $0x28] sm:$0xff] }
 0x171   :  { %1591 = vst [vmem:[%s2941_s4 + $0x48] sm:$0xff] %v1575_v27  ;;  %v1580_v56 = vmax.f32 %v1564_v1, 0.0  ;;  %v1562_v31 = vadd.f32 %v1546_v18, %v1520_v25  ;;  %v1531_v53 = vadd.f32 %v2050_v59, %v1434_v3  ;;  %v1490_v6 = vpop.f32.mrf.mxu0 }
 0x172   :  { %1588 = vst [vmem:[%s2941_s4 + $0x30] sm:$0xff] %v1572_v42  ;;  %v1570_v47 = vmax.f32 %v1554_v32, 0.0  ;;  %v1557_v55 = vadd.f32 %v1541_v35, %v1499_v51  ;;  %v1491_v45 = vadd.f32 %v1490_v6, %v1394_v50  ;;  %v1522_v12 = vpop.f32.mrf.mxu1 }
 0x173   :  { %1596 = vst [vmem:[%s2941_s4 + $0x70] sm:$0xff] %v1580_v56  ;;  %v1578_v58 = vmax.f32 %v1562_v31, 0.0  ;;  %v1565_v61 = vadd.f32 %v1549_v48, %v1531_v53  ;;  %v1523_v63 = vadd.f32 %v1522_v12, %v1426_v52 }
 0x174   :  { %1586 = vst [vmem:[%s2941_s4 + $0x20] sm:$0xff] %v1570_v47  ;;  %v1573_v2 = vmax.f32 %v1557_v55, 0.0  ;;  %v1555_v62 = vadd.f32 %v1539_v39, %v1491_v45 }
 0x175   :  { %1594 = vst [vmem:[%s2941_s4 + $0x60] sm:$0xff] %v1578_v58  ;;  %v1581_v14 = vmax.f32 %v1565_v61, 0.0  ;;  %v1563_v37 = vadd.f32 %v1547_v8, %v1523_v63 }
 0x176   :  { %1589 = vst [vmem:[%s2941_s4 + $0x38] sm:$0xff] %v1573_v2  ;;  %v1571_v60 = vmax.f32 %v1555_v62, 0.0 }
 0x177   :  { %1597 = vst [vmem:[%s2941_s4 + $0x78] sm:$0xff] %v1581_v14  ;;  %v1579_v0 = vmax.f32 %v1563_v37, 0.0 }
 0x178   :  { %1587 = vst [vmem:[%s2941_s4 + $0x28] sm:$0xff] %v1571_v60 }
 0x179   :  { %1595 = vst [vmem:[%s2941_s4 + $0x68] sm:$0xff] %v1579_v0 }

// kernel: resnet_forward.16
= control target key start
LH: loop header
LB: loop body
LE: loop exit
PB: predicated region body
PF: predicated region fallthrough
CT: control target
= control target key end

     0   :  { %s1603_s1 = inlined_call_operand.vmem [shape: bf16[1152,128], index: 1, kind: input, shape index: {}]   ;;  %s1604_s0 = inlined_call_operand.vmem [shape: bf16[32,1152], index: 0, kind: input, shape index: {}]   ;;  %s1605_s2 = inlined_call_operand.vmem [shape: f32[1,128], index: 2, kind: input, shape index: {}]   ;;  %s1606_s3 = inlined_call_operand.vmem [shape: f32[32,128], index: 3, kind: output, shape index: {}]  }
   0x1   :  { %v1200_v0 = vld [vmem:[%s1603_s1 + $0x78] sm:$0xff]   ;;  %v1204_v4 = vld [vmem:[%s1603_s1 + $0x70] sm:$0xff]   ;;  %v1208_v8 = vld [vmem:[%s1603_s1 + $0x68] sm:$0xff]  }
   0x2   :  { %v1201_v1 = vld [vmem:[%s1603_s1 + $0x38] sm:$0xff]   ;;  %1058 = vmatprep.subr.bf16.mxu0 %v1200_v0  ;;  %v1205_v5 = vld [vmem:[%s1603_s1 + $0x30] sm:$0xff]   ;;  %v1209_v9 = vld [vmem:[%s1603_s1 + $0x28] sm:$0xff]  }
   0x3   :  { %v1202_v2 = vld [vmem:[%s1603_s1 + $0xf8] sm:$0xff]   ;;  %1059 = vmatpush3.bf16.msra.mxu0 %v1201_v1  ;;  %v1206_v6 = vld [vmem:[%s1603_s1 + $0xf0] sm:$0xff]   ;;  %v1210_v10 = vld [vmem:[%s1603_s1 + $0xe8] sm:$0xff]  }
   0x4   :  { %v1203_v3 = vld [vmem:[%s1603_s1 + $0xb8] sm:$0xff]   ;;  %1086 = vmatprep.subr.bf16.mxu1 %v1202_v2  ;;  %1060 = vmatprep.subr.bf16.mxu0 %v1204_v4  ;;  %v1207_v7 = vld [vmem:[%s1603_s1 + $0xb0] sm:$0xff]   ;;  %v1211_v11 = vld [vmem:[%s1603_s1 + $0xa8] sm:$0xff]  }
   0x5   :  { %1087 = vmatpush3.bf16.msra.mxu1 %v1203_v3  ;;  %v1212_v12 = vld [vmem:[%s1603_s1 + $0x60] sm:$0xff]   ;;  %v1216_v16 = vld [vmem:[%s1603_s1 + $0x58] sm:$0xff]   ;;  %v1220_v20 = vld [vmem:[%s1603_s1 + $0x50] sm:$0xff]  }
   0x6   :  { %1088 = vmatprep.subr.bf16.mxu1 %v1206_v6  ;;  %v1213_v13 = vld [vmem:[%s1603_s1 + $0x20] sm:$0xff]   ;;  %v1217_v17 = vld [vmem:[%s1603_s1 + $0x18] sm:$0xff]   ;;  %v1221_v21 = vld [vmem:[%s1603_s1 + $0x10] sm:$0xff]  }
   0x7   :  { %1061 = vmatpush3.bf16.msra.mxu0 %v1205_v5  ;;  %v1214_v14 = vld [vmem:[%s1603_s1 + $0xe0] sm:$0xff]   ;;  %v1218_v18 = vld [vmem:[%s1603_s1 + $0xd8] sm:$0xff]   ;;  %v1222_v22 = vld [vmem:[%s1603_s1 + $0xd0] sm:$0xff]  }
   0x8   :  { %1062 = vmatprep.subr.bf16.mxu0 %v1208_v8  ;;  %v1215_v15 = vld [vmem:[%s1603_s1 + $0xa0] sm:$0xff]   ;;  %v1219_v19 = vld [vmem:[%s1603_s1 + $0x98] sm:$0xff]   ;;  %v1223_v23 = vld [vmem:[%s1603_s1 + $0x90] sm:$0xff]  }
   0x9   :  { %1089 = vmatpush3.bf16.msra.mxu1 %v1207_v7  ;;  %v1224_v24 = vld [vmem:[%s1603_s1 + $0x48] sm:$0xff]   ;;  %v1228_v28 = vld [vmem:[%s1603_s1 + $0x40] sm:$0xff]   ;;  %v1235_v34 = vld [vmem:[%s1603_s1 + $0x178] sm:$0xff]  }
   0xa   :  { %1090 = vmatprep.subr.bf16.mxu1 %v1210_v10  ;;  %v1225_v25 = vld [vmem:[%s1603_s1 + $0x8] sm:$0xff]   ;;  %v1229_v29 = vld [vmem:[%s1603_s1] sm:$0xff]   ;;  %v1239_v37 = vld [vmem:[%s1603_s1 + $0x138] sm:$0xff]  }
   0xb   :  { %1063 = vmatpush3.bf16.msra.mxu0 %v1209_v9  ;;  %v1226_v26 = vld [vmem:[%s1603_s1 + $0xc8] sm:$0xff]   ;;  %v1230_v30 = vld [vmem:[%s1603_s1 + $0xc0] sm:$0xff]   ;;  %v1240_v38 = vld [vmem:[%s1603_s1 + $0x1f8] sm:$0xff]  }
   0xc   :  { %1064 = vmatprep.subr.bf16.mxu0 %v1212_v12  ;;  %v1227_v27 = vld [vmem:[%s1603_s1 + $0x88] sm:$0xff]   ;;  %v1231_v31 = vld [vmem:[%s1604_s0] ss:$36 sps:$4 sm:$0xff]   ;;  %v1241_v39 = vld [vmem:[%s1603_s1 + $0x1b8] sm:$0xff]  }
   0xd   :  { %1091 = vmatpush3.bf16.msra.mxu1 %v1211_v11  ;;  %v1233_v32 = vld [vmem:[%s1604_s0 + $0x4] ss:$36 sps:$4 sm:$0xff]   ;;  %v1238_v36 = vld [vmem:[%s1604_s0 + $0xc] ss:$36 sps:$4 sm:$0xff]   ;;  %v1254_v52 = vld [vmem:[%s1603_s1 + $0x158] sm:$0xff]  }
   0xe   :  { %1092 = vmatprep.subr.bf16.mxu1 %v1214_v14  ;;  %v1234_v33 = vld [vmem:[%s1603_s1 + $0x80] sm:$0xff]   ;;  %742 = vmatprep.mubr.bf16.mxu0 %v1233_v32  ;;  %v1236_v35 = vld [vmem:[%s1604_s0 + $0x8] ss:$36 sps:$4 sm:$0xff]   ;;  %v1242_v40 = vld [vmem:[%s1603_s1 + $0x170] sm:$0xff]  }
   0xf   :  { %1065 = vmatpush3.bf16.msra.mxu0 %v1213_v13  ;;  %791 = vmatprep.mubr.bf16.mxu1 %v1238_v36  ;;  %v1243_v41 = vld [vmem:[%s1603_s1 + $0x130] sm:$0xff]   ;;  %v1246_v44 = vld [vmem:[%s1603_s1 + $0x168] sm:$0xff]   ;;  %v1250_v48 = vld [vmem:[%s1603_s1 + $0x160] sm:$0xff]  }
  0x10   :  { %1066 = vmatprep.subr.bf16.mxu0 %v1216_v16  ;;  %v1244_v42 = vld [vmem:[%s1603_s1 + $0x1f0] sm:$0xff]   ;;  %v1247_v45 = vld [vmem:[%s1603_s1 + $0x128] sm:$0xff]   ;;  %v1251_v49 = vld [vmem:[%s1603_s1 + $0x120] sm:$0xff]  }
  0x11   :  { %1093 = vmatpush3.bf16.msra.mxu1 %v1215_v15  ;;  %v1245_v43 = vld [vmem:[%s1603_s1 + $0x1b0] sm:$0xff]   ;;  %v1248_v46 = vld [vmem:[%s1603_s1 + $0x1e8] sm:$0xff]   ;;  %v1252_v50 = vld [vmem:[%s1603_s1 + $0x1e0] sm:$0xff]  }
  0x12   :  { %1094 = vmatprep.subr.bf16.mxu1 %v1218_v18  ;;  %v1249_v47 = vld [vmem:[%s1603_s1 + $0x1a8] sm:$0xff]   ;;  %v1253_v51 = vld [vmem:[%s1603_s1 + $0x1a0] sm:$0xff]   ;;  %v1255_v53 = vld [vmem:[%s1603_s1 + $0x118] sm:$0xff]  }
  0x13   :  { %1067 = vmatpush3.bf16.msra.mxu0 %v1217_v17  ;;  %v1256_v54 = vld [vmem:[%s1604_s0 + $0x4c] ss:$36 sps:$4 sm:$0xff]   ;;  %v1258_v55 = vld [vmem:[%s1603_s1 + $0x1d8] sm:$0xff]   ;;  %v1272_v4 = vld [vmem:[%s1603_s1 + $0x140] sm:$0xff]  }
  0x14   :  { %1068 = vmatprep.subr.bf16.mxu0 %v1220_v20  ;;  %v1259_v56 = vld [vmem:[%s1604_s0 + $0x48] ss:$36 sps:$4 sm:$0xff]   ;;  %v1260_v57 = vld [vmem:[%s1603_s1 + $0x198] sm:$0xff]   ;;  %v1263_v59 = vld [vmem:[%s1603_s1 + $0x150] sm:$0xff]  }
  0x15   :  { %1095 = vmatpush3.bf16.msra.mxu1 %v1219_v19  ;;  %v1261_v58 = vld [vmem:[%s1604_s0 + $0x54] ss:$36 sps:$4 sm:$0xff]   ;;  %v1268_v0 = vld [vmem:[%s1603_s1 + $0x148] sm:$0xff]   ;;  %v1273_v5 = vld [vmem:[%s1603_s1 + $0x100] sm:$0xff]  }
  0x16   :  { %1096 = vmatprep.subr.bf16.mxu1 %v1222_v22  ;;  %v1264_v60 = vld [vmem:[%s1604_s0 + $0x50] ss:$36 sps:$4 sm:$0xff]   ;;  %v1269_v1 = vld [vmem:[%s1603_s1 + $0x108] sm:$0xff]   ;;  %v1274_v6 = vld [vmem:[%s1603_s1 + $0x1c0] sm:$0xff]  }
  0x17   :  { %1069 = vmatpush3.bf16.msra.mxu0 %v1221_v21  ;;  %v1265_v61 = vld [vmem:[%s1603_s1 + $0x110] sm:$0xff]   ;;  %v1270_v2 = vld [vmem:[%s1603_s1 + $0x1c8] sm:$0xff]   ;;  %v1278_v9 = vld [vmem:[%s1603_s1 + $0x180] sm:$0xff]  }
  0x18   :  { %1070 = vmatprep.subr.bf16.mxu0 %v1224_v24  ;;  %v1266_v62 = vld [vmem:[%s1603_s1 + $0x1d0] sm:$0xff]   ;;  %v1271_v3 = vld [vmem:[%s1603_s1 + $0x188] sm:$0xff]   ;;  %v1279_v10 = vld [vmem:[%s1603_s1 + $0x238] sm:$0xff]  }
  0x19   :  { %1097 = vmatpush3.bf16.msra.mxu1 %v1223_v23  ;;  %v1267_v63 = vld [vmem:[%s1603_s1 + $0x190] sm:$0xff]   ;;  %v1280_v11 = vld [vmem:[%s1604_s0 + $0x18] ss:$36 sps:$4 sm:$0xff]   ;;  %v1287_v16 = vld [vmem:[%s1603_s1 + $0x228] sm:$0xff]  }
  0x1a   :  { %1098 = vmatprep.subr.bf16.mxu1 %v1226_v26  ;;  %v1275_v7 = vld [vmem:[%s1604_s0 + $0x10] ss:$36 sps:$4 sm:$0xff]   ;;  %v1282_v12 = vld [vmem:[%s1604_s0 + $0x1c] ss:$36 sps:$4 sm:$0xff]   ;;  %v1288_v17 = vld [vmem:[%s1604_s0 + $0x64] ss:$36 sps:$4 sm:$0xff]  }
  0x1b   :  { %1071 = vmatpush3.bf16.msra.mxu0 %v1225_v25  ;;  %v1277_v8 = vld [vmem:[%s1604_s0 + $0x14] ss:$36 sps:$4 sm:$0xff]   ;;  %v1284_v14 = vld [vmem:[%s1604_s0 + $0x5c] ss:$36 sps:$4 sm:$0xff]   ;;  %v1294_v23 = vld [vmem:[%s1603_s1 + $0x208] sm:$0xff]  }
  0x1c   :  { %1072 = vmatprep.subr.bf16.mxu0 %v1228_v28  ;;  %v1283_v13 = vld [vmem:[%s1603_s1 + $0x230] sm:$0xff]   ;;  %v1286_v15 = vld [vmem:[%s1604_s0 + $0x58] ss:$36 sps:$4 sm:$0xff]   ;;  %v1290_v18 = vld [vmem:[%s1604_s0 + $0x60] ss:$36 sps:$4 sm:$0xff]  }
  0x1d   :  { %1099 = vmatpush3.bf16.msra.mxu1 %v1227_v27  ;;  %v1291_v19 = vld [vmem:[%s1603_s1 + $0x220] sm:$0xff]   ;;  %v1292_v20 = vld [vmem:[%s1603_s1 + $0x218] sm:$0xff]   ;;  %v1293_v22 = vld [vmem:[%s1603_s1 + $0x210] sm:$0xff]  }
  0x1e   :  { %1100 = vmatprep.subr.bf16.mxu1 %v1230_v30  ;;  %v1296_v21 = vld [vmem:[%s1604_s0 + $0x20] ss:$36 sps:$4 sm:$0xff]   ;;  %v1297_v25 = vld [vmem:[%s1604_s0 + $0x68] ss:$36 sps:$4 sm:$0xff]  }
  0x1f   :  { %1073 = vmatpush3.bf16.msra.mxu0 %v1229_v29  ;;  %v1295_v24 = vld [vmem:[%s1603_s1 + $0x200] sm:$0xff]  }
  0x20   :  { %1114 = vmatprep.subr.bf16.mxu0 %v1235_v34 }
  0x21   :  { %1101 = vmatpush3.bf16.msra.mxu1 %v1234_v33 }
  0x22   :  { %743 = vmatmul.mubr.bf16.vlgmr.msra.gmra.mxu0 %v1231_v31  ;;  %1142 = vmatprep.subr.bf16.mxu1 %v1240_v38 }
  0x23   :  { %1115 = vmatpush3.bf16.msra.mxu0 %v1239_v37  ;;  %750 = vmatprep.mubr.bf16.mxu0 %v1256_v54 }
  0x24   :  { %792 = vmatmul.mubr.bf16.vlgmr.msra.gmra.mxu1 %v1236_v35  ;;  %1116 = vmatprep.subr.bf16.mxu0 %v1242_v40 }
  0x25   :  { %1143 = vmatpush3.bf16.msra.mxu1 %v1241_v39  ;;  %799 = vmatprep.mubr.bf16.mxu1 %v1261_v58 }
  0x26   :  { %1144 = vmatprep.subr.bf16.mxu1 %v1244_v42 }
  0x27   :  { %1117 = vmatpush3.bf16.msra.mxu0 %v1243_v41 }
  0x28   :  { %1118 = vmatprep.subr.bf16.mxu0 %v1246_v44 }
  0x29   :  { %1145 = vmatpush3.bf16.msra.mxu1 %v1245_v43 }
  0x2a   :  { %1146 = vmatprep.subr.bf16.mxu1 %v1248_v46  ;;  %751 = vmatmul.mubr.bf16.gmra.mxu0 %v1259_v56 }
  0x2b   :  { %1119 = vmatpush3.bf16.msra.mxu0 %v1247_v45  ;;  %840 = vmatprep.mubr.bf16.mxu0 %v1277_v8 }
  0x2c   :  { %1120 = vmatprep.subr.bf16.mxu0 %v1250_v48  ;;  %800 = vmatmul.mubr.bf16.gmra.mxu1 %v1264_v60 }
  0x2d   :  { %1147 = vmatpush3.bf16.msra.mxu1 %v1249_v47  ;;  %889 = vmatprep.mubr.bf16.mxu1 %v1282_v12 }
  0x2e   :  { %1148 = vmatprep.subr.bf16.mxu1 %v1252_v50 }
  0x2f   :  { %1121 = vmatpush3.bf16.msra.mxu0 %v1251_v49 }
  0x30   :  { %1122 = vmatprep.subr.bf16.mxu0 %v1254_v52 }
  0x31   :  { %1149 = vmatpush3.bf16.msra.mxu1 %v1253_v51 }
  0x32   :  { %1150 = vmatprep.subr.bf16.mxu1 %v1258_v55  ;;  %v967_v55 = vld [vmem:[%s1605_s2] ss:$0 sm:$0xff] }
  0x33   :  { %1123 = vmatpush3.bf16.msra.mxu0 %v1255_v53 }
  0x34   :  { %1124 = vmatprep.subr.bf16.mxu0 %v1263_v59 }
  0x35   :  { %1151 = vmatpush3.bf16.msra.mxu1 %v1260_v57 }
  0x36   :  { %1152 = vmatprep.subr.bf16.mxu1 %v1266_v62 }
  0x37   :  { %1125 = vmatpush3.bf16.msra.mxu0 %v1265_v61 }
  0x38   :  { %1126 = vmatprep.subr.bf16.mxu0 %v1268_v0 }
  0x39   :  { %1153 = vmatpush3.bf16.msra.mxu1 %v1267_v63 }
  0x3a   :  { %1154 = vmatprep.subr.bf16.mxu1 %v1270_v2 }
  0x3b   :  { %1127 = vmatpush3.bf16.msra.mxu0 %v1269_v1 }
  0x3c   :  { %1128 = vmatprep.subr.bf16.mxu0 %v1272_v4 }
  0x3d   :  { %1155 = vmatpush3.bf16.msra.mxu1 %v1271_v3 }
  0x3e   :  { %1156 = vmatprep.subr.bf16.mxu1 %v1274_v6 }
  0x3f   :  { %1129 = vmatpush3.bf16.msra.mxu0 %v1273_v5 }
  0x40   :  { %1180 = vmatprep.subr.bf16.mxu0 %v1279_v10 }
  0x41   :  { %1157 = vmatpush3.bf16.msra.mxu1 %v1278_v9 }
  0x42   :  { %841 = vmatmul.mubr.bf16.vlgmr.msra.gmra.mxu0 %v1275_v7 }
  0x43   :  { %1181 = vmatpush3.bf16.msra.mxu0 %v1279_v10  ;;  %848 = vmatprep.mubr.bf16.mxu0 %v1284_v14 }
  0x44   :  { %890 = vmatmul.mubr.bf16.vlgmr.msra.gmra.mxu1 %v1280_v11  ;;  %1182 = vmatprep.subr.bf16.mxu0 %v1283_v13 }
  0x45   :  { %897 = vmatprep.mubr.bf16.mxu1 %v1288_v17 }
  0x47   :  { %1183 = vmatpush3.bf16.msra.mxu0 %v1283_v13 }
  0x48   :  { %1184 = vmatprep.subr.bf16.mxu0 %v1287_v16 }
  0x4a   :  { %849 = vmatmul.mubr.bf16.gmra.mxu0 %v1286_v15 }
  0x4b   :  { %1185 = vmatpush3.bf16.msra.mxu0 %v1287_v16  ;;  %1196 = vmatprep.mubr.bf16.mxu0 %v1296_v21 }
  0x4c   :  { %898 = vmatmul.mubr.bf16.gmra.mxu1 %v1290_v18  ;;  %1186 = vmatprep.subr.bf16.mxu0 %v1291_v19 }
  0x4f   :  { %1187 = vmatpush3.bf16.msra.mxu0 %v1291_v19 }
  0x50   :  { %1188 = vmatprep.subr.bf16.mxu0 %v1292_v20 }
  0x53   :  { %1189 = vmatpush3.bf16.msra.mxu0 %v1292_v20 }
  0x54   :  { %1190 = vmatprep.subr.bf16.mxu0 %v1293_v22 }
  0x57   :  { %1191 = vmatpush3.bf16.msra.mxu0 %v1293_v22 }
  0x58   :  { %1192 = vmatprep.subr.bf16.mxu0 %v1294_v23 }
  0x5b   :  { %1193 = vmatpush3.bf16.msra.mxu0 %v1294_v23 }
  0x5c   :  { %1194 = vmatprep.subr.bf16.mxu0 %v1295_v24 }
  0x5f   :  { %1195 = vmatpush3.bf16.msra.mxu0 %v1295_v24 }
  0x62   :  { %1197 = vmatmul.mubr.bf16.vlgmr.msra.gmra.mxu0 %v1297_v25 }
  0xe2   :  { %v1074_v26 = vpop.f32.mrf.mxu0 }
  0xe4   :  { %v1102_v27 = vpop.f32.mrf.mxu1  ;;  %v1075_v28 = vpop.f32.mrf.mxu0 }
  0xe5   :  { %v1076_v54 = vadd.f32 %v1075_v28, %v1074_v26 }
  0xe6   :  { %v1103_v29 = vpop.f32.mrf.mxu1  ;;  %v1077_v30 = vpop.f32.mrf.mxu0 }
  0xe7   :  { %v745_v61 = vadd.f32 %v1076_v54, %v967_v55  ;;  %v1104_v62 = vadd.f32 %v1103_v29, %v1102_v27 }
  0xe8   :  { %v1105_v31 = vpop.f32.mrf.mxu1  ;;  %v1078_v32 = vpop.f32.mrf.mxu0 }
  0xe9   :  { %v1079_v63 = vadd.f32 %v1078_v32, %v1077_v30  ;;  %v794_v7 = vadd.f32 %v1104_v62, %v745_v61 }
  0xea   :  { %v1080_v33 = vpop.f32.mrf.mxu0  ;;  %v1106_v34 = vpop.f32.mrf.mxu1 }
  0xeb   :  { %v748_v8 = vadd.f32 %v1079_v63, %v967_v55  ;;  %v1107_v9 = vadd.f32 %v1106_v34, %v1105_v31 }
  0xec   :  { %v1108_v35 = vpop.f32.mrf.mxu1  ;;  %v1081_v36 = vpop.f32.mrf.mxu0 }
  0xed   :  { %v1082_v53 = vadd.f32 %v1081_v36, %v1080_v33  ;;  %v797_v18 = vadd.f32 %v1107_v9, %v748_v8 }
  0xee   :  { %v1109_v37 = vpop.f32.mrf.mxu1  ;;  %v1083_v38 = vpop.f32.mrf.mxu0 }
  0xef   :  { %v753_v58 = vadd.f32 %v1082_v53, %v967_v55  ;;  %v1110_v59 = vadd.f32 %v1109_v37, %v1108_v35 }
  0xf0   :  { %v1111_v39 = vpop.f32.mrf.mxu1  ;;  %v1084_v40 = vpop.f32.mrf.mxu0 }
  0xf1   :  { %v1085_v60 = vadd.f32 %v1084_v40, %v1083_v38  ;;  %v802_v3 = vadd.f32 %v1110_v59, %v753_v58 }
  0xf2   :  { %v1112_v42 = vpop.f32.mrf.mxu1 }
  0xf3   :  { %v756_v4 = vadd.f32 %v1085_v60, %v967_v55  ;;  %v1113_v5 = vadd.f32 %v1112_v42, %v1111_v39 }
  0xf5   :  { %v805_v14 = vadd.f32 %v1113_v5, %v756_v4 }
 0x102   :  { %v1130_v41 = vpop.f32.mrf.mxu0 }
 0x104   :  { %v1131_v43 = vpop.f32.mrf.mxu0  ;;  %v1158_v44 = vpop.f32.mrf.mxu1 }
 0x105   :  { %v1132_v6 = vadd.f32 %v1131_v43, %v1130_v41 }
 0x106   :  { %v1133_v45 = vpop.f32.mrf.mxu0  ;;  %v1159_v46 = vpop.f32.mrf.mxu1 }
 0x107   :  { %v843_v15 = vadd.f32 %v1132_v6, %v794_v7  ;;  %v1160_v16 = vadd.f32 %v1159_v46, %v1158_v44 }
 0x108   :  { %v1134_v47 = vpop.f32.mrf.mxu0  ;;  %v1161_v48 = vpop.f32.mrf.mxu1 }
 0x109   :  { %v1135_v17 = vadd.f32 %v1134_v47, %v1133_v45  ;;  %v892_v26 = vadd.f32 %v1160_v16, %v843_v15 }
 0x10a   :  { %v1136_v49 = vpop.f32.mrf.mxu0  ;;  %v1162_v50 = vpop.f32.mrf.mxu1 }
 0x10b   :  { %v846_v23 = vadd.f32 %v1135_v17, %v797_v18  ;;  %v1163_v24 = vadd.f32 %v1162_v50, %v1161_v48 }
 0x10c   :  { %v1137_v51 = vpop.f32.mrf.mxu0  ;;  %v1164_v52 = vpop.f32.mrf.mxu1 }
 0x10d   :  { %v1138_v0 = vadd.f32 %v1137_v51, %v1136_v49  ;;  %v895_v34 = vadd.f32 %v1163_v24, %v846_v23 }
 0x10e   :  { %v1139_v56 = vpop.f32.mrf.mxu0  ;;  %v1165_v57 = vpop.f32.mrf.mxu1 }
 0x10f   :  { %v851_v10 = vadd.f32 %v1138_v0, %v802_v3  ;;  %v1166_v11 = vadd.f32 %v1165_v57, %v1164_v52 }
 0x110   :  { %v1140_v1 = vpop.f32.mrf.mxu0  ;;  %v1167_v2 = vpop.f32.mrf.mxu1 }
 0x111   :  { %v1141_v12 = vadd.f32 %v1140_v1, %v1139_v56  ;;  %v900_v21 = vadd.f32 %v1166_v11, %v851_v10 }
 0x112   :  { %v1168_v13 = vpop.f32.mrf.mxu1 }
 0x113   :  { %v854_v19 = vadd.f32 %v1141_v12, %v805_v14  ;;  %v1169_v20 = vadd.f32 %v1168_v13, %v1167_v2 }
 0x115   :  { %v903_v30 = vadd.f32 %v1169_v20, %v854_v19 }
 0x122   :  { %v1198_v22 = vpop.f32.mrf.mxu0 }
 0x123   :  { %v949_v25 = vadd.f32 %v1198_v22, %v900_v21 }
 0x124   :  { %v940_v27 = vpop.f32.mrf.mxu0 }
 0x125   :  { %v957_v28 = vmax.f32 %v949_v25, 0.0  ;;  %v941_v29 = vadd.f32 %v940_v27, %v892_v26 }
 0x126   :  { %v1199_v31 = vpop.f32.mrf.mxu0 }
 0x127   :  { %961 = vst [vmem:[%s1606_s3 + $0x10] sm:$0xff] %v957_v28  ;;  %v955_v32 = vmax.f32 %v941_v29, 0.0  ;;  %v952_v33 = vadd.f32 %v1199_v31, %v903_v30 }
 0x128   :  { %v943_v35 = vpop.f32.mrf.mxu0 }
 0x129   :  { %959 = vst [vmem:[%s1606_s3] sm:$0xff] %v955_v32  ;;  %v958_v36 = vmax.f32 %v952_v33, 0.0  ;;  %v944_v37 = vadd.f32 %v943_v35, %v895_v34 }
 0x12b   :  { %962 = vst [vmem:[%s1606_s3 + $0x18] sm:$0xff] %v958_v36  ;;  %v956_v38 = vmax.f32 %v944_v37, 0.0 }
 0x12d   :  { %960 = vst [vmem:[%s1606_s3 + $0x8] sm:$0xff] %v956_v38 }

// kernel: resnet_forward.19
= control target key start
LH: loop header
LB: loop body
LE: loop exit
PB: predicated region body
PF: predicated region fallthrough
CT: control target
= control target key end

     0   :  { %v243_v1 = vmov 0.0   ;;  %vm244_vm0 = vmmov 0   ;;  %s308_s0 = inlined_call_operand.vmem [shape: f32[2,16,128], index: 0, kind: input, shape index: {}]   ;;  %s309_s1 = inlined_call_operand.vmem [shape: bf16[128,128], index: 1, kind: input, shape index: {}]   ;;  %s310_s2 = inlined_call_operand.vmem [shape: f32[1,128], index: 2, kind: input, shape index: {}]   ;;  %s311_s3 = inlined_call_operand.hbm [shape: f32[2,128], index: 3, kind: output, shape index: {}]  }
   0x1   :  { %v213_v0 = vld [vmem:[%s309_s1 + $0x38] sm:$0xff]   ;;  %190 = vmatprep.subr.bf16.mxu0 %v243_v1  ;;  %v214_v2 = vld [vmem:[%s309_s1 + $0x30] sm:$0xff]   ;;  %206 = vmatprep.mubr.msk.bf16.mxu0 %vm244_vm0, %v243_v1  ;;  %v215_v3 = vld [vmem:[%s309_s1 + $0x28] sm:$0xff]  }
   0x2   :  { %191 = vmatpush3.bf16.msra.mxu0 %v213_v0  ;;  %v16_v4 = vld [vmem:[%s308_s0] sm:$0xff]  ;;  %v17_v5 = vld [vmem:[%s308_s0 + $0x8] sm:$0xff]  ;;  %v18_v6 = vld [vmem:[%s308_s0 + $0x10] sm:$0xff] }
   0x3   :  { %192 = vmatprep.subr.bf16.mxu0 %v243_v1  ;;  %v19_v7 = vld [vmem:[%s308_s0 + $0x18] sm:$0xff]  ;;  %v20_v8 = vadd.f32 %v17_v5, %v16_v4 }
   0x6   :  { %193 = vmatpush3.bf16.msra.mxu0 %v214_v2 }
   0x7   :  { %194 = vmatprep.subr.bf16.mxu0 %v243_v1 }
   0x8   :  { %8 = vsyncpa [#allocation3], 0  ;;  %v216_v9 = vld [vmem:[%s309_s1 + $0x20] sm:$0xff]   ;;  %v27_v10 = vadd.f32 %v19_v7, %v18_v6  ;;  %v21_v11 = vrot.slane %v20_v8, 4  ;;  %v217_v14 = vld [vmem:[%s309_s1 + $0x18] sm:$0xff]   ;;  %vm65_vm1 = vcmask 1041409  }
   0x9   :  { %v218_v19 = vld [vmem:[%s309_s1 + $0x10] sm:$0xff]   ;;  %v219_v24 = vld [vmem:[%s309_s1 + $0x8] sm:$0xff]   ;;  %v220_v29 = vld [vmem:[%s309_s1] sm:$0xff]   ;;  %s245_s10 = smov [#allocation2]  }
   0xa   :  { %195 = vmatpush3.bf16.msra.mxu0 %v215_v3  ;;  %v28_v12 = vrot.slane %v27_v10, 4  ;;  %v22_v13 = vadd.f32 %v21_v11, %v20_v8  ;;  %v172_v35 = vld [vmem:[%s310_s2] ss:$0 sm:$0xff]  ;;  %s164_s11 = sshll.u32 %s245_s10, 4  ;;  %s165_s11 = int_to_ptr.vmem [resolvable:$true] %s164_s11 }
   0xb   :  { %196 = vmatprep.subr.bf16.mxu0 %v243_v1  ;;  %s221_s1 = scalar_lea.vmem %s165_s11, 32  ;;  %p226_p1 = scmp.lt.s32.totalorder %s165_s11, %s165_s11 }
   0xc   :  { %v29_v15 = vadd.f32 %v28_v12, %v27_v10  ;;  %v23_v16 = vrot.slane %v22_v13, 2  ;;  %p222_p0 = scmp.ne.s32.totalorder %s165_s11, %s221_s1  ;;  %p227_p2 = scmp.lt.s32.totalorder %s221_s1, %s221_s1 }
   0xe   :  { %197 = vmatpush3.bf16.msra.mxu0 %v216_v9  ;;  %v30_v17 = vrot.slane %v29_v15, 2  ;;  %v24_v18 = vadd.f32 %v23_v16, %v22_v13  ;;  %p228_p3 = por %p227_p2, %p226_p1 }
   0xf   :  { %198 = vmatprep.subr.bf16.mxu0 %v243_v1 }
  0x10   :  { %v31_v20 = vadd.f32 %v30_v17, %v29_v15  ;;  %v25_v21 = vrot.slane %v24_v18, 1  ;;  %p229_p4 = pnand %p228_p3, %p222_p0 }
  0x12   :  { %199 = vmatpush3.bf16.msra.mxu0 %v217_v14  ;;  %v32_v22 = vrot.slane %v31_v20, 1  ;;  %v26_v23 = vadd.f32 %v25_v21, %v24_v18 }
  0x13   :  { %200 = vmatprep.subr.bf16.mxu0 %v243_v1 }
  0x14   :  { %v33_v25 = vadd.f32 %v32_v22, %v31_v20  ;;  %v34_v26 = vmul.f32 0.0625, %v26_v23 }
  0x16   :  { %201 = vmatpush3.bf16.msra.mxu0 %v218_v19  ;;  %v35_v27 = vmul.f32 0.0625, %v33_v25  ;;  %v36_v28 = vpack.c.bf16 %v34_v26, %v34_v26 }
  0x17   :  { %202 = vmatprep.subr.bf16.mxu0 %v243_v1 }
  0x18   :  { %v37_v30 = vpack.c.bf16 %v35_v27, %v35_v27  ;;  %v63_v31 = vunpack.c.l.b16 %v36_v28 }
  0x1a   :  { %203 = vmatpush3.bf16.msra.mxu0 %v219_v24  ;;  %v64_v32 = vunpack.c.l.b16 %v37_v30 }
  0x1b   :  { %204 = vmatprep.subr.bf16.mxu0 %v243_v1 }
  0x1c   :  { %v66_v33 = vsel %vm65_vm1, %v64_v32, %v63_v31 }
  0x1d   :  { %v67_v34 = vpack.c.b16 %v66_v33, %v66_v33 }
  0x1e   :  { %205 = vmatpush3.bf16.msra.mxu0 %v220_v29 }
  0x21   :  { %207 = vmatmul.mubr.bf16.vlgmr.msra.gmra.mxu0 %v67_v34 }
  0xe1   :  { %v151_v36 = vpop.f32.mrf.mxu0 }
  0xe2   :  { %v152_v37 = vadd.f32 %v172_v35, %v151_v36 }
  0xe3   :  { %v208_v38 = vpop.f32.mrf.mxu0 }
  0xe4   :  { %157 = vst [vmem:[#allocation2] sm:$0x3] %v152_v37 }
  0xe5   :  { %v154_v39 = vpop.f32.mrf.mxu0 }
  0xe6   :  { %232 = shalt.err (!%p229_p4)
}
  0xe7   :  { %167 = dma.vmem_to_hbm [thread:$0]  %s165_s11, 32, %s311_s3, [#allocation3]   ;;  %v209_v40 = vpop.f32.mrf.mxu0 }
  0xe8   :  { %241 = dma.done.wait [#allocation3], 32  }
  0xe9   :  { %242 = vsyncadd [#allocation3], 4294967264 }
  0xea   :  { %171 = vsyncpa [#allocation3], 1 }

// kernel: resnet_forward.18
= control target key start
LH: loop header
LB: loop body
LE: loop exit
PB: predicated region body
PF: predicated region fallthrough
CT: control target
= control target key end

     0   :  { %s1631_s1 = inlined_call_operand.vmem [shape: bf16[1152,128], index: 1, kind: input, shape index: {}]   ;;  %s1632_s0 = inlined_call_operand.vmem [shape: bf16[32,1152], index: 0, kind: input, shape index: {}]   ;;  %s1633_s2 = inlined_call_operand.vmem [shape: f32[1,128], index: 2, kind: input, shape index: {}]   ;;  %s1634_s3 = inlined_call_operand.vmem [shape: f32[32,128], index: 3, kind: input, shape index: {}]   ;;  %s1635_s4 = inlined_call_operand.vmem [shape: f32[32,128], index: 4, kind: output, shape index: {}]  }
   0x1   :  { %v1211_v0 = vld [vmem:[%s1631_s1 + $0x78] sm:$0xff]   ;;  %v1215_v4 = vld [vmem:[%s1631_s1 + $0x70] sm:$0xff]   ;;  %v1219_v8 = vld [vmem:[%s1631_s1 + $0x68] sm:$0xff]  }
   0x2   :  { %v1212_v1 = vld [vmem:[%s1631_s1 + $0x38] sm:$0xff]   ;;  %1069 = vmatprep.subr.bf16.mxu0 %v1211_v0  ;;  %v1216_v5 = vld [vmem:[%s1631_s1 + $0x30] sm:$0xff]   ;;  %v1220_v9 = vld [vmem:[%s1631_s1 + $0x28] sm:$0xff]  }
   0x3   :  { %v1213_v2 = vld [vmem:[%s1631_s1 + $0xf8] sm:$0xff]   ;;  %1070 = vmatpush3.bf16.msra.mxu0 %v1212_v1  ;;  %v1217_v6 = vld [vmem:[%s1631_s1 + $0xf0] sm:$0xff]   ;;  %v1221_v10 = vld [vmem:[%s1631_s1 + $0xe8] sm:$0xff]  }
   0x4   :  { %v1214_v3 = vld [vmem:[%s1631_s1 + $0xb8] sm:$0xff]   ;;  %1097 = vmatprep.subr.bf16.mxu1 %v1213_v2  ;;  %1071 = vmatprep.subr.bf16.mxu0 %v1215_v4  ;;  %v1218_v7 = vld [vmem:[%s1631_s1 + $0xb0] sm:$0xff]   ;;  %v1222_v11 = vld [vmem:[%s1631_s1 + $0xa8] sm:$0xff]  }
   0x5   :  { %1098 = vmatpush3.bf16.msra.mxu1 %v1214_v3  ;;  %v1223_v12 = vld [vmem:[%s1631_s1 + $0x60] sm:$0xff]   ;;  %v1227_v16 = vld [vmem:[%s1631_s1 + $0x58] sm:$0xff]   ;;  %v1231_v20 = vld [vmem:[%s1631_s1 + $0x50] sm:$0xff]  }
   0x6   :  { %1099 = vmatprep.subr.bf16.mxu1 %v1217_v6  ;;  %v1224_v13 = vld [vmem:[%s1631_s1 + $0x20] sm:$0xff]   ;;  %v1228_v17 = vld [vmem:[%s1631_s1 + $0x18] sm:$0xff]   ;;  %v1232_v21 = vld [vmem:[%s1631_s1 + $0x10] sm:$0xff]  }
   0x7   :  { %1072 = vmatpush3.bf16.msra.mxu0 %v1216_v5  ;;  %v1225_v14 = vld [vmem:[%s1631_s1 + $0xe0] sm:$0xff]   ;;  %v1229_v18 = vld [vmem:[%s1631_s1 + $0xd8] sm:$0xff]   ;;  %v1233_v22 = vld [vmem:[%s1631_s1 + $0xd0] sm:$0xff]  }
   0x8   :  { %1073 = vmatprep.subr.bf16.mxu0 %v1219_v8  ;;  %v1226_v15 = vld [vmem:[%s1631_s1 + $0xa0] sm:$0xff]   ;;  %v1230_v19 = vld [vmem:[%s1631_s1 + $0x98] sm:$0xff]   ;;  %v1234_v23 = vld [vmem:[%s1631_s1 + $0x90] sm:$0xff]  }
   0x9   :  { %1100 = vmatpush3.bf16.msra.mxu1 %v1218_v7  ;;  %v1235_v24 = vld [vmem:[%s1631_s1 + $0x48] sm:$0xff]   ;;  %v1239_v28 = vld [vmem:[%s1631_s1 + $0x40] sm:$0xff]   ;;  %v1246_v34 = vld [vmem:[%s1631_s1 + $0x178] sm:$0xff]  }
   0xa   :  { %1101 = vmatprep.subr.bf16.mxu1 %v1221_v10  ;;  %v1236_v25 = vld [vmem:[%s1631_s1 + $0x8] sm:$0xff]   ;;  %v1240_v29 = vld [vmem:[%s1631_s1] sm:$0xff]   ;;  %v1250_v37 = vld [vmem:[%s1631_s1 + $0x138] sm:$0xff]  }
   0xb   :  { %1074 = vmatpush3.bf16.msra.mxu0 %v1220_v9  ;;  %v1237_v26 = vld [vmem:[%s1631_s1 + $0xc8] sm:$0xff]   ;;  %v1241_v30 = vld [vmem:[%s1631_s1 + $0xc0] sm:$0xff]   ;;  %v1251_v38 = vld [vmem:[%s1631_s1 + $0x1f8] sm:$0xff]  }
   0xc   :  { %1075 = vmatprep.subr.bf16.mxu0 %v1223_v12  ;;  %v1238_v27 = vld [vmem:[%s1631_s1 + $0x88] sm:$0xff]   ;;  %v1242_v31 = vld [vmem:[%s1632_s0] ss:$36 sps:$4 sm:$0xff]   ;;  %v1252_v39 = vld [vmem:[%s1631_s1 + $0x1b8] sm:$0xff]  }
   0xd   :  { %1102 = vmatpush3.bf16.msra.mxu1 %v1222_v11  ;;  %v1244_v32 = vld [vmem:[%s1632_s0 + $0x4] ss:$36 sps:$4 sm:$0xff]   ;;  %v1249_v36 = vld [vmem:[%s1632_s0 + $0xc] ss:$36 sps:$4 sm:$0xff]   ;;  %v1265_v52 = vld [vmem:[%s1631_s1 + $0x158] sm:$0xff]  }
   0xe   :  { %1103 = vmatprep.subr.bf16.mxu1 %v1225_v14  ;;  %v1245_v33 = vld [vmem:[%s1631_s1 + $0x80] sm:$0xff]   ;;  %745 = vmatprep.mubr.bf16.mxu0 %v1244_v32  ;;  %v1247_v35 = vld [vmem:[%s1632_s0 + $0x8] ss:$36 sps:$4 sm:$0xff]   ;;  %v1253_v40 = vld [vmem:[%s1631_s1 + $0x170] sm:$0xff]  }
   0xf   :  { %1076 = vmatpush3.bf16.msra.mxu0 %v1224_v13  ;;  %794 = vmatprep.mubr.bf16.mxu1 %v1249_v36  ;;  %v1254_v41 = vld [vmem:[%s1631_s1 + $0x130] sm:$0xff]   ;;  %v1257_v44 = vld [vmem:[%s1631_s1 + $0x168] sm:$0xff]   ;;  %v1261_v48 = vld [vmem:[%s1631_s1 + $0x160] sm:$0xff]  }
  0x10   :  { %1077 = vmatprep.subr.bf16.mxu0 %v1227_v16  ;;  %v1255_v42 = vld [vmem:[%s1631_s1 + $0x1f0] sm:$0xff]   ;;  %v1258_v45 = vld [vmem:[%s1631_s1 + $0x128] sm:$0xff]   ;;  %v1262_v49 = vld [vmem:[%s1631_s1 + $0x120] sm:$0xff]  }
  0x11   :  { %1104 = vmatpush3.bf16.msra.mxu1 %v1226_v15  ;;  %v1256_v43 = vld [vmem:[%s1631_s1 + $0x1b0] sm:$0xff]   ;;  %v1259_v46 = vld [vmem:[%s1631_s1 + $0x1e8] sm:$0xff]   ;;  %v1263_v50 = vld [vmem:[%s1631_s1 + $0x1e0] sm:$0xff]  }
  0x12   :  { %1105 = vmatprep.subr.bf16.mxu1 %v1229_v18  ;;  %v1260_v47 = vld [vmem:[%s1631_s1 + $0x1a8] sm:$0xff]   ;;  %v1264_v51 = vld [vmem:[%s1631_s1 + $0x1a0] sm:$0xff]   ;;  %v1266_v53 = vld [vmem:[%s1631_s1 + $0x118] sm:$0xff]  }
  0x13   :  { %1078 = vmatpush3.bf16.msra.mxu0 %v1228_v17  ;;  %v1267_v54 = vld [vmem:[%s1632_s0 + $0x4c] ss:$36 sps:$4 sm:$0xff]   ;;  %v1269_v55 = vld [vmem:[%s1631_s1 + $0x1d8] sm:$0xff]   ;;  %v1283_v4 = vld [vmem:[%s1631_s1 + $0x140] sm:$0xff]  }
  0x14   :  { %1079 = vmatprep.subr.bf16.mxu0 %v1231_v20  ;;  %v1270_v56 = vld [vmem:[%s1632_s0 + $0x48] ss:$36 sps:$4 sm:$0xff]   ;;  %v1271_v57 = vld [vmem:[%s1631_s1 + $0x198] sm:$0xff]   ;;  %v1274_v59 = vld [vmem:[%s1631_s1 + $0x150] sm:$0xff]  }
  0x15   :  { %1106 = vmatpush3.bf16.msra.mxu1 %v1230_v19  ;;  %v1272_v58 = vld [vmem:[%s1632_s0 + $0x54] ss:$36 sps:$4 sm:$0xff]   ;;  %v1279_v0 = vld [vmem:[%s1631_s1 + $0x148] sm:$0xff]   ;;  %v1284_v5 = vld [vmem:[%s1631_s1 + $0x100] sm:$0xff]  }
  0x16   :  { %1107 = vmatprep.subr.bf16.mxu1 %v1233_v22  ;;  %v1275_v60 = vld [vmem:[%s1632_s0 + $0x50] ss:$36 sps:$4 sm:$0xff]   ;;  %v1280_v1 = vld [vmem:[%s1631_s1 + $0x108] sm:$0xff]   ;;  %v1285_v6 = vld [vmem:[%s1631_s1 + $0x1c0] sm:$0xff]  }
  0x17   :  { %1080 = vmatpush3.bf16.msra.mxu0 %v1232_v21  ;;  %v1276_v61 = vld [vmem:[%s1631_s1 + $0x110] sm:$0xff]   ;;  %v1281_v2 = vld [vmem:[%s1631_s1 + $0x1c8] sm:$0xff]   ;;  %v1289_v9 = vld [vmem:[%s1631_s1 + $0x180] sm:$0xff]  }
  0x18   :  { %1081 = vmatprep.subr.bf16.mxu0 %v1235_v24  ;;  %v1277_v62 = vld [vmem:[%s1631_s1 + $0x1d0] sm:$0xff]   ;;  %v1282_v3 = vld [vmem:[%s1631_s1 + $0x188] sm:$0xff]   ;;  %v1290_v10 = vld [vmem:[%s1631_s1 + $0x238] sm:$0xff]  }
  0x19   :  { %1108 = vmatpush3.bf16.msra.mxu1 %v1234_v23  ;;  %v1278_v63 = vld [vmem:[%s1631_s1 + $0x190] sm:$0xff]   ;;  %v1291_v11 = vld [vmem:[%s1632_s0 + $0x18] ss:$36 sps:$4 sm:$0xff]   ;;  %v1298_v16 = vld [vmem:[%s1631_s1 + $0x228] sm:$0xff]  }
  0x1a   :  { %1109 = vmatprep.subr.bf16.mxu1 %v1237_v26  ;;  %v1286_v7 = vld [vmem:[%s1632_s0 + $0x10] ss:$36 sps:$4 sm:$0xff]   ;;  %v1293_v12 = vld [vmem:[%s1632_s0 + $0x1c] ss:$36 sps:$4 sm:$0xff]   ;;  %v1299_v17 = vld [vmem:[%s1632_s0 + $0x64] ss:$36 sps:$4 sm:$0xff]  }
  0x1b   :  { %1082 = vmatpush3.bf16.msra.mxu0 %v1236_v25  ;;  %v1288_v8 = vld [vmem:[%s1632_s0 + $0x14] ss:$36 sps:$4 sm:$0xff]   ;;  %v1295_v14 = vld [vmem:[%s1632_s0 + $0x5c] ss:$36 sps:$4 sm:$0xff]   ;;  %v1305_v23 = vld [vmem:[%s1631_s1 + $0x208] sm:$0xff]  }
  0x1c   :  { %1083 = vmatprep.subr.bf16.mxu0 %v1239_v28  ;;  %v1294_v13 = vld [vmem:[%s1631_s1 + $0x230] sm:$0xff]   ;;  %v1297_v15 = vld [vmem:[%s1632_s0 + $0x58] ss:$36 sps:$4 sm:$0xff]   ;;  %v1301_v18 = vld [vmem:[%s1632_s0 + $0x60] ss:$36 sps:$4 sm:$0xff]  }
  0x1d   :  { %1110 = vmatpush3.bf16.msra.mxu1 %v1238_v27  ;;  %v1302_v19 = vld [vmem:[%s1631_s1 + $0x220] sm:$0xff]   ;;  %v1303_v20 = vld [vmem:[%s1631_s1 + $0x218] sm:$0xff]   ;;  %v1304_v22 = vld [vmem:[%s1631_s1 + $0x210] sm:$0xff]  }
  0x1e   :  { %1111 = vmatprep.subr.bf16.mxu1 %v1241_v30  ;;  %v1307_v21 = vld [vmem:[%s1632_s0 + $0x20] ss:$36 sps:$4 sm:$0xff]   ;;  %v1308_v25 = vld [vmem:[%s1632_s0 + $0x68] ss:$36 sps:$4 sm:$0xff]  }
  0x1f   :  { %1084 = vmatpush3.bf16.msra.mxu0 %v1240_v29  ;;  %v1306_v24 = vld [vmem:[%s1631_s1 + $0x200] sm:$0xff]  }
  0x20   :  { %1125 = vmatprep.subr.bf16.mxu0 %v1246_v34 }
  0x21   :  { %1112 = vmatpush3.bf16.msra.mxu1 %v1245_v33 }
  0x22   :  { %746 = vmatmul.mubr.bf16.vlgmr.msra.gmra.mxu0 %v1242_v31  ;;  %1153 = vmatprep.subr.bf16.mxu1 %v1251_v38 }
  0x23   :  { %1126 = vmatpush3.bf16.msra.mxu0 %v1250_v37  ;;  %753 = vmatprep.mubr.bf16.mxu0 %v1267_v54 }
  0x24   :  { %795 = vmatmul.mubr.bf16.vlgmr.msra.gmra.mxu1 %v1247_v35  ;;  %1127 = vmatprep.subr.bf16.mxu0 %v1253_v40 }
  0x25   :  { %1154 = vmatpush3.bf16.msra.mxu1 %v1252_v39  ;;  %802 = vmatprep.mubr.bf16.mxu1 %v1272_v58 }
  0x26   :  { %1155 = vmatprep.subr.bf16.mxu1 %v1255_v42 }
  0x27   :  { %1128 = vmatpush3.bf16.msra.mxu0 %v1254_v41 }
  0x28   :  { %1129 = vmatprep.subr.bf16.mxu0 %v1257_v44 }
  0x29   :  { %1156 = vmatpush3.bf16.msra.mxu1 %v1256_v43 }
  0x2a   :  { %1157 = vmatprep.subr.bf16.mxu1 %v1259_v46  ;;  %754 = vmatmul.mubr.bf16.gmra.mxu0 %v1270_v56 }
  0x2b   :  { %1130 = vmatpush3.bf16.msra.mxu0 %v1258_v45  ;;  %843 = vmatprep.mubr.bf16.mxu0 %v1288_v8 }
  0x2c   :  { %1131 = vmatprep.subr.bf16.mxu0 %v1261_v48  ;;  %803 = vmatmul.mubr.bf16.gmra.mxu1 %v1275_v60 }
  0x2d   :  { %1158 = vmatpush3.bf16.msra.mxu1 %v1260_v47  ;;  %892 = vmatprep.mubr.bf16.mxu1 %v1293_v12 }
  0x2e   :  { %1159 = vmatprep.subr.bf16.mxu1 %v1263_v50 }
  0x2f   :  { %1132 = vmatpush3.bf16.msra.mxu0 %v1262_v49 }
  0x30   :  { %1133 = vmatprep.subr.bf16.mxu0 %v1265_v52 }
  0x31   :  { %1160 = vmatpush3.bf16.msra.mxu1 %v1264_v51 }
  0x32   :  { %1161 = vmatprep.subr.bf16.mxu1 %v1269_v55  ;;  %v978_v55 = vld [vmem:[%s1633_s2] ss:$0 sm:$0xff] }
  0x33   :  { %1134 = vmatpush3.bf16.msra.mxu0 %v1266_v53 }
  0x34   :  { %1135 = vmatprep.subr.bf16.mxu0 %v1274_v59 }
  0x35   :  { %1162 = vmatpush3.bf16.msra.mxu1 %v1271_v57 }
  0x36   :  { %1163 = vmatprep.subr.bf16.mxu1 %v1277_v62 }
  0x37   :  { %1136 = vmatpush3.bf16.msra.mxu0 %v1276_v61 }
  0x38   :  { %1137 = vmatprep.subr.bf16.mxu0 %v1279_v0 }
  0x39   :  { %1164 = vmatpush3.bf16.msra.mxu1 %v1278_v63 }
  0x3a   :  { %1165 = vmatprep.subr.bf16.mxu1 %v1281_v2 }
  0x3b   :  { %1138 = vmatpush3.bf16.msra.mxu0 %v1280_v1 }
  0x3c   :  { %1139 = vmatprep.subr.bf16.mxu0 %v1283_v4 }
  0x3d   :  { %1166 = vmatpush3.bf16.msra.mxu1 %v1282_v3 }
  0x3e   :  { %1167 = vmatprep.subr.bf16.mxu1 %v1285_v6 }
  0x3f   :  { %1140 = vmatpush3.bf16.msra.mxu0 %v1284_v5 }
  0x40   :  { %1191 = vmatprep.subr.bf16.mxu0 %v1290_v10 }
  0x41   :  { %1168 = vmatpush3.bf16.msra.mxu1 %v1289_v9 }
  0x42   :  { %844 = vmatmul.mubr.bf16.vlgmr.msra.gmra.mxu0 %v1286_v7 }
  0x43   :  { %1192 = vmatpush3.bf16.msra.mxu0 %v1290_v10  ;;  %851 = vmatprep.mubr.bf16.mxu0 %v1295_v14 }
  0x44   :  { %893 = vmatmul.mubr.bf16.vlgmr.msra.gmra.mxu1 %v1291_v11  ;;  %1193 = vmatprep.subr.bf16.mxu0 %v1294_v13 }
  0x45   :  { %900 = vmatprep.mubr.bf16.mxu1 %v1299_v17 }
  0x47   :  { %1194 = vmatpush3.bf16.msra.mxu0 %v1294_v13 }
  0x48   :  { %1195 = vmatprep.subr.bf16.mxu0 %v1298_v16 }
  0x4a   :  { %852 = vmatmul.mubr.bf16.gmra.mxu0 %v1297_v15 }
  0x4b   :  { %1196 = vmatpush3.bf16.msra.mxu0 %v1298_v16  ;;  %1207 = vmatprep.mubr.bf16.mxu0 %v1307_v21 }
  0x4c   :  { %901 = vmatmul.mubr.bf16.gmra.mxu1 %v1301_v18  ;;  %1197 = vmatprep.subr.bf16.mxu0 %v1302_v19 }
  0x4f   :  { %1198 = vmatpush3.bf16.msra.mxu0 %v1302_v19 }
  0x50   :  { %1199 = vmatprep.subr.bf16.mxu0 %v1303_v20 }
  0x53   :  { %1200 = vmatpush3.bf16.msra.mxu0 %v1303_v20 }
  0x54   :  { %1201 = vmatprep.subr.bf16.mxu0 %v1304_v22 }
  0x57   :  { %1202 = vmatpush3.bf16.msra.mxu0 %v1304_v22 }
  0x58   :  { %1203 = vmatprep.subr.bf16.mxu0 %v1305_v23 }
  0x5b   :  { %1204 = vmatpush3.bf16.msra.mxu0 %v1305_v23  ;;  %v960_v23 = vld [vmem:[%s1634_s3 + $0x10] sm:$0xff] }
  0x5c   :  { %1205 = vmatprep.subr.bf16.mxu0 %v1306_v24 }
  0x5f   :  { %1206 = vmatpush3.bf16.msra.mxu0 %v1306_v24 }
  0x62   :  { %1208 = vmatmul.mubr.bf16.vlgmr.msra.gmra.mxu0 %v1308_v25 }
  0xe2   :  { %v1085_v26 = vpop.f32.mrf.mxu0 }
  0xe4   :  { %v1113_v27 = vpop.f32.mrf.mxu1  ;;  %v1086_v28 = vpop.f32.mrf.mxu0 }
  0xe5   :  { %v1087_v54 = vadd.f32 %v1086_v28, %v1085_v26 }
  0xe6   :  { %v1114_v29 = vpop.f32.mrf.mxu1  ;;  %v1088_v30 = vpop.f32.mrf.mxu0 }
  0xe7   :  { %v748_v61 = vadd.f32 %v1087_v54, %v978_v55  ;;  %v1115_v62 = vadd.f32 %v1114_v29, %v1113_v27  ;;  %v958_v29 = vld [vmem:[%s1634_s3] sm:$0xff] }
  0xe8   :  { %v1116_v31 = vpop.f32.mrf.mxu1  ;;  %v1089_v32 = vpop.f32.mrf.mxu0 }
  0xe9   :  { %v1090_v63 = vadd.f32 %v1089_v32, %v1088_v30  ;;  %v797_v7 = vadd.f32 %v1115_v62, %v748_v61 }
  0xea   :  { %v1091_v33 = vpop.f32.mrf.mxu0  ;;  %v1117_v34 = vpop.f32.mrf.mxu1 }
  0xeb   :  { %v751_v8 = vadd.f32 %v1090_v63, %v978_v55  ;;  %v1118_v9 = vadd.f32 %v1117_v34, %v1116_v31  ;;  %v961_v34 = vld [vmem:[%s1634_s3 + $0x18] sm:$0xff] }
  0xec   :  { %v1119_v35 = vpop.f32.mrf.mxu1  ;;  %v1092_v36 = vpop.f32.mrf.mxu0 }
  0xed   :  { %v1093_v53 = vadd.f32 %v1092_v36, %v1091_v33  ;;  %v800_v18 = vadd.f32 %v1118_v9, %v751_v8 }
  0xee   :  { %v1120_v37 = vpop.f32.mrf.mxu1  ;;  %v1094_v38 = vpop.f32.mrf.mxu0 }
  0xef   :  { %v756_v58 = vadd.f32 %v1093_v53, %v978_v55  ;;  %v1121_v59 = vadd.f32 %v1120_v37, %v1119_v35 }
  0xf0   :  { %v1122_v39 = vpop.f32.mrf.mxu1  ;;  %v1095_v40 = vpop.f32.mrf.mxu0 }
  0xf1   :  { %v1096_v60 = vadd.f32 %v1095_v40, %v1094_v38  ;;  %v805_v3 = vadd.f32 %v1121_v59, %v756_v58  ;;  %v959_v40 = vld [vmem:[%s1634_s3 + $0x8] sm:$0xff] }
  0xf2   :  { %v1123_v42 = vpop.f32.mrf.mxu1 }
  0xf3   :  { %v759_v4 = vadd.f32 %v1096_v60, %v978_v55  ;;  %v1124_v5 = vadd.f32 %v1123_v42, %v1122_v39 }
  0xf5   :  { %v808_v14 = vadd.f32 %v1124_v5, %v759_v4 }
 0x102   :  { %v1141_v41 = vpop.f32.mrf.mxu0 }
 0x104   :  { %v1142_v43 = vpop.f32.mrf.mxu0  ;;  %v1169_v44 = vpop.f32.mrf.mxu1 }
 0x105   :  { %v1143_v6 = vadd.f32 %v1142_v43, %v1141_v41 }
 0x106   :  { %v1144_v45 = vpop.f32.mrf.mxu0  ;;  %v1170_v46 = vpop.f32.mrf.mxu1 }
 0x107   :  { %v846_v15 = vadd.f32 %v1143_v6, %v797_v7  ;;  %v1171_v16 = vadd.f32 %v1170_v46, %v1169_v44 }
 0x108   :  { %v1145_v47 = vpop.f32.mrf.mxu0  ;;  %v1172_v48 = vpop.f32.mrf.mxu1 }
 0x109   :  { %v1146_v17 = vadd.f32 %v1145_v47, %v1144_v45  ;;  %v895_v27 = vadd.f32 %v1171_v16, %v846_v15 }
 0x10a   :  { %v1147_v49 = vpop.f32.mrf.mxu0  ;;  %v1173_v50 = vpop.f32.mrf.mxu1 }
 0x10b   :  { %v849_v24 = vadd.f32 %v1146_v17, %v800_v18  ;;  %v1174_v25 = vadd.f32 %v1173_v50, %v1172_v48 }
 0x10c   :  { %v1148_v51 = vpop.f32.mrf.mxu0  ;;  %v1175_v52 = vpop.f32.mrf.mxu1 }
 0x10d   :  { %v1149_v0 = vadd.f32 %v1148_v51, %v1147_v49  ;;  %v898_v38 = vadd.f32 %v1174_v25, %v849_v24 }
 0x10e   :  { %v1150_v56 = vpop.f32.mrf.mxu0  ;;  %v1176_v57 = vpop.f32.mrf.mxu1 }
 0x10f   :  { %v854_v10 = vadd.f32 %v1149_v0, %v805_v3  ;;  %v1177_v11 = vadd.f32 %v1176_v57, %v1175_v52 }
 0x110   :  { %v1151_v1 = vpop.f32.mrf.mxu0  ;;  %v1178_v2 = vpop.f32.mrf.mxu1 }
 0x111   :  { %v1152_v12 = vadd.f32 %v1151_v1, %v1150_v56  ;;  %v903_v21 = vadd.f32 %v1177_v11, %v854_v10 }
 0x112   :  { %v1179_v13 = vpop.f32.mrf.mxu1 }
 0x113   :  { %v857_v19 = vadd.f32 %v1152_v12, %v808_v14  ;;  %v1180_v20 = vadd.f32 %v1179_v13, %v1178_v2 }
 0x115   :  { %v906_v32 = vadd.f32 %v1180_v20, %v857_v19 }
 0x122   :  { %v1209_v22 = vpop.f32.mrf.mxu0 }
 0x123   :  { %v952_v26 = vadd.f32 %v1209_v22, %v903_v21 }
 0x124   :  { %v943_v28 = vpop.f32.mrf.mxu0 }
 0x125   :  { %v964_v30 = vadd.f32 %v960_v23, %v952_v26  ;;  %v944_v31 = vadd.f32 %v943_v28, %v895_v27 }
 0x126   :  { %v1210_v33 = vpop.f32.mrf.mxu0 }
 0x127   :  { %v968_v35 = vmax.f32 %v964_v30, 0.0  ;;  %v962_v36 = vadd.f32 %v958_v29, %v944_v31  ;;  %v955_v37 = vadd.f32 %v1210_v33, %v906_v32 }
 0x128   :  { %v946_v39 = vpop.f32.mrf.mxu0 }
 0x129   :  { %972 = vst [vmem:[%s1635_s4 + $0x10] sm:$0xff] %v968_v35  ;;  %v966_v41 = vmax.f32 %v962_v36, 0.0  ;;  %v965_v42 = vadd.f32 %v961_v34, %v955_v37  ;;  %v947_v43 = vadd.f32 %v946_v39, %v898_v38 }
 0x12b   :  { %970 = vst [vmem:[%s1635_s4] sm:$0xff] %v966_v41  ;;  %v969_v44 = vmax.f32 %v965_v42, 0.0  ;;  %v963_v45 = vadd.f32 %v959_v40, %v947_v43 }
 0x12d   :  { %973 = vst [vmem:[%s1635_s4 + $0x18] sm:$0xff] %v969_v44  ;;  %v967_v46 = vmax.f32 %v963_v45, 0.0 }
 0x12f   :  { %971 = vst [vmem:[%s1635_s4 + $0x8] sm:$0xff] %v967_v46 }

</bundles_post_ra>
